<compile_context>
chip_gen: v5e
topology: v5e:2x2
jax: 0.10.0
libtpu: 0.0.40
codegen_flags: <defaults>
</compile_context>

<pallas_src>
import functools

import jax
import jax.numpy as jnp
from jax.experimental import pallas as pl
from jax.experimental.pallas import tpu as pltpu


# ---------------------------------------------------------------------------
# Fused encoder kernel: conv1 + ReLU + conv2 + ReLU + maxpool2x2
# ---------------------------------------------------------------------------
def _encoder_kernel(x_ref, w1_ref, b1_ref, w2_ref, b2_ref, o_ref,
                    xpad, h1pad, h2buf, *, H, W, C1, C2):
    f32 = jnp.float32
    H2, W2 = H // 2, W // 2

    # Re-zero the padded scratches every step (cheap) so grid steps are fully
    # independent -> the batch axis can be megacore-sharded ("parallel").
    xpad[...] = jnp.zeros_like(xpad)
    h1pad[...] = jnp.zeros_like(h1pad)

    # ---- conv1 (3->64) + ReLU.  cin=3 contributes <1% of the FLOPs, so it is
    # kept as 9 small per-tap dots in f32 (proven lowering path).
    xpad[1:H + 1, 1:W + 1, :] = x_ref[0]
    acc = jnp.zeros((H * W, C1), f32)
    for kh in range(3):
        for kw in range(3):
            tap = xpad[kh:kh + H, kw:kw + W, :].reshape(H * W, 3)
            acc = acc + jnp.dot(tap, w1_ref[kh * 3 + kw],
                                preferred_element_type=f32)
    h1 = jnp.maximum(acc + b1_ref[...], 0.0)

    # ---- conv2 (64->128) + ReLU as ONE wide-K im2col matmul:
    #      (H*W, 9*64) @ (9*64, 128), bf16 operands, f32 accumulation.
    h1pad[1:H + 1, 1:W + 1, :] = h1.reshape(H, W, C1)
    taps = [h1pad[kh:kh + H, kw:kw + W, :].astype(jnp.bfloat16)
            for kh in range(3) for kw in range(3)]
    p2 = jnp.concatenate(taps, axis=-1).reshape(H * W, 9 * C1)
    h2 = jnp.dot(p2, w2_ref[...], preferred_element_type=f32) + b2_ref[...]
    h2 = jnp.maximum(h2, 0.0)                                   # (H*W, C2)

    # ---- fused 2x2 max-pool (full-res activation never written to HBM).
    h2buf[...] = h2
    # pool along W: neighbouring pixels are adjacent im2col rows -> two
    # sublane-strided loads.
    wmax = jnp.maximum(h2buf[pl.ds(0, H * W2, 2), :],
                       h2buf[pl.ds(1, H * W2, 2), :])            # (H*W2, C2)
    # pool along H: rows h=2q and h=2q+1 are adjacent groups of W2 rows.
    pooled = jnp.max(wmax.reshape(H2, 2, W2, C2), axis=1)        # (H2, W2, C2)
    o_ref[0] = pooled.astype(o_ref.dtype)


def encoder(x_nhwc, params):
    N, H, W, _ = x_nhwc.shape
    C1, C2 = 64, 128
    H2, W2 = H // 2, W // 2
    # (cout, cin, kh, kw) -> (kh, kw, cin, cout)
    w1 = jnp.transpose(params["w1"], (2, 3, 1, 0)).reshape(9, 3, C1).astype(jnp.float32)
    b1 = params["b1"].reshape(1, C1).astype(jnp.float32)
    w2 = jnp.transpose(params["w2"], (2, 3, 1, 0)).reshape(9 * C1, C2).astype(jnp.bfloat16)
    b2 = params["b2"].reshape(1, C2).astype(jnp.float32)
    kern = functools.partial(_encoder_kernel, H=H, W=W, C1=C1, C2=C2)
    return pl.pallas_call(
        kern,
        out_shape=jax.ShapeDtypeStruct((N, H2, W2, C2), jnp.bfloat16),
        grid_spec=pltpu.PrefetchScalarGridSpec(
            num_scalar_prefetch=0,
            grid=(N,),
            in_specs=[
                pl.BlockSpec((1, H, W, 3), lambda n: (n, 0, 0, 0)),
                pl.BlockSpec((9, 3, C1), lambda n: (0, 0, 0)),
                pl.BlockSpec((1, C1), lambda n: (0, 0)),
                pl.BlockSpec((9 * C1, C2), lambda n: (0, 0)),
                pl.BlockSpec((1, C2), lambda n: (0, 0)),
            ],
            out_specs=pl.BlockSpec((1, H2, W2, C2), lambda n: (n, 0, 0, 0)),
            scratch_shapes=[
                pltpu.VMEM((H + 2, W + 2, 3), jnp.float32),    # padded input
                pltpu.VMEM((H + 2, W + 2, C1), jnp.float32),   # padded conv1 out
                pltpu.VMEM((H * W, C2), jnp.float32),          # conv2 out, pre-pool
            ],
        ),
        compiler_params=pltpu.CompilerParams(
            dimension_semantics=("parallel",),
            vmem_limit_bytes=64 * 1024 * 1024),
    )(x_nhwc, w1, b1, w2, b2)


# ---------------------------------------------------------------------------
# Fused decoder kernel:
#   ConvTranspose2d(128,64,2,stride=2) + ReLU + depth-to-space
#   + Conv2d(64,3,3,p=1) + Sigmoid
# The upsampled image u (2H2 x 2W2 x 64) is represented by its 4 phase planes
# (kept zero-padded in one VMEM scratch); each of the 4 OUTPUT phases is one
# wide-K (9*64) matmul over shifted slices of those planes.
# ---------------------------------------------------------------------------
def _decoder_kernel(p_ref, wd_ref, bd_ref, w3_ref, b3_ref, o_ref, ypad,
                    *, H2, W2, C1, C2):
    f32 = jnp.float32
    ypad[...] = jnp.zeros_like(ypad)

    # ---- deconv: one (H2*W2, 128) @ (128, 4*64) matmul, bf16 operands.
    p = p_ref[0].reshape(H2 * W2, C2)                            # bf16
    ydec = jnp.dot(p, wd_ref[...], preferred_element_type=f32)   # (H2*W2, 4*C1)
    for ph in range(4):                                          # ph = a*2 + b
        y = jnp.maximum(ydec[:, ph * C1:(ph + 1) * C1] + bd_ref[...], 0.0)
        ypad[ph, 1:H2 + 1, 1:W2 + 1, :] = y.reshape(H2, W2, C1)

    # ---- depth-to-space + 3x3 conv + sigmoid, phase-decomposed.
    # Output pixel (2i+a, 2j+b), tap (dh,dw) reads u[2i+a+dh-1, 2j+b+dw-1],
    # which lives in phase plane (a',b') at offset (di,dj).
    phase_patches = []
    for a in range(2):
        for b in range(2):
            taps = []
            for dh in range(3):
                th = a + dh - 1
                di, asrc = th // 2, th % 2
                for dw in range(3):
                    tw = b + dw - 1
                    dj, bsrc = tw // 2, tw % 2
                    taps.append(ypad[asrc * 2 + bsrc,
                                     1 + di:1 + di + H2,
                                     1 + dj:1 + dj + W2, :].astype(jnp.bfloat16))
            phase_patches.append(
                jnp.concatenate(taps, axis=-1).reshape(H2 * W2, 9 * C1))
    patches = jnp.concatenate(phase_patches, axis=0)             # (4*H2*W2, 9*C1)
    z = jnp.dot(patches, w3_ref[...], preferred_element_type=f32) + b3_ref[...]
    o_ref[0] = jax.nn.sigmoid(z).reshape(4, H2, W2, 3)


def decoder(p_nhwc, params):
    N, H2, W2, C2 = p_nhwc.shape
    C1 = 64
    # ConvTranspose2d weight (cin, cout, 2, 2) -> (cin, a, b, cout) -> (cin, 4*cout)
    wd = jnp.transpose(params["wt"], (0, 2, 3, 1)).reshape(C2, 4 * C1).astype(jnp.bfloat16)
    bd = params["bt"].reshape(1, C1).astype(jnp.float32)
    w3 = jnp.transpose(params["w3"], (2, 3, 1, 0)).reshape(9 * C1, 3).astype(jnp.bfloat16)
    b3 = params["b3"].reshape(1, 3).astype(jnp.float32)
    kern = functools.partial(_decoder_kernel, H2=H2, W2=W2, C1=C1, C2=C2)
    return pl.pallas_call(
        kern,
        out_shape=jax.ShapeDtypeStruct((N, 4, H2, W2, 3), jnp.float32),
        grid_spec=pltpu.PrefetchScalarGridSpec(
            num_scalar_prefetch=0,
            grid=(N,),
            in_specs=[
                pl.BlockSpec((1, H2, W2, C2), lambda n: (n, 0, 0, 0)),
                pl.BlockSpec((C2, 4 * C1), lambda n: (0, 0)),
                pl.BlockSpec((1, C1), lambda n: (0, 0)),
                pl.BlockSpec((9 * C1, 3), lambda n: (0, 0)),
                pl.BlockSpec((1, 3), lambda n: (0, 0)),
            ],
            out_specs=pl.BlockSpec((1, 4, H2, W2, 3), lambda n: (n, 0, 0, 0, 0)),
            scratch_shapes=[
                pltpu.VMEM((4, H2 + 2, W2 + 2, C1), jnp.float32),  # padded phases
            ],
        ),
        compiler_params=pltpu.CompilerParams(
            dimension_semantics=("parallel",),
            vmem_limit_bytes=64 * 1024 * 1024),
    )(p_nhwc, wd, bd, w3, b3)


# ---------------------------------------------------------------------------
# Full module forward (NCHW in / NCHW out, like the PyTorch module).
# ---------------------------------------------------------------------------
def video_frame_transformer(x_nchw, params):
    N, C, H, W = x_nchw.shape
    assert C == 3 and H % 2 == 0 and W % 2 == 0
    x = jnp.transpose(x_nchw, (0, 2, 3, 1)).astype(jnp.float32)   # NHWC (3-ch, tiny)
    enc = encoder(x, params)                                      # (N,H/2,W/2,128) bf16
    y4 = decoder(enc, params)                                     # (N,4,H/2,W/2,3) f32
    H2, W2 = H // 2, W // 2
    # interleave the 4 output phases + go to NCHW (tiny 3-channel glue only)
    y = y4.reshape(N, 2, 2, H2, W2, 3)
    y = jnp.transpose(y, (0, 5, 3, 1, 4, 2))                      # (N,3,H2,2,W2,2)
    return y.reshape(N, 3, H, W)


# ---------------------------------------------------------------------------
# Pure-JAX reference (correctness check only).
# ---------------------------------------------------------------------------
def _ref_forward(x_nchw, params):
    x = jnp.transpose(x_nchw, (0, 2, 3, 1)).astype(jnp.float32)

    def conv(x, w, b):
        return jax.lax.conv_general_dilated(
            x, jnp.transpose(w, (2, 3, 1, 0)), window_strides=(1, 1),
            padding="SAME", dimension_numbers=("NHWC", "HWIO", "NHWC")) + b

    x = jax.nn.relu(conv(x, params["w1"], params["b1"]))
    x = jax.nn.relu(conv(x, params["w2"], params["b2"]))
    x = jax.lax.reduce_window(x, -jnp.inf, jax.lax.max,
                              (1, 2, 2, 1), (1, 2, 2, 1), "VALID")
    N, H2, W2, _ = x.shape
    cout = params["wt"].shape[1]
    y = jnp.einsum("nhwi,ioab->nhawbo", x, params["wt"]) + params["bt"]
    y = jax.nn.relu(y.reshape(N, 2 * H2, 2 * W2, cout))
    y = jax.nn.sigmoid(conv(y, params["w3"], params["b3"]))
    return jnp.transpose(y, (0, 3, 1, 2))


def init_params(key):
    ks = jax.random.split(key, 8)
    f32 = jnp.float32
    return {
        "w1": 0.1 * jax.random.normal(ks[0], (64, 3, 3, 3), f32),
        "b1": 0.05 * jax.random.normal(ks[1], (64,), f32),
        "w2": 0.05 * jax.random.normal(ks[2], (128, 64, 3, 3), f32),
        "b2": 0.05 * jax.random.normal(ks[3], (128,), f32),
        "wt": 0.05 * jax.random.normal(ks[4], (128, 64, 2, 2), f32),
        "bt": 0.05 * jax.random.normal(ks[5], (64,), f32),
        "w3": 0.05 * jax.random.normal(ks[6], (3, 64, 3, 3), f32),
        "b3": 0.05 * jax.random.normal(ks[7], (3,), f32),
    }


if __name__ == "__main__":
    key = jax.random.PRNGKey(0)
    kx, kp = jax.random.split(key)
    params = init_params(kp)
    x = jax.random.uniform(kx, (2, 3, 16, 16), jnp.float32)   # NCHW, like PyTorch

    out = jax.block_until_ready(jax.jit(video_frame_transformer)(x, params))
    assert out.shape == (2, 3, 16, 16), out.shape

    ref = jax.block_until_ready(_ref_forward(x, params))
    err = float(jnp.max(jnp.abs(out - ref)))
    # conv2 / deconv / conv3 matmuls run with bf16 operands (f32 accumulation),
    # so allow a looser (but still tight post-sigmoid) tolerance.
    assert err < 2e-2, err

    print("KERNEL_OK")
</pallas_src>

<mosaic_0001>
module attributes {stable_mosaic.version = 11 : i64} {
  func.func @_encoder_kernel(%arg0: i32, %arg1: memref<1x16x16x3xf32, #tpu.memory_space<vmem>>, %arg2: memref<9x3x64xf32, #tpu.memory_space<vmem>>, %arg3: memref<1x64xf32, #tpu.memory_space<vmem>>, %arg4: memref<576x128xbf16, #tpu.memory_space<vmem>>, %arg5: memref<1x128xf32, #tpu.memory_space<vmem>>, %arg6: memref<1x8x8x128xbf16, #tpu.memory_space<vmem>>, %arg7: memref<18x18x3xf32, #tpu.memory_space<vmem>>, %arg8: memref<18x18x64xf32, #tpu.memory_space<vmem>>, %arg9: memref<256x128xf32, #tpu.memory_space<vmem>>) attributes {dimension_semantics = [#tpu.dimension_semantics<parallel>], iteration_bounds = array<i64: 2>, scalar_prefetch = 0 : i64, scratch_operands = 3 : i64, tpu.core_type = #tpu.core_type<tc>, window_params = [{transform_indices = @transform_0, window_bounds = array<i64: 1, 16, 16, 3>}, {pipeline_mode = #tpu.pipeline_mode<synchronous>, transform_indices = @transform_1, window_bounds = array<i64: 9, 3, 64>}, {pipeline_mode = #tpu.pipeline_mode<synchronous>, transform_indices = @transform_2, window_bounds = array<i64: 1, 64>}, {pipeline_mode = #tpu.pipeline_mode<synchronous>, transform_indices = @transform_3, window_bounds = array<i64: 576, 128>}, {pipeline_mode = #tpu.pipeline_mode<synchronous>, transform_indices = @transform_4, window_bounds = array<i64: 1, 128>}, {transform_indices = @transform_5, window_bounds = array<i64: 1, 8, 8, 128>}]} {
    %cst = arith.constant 0.000000e+00 : f32
    %0 = vector.broadcast %cst : f32 to vector<18x18x3xf32>
    %c0 = arith.constant 0 : index
    %c0_0 = arith.constant 0 : index
    %c0_1 = arith.constant 0 : index
    %1 = vector.load %arg7[%c0, %c0_0, %c0_1] : memref<18x18x3xf32, #tpu.memory_space<vmem>>, vector<18x18x3xf32>
    tpu.vector_store %arg7[%c0, %c0_0, %c0_1], %0 {strides = array<i32>} : memref<18x18x3xf32, #tpu.memory_space<vmem>>, vector<18x18x3xf32>,
    %cst_2 = arith.constant 0.000000e+00 : f32
    %2 = vector.broadcast %cst_2 : f32 to vector<18x18x64xf32>
    %c0_3 = arith.constant 0 : index
    %c0_4 = arith.constant 0 : index
    %c0_5 = arith.constant 0 : index
    %3 = vector.load %arg8[%c0_3, %c0_4, %c0_5] : memref<18x18x64xf32, #tpu.memory_space<vmem>>, vector<18x18x64xf32>
    tpu.vector_store %arg8[%c0_3, %c0_4, %c0_5], %2 {strides = array<i32>} : memref<18x18x64xf32, #tpu.memory_space<vmem>>, vector<18x18x64xf32>,
    %c0_6 = arith.constant 0 : index
    %c0_7 = arith.constant 0 : index
    %c0_8 = arith.constant 0 : index
    %c0_9 = arith.constant 0 : index
    %4 = vector.load %arg1[%c0_6, %c0_7, %c0_8, %c0_9] : memref<1x16x16x3xf32, #tpu.memory_space<vmem>>, vector<1x16x16x3xf32>
    %5 = vector.shape_cast %4 : vector<1x16x16x3xf32> to vector<16x16x3xf32>
    %c1 = arith.constant 1 : index
    %c1_10 = arith.constant 1 : index
    %c0_11 = arith.constant 0 : index
    %6 = vector.load %arg7[%c1, %c1_10, %c0_11] : memref<18x18x3xf32, #tpu.memory_space<vmem>>, vector<16x16x3xf32>
    tpu.vector_store %arg7[%c1, %c1_10, %c0_11], %5 {strides = array<i32>} : memref<18x18x3xf32, #tpu.memory_space<vmem>>, vector<16x16x3xf32>,
    %cst_12 = arith.constant 0.000000e+00 : f32
    %7 = vector.broadcast %cst_12 : f32 to vector<256x64xf32>
    %c0_13 = arith.constant 0 : index
    %c0_14 = arith.constant 0 : index
    %c0_15 = arith.constant 0 : index
    %8 = vector.load %arg7[%c0_13, %c0_14, %c0_15] : memref<18x18x3xf32, #tpu.memory_space<vmem>>, vector<16x16x3xf32>
    %9 = vector.shape_cast %8 : vector<16x16x3xf32> to vector<256x3xf32>
    %c0_16 = arith.constant 0 : index
    %c0_17 = arith.constant 0 : index
    %c0_18 = arith.constant 0 : index
    %10 = vector.load %arg2[%c0_16, %c0_17, %c0_18] : memref<9x3x64xf32, #tpu.memory_space<vmem>>, vector<1x3x64xf32>
    %11 = vector.shape_cast %10 : vector<1x3x64xf32> to vector<3x64xf32>
    %cst_19 = arith.constant dense<0.000000e+00> : vector<256x64xf32>
    %12 = tpu.matmul %9, %11, %cst_19 {dimension_numbers = #tpu.dot_dimension_numbers<[1], [0], [0], [1], [0, 0, 1, 1], [], []>} : vector<256x3xf32>, vector<3x64xf32>, vector<256x64xf32> -> vector<256x64xf32>
    %13 = arith.addf %7, %12 : vector<256x64xf32>
    %c0_20 = arith.constant 0 : index
    %c1_21 = arith.constant 1 : index
    %c0_22 = arith.constant 0 : index
    %14 = vector.load %arg7[%c0_20, %c1_21, %c0_22] : memref<18x18x3xf32, #tpu.memory_space<vmem>>, vector<16x16x3xf32>
    %15 = vector.shape_cast %14 : vector<16x16x3xf32> to vector<256x3xf32>
    %c1_23 = arith.constant 1 : index
    %c0_24 = arith.constant 0 : index
    %c0_25 = arith.constant 0 : index
    %16 = vector.load %arg2[%c1_23, %c0_24, %c0_25] : memref<9x3x64xf32, #tpu.memory_space<vmem>>, vector<1x3x64xf32>
    %17 = vector.shape_cast %16 : vector<1x3x64xf32> to vector<3x64xf32>
    %cst_26 = arith.constant dense<0.000000e+00> : vector<256x64xf32>
    %18 = tpu.matmul %15, %17, %cst_26 {dimension_numbers = #tpu.dot_dimension_numbers<[1], [0], [0], [1], [0, 0, 1, 1], [], []>} : vector<256x3xf32>, vector<3x64xf32>, vector<256x64xf32> -> vector<256x64xf32>
    %19 = arith.addf %13, %18 : vector<256x64xf32>
    %c0_27 = arith.constant 0 : index
    %c2 = arith.constant 2 : index
    %c0_28 = arith.constant 0 : index
    %20 = vector.load %arg7[%c0_27, %c2, %c0_28] : memref<18x18x3xf32, #tpu.memory_space<vmem>>, vector<16x16x3xf32>
    %21 = vector.shape_cast %20 : vector<16x16x3xf32> to vector<256x3xf32>
    %c2_29 = arith.constant 2 : index
    %c0_30 = arith.constant 0 : index
    %c0_31 = arith.constant 0 : index
    %22 = vector.load %arg2[%c2_29, %c0_30, %c0_31] : memref<9x3x64xf32, #tpu.memory_space<vmem>>, vector<1x3x64xf32>
    %23 = vector.shape_cast %22 : vector<1x3x64xf32> to vector<3x64xf32>
    %cst_32 = arith.constant dense<0.000000e+00> : vector<256x64xf32>
    %24 = tpu.matmul %21, %23, %cst_32 {dimension_numbers = #tpu.dot_dimension_numbers<[1], [0], [0], [1], [0, 0, 1, 1], [], []>} : vector<256x3xf32>, vector<3x64xf32>, vector<256x64xf32> -> vector<256x64xf32>
    %25 = arith.addf %19, %24 : vector<256x64xf32>
    %c1_33 = arith.constant 1 : index
    %c0_34 = arith.constant 0 : index
    %c0_35 = arith.constant 0 : index
    %26 = vector.load %arg7[%c1_33, %c0_34, %c0_35] : memref<18x18x3xf32, #tpu.memory_space<vmem>>, vector<16x16x3xf32>
    %27 = vector.shape_cast %26 : vector<16x16x3xf32> to vector<256x3xf32>
    %c3 = arith.constant 3 : index
    %c0_36 = arith.constant 0 : index
    %c0_37 = arith.constant 0 : index
    %28 = vector.load %arg2[%c3, %c0_36, %c0_37] : memref<9x3x64xf32, #tpu.memory_space<vmem>>, vector<1x3x64xf32>
    %29 = vector.shape_cast %28 : vector<1x3x64xf32> to vector<3x64xf32>
    %cst_38 = arith.constant dense<0.000000e+00> : vector<256x64xf32>
    %30 = tpu.matmul %27, %29, %cst_38 {dimension_numbers = #tpu.dot_dimension_numbers<[1], [0], [0], [1], [0, 0, 1, 1], [], []>} : vector<256x3xf32>, vector<3x64xf32>, vector<256x64xf32> -> vector<256x64xf32>
    %31 = arith.addf %25, %30 : vector<256x64xf32>
    %c1_39 = arith.constant 1 : index
    %c1_40 = arith.constant 1 : index
    %c0_41 = arith.constant 0 : index
    %32 = vector.load %arg7[%c1_39, %c1_40, %c0_41] : memref<18x18x3xf32, #tpu.memory_space<vmem>>, vector<16x16x3xf32>
    %33 = vector.shape_cast %32 : vector<16x16x3xf32> to vector<256x3xf32>
    %c4 = arith.constant 4 : index
    %c0_42 = arith.constant 0 : index
    %c0_43 = arith.constant 0 : index
    %34 = vector.load %arg2[%c4, %c0_42, %c0_43] : memref<9x3x64xf32, #tpu.memory_space<vmem>>, vector<1x3x64xf32>
    %35 = vector.shape_cast %34 : vector<1x3x64xf32> to vector<3x64xf32>
    %cst_44 = arith.constant dense<0.000000e+00> : vector<256x64xf32>
    %36 = tpu.matmul %33, %35, %cst_44 {dimension_numbers = #tpu.dot_dimension_numbers<[1], [0], [0], [1], [0, 0, 1, 1], [], []>} : vector<256x3xf32>, vector<3x64xf32>, vector<256x64xf32> -> vector<256x64xf32>
    %37 = arith.addf %31, %36 : vector<256x64xf32>
    %c1_45 = arith.constant 1 : index
    %c2_46 = arith.constant 2 : index
    %c0_47 = arith.constant 0 : index
    %38 = vector.load %arg7[%c1_45, %c2_46, %c0_47] : memref<18x18x3xf32, #tpu.memory_space<vmem>>, vector<16x16x3xf32>
    %39 = vector.shape_cast %38 : vector<16x16x3xf32> to vector<256x3xf32>
    %c5 = arith.constant 5 : index
    %c0_48 = arith.constant 0 : index
    %c0_49 = arith.constant 0 : index
    %40 = vector.load %arg2[%c5, %c0_48, %c0_49] : memref<9x3x64xf32, #tpu.memory_space<vmem>>, vector<1x3x64xf32>
    %41 = vector.shape_cast %40 : vector<1x3x64xf32> to vector<3x64xf32>
    %cst_50 = arith.constant dense<0.000000e+00> : vector<256x64xf32>
    %42 = tpu.matmul %39, %41, %cst_50 {dimension_numbers = #tpu.dot_dimension_numbers<[1], [0], [0], [1], [0, 0, 1, 1], [], []>} : vector<256x3xf32>, vector<3x64xf32>, vector<256x64xf32> -> vector<256x64xf32>
    %43 = arith.addf %37, %42 : vector<256x64xf32>
    %c2_51 = arith.constant 2 : index
    %c0_52 = arith.constant 0 : index
    %c0_53 = arith.constant 0 : index
    %44 = vector.load %arg7[%c2_51, %c0_52, %c0_53] : memref<18x18x3xf32, #tpu.memory_space<vmem>>, vector<16x16x3xf32>
    %45 = vector.shape_cast %44 : vector<16x16x3xf32> to vector<256x3xf32>
    %c6 = arith.constant 6 : index
    %c0_54 = arith.constant 0 : index
    %c0_55 = arith.constant 0 : index
    %46 = vector.load %arg2[%c6, %c0_54, %c0_55] : memref<9x3x64xf32, #tpu.memory_space<vmem>>, vector<1x3x64xf32>
    %47 = vector.shape_cast %46 : vector<1x3x64xf32> to vector<3x64xf32>
    %cst_56 = arith.constant dense<0.000000e+00> : vector<256x64xf32>
    %48 = tpu.matmul %45, %47, %cst_56 {dimension_numbers = #tpu.dot_dimension_numbers<[1], [0], [0], [1], [0, 0, 1, 1], [], []>} : vector<256x3xf32>, vector<3x64xf32>, vector<256x64xf32> -> vector<256x64xf32>
    %49 = arith.addf %43, %48 : vector<256x64xf32>
    %c2_57 = arith.constant 2 : index
    %c1_58 = arith.constant 1 : index
    %c0_59 = arith.constant 0 : index
    %50 = vector.load %arg7[%c2_57, %c1_58, %c0_59] : memref<18x18x3xf32, #tpu.memory_space<vmem>>, vector<16x16x3xf32>
    %51 = vector.shape_cast %50 : vector<16x16x3xf32> to vector<256x3xf32>
    %c7 = arith.constant 7 : index
    %c0_60 = arith.constant 0 : index
    %c0_61 = arith.constant 0 : index
    %52 = vector.load %arg2[%c7, %c0_60, %c0_61] : memref<9x3x64xf32, #tpu.memory_space<vmem>>, vector<1x3x64xf32>
    %53 = vector.shape_cast %52 : vector<1x3x64xf32> to vector<3x64xf32>
    %cst_62 = arith.constant dense<0.000000e+00> : vector<256x64xf32>
    %54 = tpu.matmul %51, %53, %cst_62 {dimension_numbers = #tpu.dot_dimension_numbers<[1], [0], [0], [1], [0, 0, 1, 1], [], []>} : vector<256x3xf32>, vector<3x64xf32>, vector<256x64xf32> -> vector<256x64xf32>
    %55 = arith.addf %49, %54 : vector<256x64xf32>
    %c2_63 = arith.constant 2 : index
    %c2_64 = arith.constant 2 : index
    %c0_65 = arith.constant 0 : index
    %56 = vector.load %arg7[%c2_63, %c2_64, %c0_65] : memref<18x18x3xf32, #tpu.memory_space<vmem>>, vector<16x16x3xf32>
    %57 = vector.shape_cast %56 : vector<16x16x3xf32> to vector<256x3xf32>
    %c8 = arith.constant 8 : index
    %c0_66 = arith.constant 0 : index
    %c0_67 = arith.constant 0 : index
    %58 = vector.load %arg2[%c8, %c0_66, %c0_67] : memref<9x3x64xf32, #tpu.memory_space<vmem>>, vector<1x3x64xf32>
    %59 = vector.shape_cast %58 : vector<1x3x64xf32> to vector<3x64xf32>
    %cst_68 = arith.constant dense<0.000000e+00> : vector<256x64xf32>
    %60 = tpu.matmul %57, %59, %cst_68 {dimension_numbers = #tpu.dot_dimension_numbers<[1], [0], [0], [1], [0, 0, 1, 1], [], []>} : vector<256x3xf32>, vector<3x64xf32>, vector<256x64xf32> -> vector<256x64xf32>
    %61 = arith.addf %55, %60 : vector<256x64xf32>
    %c0_69 = arith.constant 0 : index
    %c0_70 = arith.constant 0 : index
    %62 = vector.load %arg3[%c0_69, %c0_70] : memref<1x64xf32, #tpu.memory_space<vmem>>, vector<1x64xf32>
    %63 = vector.broadcast %62 : vector<1x64xf32> to vector<256x64xf32>
    %64 = arith.addf %61, %63 : vector<256x64xf32>
    %cst_71 = arith.constant 0.000000e+00 : f32
    %65 = vector.broadcast %cst_71 : f32 to vector<256x64xf32>
    %66 = arith.maximumf %64, %65 : vector<256x64xf32>
    %67 = vector.shape_cast %66 : vector<256x64xf32> to vector<16x16x64xf32>
    %c1_72 = arith.constant 1 : index
    %c1_73 = arith.constant 1 : index
    %c0_74 = arith.constant 0 : index
    %68 = vector.load %arg8[%c1_72, %c1_73, %c0_74] : memref<18x18x64xf32, #tpu.memory_space<vmem>>, vector<16x16x64xf32>
    tpu.vector_store %arg8[%c1_72, %c1_73, %c0_74], %67 {strides = array<i32>} : memref<18x18x64xf32, #tpu.memory_space<vmem>>, vector<16x16x64xf32>,
    %c0_75 = arith.constant 0 : index
    %c0_76 = arith.constant 0 : index
    %c0_77 = arith.constant 0 : index
    %69 = vector.load %arg8[%c0_75, %c0_76, %c0_77] : memref<18x18x64xf32, #tpu.memory_space<vmem>>, vector<16x16x64xf32>
    %70 = arith.truncf %69 : vector<16x16x64xf32> to vector<16x16x64xbf16>
    %c0_78 = arith.constant 0 : index
    %c1_79 = arith.constant 1 : index
    %c0_80 = arith.constant 0 : index
    %71 = vector.load %arg8[%c0_78, %c1_79, %c0_80] : memref<18x18x64xf32, #tpu.memory_space<vmem>>, vector<16x16x64xf32>
    %72 = arith.truncf %71 : vector<16x16x64xf32> to vector<16x16x64xbf16>
    %c0_81 = arith.constant 0 : index
    %c2_82 = arith.constant 2 : index
    %c0_83 = arith.constant 0 : index
    %73 = vector.load %arg8[%c0_81, %c2_82, %c0_83] : memref<18x18x64xf32, #tpu.memory_space<vmem>>, vector<16x16x64xf32>
    %74 = arith.truncf %73 : vector<16x16x64xf32> to vector<16x16x64xbf16>
    %c1_84 = arith.constant 1 : index
    %c0_85 = arith.constant 0 : index
    %c0_86 = arith.constant 0 : index
    %75 = vector.load %arg8[%c1_84, %c0_85, %c0_86] : memref<18x18x64xf32, #tpu.memory_space<vmem>>, vector<16x16x64xf32>
    %76 = arith.truncf %75 : vector<16x16x64xf32> to vector<16x16x64xbf16>
    %c1_87 = arith.constant 1 : index
    %c1_88 = arith.constant 1 : index
    %c0_89 = arith.constant 0 : index
    %77 = vector.load %arg8[%c1_87, %c1_88, %c0_89] : memref<18x18x64xf32, #tpu.memory_space<vmem>>, vector<16x16x64xf32>
    %78 = arith.truncf %77 : vector<16x16x64xf32> to vector<16x16x64xbf16>
    %c1_90 = arith.constant 1 : index
    %c2_91 = arith.constant 2 : index
    %c0_92 = arith.constant 0 : index
    %79 = vector.load %arg8[%c1_90, %c2_91, %c0_92] : memref<18x18x64xf32, #tpu.memory_space<vmem>>, vector<16x16x64xf32>
    %80 = arith.truncf %79 : vector<16x16x64xf32> to vector<16x16x64xbf16>
    %c2_93 = arith.constant 2 : index
    %c0_94 = arith.constant 0 : index
    %c0_95 = arith.constant 0 : index
    %81 = vector.load %arg8[%c2_93, %c0_94, %c0_95] : memref<18x18x64xf32, #tpu.memory_space<vmem>>, vector<16x16x64xf32>
    %82 = arith.truncf %81 : vector<16x16x64xf32> to vector<16x16x64xbf16>
    %c2_96 = arith.constant 2 : index
    %c1_97 = arith.constant 1 : index
    %c0_98 = arith.constant 0 : index
    %83 = vector.load %arg8[%c2_96, %c1_97, %c0_98] : memref<18x18x64xf32, #tpu.memory_space<vmem>>, vector<16x16x64xf32>
    %84 = arith.truncf %83 : vector<16x16x64xf32> to vector<16x16x64xbf16>
    %c2_99 = arith.constant 2 : index
    %c2_100 = arith.constant 2 : index
    %c0_101 = arith.constant 0 : index
    %85 = vector.load %arg8[%c2_99, %c2_100, %c0_101] : memref<18x18x64xf32, #tpu.memory_space<vmem>>, vector<16x16x64xf32>
    %86 = arith.truncf %85 : vector<16x16x64xf32> to vector<16x16x64xbf16>
    %87 = tpu.concatenate %70, %72, %74, %76, %78, %80, %82, %84, %86 in 2 : vector<16x16x64xbf16>, vector<16x16x64xbf16>, vector<16x16x64xbf16>, vector<16x16x64xbf16>, vector<16x16x64xbf16>, vector<16x16x64xbf16>, vector<16x16x64xbf16>, vector<16x16x64xbf16>, vector<16x16x64xbf16> -> vector<16x16x576xbf16>
    %88 = vector.shape_cast %87 : vector<16x16x576xbf16> to vector<256x576xbf16>
    %c0_102 = arith.constant 0 : index
    %c0_103 = arith.constant 0 : index
    %89 = vector.load %arg4[%c0_102, %c0_103] : memref<576x128xbf16, #tpu.memory_space<vmem>>, vector<576x128xbf16>
    %cst_104 = arith.constant dense<0.000000e+00> : vector<256x128xf32>
    %90 = tpu.matmul %88, %89, %cst_104 {dimension_numbers = #tpu.dot_dimension_numbers<[1], [0], [0], [1], [0, 0, 1, 1], [], []>} : vector<256x576xbf16>, vector<576x128xbf16>, vector<256x128xf32> -> vector<256x128xf32>
    %c0_105 = arith.constant 0 : index
    %c0_106 = arith.constant 0 : index
    %91 = vector.load %arg5[%c0_105, %c0_106] : memref<1x128xf32, #tpu.memory_space<vmem>>, vector<1x128xf32>
    %92 = vector.broadcast %91 : vector<1x128xf32> to vector<256x128xf32>
    %93 = arith.addf %90, %92 : vector<256x128xf32>
    %cst_107 = arith.constant 0.000000e+00 : f32
    %94 = vector.broadcast %cst_107 : f32 to vector<256x128xf32>
    %95 = arith.maximumf %93, %94 : vector<256x128xf32>
    %c0_108 = arith.constant 0 : index
    %c0_109 = arith.constant 0 : index
    %96 = vector.load %arg9[%c0_108, %c0_109] : memref<256x128xf32, #tpu.memory_space<vmem>>, vector<256x128xf32>
    tpu.vector_store %arg9[%c0_108, %c0_109], %95 {strides = array<i32>} : memref<256x128xf32, #tpu.memory_space<vmem>>, vector<256x128xf32>,
    %c0_110 = arith.constant 0 : index
    %c0_111 = arith.constant 0 : index
    %97 = tpu.strided_load %arg9[%c0_110, %c0_111] {strides = array<i32: 2, 1>} : memref<256x128xf32, #tpu.memory_space<vmem>>, vector<128x128xf32>
    %c1_112 = arith.constant 1 : index
    %c0_113 = arith.constant 0 : index
    %98 = tpu.strided_load %arg9[%c1_112, %c0_113] {strides = array<i32: 2, 1>} : memref<256x128xf32, #tpu.memory_space<vmem>>, vector<128x128xf32>
    %99 = arith.maximumf %97, %98 : vector<128x128xf32>
    %100 = vector.shape_cast %99 : vector<128x128xf32> to vector<8x2x8x128xf32>
    %cst_114 = arith.constant dense<0xFF800000> : vector<8x8x128xf32>
    %101 = vector.multi_reduction <maximumf>, %100, %cst_114 [1] : vector<8x2x8x128xf32> to vector<8x8x128xf32>
    %102 = arith.truncf %101 : vector<8x8x128xf32> to vector<8x8x128xbf16>
    %c0_115 = arith.constant 0 : index
    %c0_116 = arith.constant 0 : index
    %c0_117 = arith.constant 0 : index
    %c0_118 = arith.constant 0 : index
    %103 = vector.load %arg6[%c0_115, %c0_116, %c0_117, %c0_118] : memref<1x8x8x128xbf16, #tpu.memory_space<vmem>>, vector<1x8x8x128xbf16>
    %104 = vector.shape_cast %103 : vector<1x8x8x128xbf16> to vector<8x8x128xbf16>
    %105 = vector.shape_cast %102 : vector<8x8x128xbf16> to vector<1x8x8x128xbf16>
    tpu.vector_store %arg6[%c0_115, %c0_116, %c0_117, %c0_118], %105 {strides = array<i32>} : memref<1x8x8x128xbf16, #tpu.memory_space<vmem>>, vector<1x8x8x128xbf16>,
    return
  }
  func.func @transform_0(%arg0: i32) -> (i32, i32, i32, i32) {
    %c0_i32 = arith.constant 0 : i32
    %c0_i32_0 = arith.constant 0 : i32
    %c0_i32_1 = arith.constant 0 : i32
    %c0_i32_2 = arith.constant 0 : i32
    return %arg0, %c0_i32, %c0_i32_0, %c0_i32_1 : i32, i32, i32, i32
  }
  func.func @transform_1(%arg0: i32) -> (i32, i32, i32) {
    %c0_i32 = arith.constant 0 : i32
    %c0_i32_0 = arith.constant 0 : i32
    %c0_i32_1 = arith.constant 0 : i32
    %c0_i32_2 = arith.constant 0 : i32
    return %c0_i32, %c0_i32_0, %c0_i32_1 : i32, i32, i32
  }
  func.func @transform_2(%arg0: i32) -> (i32, i32) {
    %c0_i32 = arith.constant 0 : i32
    %c0_i32_0 = arith.constant 0 : i32
    %c0_i32_1 = arith.constant 0 : i32
    return %c0_i32, %c0_i32_0 : i32, i32
  }
  func.func @transform_3(%arg0: i32) -> (i32, i32) {
    %c0_i32 = arith.constant 0 : i32
    %c0_i32_0 = arith.constant 0 : i32
    %c0_i32_1 = arith.constant 0 : i32
    return %c0_i32, %c0_i32_0 : i32, i32
  }
  func.func @transform_4(%arg0: i32) -> (i32, i32) {
    %c0_i32 = arith.constant 0 : i32
    %c0_i32_0 = arith.constant 0 : i32
    %c0_i32_1 = arith.constant 0 : i32
    return %c0_i32, %c0_i32_0 : i32, i32
  }
  func.func @transform_5(%arg0: i32) -> (i32, i32, i32, i32) {
    %c0_i32 = arith.constant 0 : i32
    %c0_i32_0 = arith.constant 0 : i32
    %c0_i32_1 = arith.constant 0 : i32
    %c0_i32_2 = arith.constant 0 : i32
    return %arg0, %c0_i32, %c0_i32_0, %c0_i32_1 : i32, i32, i32, i32
  }
}

module attributes {stable_mosaic.version = 11 : i64} {
  func.func @_decoder_kernel(%arg0: i32, %arg1: memref<1x8x8x128xbf16, #tpu.memory_space<vmem>>, %arg2: memref<128x256xbf16, #tpu.memory_space<vmem>>, %arg3: memref<1x64xf32, #tpu.memory_space<vmem>>, %arg4: memref<576x3xbf16, #tpu.memory_space<vmem>>, %arg5: memref<1x3xf32, #tpu.memory_space<vmem>>, %arg6: memref<1x4x8x8x3xf32, #tpu.memory_space<vmem>>, %arg7: memref<4x10x10x64xf32, #tpu.memory_space<vmem>>) attributes {dimension_semantics = [#tpu.dimension_semantics<parallel>], iteration_bounds = array<i64: 2>, scalar_prefetch = 0 : i64, scratch_operands = 1 : i64, tpu.core_type = #tpu.core_type<tc>, window_params = [{transform_indices = @transform_0, window_bounds = array<i64: 1, 8, 8, 128>}, {pipeline_mode = #tpu.pipeline_mode<synchronous>, transform_indices = @transform_1, window_bounds = array<i64: 128, 256>}, {pipeline_mode = #tpu.pipeline_mode<synchronous>, transform_indices = @transform_2, window_bounds = array<i64: 1, 64>}, {pipeline_mode = #tpu.pipeline_mode<synchronous>, transform_indices = @transform_3, window_bounds = array<i64: 576, 3>}, {pipeline_mode = #tpu.pipeline_mode<synchronous>, transform_indices = @transform_4, window_bounds = array<i64: 1, 3>}, {transform_indices = @transform_5, window_bounds = array<i64: 1, 4, 8, 8, 3>}]} {
    %cst = arith.constant 0.000000e+00 : f32
    %0 = vector.broadcast %cst : f32 to vector<4x10x10x64xf32>
    %c0 = arith.constant 0 : index
    %c0_0 = arith.constant 0 : index
    %c0_1 = arith.constant 0 : index
    %c0_2 = arith.constant 0 : index
    %1 = vector.load %arg7[%c0, %c0_0, %c0_1, %c0_2] : memref<4x10x10x64xf32, #tpu.memory_space<vmem>>, vector<4x10x10x64xf32>
    tpu.vector_store %arg7[%c0, %c0_0, %c0_1, %c0_2], %0 {strides = array<i32>} : memref<4x10x10x64xf32, #tpu.memory_space<vmem>>, vector<4x10x10x64xf32>,
    %c0_3 = arith.constant 0 : index
    %c0_4 = arith.constant 0 : index
    %c0_5 = arith.constant 0 : index
    %c0_6 = arith.constant 0 : index
    %2 = vector.load %arg1[%c0_3, %c0_4, %c0_5, %c0_6] : memref<1x8x8x128xbf16, #tpu.memory_space<vmem>>, vector<1x8x8x128xbf16>
    %3 = vector.shape_cast %2 : vector<1x8x8x128xbf16> to vector<8x8x128xbf16>
    %4 = vector.shape_cast %3 : vector<8x8x128xbf16> to vector<64x128xbf16>
    %c0_7 = arith.constant 0 : index
    %c0_8 = arith.constant 0 : index
    %5 = vector.load %arg2[%c0_7, %c0_8] : memref<128x256xbf16, #tpu.memory_space<vmem>>, vector<128x256xbf16>
    %cst_9 = arith.constant dense<0.000000e+00> : vector<64x256xf32>
    %6 = tpu.matmul %4, %5, %cst_9 {dimension_numbers = #tpu.dot_dimension_numbers<[1], [0], [0], [1], [0, 0, 1, 1], [], []>} : vector<64x128xbf16>, vector<128x256xbf16>, vector<64x256xf32> -> vector<64x256xf32>
    %7 = vector.extract_strided_slice %6 {offsets = [0, 0], sizes = [64, 64], strides = [1, 1]} : vector<64x256xf32> to vector<64x64xf32>
    %c0_10 = arith.constant 0 : index
    %c0_11 = arith.constant 0 : index
    %8 = vector.load %arg3[%c0_10, %c0_11] : memref<1x64xf32, #tpu.memory_space<vmem>>, vector<1x64xf32>
    %9 = vector.broadcast %8 : vector<1x64xf32> to vector<64x64xf32>
    %10 = arith.addf %7, %9 : vector<64x64xf32>
    %cst_12 = arith.constant 0.000000e+00 : f32
    %11 = vector.broadcast %cst_12 : f32 to vector<64x64xf32>
    %12 = arith.maximumf %10, %11 : vector<64x64xf32>
    %13 = vector.shape_cast %12 : vector<64x64xf32> to vector<8x8x64xf32>
    %c0_13 = arith.constant 0 : index
    %c1 = arith.constant 1 : index
    %c1_14 = arith.constant 1 : index
    %c0_15 = arith.constant 0 : index
    %14 = vector.load %arg7[%c0_13, %c1, %c1_14, %c0_15] : memref<4x10x10x64xf32, #tpu.memory_space<vmem>>, vector<1x8x8x64xf32>
    %15 = vector.shape_cast %14 : vector<1x8x8x64xf32> to vector<8x8x64xf32>
    %16 = vector.shape_cast %13 : vector<8x8x64xf32> to vector<1x8x8x64xf32>
    tpu.vector_store %arg7[%c0_13, %c1, %c1_14, %c0_15], %16 {strides = array<i32>} : memref<4x10x10x64xf32, #tpu.memory_space<vmem>>, vector<1x8x8x64xf32>,
    %17 = vector.extract_strided_slice %6 {offsets = [0, 64], sizes = [64, 64], strides = [1, 1]} : vector<64x256xf32> to vector<64x64xf32>
    %c0_16 = arith.constant 0 : index
    %c0_17 = arith.constant 0 : index
    %18 = vector.load %arg3[%c0_16, %c0_17] : memref<1x64xf32, #tpu.memory_space<vmem>>, vector<1x64xf32>
    %19 = vector.broadcast %18 : vector<1x64xf32> to vector<64x64xf32>
    %20 = arith.addf %17, %19 : vector<64x64xf32>
    %cst_18 = arith.constant 0.000000e+00 : f32
    %21 = vector.broadcast %cst_18 : f32 to vector<64x64xf32>
    %22 = arith.maximumf %20, %21 : vector<64x64xf32>
    %23 = vector.shape_cast %22 : vector<64x64xf32> to vector<8x8x64xf32>
    %c1_19 = arith.constant 1 : index
    %c1_20 = arith.constant 1 : index
    %c1_21 = arith.constant 1 : index
    %c0_22 = arith.constant 0 : index
    %24 = vector.load %arg7[%c1_19, %c1_20, %c1_21, %c0_22] : memref<4x10x10x64xf32, #tpu.memory_space<vmem>>, vector<1x8x8x64xf32>
    %25 = vector.shape_cast %24 : vector<1x8x8x64xf32> to vector<8x8x64xf32>
    %26 = vector.shape_cast %23 : vector<8x8x64xf32> to vector<1x8x8x64xf32>
    tpu.vector_store %arg7[%c1_19, %c1_20, %c1_21, %c0_22], %26 {strides = array<i32>} : memref<4x10x10x64xf32, #tpu.memory_space<vmem>>, vector<1x8x8x64xf32>,
    %27 = vector.extract_strided_slice %6 {offsets = [0, 128], sizes = [64, 64], strides = [1, 1]} : vector<64x256xf32> to vector<64x64xf32>
    %c0_23 = arith.constant 0 : index
    %c0_24 = arith.constant 0 : index
    %28 = vector.load %arg3[%c0_23, %c0_24] : memref<1x64xf32, #tpu.memory_space<vmem>>, vector<1x64xf32>
    %29 = vector.broadcast %28 : vector<1x64xf32> to vector<64x64xf32>
    %30 = arith.addf %27, %29 : vector<64x64xf32>
    %cst_25 = arith.constant 0.000000e+00 : f32
    %31 = vector.broadcast %cst_25 : f32 to vector<64x64xf32>
    %32 = arith.maximumf %30, %31 : vector<64x64xf32>
    %33 = vector.shape_cast %32 : vector<64x64xf32> to vector<8x8x64xf32>
    %c2 = arith.constant 2 : index
    %c1_26 = arith.constant 1 : index
    %c1_27 = arith.constant 1 : index
    %c0_28 = arith.constant 0 : index
    %34 = vector.load %arg7[%c2, %c1_26, %c1_27, %c0_28] : memref<4x10x10x64xf32, #tpu.memory_space<vmem>>, vector<1x8x8x64xf32>
    %35 = vector.shape_cast %34 : vector<1x8x8x64xf32> to vector<8x8x64xf32>
    %36 = vector.shape_cast %33 : vector<8x8x64xf32> to vector<1x8x8x64xf32>
    tpu.vector_store %arg7[%c2, %c1_26, %c1_27, %c0_28], %36 {strides = array<i32>} : memref<4x10x10x64xf32, #tpu.memory_space<vmem>>, vector<1x8x8x64xf32>,
    %37 = vector.extract_strided_slice %6 {offsets = [0, 192], sizes = [64, 64], strides = [1, 1]} : vector<64x256xf32> to vector<64x64xf32>
    %c0_29 = arith.constant 0 : index
    %c0_30 = arith.constant 0 : index
    %38 = vector.load %arg3[%c0_29, %c0_30] : memref<1x64xf32, #tpu.memory_space<vmem>>, vector<1x64xf32>
    %39 = vector.broadcast %38 : vector<1x64xf32> to vector<64x64xf32>
    %40 = arith.addf %37, %39 : vector<64x64xf32>
    %cst_31 = arith.constant 0.000000e+00 : f32
    %41 = vector.broadcast %cst_31 : f32 to vector<64x64xf32>
    %42 = arith.maximumf %40, %41 : vector<64x64xf32>
    %43 = vector.shape_cast %42 : vector<64x64xf32> to vector<8x8x64xf32>
    %c3 = arith.constant 3 : index
    %c1_32 = arith.constant 1 : index
    %c1_33 = arith.constant 1 : index
    %c0_34 = arith.constant 0 : index
    %44 = vector.load %arg7[%c3, %c1_32, %c1_33, %c0_34] : memref<4x10x10x64xf32, #tpu.memory_space<vmem>>, vector<1x8x8x64xf32>
    %45 = vector.shape_cast %44 : vector<1x8x8x64xf32> to vector<8x8x64xf32>
    %46 = vector.shape_cast %43 : vector<8x8x64xf32> to vector<1x8x8x64xf32>
    tpu.vector_store %arg7[%c3, %c1_32, %c1_33, %c0_34], %46 {strides = array<i32>} : memref<4x10x10x64xf32, #tpu.memory_space<vmem>>, vector<1x8x8x64xf32>,
    %c3_35 = arith.constant 3 : index
    %c0_36 = arith.constant 0 : index
    %c0_37 = arith.constant 0 : index
    %c0_38 = arith.constant 0 : index
    %47 = vector.load %arg7[%c3_35, %c0_36, %c0_37, %c0_38] : memref<4x10x10x64xf32, #tpu.memory_space<vmem>>, vector<1x8x8x64xf32>
    %48 = vector.shape_cast %47 : vector<1x8x8x64xf32> to vector<8x8x64xf32>
    %49 = arith.truncf %48 : vector<8x8x64xf32> to vector<8x8x64xbf16>
    %c2_39 = arith.constant 2 : index
    %c0_40 = arith.constant 0 : index
    %c1_41 = arith.constant 1 : index
    %c0_42 = arith.constant 0 : index
    %50 = vector.load %arg7[%c2_39, %c0_40, %c1_41, %c0_42] : memref<4x10x10x64xf32, #tpu.memory_space<vmem>>, vector<1x8x8x64xf32>
    %51 = vector.shape_cast %50 : vector<1x8x8x64xf32> to vector<8x8x64xf32>
    %52 = arith.truncf %51 : vector<8x8x64xf32> to vector<8x8x64xbf16>
    %c3_43 = arith.constant 3 : index
    %c0_44 = arith.constant 0 : index
    %c1_45 = arith.constant 1 : index
    %c0_46 = arith.constant 0 : index
    %53 = vector.load %arg7[%c3_43, %c0_44, %c1_45, %c0_46] : memref<4x10x10x64xf32, #tpu.memory_space<vmem>>, vector<1x8x8x64xf32>
    %54 = vector.shape_cast %53 : vector<1x8x8x64xf32> to vector<8x8x64xf32>
    %55 = arith.truncf %54 : vector<8x8x64xf32> to vector<8x8x64xbf16>
    %c1_47 = arith.constant 1 : index
    %c1_48 = arith.constant 1 : index
    %c0_49 = arith.constant 0 : index
    %c0_50 = arith.constant 0 : index
    %56 = vector.load %arg7[%c1_47, %c1_48, %c0_49, %c0_50] : memref<4x10x10x64xf32, #tpu.memory_space<vmem>>, vector<1x8x8x64xf32>
    %57 = vector.shape_cast %56 : vector<1x8x8x64xf32> to vector<8x8x64xf32>
    %58 = arith.truncf %57 : vector<8x8x64xf32> to vector<8x8x64xbf16>
    %c0_51 = arith.constant 0 : index
    %c1_52 = arith.constant 1 : index
    %c1_53 = arith.constant 1 : index
    %c0_54 = arith.constant 0 : index
    %59 = vector.load %arg7[%c0_51, %c1_52, %c1_53, %c0_54] : memref<4x10x10x64xf32, #tpu.memory_space<vmem>>, vector<1x8x8x64xf32>
    %60 = vector.shape_cast %59 : vector<1x8x8x64xf32> to vector<8x8x64xf32>
    %61 = arith.truncf %60 : vector<8x8x64xf32> to vector<8x8x64xbf16>
    %c1_55 = arith.constant 1 : index
    %c1_56 = arith.constant 1 : index
    %c1_57 = arith.constant 1 : index
    %c0_58 = arith.constant 0 : index
    %62 = vector.load %arg7[%c1_55, %c1_56, %c1_57, %c0_58] : memref<4x10x10x64xf32, #tpu.memory_space<vmem>>, vector<1x8x8x64xf32>
    %63 = vector.shape_cast %62 : vector<1x8x8x64xf32> to vector<8x8x64xf32>
    %64 = arith.truncf %63 : vector<8x8x64xf32> to vector<8x8x64xbf16>
    %c3_59 = arith.constant 3 : index
    %c1_60 = arith.constant 1 : index
    %c0_61 = arith.constant 0 : index
    %c0_62 = arith.constant 0 : index
    %65 = vector.load %arg7[%c3_59, %c1_60, %c0_61, %c0_62] : memref<4x10x10x64xf32, #tpu.memory_space<vmem>>, vector<1x8x8x64xf32>
    %66 = vector.shape_cast %65 : vector<1x8x8x64xf32> to vector<8x8x64xf32>
    %67 = arith.truncf %66 : vector<8x8x64xf32> to vector<8x8x64xbf16>
    %c2_63 = arith.constant 2 : index
    %c1_64 = arith.constant 1 : index
    %c1_65 = arith.constant 1 : index
    %c0_66 = arith.constant 0 : index
    %68 = vector.load %arg7[%c2_63, %c1_64, %c1_65, %c0_66] : memref<4x10x10x64xf32, #tpu.memory_space<vmem>>, vector<1x8x8x64xf32>
    %69 = vector.shape_cast %68 : vector<1x8x8x64xf32> to vector<8x8x64xf32>
    %70 = arith.truncf %69 : vector<8x8x64xf32> to vector<8x8x64xbf16>
    %c3_67 = arith.constant 3 : index
    %c1_68 = arith.constant 1 : index
    %c1_69 = arith.constant 1 : index
    %c0_70 = arith.constant 0 : index
    %71 = vector.load %arg7[%c3_67, %c1_68, %c1_69, %c0_70] : memref<4x10x10x64xf32, #tpu.memory_space<vmem>>, vector<1x8x8x64xf32>
    %72 = vector.shape_cast %71 : vector<1x8x8x64xf32> to vector<8x8x64xf32>
    %73 = arith.truncf %72 : vector<8x8x64xf32> to vector<8x8x64xbf16>
    %74 = tpu.concatenate %49, %52, %55, %58, %61, %64, %67, %70, %73 in 2 : vector<8x8x64xbf16>, vector<8x8x64xbf16>, vector<8x8x64xbf16>, vector<8x8x64xbf16>, vector<8x8x64xbf16>, vector<8x8x64xbf16>, vector<8x8x64xbf16>, vector<8x8x64xbf16>, vector<8x8x64xbf16> -> vector<8x8x576xbf16>
    %75 = vector.shape_cast %74 : vector<8x8x576xbf16> to vector<64x576xbf16>
    %c2_71 = arith.constant 2 : index
    %c0_72 = arith.constant 0 : index
    %c1_73 = arith.constant 1 : index
    %c0_74 = arith.constant 0 : index
    %76 = vector.load %arg7[%c2_71, %c0_72, %c1_73, %c0_74] : memref<4x10x10x64xf32, #tpu.memory_space<vmem>>, vector<1x8x8x64xf32>
    %77 = vector.shape_cast %76 : vector<1x8x8x64xf32> to vector<8x8x64xf32>
    %78 = arith.truncf %77 : vector<8x8x64xf32> to vector<8x8x64xbf16>
    %c3_75 = arith.constant 3 : index
    %c0_76 = arith.constant 0 : index
    %c1_77 = arith.constant 1 : index
    %c0_78 = arith.constant 0 : index
    %79 = vector.load %arg7[%c3_75, %c0_76, %c1_77, %c0_78] : memref<4x10x10x64xf32, #tpu.memory_space<vmem>>, vector<1x8x8x64xf32>
    %80 = vector.shape_cast %79 : vector<1x8x8x64xf32> to vector<8x8x64xf32>
    %81 = arith.truncf %80 : vector<8x8x64xf32> to vector<8x8x64xbf16>
    %c2_79 = arith.constant 2 : index
    %c0_80 = arith.constant 0 : index
    %c2_81 = arith.constant 2 : index
    %c0_82 = arith.constant 0 : index
    %82 = vector.load %arg7[%c2_79, %c0_80, %c2_81, %c0_82] : memref<4x10x10x64xf32, #tpu.memory_space<vmem>>, vector<1x8x8x64xf32>
    %83 = vector.shape_cast %82 : vector<1x8x8x64xf32> to vector<8x8x64xf32>
    %84 = arith.truncf %83 : vector<8x8x64xf32> to vector<8x8x64xbf16>
    %c0_83 = arith.constant 0 : index
    %c1_84 = arith.constant 1 : index
    %c1_85 = arith.constant 1 : index
    %c0_86 = arith.constant 0 : index
    %85 = vector.load %arg7[%c0_83, %c1_84, %c1_85, %c0_86] : memref<4x10x10x64xf32, #tpu.memory_space<vmem>>, vector<1x8x8x64xf32>
    %86 = vector.shape_cast %85 : vector<1x8x8x64xf32> to vector<8x8x64xf32>
    %87 = arith.truncf %86 : vector<8x8x64xf32> to vector<8x8x64xbf16>
    %c1_87 = arith.constant 1 : index
    %c1_88 = arith.constant 1 : index
    %c1_89 = arith.constant 1 : index
    %c0_90 = arith.constant 0 : index
    %88 = vector.load %arg7[%c1_87, %c1_88, %c1_89, %c0_90] : memref<4x10x10x64xf32, #tpu.memory_space<vmem>>, vector<1x8x8x64xf32>
    %89 = vector.shape_cast %88 : vector<1x8x8x64xf32> to vector<8x8x64xf32>
    %90 = arith.truncf %89 : vector<8x8x64xf32> to vector<8x8x64xbf16>
    %c0_91 = arith.constant 0 : index
    %c1_92 = arith.constant 1 : index
    %c2_93 = arith.constant 2 : index
    %c0_94 = arith.constant 0 : index
    %91 = vector.load %arg7[%c0_91, %c1_92, %c2_93, %c0_94] : memref<4x10x10x64xf32, #tpu.memory_space<vmem>>, vector<1x8x8x64xf32>
    %92 = vector.shape_cast %91 : vector<1x8x8x64xf32> to vector<8x8x64xf32>
    %93 = arith.truncf %92 : vector<8x8x64xf32> to vector<8x8x64xbf16>
    %c2_95 = arith.constant 2 : index
    %c1_96 = arith.constant 1 : index
    %c1_97 = arith.constant 1 : index
    %c0_98 = arith.constant 0 : index
    %94 = vector.load %arg7[%c2_95, %c1_96, %c1_97, %c0_98] : memref<4x10x10x64xf32, #tpu.memory_space<vmem>>, vector<1x8x8x64xf32>
    %95 = vector.shape_cast %94 : vector<1x8x8x64xf32> to vector<8x8x64xf32>
    %96 = arith.truncf %95 : vector<8x8x64xf32> to vector<8x8x64xbf16>
    %c3_99 = arith.constant 3 : index
    %c1_100 = arith.constant 1 : index
    %c1_101 = arith.constant 1 : index
    %c0_102 = arith.constant 0 : index
    %97 = vector.load %arg7[%c3_99, %c1_100, %c1_101, %c0_102] : memref<4x10x10x64xf32, #tpu.memory_space<vmem>>, vector<1x8x8x64xf32>
    %98 = vector.shape_cast %97 : vector<1x8x8x64xf32> to vector<8x8x64xf32>
    %99 = arith.truncf %98 : vector<8x8x64xf32> to vector<8x8x64xbf16>
    %c2_103 = arith.constant 2 : index
    %c1_104 = arith.constant 1 : index
    %c2_105 = arith.constant 2 : index
    %c0_106 = arith.constant 0 : index
    %100 = vector.load %arg7[%c2_103, %c1_104, %c2_105, %c0_106] : memref<4x10x10x64xf32, #tpu.memory_space<vmem>>, vector<1x8x8x64xf32>
    %101 = vector.shape_cast %100 : vector<1x8x8x64xf32> to vector<8x8x64xf32>
    %102 = arith.truncf %101 : vector<8x8x64xf32> to vector<8x8x64xbf16>
    %103 = tpu.concatenate %78, %81, %84, %87, %90, %93, %96, %99, %102 in 2 : vector<8x8x64xbf16>, vector<8x8x64xbf16>, vector<8x8x64xbf16>, vector<8x8x64xbf16>, vector<8x8x64xbf16>, vector<8x8x64xbf16>, vector<8x8x64xbf16>, vector<8x8x64xbf16>, vector<8x8x64xbf16> -> vector<8x8x576xbf16>
    %104 = vector.shape_cast %103 : vector<8x8x576xbf16> to vector<64x576xbf16>
    %c1_107 = arith.constant 1 : index
    %c1_108 = arith.constant 1 : index
    %c0_109 = arith.constant 0 : index
    %c0_110 = arith.constant 0 : index
    %105 = vector.load %arg7[%c1_107, %c1_108, %c0_109, %c0_110] : memref<4x10x10x64xf32, #tpu.memory_space<vmem>>, vector<1x8x8x64xf32>
    %106 = vector.shape_cast %105 : vector<1x8x8x64xf32> to vector<8x8x64xf32>
    %107 = arith.truncf %106 : vector<8x8x64xf32> to vector<8x8x64xbf16>
    %c0_111 = arith.constant 0 : index
    %c1_112 = arith.constant 1 : index
    %c1_113 = arith.constant 1 : index
    %c0_114 = arith.constant 0 : index
    %108 = vector.load %arg7[%c0_111, %c1_112, %c1_113, %c0_114] : memref<4x10x10x64xf32, #tpu.memory_space<vmem>>, vector<1x8x8x64xf32>
    %109 = vector.shape_cast %108 : vector<1x8x8x64xf32> to vector<8x8x64xf32>
    %110 = arith.truncf %109 : vector<8x8x64xf32> to vector<8x8x64xbf16>
    %c1_115 = arith.constant 1 : index
    %c1_116 = arith.constant 1 : index
    %c1_117 = arith.constant 1 : index
    %c0_118 = arith.constant 0 : index
    %111 = vector.load %arg7[%c1_115, %c1_116, %c1_117, %c0_118] : memref<4x10x10x64xf32, #tpu.memory_space<vmem>>, vector<1x8x8x64xf32>
    %112 = vector.shape_cast %111 : vector<1x8x8x64xf32> to vector<8x8x64xf32>
    %113 = arith.truncf %112 : vector<8x8x64xf32> to vector<8x8x64xbf16>
    %c3_119 = arith.constant 3 : index
    %c1_120 = arith.constant 1 : index
    %c0_121 = arith.constant 0 : index
    %c0_122 = arith.constant 0 : index
    %114 = vector.load %arg7[%c3_119, %c1_120, %c0_121, %c0_122] : memref<4x10x10x64xf32, #tpu.memory_space<vmem>>, vector<1x8x8x64xf32>
    %115 = vector.shape_cast %114 : vector<1x8x8x64xf32> to vector<8x8x64xf32>
    %116 = arith.truncf %115 : vector<8x8x64xf32> to vector<8x8x64xbf16>
    %c2_123 = arith.constant 2 : index
    %c1_124 = arith.constant 1 : index
    %c1_125 = arith.constant 1 : index
    %c0_126 = arith.constant 0 : index
    %117 = vector.load %arg7[%c2_123, %c1_124, %c1_125, %c0_126] : memref<4x10x10x64xf32, #tpu.memory_space<vmem>>, vector<1x8x8x64xf32>
    %118 = vector.shape_cast %117 : vector<1x8x8x64xf32> to vector<8x8x64xf32>
    %119 = arith.truncf %118 : vector<8x8x64xf32> to vector<8x8x64xbf16>
    %c3_127 = arith.constant 3 : index
    %c1_128 = arith.constant 1 : index
    %c1_129 = arith.constant 1 : index
    %c0_130 = arith.constant 0 : index
    %120 = vector.load %arg7[%c3_127, %c1_128, %c1_129, %c0_130] : memref<4x10x10x64xf32, #tpu.memory_space<vmem>>, vector<1x8x8x64xf32>
    %121 = vector.shape_cast %120 : vector<1x8x8x64xf32> to vector<8x8x64xf32>
    %122 = arith.truncf %121 : vector<8x8x64xf32> to vector<8x8x64xbf16>
    %c1_131 = arith.constant 1 : index
    %c2_132 = arith.constant 2 : index
    %c0_133 = arith.constant 0 : index
    %c0_134 = arith.constant 0 : index
    %123 = vector.load %arg7[%c1_131, %c2_132, %c0_133, %c0_134] : memref<4x10x10x64xf32, #tpu.memory_space<vmem>>, vector<1x8x8x64xf32>
    %124 = vector.shape_cast %123 : vector<1x8x8x64xf32> to vector<8x8x64xf32>
    %125 = arith.truncf %124 : vector<8x8x64xf32> to vector<8x8x64xbf16>
    %c0_135 = arith.constant 0 : index
    %c2_136 = arith.constant 2 : index
    %c1_137 = arith.constant 1 : index
    %c0_138 = arith.constant 0 : index
    %126 = vector.load %arg7[%c0_135, %c2_136, %c1_137, %c0_138] : memref<4x10x10x64xf32, #tpu.memory_space<vmem>>, vector<1x8x8x64xf32>
    %127 = vector.shape_cast %126 : vector<1x8x8x64xf32> to vector<8x8x64xf32>
    %128 = arith.truncf %127 : vector<8x8x64xf32> to vector<8x8x64xbf16>
    %c1_139 = arith.constant 1 : index
    %c2_140 = arith.constant 2 : index
    %c1_141 = arith.constant 1 : index
    %c0_142 = arith.constant 0 : index
    %129 = vector.load %arg7[%c1_139, %c2_140, %c1_141, %c0_142] : memref<4x10x10x64xf32, #tpu.memory_space<vmem>>, vector<1x8x8x64xf32>
    %130 = vector.shape_cast %129 : vector<1x8x8x64xf32> to vector<8x8x64xf32>
    %131 = arith.truncf %130 : vector<8x8x64xf32> to vector<8x8x64xbf16>
    %132 = tpu.concatenate %107, %110, %113, %116, %119, %122, %125, %128, %131 in 2 : vector<8x8x64xbf16>, vector<8x8x64xbf16>, vector<8x8x64xbf16>, vector<8x8x64xbf16>, vector<8x8x64xbf16>, vector<8x8x64xbf16>, vector<8x8x64xbf16>, vector<8x8x64xbf16>, vector<8x8x64xbf16> -> vector<8x8x576xbf16>
    %133 = vector.shape_cast %132 : vector<8x8x576xbf16> to vector<64x576xbf16>
    %c0_143 = arith.constant 0 : index
    %c1_144 = arith.constant 1 : index
    %c1_145 = arith.constant 1 : index
    %c0_146 = arith.constant 0 : index
    %134 = vector.load %arg7[%c0_143, %c1_144, %c1_145, %c0_146] : memref<4x10x10x64xf32, #tpu.memory_space<vmem>>, vector<1x8x8x64xf32>
    %135 = vector.shape_cast %134 : vector<1x8x8x64xf32> to vector<8x8x64xf32>
    %136 = arith.truncf %135 : vector<8x8x64xf32> to vector<8x8x64xbf16>
    %c1_147 = arith.constant 1 : index
    %c1_148 = arith.constant 1 : index
    %c1_149 = arith.constant 1 : index
    %c0_150 = arith.constant 0 : index
    %137 = vector.load %arg7[%c1_147, %c1_148, %c1_149, %c0_150] : memref<4x10x10x64xf32, #tpu.memory_space<vmem>>, vector<1x8x8x64xf32>
    %138 = vector.shape_cast %137 : vector<1x8x8x64xf32> to vector<8x8x64xf32>
    %139 = arith.truncf %138 : vector<8x8x64xf32> to vector<8x8x64xbf16>
    %c0_151 = arith.constant 0 : index
    %c1_152 = arith.constant 1 : index
    %c2_153 = arith.constant 2 : index
    %c0_154 = arith.constant 0 : index
    %140 = vector.load %arg7[%c0_151, %c1_152, %c2_153, %c0_154] : memref<4x10x10x64xf32, #tpu.memory_space<vmem>>, vector<1x8x8x64xf32>
    %141 = vector.shape_cast %140 : vector<1x8x8x64xf32> to vector<8x8x64xf32>
    %142 = arith.truncf %141 : vector<8x8x64xf32> to vector<8x8x64xbf16>
    %c2_155 = arith.constant 2 : index
    %c1_156 = arith.constant 1 : index
    %c1_157 = arith.constant 1 : index
    %c0_158 = arith.constant 0 : index
    %143 = vector.load %arg7[%c2_155, %c1_156, %c1_157, %c0_158] : memref<4x10x10x64xf32, #tpu.memory_space<vmem>>, vector<1x8x8x64xf32>
    %144 = vector.shape_cast %143 : vector<1x8x8x64xf32> to vector<8x8x64xf32>
    %145 = arith.truncf %144 : vector<8x8x64xf32> to vector<8x8x64xbf16>
    %c3_159 = arith.constant 3 : index
    %c1_160 = arith.constant 1 : index
    %c1_161 = arith.constant 1 : index
    %c0_162 = arith.constant 0 : index
    %146 = vector.load %arg7[%c3_159, %c1_160, %c1_161, %c0_162] : memref<4x10x10x64xf32, #tpu.memory_space<vmem>>, vector<1x8x8x64xf32>
    %147 = vector.shape_cast %146 : vector<1x8x8x64xf32> to vector<8x8x64xf32>
    %148 = arith.truncf %147 : vector<8x8x64xf32> to vector<8x8x64xbf16>
    %c2_163 = arith.constant 2 : index
    %c1_164 = arith.constant 1 : index
    %c2_165 = arith.constant 2 : index
    %c0_166 = arith.constant 0 : index
    %149 = vector.load %arg7[%c2_163, %c1_164, %c2_165, %c0_166] : memref<4x10x10x64xf32, #tpu.memory_space<vmem>>, vector<1x8x8x64xf32>
    %150 = vector.shape_cast %149 : vector<1x8x8x64xf32> to vector<8x8x64xf32>
    %151 = arith.truncf %150 : vector<8x8x64xf32> to vector<8x8x64xbf16>
    %c0_167 = arith.constant 0 : index
    %c2_168 = arith.constant 2 : index
    %c1_169 = arith.constant 1 : index
    %c0_170 = arith.constant 0 : index
    %152 = vector.load %arg7[%c0_167, %c2_168, %c1_169, %c0_170] : memref<4x10x10x64xf32, #tpu.memory_space<vmem>>, vector<1x8x8x64xf32>
    %153 = vector.shape_cast %152 : vector<1x8x8x64xf32> to vector<8x8x64xf32>
    %154 = arith.truncf %153 : vector<8x8x64xf32> to vector<8x8x64xbf16>
    %c1_171 = arith.constant 1 : index
    %c2_172 = arith.constant 2 : index
    %c1_173 = arith.constant 1 : index
    %c0_174 = arith.constant 0 : index
    %155 = vector.load %arg7[%c1_171, %c2_172, %c1_173, %c0_174] : memref<4x10x10x64xf32, #tpu.memory_space<vmem>>, vector<1x8x8x64xf32>
    %156 = vector.shape_cast %155 : vector<1x8x8x64xf32> to vector<8x8x64xf32>
    %157 = arith.truncf %156 : vector<8x8x64xf32> to vector<8x8x64xbf16>
    %c0_175 = arith.constant 0 : index
    %c2_176 = arith.constant 2 : index
    %c2_177 = arith.constant 2 : index
    %c0_178 = arith.constant 0 : index
    %158 = vector.load %arg7[%c0_175, %c2_176, %c2_177, %c0_178] : memref<4x10x10x64xf32, #tpu.memory_space<vmem>>, vector<1x8x8x64xf32>
    %159 = vector.shape_cast %158 : vector<1x8x8x64xf32> to vector<8x8x64xf32>
    %160 = arith.truncf %159 : vector<8x8x64xf32> to vector<8x8x64xbf16>
    %161 = tpu.concatenate %136, %139, %142, %145, %148, %151, %154, %157, %160 in 2 : vector<8x8x64xbf16>, vector<8x8x64xbf16>, vector<8x8x64xbf16>, vector<8x8x64xbf16>, vector<8x8x64xbf16>, vector<8x8x64xbf16>, vector<8x8x64xbf16>, vector<8x8x64xbf16>, vector<8x8x64xbf16> -> vector<8x8x576xbf16>
    %162 = vector.shape_cast %161 : vector<8x8x576xbf16> to vector<64x576xbf16>
    %163 = tpu.concatenate %75, %104, %133, %162 in 0 : vector<64x576xbf16>, vector<64x576xbf16>, vector<64x576xbf16>, vector<64x576xbf16> -> vector<256x576xbf16>
    %c0_179 = arith.constant 0 : index
    %c0_180 = arith.constant 0 : index
    %164 = vector.load %arg4[%c0_179, %c0_180] : memref<576x3xbf16, #tpu.memory_space<vmem>>, vector<576x3xbf16>
    %cst_181 = arith.constant dense<0.000000e+00> : vector<256x3xf32>
    %165 = tpu.matmul %163, %164, %cst_181 {dimension_numbers = #tpu.dot_dimension_numbers<[1], [0], [0], [1], [0, 0, 1, 1], [], []>} : vector<256x576xbf16>, vector<576x3xbf16>, vector<256x3xf32> -> vector<256x3xf32>
    %c0_182 = arith.constant 0 : index
    %c0_183 = arith.constant 0 : index
    %166 = vector.load %arg5[%c0_182, %c0_183] : memref<1x3xf32, #tpu.memory_space<vmem>>, vector<1x3xf32>
    %167 = vector.broadcast %166 : vector<1x3xf32> to vector<256x3xf32>
    %168 = arith.addf %165, %167 : vector<256x3xf32>
    %169 = arith.negf %168 : vector<256x3xf32>
    %170 = math.exp %169 : vector<256x3xf32>
    %cst_184 = arith.constant 1.000000e+00 : f32
    %171 = vector.broadcast %cst_184 : f32 to vector<256x3xf32>
    %172 = arith.addf %171, %170 : vector<256x3xf32>
    %173 = arith.divf %171, %172 : vector<256x3xf32>
    %174 = vector.shape_cast %173 : vector<256x3xf32> to vector<4x8x8x3xf32>
    %c0_185 = arith.constant 0 : index
    %c0_186 = arith.constant 0 : index
    %c0_187 = arith.constant 0 : index
    %c0_188 = arith.constant 0 : index
    %c0_189 = arith.constant 0 : index
    %175 = vector.load %arg6[%c0_185, %c0_186, %c0_187, %c0_188, %c0_189] : memref<1x4x8x8x3xf32, #tpu.memory_space<vmem>>, vector<1x4x8x8x3xf32>
    %176 = vector.shape_cast %175 : vector<1x4x8x8x3xf32> to vector<4x8x8x3xf32>
    %177 = vector.shape_cast %174 : vector<4x8x8x3xf32> to vector<1x4x8x8x3xf32>
    tpu.vector_store %arg6[%c0_185, %c0_186, %c0_187, %c0_188, %c0_189], %177 {strides = array<i32>} : memref<1x4x8x8x3xf32, #tpu.memory_space<vmem>>, vector<1x4x8x8x3xf32>,
    return
  }
  func.func @transform_0(%arg0: i32) -> (i32, i32, i32, i32) {
    %c0_i32 = arith.constant 0 : i32
    %c0_i32_0 = arith.constant 0 : i32
    %c0_i32_1 = arith.constant 0 : i32
    %c0_i32_2 = arith.constant 0 : i32
    return %arg0, %c0_i32, %c0_i32_0, %c0_i32_1 : i32, i32, i32, i32
  }
  func.func @transform_1(%arg0: i32) -> (i32, i32) {
    %c0_i32 = arith.constant 0 : i32
    %c0_i32_0 = arith.constant 0 : i32
    %c0_i32_1 = arith.constant 0 : i32
    return %c0_i32, %c0_i32_0 : i32, i32
  }
  func.func @transform_2(%arg0: i32) -> (i32, i32) {
    %c0_i32 = arith.constant 0 : i32
    %c0_i32_0 = arith.constant 0 : i32
    %c0_i32_1 = arith.constant 0 : i32
    return %c0_i32, %c0_i32_0 : i32, i32
  }
  func.func @transform_3(%arg0: i32) -> (i32, i32) {
    %c0_i32 = arith.constant 0 : i32
    %c0_i32_0 = arith.constant 0 : i32
    %c0_i32_1 = arith.constant 0 : i32
    return %c0_i32, %c0_i32_0 : i32, i32
  }
  func.func @transform_4(%arg0: i32) -> (i32, i32) {
    %c0_i32 = arith.constant 0 : i32
    %c0_i32_0 = arith.constant 0 : i32
    %c0_i32_1 = arith.constant 0 : i32
    return %c0_i32, %c0_i32_0 : i32, i32
  }
  func.func @transform_5(%arg0: i32) -> (i32, i32, i32, i32, i32) {
    %c0_i32 = arith.constant 0 : i32
    %c0_i32_0 = arith.constant 0 : i32
    %c0_i32_1 = arith.constant 0 : i32
    %c0_i32_2 = arith.constant 0 : i32
    %c0_i32_3 = arith.constant 0 : i32
    return %arg0, %c0_i32, %c0_i32_0, %c0_i32_1, %c0_i32_2 : i32, i32, i32, i32, i32
  }
}

</mosaic_0001>

<bundles_post_ra>
// kernel: video_frame_transformer.3
= control target key start
LH: loop header
LB: loop body
LE: loop exit
PB: predicated region body
PF: predicated region fallthrough
CT: control target
= control target key end

     0   :  { %s4128_s18 = smov 0   ;;  %s5769_s0 = inlined_call_operand.vmem [shape: bf16[2,8,8,128], index: 0, kind: input, shape index: {}]   ;;  %s5770_s1 = inlined_call_operand.vmem [shape: bf16[128,256], index: 1, kind: input, shape index: {}]   ;;  %s5771_s2 = inlined_call_operand.vmem [shape: f32[1,64], index: 2, kind: input, shape index: {}]   ;;  %s5772_s3 = inlined_call_operand.vmem [shape: bf16[576,3], index: 3, kind: input, shape index: {}]   ;;  %s5773_s4 = inlined_call_operand.vmem [shape: f32[1,3], index: 4, kind: input, shape index: {}]   ;;  %s5774_s5 = inlined_call_operand.vmem [shape: f32[2,4,8,8,3], index: 5, kind: output, shape index: {}]  }
   0x1 LB: > { %s3579_s19 = sadd.s32 4294967295, %s4094_s18   ;;  %p3583_p0 = scmp.ge.s32.totalorder %s4094_s18, 1  ;;  %s4094_s18 = sphi %s4128_s18, %s15_s18  }
   0x2   : > { %p187_p1 = scmp.lt.s32.totalorder %s4094_s18, 3 }
   0x4   : > { %p188_p2 = pnand %p3583_p0, %p187_p1 }
   0x6   : > { %191 = sbr.rel (%p188_p2) target bundleno = 1002 (0x3ea), region = 40 }
   0xb   : > { %v3662_v0 = vld [vmem:[%s5770_s1 + $0x70] sm:$0xf]  ;;  %v3883_v1 = vld [vmem:[%s5770_s1 + $0x74] sm:$0xf0]  ;;  %v3654_v2 = vld [vmem:[%s5770_s1 + $0x60] sm:$0xf] }
   0xc   : > { %v3663_v3 = vor.u32 %v3883_v1, %v3662_v0  ;;  %v3881_v4 = vld [vmem:[%s5770_s1 + $0x64] sm:$0xf0]  ;;  %v3646_v6 = vld [vmem:[%s5770_s1 + $0x50] sm:$0xf]  ;;  %v3879_v7 = vld [vmem:[%s5770_s1 + $0x54] sm:$0xf0] }
   0xd   : > { %v3655_v5 = vor.u32 %v3881_v4, %v3654_v2  ;;  %v3954_v8 = vld [vmem:[%s5771_s2] ss:$0 sm:$0xff]  ;;  %v3647_v9 = vor.u32 %v3879_v7, %v3646_v6  ;;  %v3877_v11 = vld [vmem:[%s5770_s1 + $0x44] sm:$0xf0]  ;;  %s4096_s13 = smov 64   ;;  %p215_p3 = scmp.lt.s32.totalorder %s3579_s19, 1 }
   0xe   : > { %436 = vmatpush.bf16.msra.mxu0 %v3663_v3  ;;  %3920 = vmatpush.bf16.msra.mxu1 %v3663_v3  ;;  %v3638_v10 = vld [vmem:[%s5770_s1 + $0x40] sm:$0xf]  ;;  %v3630_v13 = vld [vmem:[%s5770_s1 + $0x30] sm:$0xf]  ;;  %v3875_v14 = vld [vmem:[%s5770_s1 + $0x34] sm:$0xf0] }
   0xf   : > { %618 = vrot.lane.b32.xlu0 %v3954_v8, %s4096_s13  ;;  %v3639_v12 = vor.u32 %v3877_v11, %v3638_v10  ;;  %v3955_v15 = vld [vmem:[%s5771_s2] ss:$0 sm:$0xff]  ;;  %v3631_v16 = vor.u32 %v3875_v14, %v3630_v13  ;;  %v3873_v18 = vld [vmem:[%s5770_s1 + $0x24] sm:$0xf0]  ;;  %v3614_v20 = vld [vmem:[%s5770_s1 + $0x10] sm:$0xf] }
  0x10   : > { %v3622_v17 = vld [vmem:[%s5770_s1 + $0x20] sm:$0xf]  ;;  %v3871_v21 = vld [vmem:[%s5770_s1 + $0x14] sm:$0xf0]  ;;  %s5896_s19 = smov (!%p215_p3, %s3579_s19), 1  ;;  %vm226_vm0 = vcmask 523264  }
  0x11   : > { %v3623_v19 = vor.u32 %v3873_v18, %v3622_v17  ;;  %v3615_v22 = vor.u32 %v3871_v21, %v3614_v20  ;;  %v3606_v23 = vld [vmem:[%s5770_s1] sm:$0xf]  ;;  %v3869_v24 = vld [vmem:[%s5770_s1 + $0x4] sm:$0xf0]  ;;  %s3862_s9 = sshll.u32 %s5896_s19, 5  ;;  %vm228_vm1 = vcmask 517120  }
  0x12   : > { %437 = vmatpush.bf16.msra.mxu0 %v3655_v5  ;;  %3921 = vmatpush.bf16.msra.mxu1 %v3655_v5  ;;  %v3882_v25 = vld [vmem:[%s5770_s1 + $0x74] sm:$0xf]  ;;  %v3664_v26 = vld [vmem:[%s5770_s1 + $0x78] sm:$0xf0]  ;;  %v3607_v27 = vor.u32 %v3869_v24, %v3606_v23  ;;  %s219_s17 = scalar_lea.vmem %s5769_s0, %s3862_s9  ;;  %v3880_v29 = vld [vmem:[%s5770_s1 + $0x64] sm:$0xf] }
  0x13   : > { %v3667_v28 = vor.u32 %v3882_v25, %v3664_v26  ;;  %v3656_v30 = vld [vmem:[%s5770_s1 + $0x68] sm:$0xf0]  ;;  %v3864_v31 = vld [vmem:[%s219_s17] sm:$0xff]  ;;  %v3866_v32 = vld [vmem:[%s219_s17 + $0x10] sm:$0xff]  ;;  %v4097_v54 = vmov 0.0   ;;  %vm3491_vm5 = vcmask 23552  }
  0x14   : > { %v3659_v33 = vor.u32 %v3880_v29, %v3656_v30  ;;  %v3878_v34 = vld [vmem:[%s5770_s1 + $0x54] sm:$0xf]  ;;  %v3648_v35 = vld [vmem:[%s5770_s1 + $0x58] sm:$0xf0]  ;;  %v3876_v37 = vld [vmem:[%s5770_s1 + $0x44] sm:$0xf] }
  0x15   : > { %v3651_v36 = vor.u32 %v3878_v34, %v3648_v35  ;;  %v3640_v38 = vld [vmem:[%s5770_s1 + $0x48] sm:$0xf0]  ;;  %v3874_v40 = vld [vmem:[%s5770_s1 + $0x34] sm:$0xf]  ;;  %v3632_v41 = vld [vmem:[%s5770_s1 + $0x38] sm:$0xf0] }
  0x16   : > { %438 = vmatpush.bf16.msra.mxu0 %v3647_v9  ;;  %3922 = vmatpush.bf16.msra.mxu1 %v3647_v9  ;;  %v3643_v39 = vor.u32 %v3876_v37, %v3640_v38  ;;  %v3635_v42 = vor.u32 %v3874_v40, %v3632_v41  ;;  %v3872_v43 = vld [vmem:[%s5770_s1 + $0x24] sm:$0xf]  ;;  %v3624_v44 = vld [vmem:[%s5770_s1 + $0x28] sm:$0xf0]  ;;  %v3867_v46 = vld [vmem:[%s219_s17 + $0x18] sm:$0xff]  ;;  %230 = vst.msk [vmem:[#allocation2 + $0x10] sm:$0xff] %vm226_vm0, %v4097_v54 }
  0x17   : > { %526 = vrot.lane.b32.xlu0 %v3955_v15, %s4096_s13  ;;  %v3865_v45 = vld [vmem:[%s219_s17 + $0x8] sm:$0xff]  ;;  %v3627_v47 = vor.u32 %v3872_v43, %v3624_v44  ;;  %v3870_v48 = vld [vmem:[%s5770_s1 + $0x14] sm:$0xf]  ;;  %v3616_v49 = vld [vmem:[%s5770_s1 + $0x18] sm:$0xf0]  ;;  %232 = vst.msk [vmem:[#allocation2 + $0x20] sm:$0xff] %vm226_vm0, %v4097_v54 }
  0x18   : > { %v3619_v50 = vor.u32 %v3870_v48, %v3616_v49  ;;  %v3868_v51 = vld [vmem:[%s5770_s1 + $0x4] sm:$0xf]  ;;  %v3608_v52 = vld [vmem:[%s5770_s1 + $0x8] sm:$0xf0]  ;;  %231 = vst.msk [vmem:[#allocation2 + $0x18] sm:$0x3] %vm228_vm1, %v4097_v54 }
  0x19   : > { %v3611_v53 = vor.u32 %v3868_v51, %v3608_v52  ;;  %233 = vst.msk [vmem:[#allocation2 + $0x28] sm:$0x3] %vm228_vm1, %v4097_v54  ;;  %v3956_v57 = vld [vmem:[%s5771_s2] ss:$0 sm:$0xff] }
  0x1a   : > { %439 = vmatpush.bf16.msra.mxu0 %v3639_v12  ;;  %3923 = vmatpush.bf16.msra.mxu1 %v3639_v12  ;;  %234 = vst.msk [vmem:[#allocation2 + $0x30] sm:$0xff] %vm226_vm0, %v4097_v54  ;;  %v4425_v26 = vld [vmem:[%s5771_s2] ss:$0 sm:$0xff] }
  0x1b   : > { %235 = vst.msk [vmem:[#allocation2 + $0x38] sm:$0x3] %vm228_vm1, %v4097_v54 }
  0x1c   : > { %236 = vst.msk [vmem:[#allocation2 + $0x40] sm:$0xff] %vm226_vm0, %v4097_v54 }
  0x1d   : > { %237 = vst.msk [vmem:[#allocation2 + $0x48] sm:$0x3] %vm228_vm1, %v4097_v54 }
  0x1e   : > { %440 = vmatpush.bf16.msra.mxu0 %v3631_v16  ;;  %3924 = vmatpush.bf16.msra.mxu1 %v3631_v16  ;;  %238 = vst.msk [vmem:[#allocation2 + $0x50] sm:$0xff] %vm226_vm0, %v4097_v54 }
  0x1f   : > { %239 = vst.msk [vmem:[#allocation2 + $0x58] sm:$0x3] %vm228_vm1, %v4097_v54 }
  0x20   : > { %240 = vst.msk [vmem:[#allocation2 + $0x60] sm:$0xff] %vm226_vm0, %v4097_v54 }
  0x21   : > { %241 = vst.msk [vmem:[#allocation2 + $0x68] sm:$0x3] %vm228_vm1, %v4097_v54 }
  0x22   : > { %441 = vmatpush.bf16.msra.mxu0 %v3623_v19  ;;  %3925 = vmatpush.bf16.msra.mxu1 %v3623_v19  ;;  %242 = vst.msk [vmem:[#allocation2 + $0x70] sm:$0xff] %vm226_vm0, %v4097_v54 }
  0x23   : > { %243 = vst.msk [vmem:[#allocation2 + $0x78] sm:$0x3] %vm228_vm1, %v4097_v54 }
  0x24   : > { %244 = vst.msk [vmem:[#allocation2 + $0x80] sm:$0xff] %vm226_vm0, %v4097_v54 }
  0x25   : > { %245 = vst.msk [vmem:[#allocation2 + $0x88] sm:$0x3] %vm228_vm1, %v4097_v54 }
  0x26   : > { %442 = vmatpush.bf16.msra.mxu0 %v3615_v22  ;;  %3926 = vmatpush.bf16.msra.mxu1 %v3615_v22  ;;  %246 = vst.msk [vmem:[#allocation2 + $0x90] sm:$0xff] %vm226_vm0, %v4097_v54 }
  0x27   : > { %247 = vst.msk [vmem:[#allocation2 + $0x98] sm:$0x3] %vm228_vm1, %v4097_v54 }
  0x28   : > { %250 = vst.msk [vmem:[#allocation2 + $0xb0] sm:$0xff] %vm226_vm0, %v4097_v54 }
  0x29   : > { %251 = vst.msk [vmem:[#allocation2 + $0xb8] sm:$0x3] %vm228_vm1, %v4097_v54 }
  0x2a   : > { %443 = vmatpush.bf16.msra.mxu0 %v3607_v27  ;;  %3927 = vmatpush.bf16.msra.mxu1 %v3607_v27  ;;  %252 = vst.msk [vmem:[#allocation2 + $0xc0] sm:$0xff] %vm226_vm0, %v4097_v54 }
  0x2b   : > { %253 = vst.msk [vmem:[#allocation2 + $0xc8] sm:$0x3] %vm228_vm1, %v4097_v54 }
  0x2c   : > { %254 = vst.msk [vmem:[#allocation2 + $0xd0] sm:$0xff] %vm226_vm0, %v4097_v54 }
  0x2d   : > { %444 = vmatmul.bf16.vlgmr.msra.gmra.mxu0 %v3864_v31  ;;  %454 = vmatmul.bf16.vlgmr.msra.gmra.mxu1 %v3866_v32  ;;  %255 = vst.msk [vmem:[#allocation2 + $0xd8] sm:$0x3] %vm228_vm1, %v4097_v54 }
  0x2e   : > { %465 = vmatpush.bf16.msrb.mxu1 %v3667_v28  ;;  %256 = vst.msk [vmem:[#allocation2 + $0xe0] sm:$0xff] %vm226_vm0, %v4097_v54 }
  0x2f   : > { %257 = vst.msk [vmem:[#allocation2 + $0xe8] sm:$0x3] %vm228_vm1, %v4097_v54 }
  0x30   : > { %258 = vst.msk [vmem:[#allocation2 + $0xf0] sm:$0xff] %vm226_vm0, %v4097_v54 }
  0x31   : > { %259 = vst.msk [vmem:[#allocation2 + $0xf8] sm:$0x3] %vm228_vm1, %v4097_v54 }
  0x32   : > { %466 = vmatpush.bf16.msrb.mxu1 %v3659_v33  ;;  %260 = vst.msk [vmem:[#allocation2 + $0x100] sm:$0xff] %vm226_vm0, %v4097_v54 }
  0x33   : > { %261 = vst.msk [vmem:[#allocation2 + $0x108] sm:$0x3] %vm228_vm1, %v4097_v54 }
  0x34   : > { %262 = vst.msk [vmem:[#allocation2 + $0x110] sm:$0xff] %vm226_vm0, %v4097_v54 }
  0x35   : > { %263 = vst.msk [vmem:[#allocation2 + $0x118] sm:$0x3] %vm228_vm1, %v4097_v54 }
  0x36   : > { %467 = vmatpush.bf16.msrb.mxu1 %v3651_v36  ;;  %264 = vst.msk [vmem:[#allocation2 + $0x120] sm:$0xff] %vm226_vm0, %v4097_v54 }
  0x37   : > { %265 = vst.msk [vmem:[#allocation2 + $0x128] sm:$0x3] %vm228_vm1, %v4097_v54 }
  0x38   : > { %266 = vst.msk [vmem:[#allocation2 + $0x130] sm:$0xff] %vm226_vm0, %v4097_v54 }
  0x39   : > { %267 = vst.msk [vmem:[#allocation2 + $0x138] sm:$0x3] %vm228_vm1, %v4097_v54 }
  0x3a   : > { %468 = vmatpush.bf16.msrb.mxu1 %v3643_v39  ;;  %268 = vst.msk [vmem:[#allocation2 + $0x140] sm:$0xff] %vm226_vm0, %v4097_v54 }
  0x3b   : > { %269 = vst.msk [vmem:[#allocation2 + $0x148] sm:$0x3] %vm228_vm1, %v4097_v54 }
  0x3c   : > { %270 = vst.msk [vmem:[#allocation2 + $0x150] sm:$0xff] %vm226_vm0, %v4097_v54 }
  0x3d   : > { %449 = vmatmul.bf16.gmra.mxu0 %v3865_v45  ;;  %459 = vmatmul.bf16.gmra.mxu1 %v3867_v46  ;;  %271 = vst.msk [vmem:[#allocation2 + $0x158] sm:$0x3] %vm228_vm1, %v4097_v54 }
  0x3e   : > { %469 = vmatpush.bf16.msrb.mxu1 %v3635_v42  ;;  %272 = vst.msk [vmem:[#allocation2 + $0x160] sm:$0xff] %vm226_vm0, %v4097_v54 }
  0x3f   : > { %273 = vst.msk [vmem:[#allocation2 + $0x168] sm:$0x3] %vm228_vm1, %v4097_v54 }
  0x40   : > { %274 = vst.msk [vmem:[#allocation2 + $0x170] sm:$0xff] %vm226_vm0, %v4097_v54 }
  0x41   : > { %275 = vst.msk [vmem:[#allocation2 + $0x178] sm:$0x3] %vm228_vm1, %v4097_v54 }
  0x42   : > { %470 = vmatpush.bf16.msrb.mxu1 %v3627_v47  ;;  %276 = vst.msk [vmem:[#allocation2 + $0x180] sm:$0xff] %vm226_vm0, %v4097_v54 }
  0x43   : > { %277 = vst.msk [vmem:[#allocation2 + $0x188] sm:$0x3] %vm228_vm1, %v4097_v54 }
  0x44   : > { %278 = vst.msk [vmem:[#allocation2 + $0x190] sm:$0xff] %vm226_vm0, %v4097_v54 }
  0x45   : > { %279 = vst.msk [vmem:[#allocation2 + $0x198] sm:$0x3] %vm228_vm1, %v4097_v54 }
  0x46   : > { %471 = vmatpush.bf16.msrb.mxu1 %v3619_v50  ;;  %280 = vst.msk [vmem:[#allocation2 + $0x1a0] sm:$0xff] %vm226_vm0, %v4097_v54 }
  0x47   : > { %281 = vst.msk [vmem:[#allocation2 + $0x1a8] sm:$0x3] %vm228_vm1, %v4097_v54 }
  0x48   : > { %282 = vst.msk [vmem:[#allocation2 + $0x1b0] sm:$0xff] %vm226_vm0, %v4097_v54 }
  0x49   : > { %283 = vst.msk [vmem:[#allocation2 + $0x1b8] sm:$0x3] %vm228_vm1, %v4097_v54 }
  0x4a   : > { %472 = vmatpush.bf16.msrb.mxu1 %v3611_v53  ;;  %284 = vst.msk [vmem:[#allocation2 + $0x1c0] sm:$0xff] %vm226_vm0, %v4097_v54 }
  0x4b   : > { %285 = vst.msk [vmem:[#allocation2 + $0x1c8] sm:$0x3] %vm228_vm1, %v4097_v54 }
  0x4c   : > { %288 = vst.msk [vmem:[#allocation2 + $0x1e0] sm:$0xff] %vm226_vm0, %v4097_v54 }
  0x4d   : > { %473 = vmatmul.bf16.vlgmr.msrb.gmra.mxu1 %v3864_v31  ;;  %289 = vst.msk [vmem:[#allocation2 + $0x1e8] sm:$0x3] %vm228_vm1, %v4097_v54 }
  0x4e   : > { %290 = vst.msk [vmem:[#allocation2 + $0x1f0] sm:$0xff] %vm226_vm0, %v4097_v54 }
  0x4f   : > { %291 = vst.msk [vmem:[#allocation2 + $0x1f8] sm:$0x3] %vm228_vm1, %v4097_v54 }
  0x50   : > { %292 = vst.msk [vmem:[#allocation2 + $0x200] sm:$0xff] %vm226_vm0, %v4097_v54 }
  0x51   : > { %293 = vst.msk [vmem:[#allocation2 + $0x208] sm:$0x3] %vm228_vm1, %v4097_v54 }
  0x52   : > { %294 = vst.msk [vmem:[#allocation2 + $0x210] sm:$0xff] %vm226_vm0, %v4097_v54 }
  0x53   : > { %295 = vst.msk [vmem:[#allocation2 + $0x218] sm:$0x3] %vm228_vm1, %v4097_v54 }
  0x54   : > { %296 = vst.msk [vmem:[#allocation2 + $0x220] sm:$0xff] %vm226_vm0, %v4097_v54 }
  0x55   : > { %297 = vst.msk [vmem:[#allocation2 + $0x228] sm:$0x3] %vm228_vm1, %v4097_v54 }
  0x56   : > { %298 = vst.msk [vmem:[#allocation2 + $0x230] sm:$0xff] %vm226_vm0, %v4097_v54 }
  0x57   : > { %299 = vst.msk [vmem:[#allocation2 + $0x238] sm:$0x3] %vm228_vm1, %v4097_v54 }
  0x58   : > { %300 = vst.msk [vmem:[#allocation2 + $0x240] sm:$0xff] %vm226_vm0, %v4097_v54 }
  0x59   : > { %301 = vst.msk [vmem:[#allocation2 + $0x248] sm:$0x3] %vm228_vm1, %v4097_v54 }
  0x5a   : > { %302 = vst.msk [vmem:[#allocation2 + $0x250] sm:$0xff] %vm226_vm0, %v4097_v54 }
  0x5b   : > { %303 = vst.msk [vmem:[#allocation2 + $0x258] sm:$0x3] %vm228_vm1, %v4097_v54 }
  0x5c   : > { %304 = vst.msk [vmem:[#allocation2 + $0x260] sm:$0xff] %vm226_vm0, %v4097_v54 }
  0x5d   : > { %478 = vmatmul.bf16.gmra.mxu1 %v3865_v45  ;;  %305 = vst.msk [vmem:[#allocation2 + $0x268] sm:$0x3] %vm228_vm1, %v4097_v54 }
  0x6d   : > { %483 = vmatmul.bf16.gmra.mxu1 %v3866_v32 }
  0x7d   : > { %488 = vmatmul.bf16.gmra.mxu1 %v3867_v46 }
  0x81   : > { %v4330_v55 = vpop.permute.xlu0 %618 }
  0x89   : > { %v4352_v56 = vpop.permute.xlu0 %526 }
  0xaa   : > { %v445_v58 = vpop.f32.mrf.mxu0  ;;  %v455_v59 = vpop.f32.mrf.mxu1 }
  0xab   : > { %v498_v60 = vadd.f32 %v3956_v57, %v445_v58  ;;  %v529_v61 = vadd.f32 %v4352_v56, %v445_v58  ;;  %v502_v4 = vadd.f32 %v3956_v57, %v455_v59  ;;  %v533_v6 = vadd.f32 %v4352_v56, %v455_v59 }
  0xad   : > { %v506_v62 = vmax.f32 %v498_v60, 0.0  ;;  %v537_v63 = vmax.f32 %v529_v61, 0.0  ;;  %v510_v10 = vmax.f32 %v502_v4, 0.0  ;;  %v541_v14 = vmax.f32 %v533_v6, 0.0 }
  0xaf   : > { %515 = vst.msk [vmem:[#allocation2 + $0x11] sm:$0xff] %vm226_vm0, %v506_v62  ;;  %553 = vrot.lane.b32.xlu2 %v537_v63, %s4096_s13 }
  0xb0   : > { %519 = vst.msk [vmem:[#allocation2 + $0x51] sm:$0xff] %vm226_vm0, %v510_v10 }
  0xb2   : > { %v447_v0 = vpop.f32.mrf.mxu0  ;;  %v457_v1 = vpop.f32.mrf.mxu1 }
  0xb3   : > { %v530_v2 = vadd.f32 %v4352_v56, %v447_v0  ;;  %v499_v5 = vadd.f32 %v3956_v57, %v447_v0  ;;  %v503_v7 = vadd.f32 %v3956_v57, %v457_v1  ;;  %v534_v37 = vadd.f32 %v4352_v56, %v457_v1 }
  0xb5   : > { %v538_v3 = vmax.f32 %v530_v2, 0.0  ;;  %v507_v13 = vmax.f32 %v499_v5, 0.0  ;;  %v511_v15 = vmax.f32 %v503_v7, 0.0  ;;  %v542_v43 = vmax.f32 %v534_v37, 0.0  ;;  %v712_v7 = vld [vmem:[#allocation2 + $0x1e1] sm:$0xff]  ;;  %v3890_v37 = vld [vmem:[%s5772_s3 + $0x30] sm:$0xff] }
  0xb7   : > { %555 = vrot.lane.b32.xlu0 %v538_v3, %s4096_s13  ;;  %516 = vst.msk [vmem:[#allocation2 + $0x21] sm:$0xff] %vm226_vm0, %v507_v13  ;;  %v748_v46 = vld [vmem:[#allocation2 + $0x51] sm:$0xff] }
  0xb8   : > { %520 = vst.msk [vmem:[#allocation2 + $0x61] sm:$0xff] %vm226_vm0, %v511_v15  ;;  %v4445_v52 = vpack.c.bf16 %v748_v46, %v748_v46 }
  0xba   : > { %v450_v8 = vpop.f32.mrf.mxu0  ;;  %v4399_v9 = vpop.f32.mrf.mxu1  ;;  %v1260_v53 = vunpack.c.l.b16 %v4445_v52 }
  0xbb   : > { %v500_v11 = vadd.f32 %v3956_v57, %v450_v8  ;;  %v504_v12 = vadd.f32 %v3956_v57, %v4399_v9  ;;  %v531_v44 = vadd.f32 %v4352_v56, %v450_v8  ;;  %v535_v8 = vadd.f32 %v4352_v56, %v4399_v9 }
  0xbc   : > { %v1268_v62 = vpack.c.b16 %v1260_v53, %v1260_v53  ;;  %v3885_v53 = vld [vmem:[%s5772_s3 + $0x8] sm:$0xff] }
  0xbd   : > { %v508_v16 = vmax.f32 %v500_v11, 0.0  ;;  %v512_v17 = vmax.f32 %v504_v12, 0.0  ;;  %v539_v47 = vmax.f32 %v531_v44, 0.0 }
  0xbf   : > { %561 = vrot.lane.b32.xlu0 %v541_v14, %s4096_s13  ;;  %517 = vst.msk [vmem:[#allocation2 + $0x31] sm:$0xff] %vm226_vm0, %v508_v16  ;;  %v4470_v14 = vpack.c.bf16 %v712_v7, %v712_v7  ;;  %v543_v16 = vmax.f32 %v535_v8, 0.0 }
  0xc0   : > { %521 = vst.msk [vmem:[#allocation2 + $0x71] sm:$0xff] %vm226_vm0, %v512_v17 }
  0xc2   : > { %v452_v18 = vpop.f32.mrf.mxu0  ;;  %v4415_v19 = vpop.f32.mrf.mxu1 }
  0xc3   : > { %v501_v20 = vadd.f32 %v3956_v57, %v452_v18  ;;  %v532_v21 = vadd.f32 %v4352_v56, %v452_v18  ;;  %v505_v22 = vadd.f32 %v3956_v57, %v4415_v19  ;;  %v749_v57 = vld [vmem:[#allocation2 + $0x61] sm:$0xff]  ;;  %v536_v10 = vadd.f32 %v4352_v56, %v4415_v19 }
  0xc4   : > { %v4453_v63 = vpack.c.bf16 %v749_v57, %v749_v57  ;;  %v1216_v56 = vunpack.c.l.b16 %v4470_v14 }
  0xc5   : > { %v509_v23 = vmax.f32 %v501_v20, 0.0  ;;  %v513_v24 = vmax.f32 %v505_v22, 0.0  ;;  %v540_v25 = vmax.f32 %v532_v21, 0.0  ;;  %v544_v20 = vmax.f32 %v536_v10, 0.0 }
  0xc6   : > { %v1261_v0 = vunpack.c.l.b16 %v4453_v63 }
  0xc7   : > { %518 = vst.msk [vmem:[#allocation2 + $0x41] sm:$0xff] %vm226_vm0, %v509_v23  ;;  %559 = vrot.lane.b32.xlu0 %v540_v25, %s4096_s13  ;;  %v750_v15 = vld [vmem:[#allocation2 + $0x71] sm:$0xff] }
  0xc8   : > { %522 = vst.msk [vmem:[#allocation2 + $0x81] sm:$0xff] %vm226_vm0, %v513_v24  ;;  %v1269_v5 = vpack.c.b16 %v1261_v0, %v1261_v0  ;;  %v4472_v21 = vpack.c.bf16 %v750_v15, %v750_v15  ;;  %v1224_v24 = vpack.c.b16 %v1216_v56, %v1216_v56 }
  0xca   : > { %v474_v27 = vpop.f32.mrf.mxu1  ;;  %v1262_v19 = vunpack.c.l.b16 %v4472_v21 }
  0xcb   : > { %v590_v28 = vadd.f32 %v4425_v26, %v474_v27  ;;  %v621_v29 = vadd.f32 %v4330_v55, %v474_v27 }
  0xcd   : > { %v598_v30 = vmax.f32 %v590_v28, 0.0  ;;  %v629_v31 = vmax.f32 %v621_v29, 0.0  ;;  %v1270_v28 = vpack.c.b16 %v1262_v19, %v1262_v19 }
  0xcf   : > { %607 = vst.msk [vmem:[#allocation2 + $0x151] sm:$0xff] %vm226_vm0, %v598_v30  ;;  %645 = vrot.lane.b32.xlu1 %v629_v31, %s4096_s13  ;;  %v751_v22 = vld [vmem:[#allocation2 + $0x81] sm:$0xff] }
  0xd0   : > { %v4484_v27 = vpack.c.bf16 %v751_v22, %v751_v22 }
  0xd2   : > { %v476_v32 = vpop.f32.mrf.mxu1  ;;  %v1263_v30 = vunpack.c.l.b16 %v4484_v27 }
  0xd3   : > { %v591_v33 = vadd.f32 %v4425_v26, %v476_v32  ;;  %v622_v34 = vadd.f32 %v4330_v55, %v476_v32 }
  0xd4   : > { %v1271_v31 = vpack.c.b16 %v1263_v30, %v1263_v30 }
  0xd5   : > { %v599_v35 = vmax.f32 %v591_v33, 0.0  ;;  %v630_v36 = vmax.f32 %v622_v34, 0.0 }
  0xd7   : > { %608 = vst.msk [vmem:[#allocation2 + $0x161] sm:$0xff] %vm226_vm0, %v599_v35  ;;  %647 = vrot.lane.b32.xlu1 %v630_v36, %s4096_s13  ;;  %v3891_v35 = vld [vmem:[%s5772_s3 + $0x38] sm:$0xff] }
  0xd8   : > { %3929 = vmatpush.bf16.msra.mxu3 %v3891_v35  ;;  %3928 = vmatpush.bf16.msra.mxu2 %v3891_v35 }
  0xd9   : > { %2438 = vmatpush.bf16.msrb.mxu0 %v3891_v35 }
  0xda   : > { %v479_v38 = vpop.f32.mrf.mxu1 }
  0xdb   : > { %v592_v39 = vadd.f32 %v4425_v26, %v479_v38  ;;  %v623_v40 = vadd.f32 %v4330_v55, %v479_v38  ;;  %v3889_v38 = vld [vmem:[%s5772_s3 + $0x28] sm:$0xff] }
  0xdc   : > { %3931 = vmatpush.bf16.msra.mxu3 %v3890_v37  ;;  %3930 = vmatpush.bf16.msra.mxu2 %v3890_v37 }
  0xdd   : > { %v600_v41 = vmax.f32 %v592_v39, 0.0  ;;  %v631_v42 = vmax.f32 %v623_v40, 0.0  ;;  %2439 = vmatpush.bf16.msrb.mxu0 %v3890_v37 }
  0xdf   : > { %609 = vst.msk [vmem:[#allocation2 + $0x171] sm:$0xff] %vm226_vm0, %v600_v41  ;;  %563 = vrot.lane.b32.xlu1 %v542_v43, %s4096_s13  ;;  %649 = vrot.lane.b32.xlu2 %v631_v42, %s4096_s13  ;;  %v3888_v42 = vld [vmem:[%s5772_s3 + $0x20] sm:$0xff]  ;;  %v3887_v43 = vld [vmem:[%s5772_s3 + $0x18] sm:$0xff] }
  0xe0   : > { %3933 = vmatpush.bf16.msra.mxu3 %v3889_v38  ;;  %3932 = vmatpush.bf16.msra.mxu2 %v3889_v38 }
  0xe1   : > { %2440 = vmatpush.bf16.msrb.mxu0 %v3889_v38 }
  0xe2   : > { %v481_v45 = vpop.f32.mrf.mxu1 }
  0xe3   : > { %v593_v48 = vadd.f32 %v4425_v26, %v481_v45  ;;  %v624_v49 = vadd.f32 %v4330_v55, %v481_v45 }
  0xe4   : > { %3935 = vmatpush.bf16.msra.mxu3 %v3888_v42  ;;  %3934 = vmatpush.bf16.msra.mxu2 %v3888_v42 }
  0xe5   : > { %v601_v50 = vmax.f32 %v593_v48, 0.0  ;;  %v632_v51 = vmax.f32 %v624_v49, 0.0  ;;  %2441 = vmatpush.bf16.msrb.mxu0 %v3888_v42  ;;  %v3886_v48 = vld [vmem:[%s5772_s3 + $0x10] sm:$0xff] }
  0xe7   : > { %610 = vst.msk [vmem:[#allocation2 + $0x181] sm:$0xff] %vm226_vm0, %v601_v50  ;;  %651 = vrot.lane.b32.xlu1 %v632_v51, %s4096_s13  ;;  %557 = vrot.lane.b32.xlu2 %v539_v47, %s4096_s13 }
  0xe8   : > { %3937 = vmatpush.bf16.msra.mxu3 %v3887_v43  ;;  %3936 = vmatpush.bf16.msra.mxu2 %v3887_v43 }
  0xe9   : > { %2442 = vmatpush.bf16.msrb.mxu0 %v3887_v43 }
  0xea   : > { %v484_v54 = vpop.f32.mrf.mxu1 }
  0xeb   : > { %v594_v58 = vadd.f32 %v4425_v26, %v484_v54  ;;  %v625_v59 = vadd.f32 %v4330_v55, %v484_v54 }
  0xec   : > { %3939 = vmatpush.bf16.msra.mxu3 %v3886_v48  ;;  %3938 = vmatpush.bf16.msra.mxu2 %v3886_v48 }
  0xed   : > { %v602_v60 = vmax.f32 %v594_v58, 0.0  ;;  %v633_v61 = vmax.f32 %v625_v59, 0.0  ;;  %2443 = vmatpush.bf16.msrb.mxu0 %v3886_v48 }
  0xef   : > { %611 = vst.msk [vmem:[#allocation2 + $0x191] sm:$0xff] %vm226_vm0, %v602_v60  ;;  %1280 = vrot.lane.b32.xlu1 %v1268_v62, %s4096_s13  ;;  %653 = vrot.lane.b32.xlu2 %v633_v61, %s4096_s13  ;;  %v3884_v62 = vld [vmem:[%s5772_s3] sm:$0xff] }
  0xf0   : > { %3941 = vmatpush.bf16.msra.mxu3 %v3885_v53  ;;  %3940 = vmatpush.bf16.msra.mxu2 %v3885_v53 }
  0xf1   : > { %2444 = vmatpush.bf16.msrb.mxu0 %v3885_v53 }
  0xf2   : > { %v486_v1 = vpop.f32.mrf.mxu1 }
  0xf3   : > { %v595_v2 = vadd.f32 %v4425_v26, %v486_v1  ;;  %v626_v3 = vadd.f32 %v4330_v55, %v486_v1 }
  0xf4   : > { %3943 = vmatpush.bf16.msra.mxu3 %v3884_v62  ;;  %3942 = vmatpush.bf16.msra.mxu2 %v3884_v62 }
  0xf5   : > { %v603_v4 = vmax.f32 %v595_v2, 0.0  ;;  %v634_v6 = vmax.f32 %v626_v3, 0.0  ;;  %2445 = vmatpush.bf16.msrb.mxu0 %v3884_v62 }
  0xf6   : > { %v1165_v30 = vld [vmem:[#allocation2 + $0x192] sm:$0xff] }
  0xf7   : > { %612 = vst.msk [vmem:[#allocation2 + $0x1a1] sm:$0xff] %vm226_vm0, %v603_v4  ;;  %1282 = vrot.lane.b32.xlu2 %v1269_v5, %s4096_s13  ;;  %655 = vrot.lane.b32.xlu0 %v634_v6, %s4096_s13  ;;  %v1173_v37 = vpack.c.bf16 %v1165_v30, %v1165_v30 }
  0xfa   : > { %v489_v11 = vpop.f32.mrf.mxu1 }
  0xfb   : > { %v596_v12 = vadd.f32 %v4425_v26, %v489_v11  ;;  %v627_v13 = vadd.f32 %v4330_v55, %v489_v11 }
  0xfd   : > { %v604_v17 = vmax.f32 %v596_v12, 0.0  ;;  %v635_v18 = vmax.f32 %v627_v13, 0.0 }
  0xff   : > { %613 = vst.msk [vmem:[#allocation2 + $0x1b1] sm:$0xff] %vm226_vm0, %v604_v17  ;;  %657 = vrot.lane.b32.xlu1 %v635_v18, %s4096_s13  ;;  %565 = vrot.lane.b32.xlu2 %v543_v16, %s4096_s13 }
 0x100   : > { %567 = vrot.lane.b32.xlu0 %v544_v20, %s4096_s13 }
 0x102   : > { %v4479_v9 = vpop.f32.mrf.mxu1 }
 0x103   : > { %v597_v23 = vadd.f32 %v4425_v26, %v4479_v9 }
 0x105   : > { %v605_v25 = vmax.f32 %v597_v23, 0.0 }
 0x107   : > { %614 = vst.msk [vmem:[#allocation2 + $0x1c1] sm:$0xff] %vm226_vm0, %v605_v25  ;;  %1232 = vrot.lane.b32.xlu1 %v1224_v24, %s4096_s13 }
 0x108   : > { %1284 = vrot.lane.b32.xlu0 %v1270_v28, %s4096_s13 }
 0x109   : > { %v554_v29 = vpop.permute.xlu2 %553 }
 0x10a   : > { %578 = vst.msk [vmem:[#allocation2 + $0xb1] sm:$0xff] %vm226_vm0, %v554_v29  ;;  %v696_v29 = vld [vmem:[#allocation2 + $0x141] sm:$0xff] }
 0x10b   : > { %v4591_v35 = vpack.c.bf16 %v696_v29, %v696_v29 }
 0x10d   : > { %v832_v43 = vunpack.c.l.b16 %v4591_v35 }
 0x10f   : > { %1286 = vrot.lane.b32.xlu1 %v1271_v31, %s4096_s13  ;;  %v840_v62 = vpack.c.b16 %v832_v43, %v832_v43 }
 0x111   : > { %v760_v26 = vld [vmem:[#allocation2 + $0xb1] sm:$0xff] }
 0x112   : > { %v4492_v32 = vpack.c.bf16 %v760_v26, %v760_v26 }
 0x114   : > { %5807 = vst [vmem:[#allocation3_spill] sm:$0xff] %v4492_v32  ;;  %v912_v33 = vunpack.c.l.b16 %v4492_v32 }
 0x116   : > { %v920_v34 = vpack.c.b16 %v912_v33, %v912_v33 }
 0x118   : > { %928 = vrot.lane.b32.xlu1 %v920_v34, %s4096_s13  ;;  %v1164_v34 = vld [vmem:[#allocation2 + $0x182] sm:$0xff] }
 0x129   : > { %v556_v36 = vpop.permute.xlu0 %555 }
 0x12a   : > { %579 = vst.msk [vmem:[#allocation2 + $0xc1] sm:$0xff] %vm226_vm0, %v556_v36 }
 0x131   : > { %v562_v39 = vpop.permute.xlu0 %561  ;;  %v1562_v50 = vld [vmem:[#allocation2 + $0xc1] sm:$0xff] }
 0x132   : > { %582 = vst.msk [vmem:[#allocation2 + $0xf1] sm:$0xff] %vm226_vm0, %v562_v39  ;;  %v1570_v54 = vpack.c.bf16 %v1562_v50, %v1562_v50  ;;  %v761_v10 = vld [vmem:[#allocation2 + $0xc1] sm:$0xff]  ;;  %v1172_v39 = vpack.c.bf16 %v1164_v34, %v1164_v34 }
 0x133   : > { %v4564_v16 = vpack.c.bf16 %v761_v10, %v761_v10 }
 0x134   : > { %v4544_v2 = vunpack.c.l.b16 %v1570_v54 }
 0x135   : > { %5810 = vst [vmem:[#allocation6_spill] sm:$0xff] %v4564_v16  ;;  %v913_v23 = vunpack.c.l.b16 %v4564_v16 }
 0x137   : > { %v921_v33 = vpack.c.b16 %v913_v23, %v913_v23 }
 0x139   : > { %v650_v40 = vpop.permute.xlu2 %649  ;;  %v560_v41 = vpop.permute.xlu0 %559  ;;  %v732_v36 = vld [vmem:[#allocation2 + $0xf0] sm:$0xff] }
 0x13a   : > { %672 = vst.msk [vmem:[#allocation2 + $0x211] sm:$0xff] %vm226_vm0, %v650_v40  ;;  %v4597_v42 = vpack.c.bf16 %v732_v36, %v732_v36 }
 0x13b   : > { %581 = vst.msk [vmem:[#allocation2 + $0xe1] sm:$0xff] %vm226_vm0, %v560_v41 }
 0x141   : > { %v646_v44 = vpop.permute.xlu1 %645  ;;  %v558_v45 = vpop.permute.xlu2 %557  ;;  %v715_v46 = vld [vmem:[#allocation2 + $0x211] sm:$0xff] }
 0x142   : > { %670 = vst.msk [vmem:[#allocation2 + $0x1f1] sm:$0xff] %vm226_vm0, %v646_v44  ;;  %v4516_v47 = vpack.c.bf16 %v715_v46, %v715_v46 }
 0x143   : > { %580 = vst.msk [vmem:[#allocation2 + $0xd1] sm:$0xff] %vm226_vm0, %v558_v45 }
 0x144   : > { %v4523_v49 = vunpack.c.l.b16 %v4516_v47 }
 0x146   : > { %5808 = vst [vmem:[#allocation4_spill] sm:$0xff] %v4523_v49  ;;  %v4527_v51 = vpack.c.b16 %v4523_v49, %v4523_v49 }
 0x148   : > { %1238 = vrot.lane.b32.xlu0 %v4527_v51, %s4096_s13 }
 0x149   : > { %v648_v57 = vpop.permute.xlu1 %647  ;;  %v654_v58 = vpop.permute.xlu2 %653  ;;  %v713_v59 = vld [vmem:[#allocation2 + $0x1f1] sm:$0xff] }
 0x14a   : > { %671 = vst.msk [vmem:[#allocation2 + $0x201] sm:$0xff] %vm226_vm0, %v648_v57  ;;  %v4535_v60 = vpack.c.bf16 %v713_v59, %v713_v59  ;;  %v1563_v61 = vld [vmem:[#allocation2 + $0xd1] sm:$0xff] }
 0x14b   : > { %674 = vst.msk [vmem:[#allocation2 + $0x231] sm:$0xff] %vm226_vm0, %v654_v58  ;;  %v1571_v0 = vpack.c.bf16 %v1563_v61, %v1563_v61  ;;  %v762_v17 = vld [vmem:[#allocation2 + $0xd1] sm:$0xff]  ;;  %v763_v61 = vld [vmem:[#allocation2 + $0xe1] sm:$0xff] }
 0x14c   : > { %v4542_v1 = vunpack.c.l.b16 %v4535_v60  ;;  %v4579_v22 = vpack.c.bf16 %v762_v17, %v762_v17  ;;  %v697_v59 = vld [vmem:[#allocation2 + $0x151] sm:$0xff] }
 0x14d   : > { %v4546_v3 = vunpack.c.l.b16 %v1571_v0  ;;  %v4615_v10 = vpack.c.bf16 %v697_v59, %v697_v59 }
 0x14e   : > { %v4550_v4 = vpack.c.b16 %v4542_v1, %v4542_v1  ;;  %5812 = vst [vmem:[#allocation8_spill] sm:$0xff] %v4579_v22  ;;  %v914_v31 = vunpack.c.l.b16 %v4579_v22 }
 0x14f   : > { %5809 = vst [vmem:[#allocation5_spill] sm:$0xff] %v4546_v3 }
 0x150   : > { %1234 = vrot.lane.b32.xlu2 %v4550_v4, %s4096_s13  ;;  %v922_v38 = vpack.c.b16 %v914_v31, %v914_v31 }
 0x151   : > { %v564_v6 = vpop.permute.xlu1 %563  ;;  %v1283_v7 = vpop.permute.xlu2 %1282  ;;  %v714_v8 = vld [vmem:[#allocation2 + $0x201] sm:$0xff] }
 0x152   : > { %583 = vst.msk [vmem:[#allocation2 + $0x101] sm:$0xff] %vm226_vm0, %v564_v6  ;;  %v4557_v11 = vpack.c.bf16 %v714_v8, %v714_v8  ;;  %v717_v12 = vld [vmem:[#allocation2 + $0x231] sm:$0xff]  ;;  %v1393_v40 = vsel %vm226_vm0, %v1173_v37, %v1283_v7 }
 0x153   : > { %v4559_v13 = vpack.c.bf16 %v717_v12, %v717_v12  ;;  %v1514_v53 = vunpack.c.l.b16 %v1393_v40  ;;  %v4617_v12 = vpack.c.bf16 %v763_v61, %v763_v61  ;;  %v700_v61 = vld [vmem:[#allocation2 + $0x181] sm:$0xff] }
 0x154   : > { %v4562_v15 = vunpack.c.l.b16 %v4557_v11 }
 0x155   : > { %v4567_v18 = vunpack.c.l.b16 %v4559_v13  ;;  %5814 = vst [vmem:[#allocation10_spill] sm:$0xff] %v4617_v12 }
 0x156   : > { %v4571_v20 = vpack.c.b16 %v4562_v15, %v4562_v15 }
 0x157   : > { %5811 = vst [vmem:[#allocation7_spill] sm:$0xff] %v4567_v18  ;;  %v4577_v19 = vpack.c.b16 %v4567_v18, %v4567_v18 }
 0x158   : > { %1236 = vrot.lane.b32.xlu2 %v4571_v20, %s4096_s13 }
 0x159   : > { %v733_v24 = vld [vmem:[#allocation2 + $0x100] sm:$0xff]  ;;  %1242 = vrot.lane.b32.xlu1 %v4577_v19, %s4096_s13  ;;  %v652_v25 = vpop.permute.xlu1 %651  ;;  %v566_v28 = vpop.permute.xlu2 %565 }
 0x15a   : > { %673 = vst.msk [vmem:[#allocation2 + $0x221] sm:$0xff] %vm226_vm0, %v652_v25  ;;  %v4589_v26 = vpack.c.bf16 %v733_v24, %v733_v24  ;;  %v833_v24 = vunpack.c.l.b16 %v4615_v10  ;;  %v915_v25 = vunpack.c.l.b16 %v4617_v12  ;;  %v701_v12 = vld [vmem:[#allocation2 + $0x191] sm:$0xff] }
 0x15b   : > { %584 = vst.msk [vmem:[#allocation2 + $0x111] sm:$0xff] %vm226_vm0, %v566_v28  ;;  %v698_v28 = vld [vmem:[#allocation2 + $0x161] sm:$0xff] }
 0x15c   : > { %v1669_v41 = vsel %vm226_vm0, %v4589_v26, %v1283_v7  ;;  %v4627_v29 = vpack.c.b16 %v833_v24, %v833_v24  ;;  %v923_v30 = vpack.c.b16 %v915_v25, %v915_v25  ;;  %v4629_v31 = vpack.c.bf16 %v698_v28, %v698_v28  ;;  %v764_v24 = vld [vmem:[#allocation2 + $0xf1] sm:$0xff] }
 0x15d   : > { %v1766_v54 = vunpack.c.l.b16 %v1669_v41  ;;  %v699_v41 = vld [vmem:[#allocation2 + $0x171] sm:$0xff]  ;;  %v4677_v5 = vpack.c.bf16 %v764_v24, %v764_v24 }
 0x15e   : > { %v834_v37 = vunpack.c.l.b16 %v4629_v31  ;;  %v1167_v28 = vld [vmem:[#allocation2 + $0x1b2] sm:$0xff] }
 0x15f   : > { %5820 = vst [vmem:[#allocation16_spill] sm:$0xff] %v4677_v5  ;;  %v1175_v17 = vpack.c.bf16 %v1167_v28, %v1167_v28  ;;  %v916_v28 = vunpack.c.l.b16 %v4677_v5 }
 0x160   : > { %930 = vrot.lane.b32.xlu2 %v921_v33, %s4096_s13  ;;  %v4642_v43 = vpack.c.b16 %v834_v37, %v834_v37 }
 0x161   : > { %932 = vrot.lane.b32.xlu1 %v922_v38, %s4096_s13  ;;  %v1281_v44 = vpop.permute.xlu1 %1280  ;;  %v716_v45 = vld [vmem:[#allocation2 + $0x221] sm:$0xff]  ;;  %v924_v16 = vpack.c.b16 %v916_v28, %v916_v28 }
 0x162   : > { %v1390_v46 = vsel %vm226_vm0, %v1172_v39, %v1281_v44  ;;  %v1667_v48 = vsel %vm226_vm0, %v4597_v42, %v1281_v44  ;;  %v4604_v50 = vpack.c.bf16 %v716_v45, %v716_v45  ;;  %v765_v39 = vld [vmem:[#allocation2 + $0x101] sm:$0xff] }
 0x163   : > { %v1509_v57 = vunpack.c.l.b16 %v1390_v46  ;;  %v1762_v58 = vunpack.c.l.b16 %v1667_v48  ;;  %v4648_v45 = vpack.c.bf16 %v765_v39, %v765_v39  ;;  %v4652_v48 = vpack.c.bf16 %v699_v41, %v699_v41 }
 0x164   : > { %v4607_v0 = vunpack.c.l.b16 %v4604_v50 }
 0x165   : > { %v2050_v6 = vpack.c.b16 %v1766_v54, %v1762_v58  ;;  %v4609_v7 = vpack.c.b16 %v1514_v53, %v1509_v57  ;;  %5817 = vst [vmem:[#allocation13_spill] sm:$0xff] %v4648_v45  ;;  %v1166_v57 = vld [vmem:[#allocation2 + $0x1a2] sm:$0xff]  ;;  %v917_v59 = vunpack.c.l.b16 %v4648_v45 }
 0x166   : > { %v4613_v8 = vpack.c.b16 %v4607_v0, %v4607_v0 }
 0x167   : > { %5813 = vst [vmem:[#allocation9_spill] sm:$0xff] %v4609_v7  ;;  %2496 = vmatmul.bf16.vlgmr.msra.gmra.mxu3 %v2050_v6  ;;  %v734_v6 = vld [vmem:[#allocation2 + $0x110] sm:$0xff]  ;;  %v745_v7 = vld [vmem:[#allocation2 + $0x21] sm:$0xff] }
 0x168   : > { %848 = vrot.lane.b32.xlu2 %v840_v62, %s4096_s13  ;;  %1240 = vrot.lane.b32.xlu0 %v4613_v8, %s4096_s13  ;;  %v744_v62 = vld [vmem:[#allocation2 + $0x11] sm:$0xff]  ;;  %v4671_v39 = vpack.c.bf16 %v734_v6, %v734_v6 }
 0x169   : > { %v656_v23 = vpop.permute.xlu0 %655  ;;  %v4669_v37 = vpack.c.bf16 %v744_v62, %v744_v62 }
 0x16a   : > { %675 = vst.msk [vmem:[#allocation2 + $0x241] sm:$0xff] %vm226_vm0, %v656_v23  ;;  %v835_v23 = vunpack.c.l.b16 %v4652_v48 }
 0x16b   : > { %v1256_v6 = vunpack.c.l.b16 %v4669_v37 }
 0x16c   : > { %v4679_v46 = vpack.c.b16 %v835_v23, %v835_v23 }
 0x16d   : > { %v1264_v5 = vpack.c.b16 %v1256_v6, %v1256_v6 }
 0x170   : > { %850 = vrot.lane.b32.xlu0 %v4627_v29, %s4096_s13  ;;  %934 = vrot.lane.b32.xlu2 %v923_v30, %s4096_s13  ;;  %v1174_v30 = vpack.c.bf16 %v1166_v57, %v1166_v57 }
 0x171   : > { %v658_v33 = vpop.permute.xlu1 %657  ;;  %v718_v34 = vld [vmem:[#allocation2 + $0x241] sm:$0xff] }
 0x172   : > { %676 = vst.msk [vmem:[#allocation2 + $0x251] sm:$0xff] %vm226_vm0, %v658_v33  ;;  %v568_v36 = vpop.permute.xlu0 %567  ;;  %v4636_v38 = vpack.c.bf16 %v718_v34, %v718_v34 }
 0x173   : > { %585 = vst.msk [vmem:[#allocation2 + $0x121] sm:$0xff] %vm226_vm0, %v568_v36  ;;  %v4667_v36 = vpack.c.bf16 %v700_v61, %v700_v61 }
 0x174   : > { %5815 = vst [vmem:[#allocation11_spill] sm:$0xff] %v4636_v38  ;;  %v4640_v40 = vunpack.c.l.b16 %v4636_v38 }
 0x176   : > { %5816 = vst [vmem:[#allocation12_spill] sm:$0xff] %v4640_v40  ;;  %v4646_v44 = vpack.c.b16 %v4640_v40, %v4640_v40 }
 0x178   : > { %852 = vrot.lane.b32.xlu2 %v4642_v43, %s4096_s13  ;;  %1244 = vrot.lane.b32.xlu0 %v4646_v44, %s4096_s13 }
 0x179   : > { %v4658_v53 = vpop.permute.xlu1 %1232  ;;  %v719_v54 = vld [vmem:[#allocation2 + $0x251] sm:$0xff] }
 0x17a   : > { %v4660_v58 = vpack.c.bf16 %v719_v54, %v719_v54  ;;  %v1285_v33 = vpop.permute.xlu0 %1284  ;;  %v735_v34 = vld [vmem:[#allocation2 + $0x120] sm:$0xff]  ;;  %v925_v54 = vpack.c.b16 %v917_v59, %v917_v59 }
 0x17b   : > { %v1396_v57 = vsel %vm226_vm0, %v1174_v30, %v1285_v33  ;;  %v1671_v61 = vsel %vm226_vm0, %v4671_v39, %v1285_v33  ;;  %v4687_v62 = vpack.c.bf16 %v735_v34, %v735_v34  ;;  %v836_v30 = vunpack.c.l.b16 %v4667_v36  ;;  %v767_v45 = vld [vmem:[#allocation2 + $0x121] sm:$0xff] }
 0x17c   : > { %5818 = vst [vmem:[#allocation14_spill] sm:$0xff] %v4660_v58  ;;  %v4665_v25 = vunpack.c.l.b16 %v4660_v58  ;;  %v1519_v33 = vunpack.c.l.b16 %v1396_v57  ;;  %v1770_v56 = vunpack.c.l.b16 %v1671_v61  ;;  %v766_v61 = vld [vmem:[#allocation2 + $0x111] sm:$0xff] }
 0x17d   : > { %v4699_v3 = vpack.c.b16 %v836_v30, %v836_v30 }
 0x17e   : > { %5819 = vst [vmem:[#allocation15_spill] sm:$0xff] %v4665_v25  ;;  %v4675_v41 = vpack.c.b16 %v4665_v25, %v4665_v25  ;;  %v4705_v25 = vpack.c.bf16 %v701_v12, %v701_v12  ;;  %v4714_v12 = vpack.c.bf16 %v766_v61, %v766_v61 }
 0x180   : > { %1246 = vrot.lane.b32.xlu1 %v4675_v41, %s4096_s13  ;;  %938 = vrot.lane.b32.xlu2 %v925_v54, %s4096_s13  ;;  %5823 = vst [vmem:[#allocation19_spill] sm:$0xff] %v4714_v12 }
 0x181   : > { %854 = vrot.lane.b32.xlu0 %v4679_v46, %s4096_s13  ;;  %v1287_v59 = vpop.permute.xlu1 %1286 }
 0x182   : > { %v1399_v23 = vsel %vm226_vm0, %v1175_v17, %v1287_v59  ;;  %v1673_v24 = vsel %vm226_vm0, %v4687_v62, %v1287_v59  ;;  %v4701_v17 = vpack.c.bf16 %v745_v7, %v745_v7  ;;  %v4703_v59 = vpack.c.bf16 %v767_v45, %v767_v45  ;;  %v702_v45 = vld [vmem:[#allocation2 + $0x1a1] sm:$0xff] }
 0x183   : > { %v1524_v54 = vunpack.c.l.b16 %v1399_v23  ;;  %v1774_v34 = vunpack.c.l.b16 %v1673_v24  ;;  %v837_v7 = vunpack.c.l.b16 %v4705_v25  ;;  %v746_v23 = vld [vmem:[#allocation2 + $0x31] sm:$0xff]  ;;  %v4716_v24 = vpack.c.bf16 %v702_v45, %v702_v45 }
 0x184   : > { %5822 = vst [vmem:[#allocation18_spill] sm:$0xff] %v4703_v59  ;;  %v919_v57 = vunpack.c.l.b16 %v4703_v59  ;;  %v4718_v28 = vpack.c.bf16 %v746_v23, %v746_v23 }
 0x185   : > { %v2054_v22 = vpack.c.b16 %v1774_v34, %v1770_v56  ;;  %v4697_v32 = vpack.c.b16 %v1524_v54, %v1519_v33  ;;  %v1257_v56 = vunpack.c.l.b16 %v4701_v17  ;;  %v838_v30 = vunpack.c.l.b16 %v4716_v24  ;;  %v729_v54 = vld [vmem:[#allocation2 + $0xc0] sm:$0xff] }
 0x186   : > { %v927_v6 = vpack.c.b16 %v919_v57, %v919_v57  ;;  %5824 = vst [vmem:[#allocation20_spill] sm:$0xff] %v4718_v28  ;;  %v1258_v33 = vunpack.c.l.b16 %v4718_v28  ;;  %v747_v34 = vld [vmem:[#allocation2 + $0x41] sm:$0xff] }
 0x187   : > { %5821 = vst [vmem:[#allocation17_spill] sm:$0xff] %v4697_v32  ;;  %2501 = vmatmul.bf16.gmra.mxu3 %v2054_v22  ;;  %v1265_v22 = vpack.c.b16 %v1257_v56, %v1257_v56  ;;  %v703_v56 = vld [vmem:[#allocation2 + $0x1b1] sm:$0xff]  ;;  %v4726_v61 = vpack.c.b16 %v838_v30, %v838_v30  ;;  %v4730_v45 = vpack.c.bf16 %v747_v34, %v747_v34 }
 0x188   : > { %936 = vrot.lane.b32.xlu1 %v924_v16, %s4096_s13  ;;  %856 = vrot.lane.b32.xlu2 %v4699_v3, %s4096_s13  ;;  %v845_v16 = vpack.c.b16 %v837_v7, %v837_v7  ;;  %v4728_v7 = vpack.c.bf16 %v729_v54, %v729_v54  ;;  %v4732_v23 = vpack.c.b16 %v1258_v33, %v1258_v33  ;;  %v730_v54 = vld [vmem:[#allocation2 + $0xd0] sm:$0xff] }
 0x189   : > { %1272 = vrot.lane.b32.xlu0 %v1264_v5, %s4096_s13  ;;  %v918_v5 = vunpack.c.l.b16 %v4714_v12  ;;  %5825 = vst [vmem:[#allocation21_spill] sm:$0xff] %v4730_v45  ;;  %v728_v34 = vld [vmem:[#allocation2 + $0xb0] sm:$0xff] }
 0x18b   : > { %v926_v57 = vpack.c.b16 %v918_v5, %v918_v5  ;;  %v1259_v5 = vunpack.c.l.b16 %v4730_v45 }
 0x18d   : > { %v4744_v12 = vpack.c.b16 %v1259_v5, %v1259_v5  ;;  %v731_v5 = vld [vmem:[#allocation2 + $0xe0] sm:$0xff] }
 0x190   : > { %1274 = vrot.lane.b32.xlu1 %v1265_v22, %s4096_s13  ;;  %942 = vrot.lane.b32.xlu2 %v927_v6, %s4096_s13  ;;  %v4734_v22 = vpack.c.bf16 %v703_v56, %v703_v56  ;;  %v873_v6 = vunpack.c.l.b16 %v4728_v7  ;;  %v4746_v56 = vpack.c.bf16 %v730_v54, %v730_v54 }
 0x191   : > { %858 = vrot.lane.b32.xlu0 %v845_v16, %s4096_s13 }
 0x192   : > { %v839_v30 = vunpack.c.l.b16 %v4734_v22  ;;  %v881_v33 = vpack.c.b16 %v873_v6, %v873_v6  ;;  %v874_v59 = vunpack.c.l.b16 %v4746_v56 }
 0x194   : > { %v4750_v32 = vpack.c.b16 %v839_v30, %v839_v30  ;;  %v882_v18 = vpack.c.b16 %v874_v59, %v874_v59  ;;  %v1354_v30 = vsel %vm226_vm0, %v4591_v35, %v4658_v53  ;;  %v876_v35 = vunpack.c.l.b16 %v4597_v42 }
 0x196   : > { %v884_v53 = vpack.c.b16 %v876_v35, %v876_v35  ;;  %v628_v35 = vadd.f32 %v4330_v55, %v4479_v9  ;;  %v1179_v9 = vld [vmem:[#allocation2 + $0x42] sm:$0xff] }
 0x198   : > { %940 = vrot.lane.b32.xlu1 %v926_v57, %s4096_s13  ;;  %860 = vrot.lane.b32.xlu2 %v4726_v61, %s4096_s13  ;;  %v4748_v57 = vpack.c.bf16 %v728_v34, %v728_v34  ;;  %v4762_v34 = vpack.c.bf16 %v731_v5, %v731_v5 }
 0x199   : > { %1276 = vrot.lane.b32.xlu0 %v4732_v23, %s4096_s13 }
 0x19a   : > { %v872_v6 = vunpack.c.l.b16 %v4748_v57  ;;  %v875_v59 = vunpack.c.l.b16 %v4762_v34 }
 0x19c   : > { %v880_v54 = vpack.c.b16 %v872_v6, %v872_v6  ;;  %v883_v49 = vpack.c.b16 %v875_v59, %v875_v59 }
 0x1a0   : > { %890 = vrot.lane.b32.xlu2 %v881_v33, %s4096_s13  ;;  %1278 = vrot.lane.b32.xlu1 %v4744_v12, %s4096_s13  ;;  %v1488_v33 = vunpack.c.l.b16 %v1354_v30 }
 0x1a1   : > { %862 = vrot.lane.b32.xlu0 %v4750_v32, %s4096_s13 }
 0x1a8   : > { %892 = vrot.lane.b32.xlu2 %v882_v18, %s4096_s13  ;;  %888 = vrot.lane.b32.xlu1 %v880_v54, %s4096_s13 }
 0x1a9   : > { %968 = vrot.lane.b32.xlu0 %v4627_v29, %s4096_s13  ;;  %v929_v29 = vpop.permute.xlu1 %928 }
 0x1aa   : > { %v1235_v40 = vpop.permute.xlu2 %1234 }
 0x1ab   : > { %v1357_v38 = vsel %vm226_vm0, %v4615_v10, %v1235_v40 }
 0x1ac   : > { %v1493_v6 = vunpack.c.l.b16 %v1357_v38  ;;  %v1034_v38 = vsel %vm226_vm0, %v4669_v37, %v929_v29  ;;  %v877_v37 = vunpack.c.l.b16 %v4589_v26  ;;  %v1176_v29 = vld [vmem:[#allocation2 + $0x12] sm:$0xff] }
 0x1ad   : > { %v1122_v5 = vunpack.c.l.b16 %v1034_v38 }
 0x1ae   : > { %v2006_v58 = vpack.c.b16 %v1493_v6, %v1488_v33 }
 0x1b0   : > { %2466 = vmatmul.bf16.vlgmr.msra.gmra.mxu2 %v2006_v58  ;;  %974 = vrot.lane.b32.xlu2 %v4699_v3, %s4096_s13 }
 0x1b1   : > { %894 = vrot.lane.b32.xlu0 %v883_v49, %s4096_s13  ;;  %970 = vrot.lane.b32.xlu1 %v4642_v43, %s4096_s13  ;;  %v878_v43 = vunpack.c.l.b16 %v4671_v39  ;;  %v885_v39 = vpack.c.b16 %v877_v37, %v877_v37 }
 0x1b2   : > { %v1237_v18 = vpop.permute.xlu2 %1236 }
 0x1b3   : > { %v1360_v40 = vsel %vm226_vm0, %v4629_v31, %v1237_v18  ;;  %v886_v59 = vpack.c.b16 %v878_v43, %v878_v43  ;;  %v1177_v43 = vld [vmem:[#allocation2 + $0x22] sm:$0xff] }
 0x1b4   : > { %v1498_v54 = vunpack.c.l.b16 %v1360_v40 }
 0x1b8   : > { %976 = vrot.lane.b32.xlu2 %v845_v16, %s4096_s13  ;;  %v799_v16 = vld [vmem:[#allocation2 + $0x1c1] sm:$0xff] }
 0x1b9   : > { %896 = vrot.lane.b32.xlu0 %v884_v53, %s4096_s13  ;;  %972 = vrot.lane.b32.xlu1 %v4679_v46, %s4096_s13  ;;  %v4793_v18 = vpack.c.bf16 %v799_v16, %v799_v16  ;;  %v3899_v53 = vld [vmem:[%s5772_s3 + $0x78] sm:$0xff] }
 0x1ba   : > { %v931_v49 = vpop.permute.xlu2 %930  ;;  %v1239_v3 = vpop.permute.xlu0 %1238  ;;  %2527 = vmatpush.bf16.msrb.mxu3 %v3899_v53 }
 0x1bb   : > { %v1037_v42 = vsel %vm226_vm0, %v4701_v17, %v931_v49  ;;  %v1363_v58 = vsel %vm226_vm0, %v4652_v48, %v1239_v3  ;;  %5826 = vst [vmem:[#allocation22_spill] sm:$0xff] %v4793_v18  ;;  %v959_v26 = vunpack.c.l.b16 %v4793_v18  ;;  %v879_v17 = vunpack.c.l.b16 %v4687_v62 }
 0x1bc   : > { %v1127_v30 = vunpack.c.l.b16 %v1037_v42  ;;  %v1503_v33 = vunpack.c.l.b16 %v1363_v58  ;;  %v4807_v49 = vpack.c.bf16 %v1176_v29, %v1176_v29  ;;  %v636_v3 = vmax.f32 %v628_v35, 0.0  ;;  %v3919_v42 = vld [vmem:[%s5772_s3 + $0x118] sm:$0xff]  ;;  %v3898_v35 = vld [vmem:[%s5772_s3 + $0x70] sm:$0xff] }
 0x1bd   : > { %v967_v40 = vpack.c.b16 %v959_v26, %v959_v26  ;;  %v4816_v58 = vpack.c.bf16 %v1179_v9, %v1179_v9  ;;  %2798 = vmatpush.bf16.msrb.mxu2 %v3919_v42 }
 0x1be   : > { %v2011_v6 = vpack.c.b16 %v1503_v33, %v1498_v54  ;;  %v4791_v46 = vpack.c.b16 %v1127_v30, %v1122_v5  ;;  %v1296_v55 = vunpack.c.l.b16 %v4807_v49  ;;  %v4820_v5 = vpack.c.bf16 %v1177_v43, %v1177_v43  ;;  %2528 = vmatpush.bf16.msrb.mxu3 %v3898_v35 }
 0x1bf   : > { %v1299_v30 = vunpack.c.l.b16 %v4816_v58 }
 0x1c0   : > { %900 = vrot.lane.b32.xlu2 %v886_v59, %s4096_s13  ;;  %2471 = vmatmul.bf16.gmra.mxu2 %v2011_v6  ;;  %v1304_v16 = vpack.c.b16 %v1296_v55, %v1296_v55  ;;  %v1180_v59 = vld [vmem:[#allocation2 + $0x52] sm:$0xff] }
 0x1c1   : > { %978 = vrot.lane.b32.xlu0 %v4726_v61, %s4096_s13  ;;  %2506 = vmatmul.bf16.gmra.mxu3 %v4791_v46  ;;  %v887_v61 = vpack.c.b16 %v879_v17, %v879_v17  ;;  %v1178_v17 = vld [vmem:[#allocation2 + $0x32] sm:$0xff]  ;;  %v1307_v29 = vpack.c.b16 %v1299_v30, %v1299_v30  ;;  %v4834_v53 = vpack.c.bf16 %v1180_v59, %v1180_v59 }
 0x1c2   : > { %898 = vrot.lane.b32.xlu1 %v885_v39, %s4096_s13  ;;  %v849_v38 = vpop.permute.xlu2 %848  ;;  %v1297_v39 = vunpack.c.l.b16 %v4820_v5 }
 0x1c3   : > { %v1300_v43 = vunpack.c.l.b16 %v4834_v53 }
 0x1c8   : > { %982 = vrot.lane.b32.xlu2 %v967_v40, %s4096_s13  ;;  %v679_v40 = vld [vmem:[#allocation2 + $0x1e0] sm:$0xff] }
 0x1c9   : > { %902 = vrot.lane.b32.xlu0 %v887_v61, %s4096_s13  ;;  %v1305_v61 = vpack.c.b16 %v1297_v39, %v1297_v39  ;;  %v687_v42 = vpack.c.bf16 %v679_v40, %v679_v40  ;;  %v680_v39 = vld [vmem:[#allocation2 + $0x1f0] sm:$0xff] }
 0x1ca   : > { %659 = vrot.lane.b32.xlu1 %v636_v3, %s4096_s13  ;;  %v935_v37 = vpop.permute.xlu2 %934  ;;  %v4839_v3 = vpack.c.bf16 %v1178_v17, %v1178_v17  ;;  %v4860_v35 = vpack.c.bf16 %v680_v39, %v680_v39  ;;  %v3906_v39 = vld [vmem:[%s5772_s3 + $0xb0] sm:$0xff] }
 0x1cb   : > { %v1243_v62 = vpop.permute.xlu1 %1242  ;;  %v1043_v54 = vsel %vm226_vm0, %v4730_v45, %v935_v37 }
 0x1cc   : > { %v1369_v55 = vsel %vm226_vm0, %v4705_v25, %v1243_v62  ;;  %v1181_v62 = vld [vmem:[#allocation2 + $0x62] sm:$0xff] }
 0x1d0   : > { %1336 = vrot.lane.b32.xlu2 %v4550_v4, %s4096_s13  ;;  %v1137_v4 = vunpack.c.l.b16 %v1043_v54 }
 0x1d1   : > { %1312 = vrot.lane.b32.xlu0 %v1304_v16, %s4096_s13  ;;  %v1513_v16 = vunpack.c.l.b16 %v1369_v55 }
 0x1d2   : > { %980 = vrot.lane.b32.xlu1 %v4750_v32, %s4096_s13  ;;  %v853_v54 = vpop.permute.xlu2 %852 }
 0x1d3   : > { %v933_v33 = vpop.permute.xlu1 %932 }
 0x1d4   : > { %v1040_v6 = vsel %vm226_vm0, %v4718_v28, %v933_v33  ;;  %v1298_v33 = vunpack.c.l.b16 %v4839_v3 }
 0x1d5   : > { %v1132_v26 = vunpack.c.l.b16 %v1040_v6  ;;  %v1308_v6 = vpack.c.b16 %v1300_v43, %v1300_v43  ;;  %v3918_v43 = vld [vmem:[%s5772_s3 + $0x110] sm:$0xff] }
 0x1d6   : > { %v1306_v17 = vpack.c.b16 %v1298_v33, %v1298_v33  ;;  %2799 = vmatpush.bf16.msrb.mxu2 %v3918_v43  ;;  %v3915_v33 = vld [vmem:[%s5772_s3 + $0xf8] sm:$0xff] }
 0x1d7   : > { %v4836_v32 = vpack.c.b16 %v1137_v4, %v1132_v26  ;;  %v986_v4 = vsel %vm226_vm0, %v687_v42, %v849_v38  ;;  %v4855_v26 = vpack.c.bf16 %v1181_v62, %v1181_v62  ;;  %v681_v62 = vld [vmem:[#allocation2 + $0x200] sm:$0xff]  ;;  %2705 = vmatpush.bf16.msra.mxu1 %v3915_v33 }
 0x1d8   : > { %1318 = vrot.lane.b32.xlu2 %v1307_v29, %s4096_s13  ;;  %v1120_v29 = vunpack.c.l.b16 %v986_v4  ;;  %v3914_v4 = vld [vmem:[%s5772_s3 + $0xf0] sm:$0xff] }
 0x1d9   : > { %1338 = vrot.lane.b32.xlu0 %v4571_v20, %s4096_s13  ;;  %2511 = vmatmul.bf16.gmra.mxu3 %v4836_v32  ;;  %v3897_v20 = vld [vmem:[%s5772_s3 + $0x68] sm:$0xff]  ;;  %v1301_v38 = vunpack.c.l.b16 %v4855_v26 }
 0x1da   : > { %1314 = vrot.lane.b32.xlu1 %v1305_v61, %s4096_s13  ;;  %v1241_v9 = vpop.permute.xlu0 %1240  ;;  %2529 = vmatpush.bf16.msrb.mxu3 %v3897_v20  ;;  %v939_v42 = vpop.permute.xlu2 %938 }
 0x1db   : > { %v1366_v37 = vsel %vm226_vm0, %v4667_v36, %v1241_v9  ;;  %v1182_v9 = vld [vmem:[#allocation2 + $0x72] sm:$0xff]  ;;  %2706 = vmatpush.bf16.msra.mxu1 %v3914_v4 }
 0x1dc   : > { %v1508_v30 = vunpack.c.l.b16 %v1366_v37 }
 0x1de   : > { %v2016_v59 = vpack.c.b16 %v1513_v16, %v1508_v30  ;;  %v4869_v16 = vpack.c.bf16 %v1182_v9, %v1182_v9  ;;  %v3907_v30 = vld [vmem:[%s5772_s3 + $0xb8] sm:$0xff] }
 0x1df   : > { %2616 = vmatpush.bf16.msra.mxu0 %v3907_v30 }
 0x1e0   : > { %2476 = vmatmul.bf16.gmra.mxu2 %v2016_v59  ;;  %1320 = vrot.lane.b32.xlu2 %v1308_v6, %s4096_s13  ;;  %v1302_v59 = vunpack.c.l.b16 %v4869_v16  ;;  %v4883_v6 = vpack.c.bf16 %v681_v62, %v681_v62 }
 0x1e1   : > { %1340 = vrot.lane.b32.xlu0 %v4527_v51, %s4096_s13  ;;  %v1309_v51 = vpack.c.b16 %v1301_v38, %v1301_v38 }
 0x1e2   : > { %1316 = vrot.lane.b32.xlu1 %v1306_v17, %s4096_s13  ;;  %v851_v40 = vpop.permute.xlu0 %850  ;;  %v1310_v17 = vpack.c.b16 %v1302_v59, %v1302_v59 }
 0x1e3   : > { %v989_v61 = vsel %vm226_vm0, %v4860_v35, %v851_v40  ;;  %v4894_v40 = vpop.permute.xlu2 %856  ;;  %2617 = vmatpush.bf16.msra.mxu0 %v3906_v39  ;;  %v3894_v39 = vld [vmem:[%s5772_s3 + $0x50] sm:$0xff] }
 0x1e4   : > { %v1125_v55 = vunpack.c.l.b16 %v989_v61 }
 0x1e6   : > { %v1970_v37 = vpack.c.b16 %v1125_v55, %v1120_v29  ;;  %v682_v29 = vld [vmem:[#allocation2 + $0x210] sm:$0xff]  ;;  %v992_v55 = vsel %vm226_vm0, %v4883_v6, %v853_v54  ;;  %v3913_v54 = vld [vmem:[%s5772_s3 + $0xe8] sm:$0xff] }
 0x1e7   : > { %v4907_v43 = vpack.c.bf16 %v682_v29, %v682_v29  ;;  %2707 = vmatpush.bf16.msra.mxu1 %v3913_v54  ;;  %v3904_v29 = vld [vmem:[%s5772_s3 + $0xa0] sm:$0xff] }
 0x1e8   : > { %2446 = vmatmul.bf16.vlgmr.msrb.gmra.mxu0 %v1970_v37  ;;  %1346 = vrot.lane.b32.xlu2 %v4646_v44, %s4096_s13  ;;  %v1183_v44 = vld [vmem:[#allocation2 + $0x82] sm:$0xff]  ;;  %v3895_v37 = vld [vmem:[%s5772_s3 + $0x58] sm:$0xff] }
 0x1e9   : > { %1322 = vrot.lane.b32.xlu0 %v1309_v51, %s4096_s13  ;;  %v4898_v61 = vpack.c.bf16 %v1183_v44, %v1183_v44  ;;  %v3905_v51 = vld [vmem:[%s5772_s3 + $0xa8] sm:$0xff]  ;;  %v1130_v44 = vunpack.c.l.b16 %v992_v55 }
 0x1ea   : > { %1342 = vrot.lane.b32.xlu1 %v4613_v8, %s4096_s13  ;;  %v1245_v20 = vpop.permute.xlu0 %1244  ;;  %v3896_v8 = vld [vmem:[%s5772_s3 + $0x60] sm:$0xff]  ;;  %2618 = vmatpush.bf16.msra.mxu0 %v3905_v51 }
 0x1eb   : > { %2530 = vmatpush.bf16.msrb.mxu3 %v3896_v8  ;;  %v1372_v38 = vsel %vm226_vm0, %v4716_v24, %v1245_v20  ;;  %v1303_v59 = vunpack.c.l.b16 %v4898_v61  ;;  %v1160_v51 = vld [vmem:[#allocation2 + $0x142] sm:$0xff] }
 0x1ec   : > { %v1518_v33 = vunpack.c.l.b16 %v1372_v38 }
 0x1ed   : > { %v1311_v55 = vpack.c.b16 %v1303_v59, %v1303_v59 }
 0x1ee   : > { %2619 = vmatpush.bf16.msra.mxu0 %v3904_v29 }
 0x1ef   : > { %2531 = vmatpush.bf16.msrb.mxu3 %v3895_v37  ;;  %v1049_v37 = vsel %vm226_vm0, %v4453_v63, %v939_v42 }
 0x1f0   : > { %1348 = vrot.lane.b32.xlu2 %v4675_v41, %s4096_s13  ;;  %v1587_v41 = vunpack.c.l.b16 %v4883_v6  ;;  %v1147_v59 = vunpack.c.l.b16 %v1049_v37  ;;  %v3917_v37 = vld [vmem:[%s5772_s3 + $0x108] sm:$0xff] }
 0x1f1   : > { %1324 = vrot.lane.b32.xlu0 %v1310_v17, %s4096_s13  ;;  %2800 = vmatpush.bf16.msrb.mxu2 %v3917_v37 }
 0x1f2   : > { %1344 = vrot.lane.b32.xlu1 %v4577_v19, %s4096_s13  ;;  %v1247_v9 = vpop.permute.xlu1 %1246  ;;  %v1595_v17 = vpack.c.b16 %v1587_v41, %v1587_v41  ;;  %v4936_v41 = vpop.permute.xlu2 %942 }
 0x1f3   : > { %v1375_v19 = vsel %vm226_vm0, %v4734_v22, %v1247_v9  ;;  %v855_v30 = vpop.permute.xlu0 %854  ;;  %v3912_v9 = vld [vmem:[%s5772_s3 + $0xe0] sm:$0xff]  ;;  %2532 = vmatpush.bf16.msrb.mxu3 %v3894_v39  ;;  %v1586_v39 = vunpack.c.l.b16 %v4860_v35 }
 0x1f4   : > { %v1523_v62 = vunpack.c.l.b16 %v1375_v19  ;;  %v995_v20 = vsel %vm226_vm0, %v4907_v43, %v855_v30  ;;  %v1588_v19 = vunpack.c.l.b16 %v4907_v43  ;;  %v3893_v30 = vld [vmem:[%s5772_s3 + $0x48] sm:$0xff]  ;;  %2708 = vmatpush.bf16.msra.mxu1 %v3912_v9 }
 0x1f5   : > { %v1135_v8 = vunpack.c.l.b16 %v995_v20  ;;  %v3911_v20 = vld [vmem:[%s5772_s3 + $0xd8] sm:$0xff] }
 0x1f6   : > { %v2021_v4 = vpack.c.b16 %v1523_v62, %v1518_v33  ;;  %v3903_v33 = vld [vmem:[%s5772_s3 + $0x98] sm:$0xff]  ;;  %v1596_v29 = vpack.c.b16 %v1588_v19, %v1588_v19 }
 0x1f7   : > { %v1975_v38 = vpack.c.b16 %v1135_v8, %v1130_v44  ;;  %v1549_v62 = vld [vmem:[#allocation2 + $0x51] sm:$0xff]  ;;  %v1168_v8 = vpack.c.bf16 %v1160_v51, %v1160_v51  ;;  %2533 = vmatpush.bf16.msrb.mxu3 %v3893_v30  ;;  %2620 = vmatpush.bf16.msra.mxu0 %v3903_v33  ;;  %v1594_v33 = vpack.c.b16 %v1586_v39, %v1586_v39 }
 0x1f8   : > { %2481 = vmatmul.bf16.gmra.mxu2 %v2021_v4  ;;  %1604 = vrot.lane.b32.xlu2 %v1595_v17, %s4096_s13  ;;  %v683_v4 = vld [vmem:[#allocation2 + $0x220] sm:$0xff]  ;;  %v4957_v9 = vpack.c.bf16 %v1549_v62, %v1549_v62  ;;  %v684_v51 = vld [vmem:[#allocation2 + $0x230] sm:$0xff] }
 0x1f9   : > { %2451 = vmatmul.bf16.gmra.mxu0 %v1975_v38  ;;  %v3892_v17 = vld [vmem:[%s5772_s3 + $0x40] sm:$0xff]  ;;  %v1161_v38 = vld [vmem:[#allocation2 + $0x152] sm:$0xff]  ;;  %2709 = vmatpush.bf16.msra.mxu1 %v3911_v20  ;;  %v4968_v19 = vpack.c.bf16 %v683_v4, %v683_v4 }
 0x1fa   : > { %1326 = vrot.lane.b32.xlu1 %v1311_v55, %s4096_s13  ;;  %v937_v54 = vpop.permute.xlu1 %936  ;;  %5827 = vst [vmem:[#allocation23_spill] sm:$0xff] %v4957_v9  ;;  %v3902_v55 = vld [vmem:[%s5772_s3 + $0x90] sm:$0xff]  ;;  %v4975_v62 = vpack.c.bf16 %v1161_v38, %v1161_v38  ;;  %v861_v38 = vpop.permute.xlu2 %860 }
 0x1fb   : > { %v1046_v63 = vsel %vm226_vm0, %v4445_v52, %v937_v54  ;;  %v1273_v42 = vpop.permute.xlu0 %1272  ;;  %v3910_v54 = vld [vmem:[%s5772_s3 + $0xd0] sm:$0xff]  ;;  %2534 = vmatpush.bf16.msrb.mxu3 %v3892_v17  ;;  %v998_v20 = vsel %vm226_vm0, %v4968_v19, %v4894_v40  ;;  %2621 = vmatpush.bf16.msra.mxu0 %v3902_v55  ;;  %v1550_v17 = vld [vmem:[#allocation2 + $0x61] sm:$0xff] }
 0x1fc   : > { %v1142_v44 = vunpack.c.l.b16 %v1046_v63  ;;  %v1378_v30 = vsel %vm226_vm0, %v1168_v8, %v1273_v42  ;;  %v1659_v63 = vsel %vm226_vm0, %v4748_v57, %v1273_v42  ;;  %v1629_v8 = vunpack.c.l.b16 %v4957_v9  ;;  %v3901_v57 = vld [vmem:[%s5772_s3 + $0x88] sm:$0xff] }
 0x1fd   : > { %v1489_v42 = vunpack.c.l.b16 %v1378_v30  ;;  %2710 = vmatpush.bf16.msra.mxu1 %v3910_v54  ;;  %v1746_v55 = vunpack.c.l.b16 %v1659_v63  ;;  %v4996_v18 = vpack.c.bf16 %v1550_v17, %v1550_v17  ;;  %v3900_v63 = vld [vmem:[%s5772_s3 + $0x80] sm:$0xff] }
 0x1fe   : > { %v4955_v52 = vpack.c.b16 %v1147_v59, %v1142_v44  ;;  %v4981_v44 = vpack.c.bf16 %v684_v51, %v684_v51  ;;  %v1637_v28 = vpack.c.b16 %v1629_v8, %v1629_v8 }
 0x1ff   : > { %2622 = vmatpush.bf16.msra.mxu0 %v3901_v57 }
 0x200   : > { %1606 = vrot.lane.b32.xlu2 %v1596_v29, %s4096_s13  ;;  %2516 = vmatmul.bf16.gmra.mxu3 %v4955_v52  ;;  %v3909_v29 = vld [vmem:[%s5772_s3 + $0xc8] sm:$0xff] }
 0x201   : > { %2711 = vmatpush.bf16.msra.mxu1 %v3909_v29  ;;  %v1163_v29 = vld [vmem:[#allocation2 + $0x172] sm:$0xff] }
 0x202   : > { %1602 = vrot.lane.b32.xlu1 %v1594_v33, %s4096_s13  ;;  %v1275_v59 = vpop.permute.xlu1 %1274  ;;  %v1140_v33 = vunpack.c.l.b16 %v998_v20  ;;  %v3908_v20 = vld [vmem:[%s5772_s3 + $0xc0] sm:$0xff]  ;;  %v891_v17 = vpop.permute.xlu2 %890 }
 0x203   : > { %v1381_v39 = vsel %vm226_vm0, %v4975_v62, %v1275_v59  ;;  %v1661_v4 = vsel %vm226_vm0, %v4728_v7, %v1275_v59  ;;  %v859_v40 = vpop.permute.xlu0 %858  ;;  %v3916_v59 = vld [vmem:[%s5772_s3 + $0x100] sm:$0xff]  ;;  %2623 = vmatpush.bf16.msra.mxu0 %v3900_v63 }
 0x204   : > { %v1494_v37 = vunpack.c.l.b16 %v1381_v39  ;;  %v1750_v51 = vunpack.c.l.b16 %v1661_v4  ;;  %v1001_v30 = vsel %vm226_vm0, %v4981_v44, %v859_v40  ;;  %2801 = vmatpush.bf16.msrb.mxu2 %v3916_v59  ;;  %v1162_v4 = vld [vmem:[#allocation2 + $0x162] sm:$0xff] }
 0x205   : > { %v1145_v45 = vunpack.c.l.b16 %v1001_v30  ;;  %2712 = vmatpush.bf16.msra.mxu1 %v3908_v20  ;;  %v685_v40 = vld [vmem:[#allocation2 + $0x240] sm:$0xff] }
 0x206   : > { %v2042_v9 = vpack.c.b16 %v1750_v51, %v1746_v55  ;;  %v4998_v7 = vpack.c.b16 %v1494_v37, %v1489_v42  ;;  %v686_v55 = vld [vmem:[#allocation2 + $0x250] sm:$0xff]  ;;  %v5022_v37 = vpack.c.bf16 %v685_v40, %v685_v40  ;;  %v5028_v51 = vpack.c.bf16 %v1163_v29, %v1163_v29 }
 0x207   : > { %v1980_v54 = vpack.c.b16 %v1145_v45, %v1140_v33  ;;  %v1055_v45 = vsel %vm226_vm0, %v4484_v27, %v4936_v41 }
 0x208   : > { %2486 = vmatmul.bf16.gmra.mxu2 %v2042_v9  ;;  %1648 = vrot.lane.b32.xlu2 %v1637_v28, %s4096_s13  ;;  %v1630_v9 = vunpack.c.l.b16 %v4996_v18  ;;  %v1157_v42 = vunpack.c.l.b16 %v1055_v45  ;;  %v1004_v30 = vsel %vm226_vm0, %v5022_v37, %v861_v38 }
 0x209   : > { %2456 = vmatmul.bf16.gmra.mxu0 %v1980_v54  ;;  %v5036_v54 = vpack.c.bf16 %v686_v55, %v686_v55 }
 0x20a   : > { %1644 = vrot.lane.b32.xlu1 %v4732_v23, %s4096_s13  ;;  %v941_v28 = vpop.permute.xlu1 %940  ;;  %v1638_v27 = vpack.c.b16 %v1630_v9, %v1630_v9  ;;  %v5020_v23 = vpack.c.bf16 %v1162_v4, %v1162_v4 }
 0x20b   : > { %v1052_v8 = vsel %vm226_vm0, %v4472_v21, %v941_v28  ;;  %v1277_v57 = vpop.permute.xlu0 %1276 }
 0x20c   : > { %v1152_v39 = vunpack.c.l.b16 %v1052_v8  ;;  %v1384_v21 = vsel %vm226_vm0, %v5020_v23, %v1277_v57  ;;  %v1663_v33 = vsel %vm226_vm0, %v4746_v56, %v1277_v57  ;;  %v1591_v56 = vunpack.c.l.b16 %v5022_v37 }
 0x20d   : > { %v1499_v28 = vunpack.c.l.b16 %v1384_v21  ;;  %v1150_v8 = vunpack.c.l.b16 %v1004_v30  ;;  %v1754_v57 = vunpack.c.l.b16 %v1663_v33  ;;  %v1553_v21 = vld [vmem:[#allocation2 + $0x91] sm:$0xff] }
 0x20e   : > { %v5018_v41 = vpack.c.b16 %v1157_v42, %v1152_v39  ;;  %v1599_v29 = vpack.c.b16 %v1591_v56, %v1591_v56 }
 0x210   : > { %1650 = vrot.lane.b32.xlu2 %v1638_v27, %s4096_s13  ;;  %2521 = vmatmul.bf16.gmra.mxu3 %v5018_v41  ;;  %v893_v27 = vpop.permute.xlu2 %892 }
 0x212   : > { %1646 = vrot.lane.b32.xlu1 %v4744_v12, %s4096_s13  ;;  %v1279_v63 = vpop.permute.xlu1 %1278 }
 0x213   : > { %v863_v20 = vpop.permute.xlu0 %862  ;;  %v1387_v59 = vsel %vm226_vm0, %v5028_v51, %v1279_v63  ;;  %v1665_v45 = vsel %vm226_vm0, %v4762_v34, %v1279_v63  ;;  %v1013_v34 = vsel %vm226_vm0, %v4535_v60, %v891_v17 }
 0x214   : > { %v1007_v38 = vsel %vm226_vm0, %v5036_v54, %v863_v20  ;;  %v1504_v9 = vunpack.c.l.b16 %v1387_v59  ;;  %v1758_v42 = vunpack.c.l.b16 %v1665_v45  ;;  %v1126_v33 = vunpack.c.l.b16 %v1013_v34 }
 0x215   : > { %v1155_v12 = vunpack.c.l.b16 %v1007_v38  ;;  %v1592_v59 = vunpack.c.l.b16 %v5036_v54  ;;  %v5053_v45 = vpack.c.bf16 %v1553_v21, %v1553_v21 }
 0x216   : > { %v5045_v39 = vpack.c.b16 %v1504_v9, %v1499_v28  ;;  %v2046_v40 = vpack.c.b16 %v1758_v42, %v1754_v57 }
 0x217   : > { %v1985_v4 = vpack.c.b16 %v1155_v12, %v1150_v8  ;;  %5828 = vst [vmem:[#allocation24_spill] sm:$0xff] %v5053_v45  ;;  %v1600_v38 = vpack.c.b16 %v1592_v59, %v1592_v59  ;;  %v1633_v17 = vunpack.c.l.b16 %v5053_v45 }
 0x218   : > { %2491 = vmatmul.bf16.gmra.mxu2 %v2046_v40  ;;  %v975_v9 = vpop.permute.xlu2 %974 }
 0x219   : > { %2461 = vmatmul.bf16.gmra.mxu0 %v1985_v4  ;;  %v1641_v4 = vpack.c.b16 %v1633_v17, %v1633_v17 }
 0x21a   : > { %1612 = vrot.lane.b32.xlu1 %v1599_v29, %s4096_s13  ;;  %v889_v55 = vpop.permute.xlu1 %888 }
 0x21b   : > { %v969_v63 = vpop.permute.xlu0 %968  ;;  %v1010_v30 = vsel %vm226_vm0, %v4470_v14, %v889_v55 }
 0x21c   : > { %v1121_v20 = vunpack.c.l.b16 %v1010_v30  ;;  %v1058_v56 = vsel %vm226_vm0, %v4860_v35, %v969_v63  ;;  %v1843_v14 = vsel %vm226_vm0, %v4807_v49, %v969_v63  ;;  %v1016_v49 = vsel %vm226_vm0, %v4557_v11, %v893_v27 }
 0x21d   : > { %v1123_v40 = vunpack.c.l.b16 %v1058_v56  ;;  %v1938_v29 = vunpack.c.l.b16 %v1843_v14  ;;  %v1849_v63 = vsel %vm226_vm0, %v4816_v58, %v975_v9 }
 0x21e   : > { %v1971_v28 = vpack.c.b16 %v1126_v33, %v1121_v20  ;;  %v1131_v20 = vunpack.c.l.b16 %v1016_v49 }
 0x220   : > { %2535 = vmatmul.bf16.vlgmr.msrb.gmra.mxu3 %v1971_v28  ;;  %v977_v59 = vpop.permute.xlu2 %976 }
 0x222   : > { %1614 = vrot.lane.b32.xlu1 %v1600_v38, %s4096_s13  ;;  %v1950_v38 = vunpack.c.l.b16 %v1849_v63 }
 0x223   : > { %v895_v8 = vpop.permute.xlu0 %894  ;;  %v971_v57 = vpop.permute.xlu1 %970 }
 0x224   : > { %v1061_v12 = vsel %vm226_vm0, %v4883_v6, %v971_v57  ;;  %v1845_v42 = vsel %vm226_vm0, %v4820_v5, %v971_v57  ;;  %v1019_v21 = vsel %vm226_vm0, %v4516_v47, %v895_v8  ;;  %v5829_v6 = vpack.c.b16 %v4562_v15, %v4542_v1 }
 0x225   : > { %v1128_v34 = vunpack.c.l.b16 %v1061_v12  ;;  %v1942_v55 = vunpack.c.l.b16 %v1845_v42  ;;  %v1136_v5 = vunpack.c.l.b16 %v1019_v21  ;;  %v1818_v15 = vpack.c.b16 %v4544_v2, %v4544_v2 }
 0x226   : > { %v1851_v8 = vsel %vm226_vm0, %v4834_v53, %v977_v59 }
 0x227   : > { %v1973_v35 = vpack.c.b16 %v1128_v34, %v1123_v40  ;;  %v5067_v30 = vpack.c.b16 %v1942_v55, %v1938_v29  ;;  %v1976_v1 = vpack.c.b16 %v1136_v5, %v1131_v20  ;;  %v1954_v29 = vunpack.c.l.b16 %v1851_v8  ;;  %v1196_v55 = vld [vmem:[#allocation2 + $0x192] sm:$0xff]  ;;  %v5830_v5 = vld [vmem:[#allocation4_spill] sm:$0xff] }
 0x228   : > { %3812 = vmatmul.msk.bf16.vlgmr.msrb.gmra.mxu2 %vm226_vm0, %v5829_v6  ;;  %v901_v21 = vpop.permute.xlu2 %900  ;;  %v1204_v6 = vpack.c.bf16 %v1196_v55, %v1196_v55  ;;  %v5831_v63 = vpack.c.b16 %v4607_v0, %v5830_v5 }
 0x229   : > { %2624 = vmatmul.bf16.vlgmr.msra.gmra.mxu0 %v4791_v46  ;;  %2713 = vmatmul.bf16.vlgmr.msra.gmra.mxu1 %v1973_v35  ;;  %v1195_v46 = vld [vmem:[#allocation2 + $0x182] sm:$0xff] }
 0x22a   : > { %1656 = vrot.lane.b32.xlu1 %v1641_v4, %s4096_s13  ;;  %v1203_v56 = vpack.c.bf16 %v1195_v46, %v1195_v46 }
 0x22b   : > { %v897_v33 = vpop.permute.xlu0 %896  ;;  %v973_v28 = vpop.permute.xlu1 %972 }
 0x22c   : > { %v1847_v27 = vsel %vm226_vm0, %v4839_v3, %v973_v28  ;;  %v1064_v58 = vsel %vm226_vm0, %v4907_v43, %v973_v28  ;;  %v1067_v3 = vsel %vm226_vm0, %v4968_v19, %v975_v9  ;;  %v5094_v40 = vunpack.c.l.b16 %v1203_v56  ;;  %v5110_v28 = vpop.f32.mrf.mxu3 }
 0x22d   : > { %v1946_v17 = vunpack.c.l.b16 %v1847_v27  ;;  %v1133_v12 = vunpack.c.l.b16 %v1064_v58  ;;  %v1138_v43 = vunpack.c.l.b16 %v1067_v3  ;;  %5832 = vst [vmem:[#allocation4_spill] sm:$0xff] %v5110_v28  ;;  %v1070_v56 = vsel %vm226_vm0, %v4981_v44, %v977_v59 }
 0x22e   : > { %v1797_v9 = vpack.c.b16 %v5094_v40, %v5094_v40 }
 0x22f   : > { %v5083_v14 = vpack.c.b16 %v1950_v38, %v1946_v17  ;;  %v1978_v49 = vpack.c.b16 %v1138_v43, %v1133_v12  ;;  %v5112_v38 = vunpack.c.l.b16 %v1204_v6  ;;  %v1143_v43 = vunpack.c.l.b16 %v1070_v56 }
 0x230   : > { %2540 = vmatmul.bf16.gmra.mxu3 %v1976_v1 }
 0x231   : > { %v1798_v0 = vpack.c.b16 %v5112_v38, %v5112_v38 }
 0x232   : > { %1826 = vrot.lane.b32.xlu1 %v1818_v15, %s4096_s13 }
 0x233   : > { %v979_v57 = vpop.permute.xlu0 %978  ;;  %v5124_v8 = vpop.f32.mrf.mxu2 }
 0x234   : > { %v1853_v42 = vsel %vm226_vm0, %v4855_v26, %v979_v57  ;;  %v899_v4 = vpop.permute.xlu1 %898  ;;  %v1022_v26 = vsel %vm226_vm0, %v4604_v50, %v897_v33  ;;  %v1567_v33 = vld [vmem:[#allocation2 + $0x111] sm:$0xff]  ;;  %v1073_v15 = vsel %vm226_vm0, %v5022_v37, %v979_v57  ;;  %v5128_v55 = vpop.f32.mrf.mxu3  ;;  %v1568_v57 = vld [vmem:[#allocation2 + $0x121] sm:$0xff] }
 0x235   : > { %v1958_v34 = vunpack.c.l.b16 %v1853_v42  ;;  %v1025_v53 = vsel %vm226_vm0, %v4559_v13, %v899_v4  ;;  %v1141_v27 = vunpack.c.l.b16 %v1022_v26  ;;  %v1575_v1 = vpack.c.bf16 %v1567_v33, %v1567_v33  ;;  %5833 = vst [vmem:[#allocation25_spill] sm:$0xff] %v5128_v55  ;;  %v5837_v33 = vld [vmem:[#allocation12_spill] sm:$0xff] }
 0x236   : > { %v1146_v20 = vunpack.c.l.b16 %v1025_v53  ;;  %v1148_v3 = vunpack.c.l.b16 %v1073_v15 }
 0x237   : > { %v5098_v35 = vpack.c.b16 %v1958_v34, %v1954_v29  ;;  %v5126_v4 = vunpack.c.l.b16 %v1575_v1 }
 0x238   : > { %3813 = vmatmul.msk.bf16.gmra.mxu2 %vm226_vm0, %v5831_v63  ;;  %v1981_v17 = vpack.c.b16 %v1146_v20, %v1141_v27  ;;  %v1983_v5 = vpack.c.b16 %v1148_v3, %v1143_v43  ;;  %v1576_v63 = vpack.c.bf16 %v1568_v57, %v1568_v57  ;;  %v1546_v20 = vld [vmem:[#allocation2 + $0x21] sm:$0xff]  ;;  %v5161_v43 = vunpack.c.l.b16 %v4975_v62 }
 0x239   : > { %2629 = vmatmul.bf16.gmra.mxu0 %v4836_v32  ;;  %2718 = vmatmul.bf16.gmra.mxu1 %v1978_v49  ;;  %v983_v32 = vpop.permute.xlu2 %982  ;;  %v1823_v26 = vpack.c.b16 %v5126_v4, %v5126_v4 }
 0x23a   : > { %1808 = vrot.lane.b32.xlu1 %v1797_v9, %s4096_s13  ;;  %v1857_v58 = vsel %vm226_vm0, %v4898_v61, %v983_v32  ;;  %v5834_v9 = vld [vmem:[#allocation14_spill] sm:$0xff] }
 0x23b   : > { %v903_v12 = vpop.permute.xlu0 %902  ;;  %v1966_v59 = vunpack.c.l.b16 %v1857_v58 }
 0x23c   : > { %v660_v46 = vpop.permute.xlu1 %659  ;;  %v1031_v61 = vsel %vm226_vm0, %v5834_v9, %v903_v12  ;;  %v5149_v12 = vpack.c.bf16 %v1546_v20, %v1546_v20 }
 0x23d   : > { %677 = vst.msk [vmem:[#allocation2 + $0x261] sm:$0xff] %vm226_vm0, %v660_v46  ;;  %v5836_v46 = vld [vmem:[#allocation11_spill] sm:$0xff]  ;;  %v1156_v56 = vunpack.c.l.b16 %v1031_v61 }
 0x23e   : > { %v1626_v57 = vunpack.c.l.b16 %v5149_v12 }
 0x240   : > { %2545 = vmatmul.bf16.gmra.mxu3 %v1981_v17  ;;  %v5838_v17 = vld [vmem:[#allocation7_spill] sm:$0xff] }
 0x242   : > { %1810 = vrot.lane.b32.xlu1 %v1798_v0, %s4096_s13  ;;  %v5839_v0 = vpack.c.b16 %v5837_v33, %v5838_v17  ;;  %v1589_v17 = vunpack.c.l.b16 %v4968_v19  ;;  %v1590_v19 = vunpack.c.l.b16 %v4981_v44  ;;  %v5200_v44 = vunpack.c.l.b16 %v5020_v23 }
 0x244   : > { %v981_v42 = vpop.permute.xlu1 %980  ;;  %v815_v29 = vld [vmem:[#allocation2 + $0x261] sm:$0xff] }
 0x245   : > { %v783_v34 = vld [vmem:[#allocation2 + $0x260] sm:$0xff]  ;;  %v1855_v37 = vsel %vm226_vm0, %v4869_v16, %v981_v42  ;;  %v5134_v49 = vpack.c.bf16 %v815_v29, %v815_v29  ;;  %v1028_v16 = vsel %vm226_vm0, %v5836_v46, %v901_v21  ;;  %v5151_v21 = vunpack.c.l.b16 %v1576_v63  ;;  %v1313_v63 = vpop.permute.xlu0 %1312 }
 0x246   : > { %v1962_v53 = vunpack.c.l.b16 %v1855_v37  ;;  %v791_v6 = vpack.c.bf16 %v783_v34, %v783_v34  ;;  %v1151_v29 = vunpack.c.l.b16 %v1028_v16  ;;  %v5155_v34 = vpop.f32.mrf.mxu2  ;;  %v1076_v61 = vsel %vm226_vm0, %v5036_v54, %v981_v42 }
 0x247   : > { %v1159_v1 = vunpack.c.l.b16 %v5134_v49  ;;  %v1153_v62 = vunpack.c.l.b16 %v1076_v61 }
 0x248   : > { %v5138_v27 = vpack.c.b16 %v1966_v59, %v1962_v53  ;;  %3814 = vmatmul.msk.bf16.gmra.mxu2 %vm226_vm0, %v5839_v0  ;;  %v1593_v15 = vunpack.c.l.b16 %v791_v6  ;;  %v1986_v37 = vpack.c.b16 %v1156_v56, %v1151_v29  ;;  %v1824_v59 = vpack.c.b16 %v5151_v21, %v5151_v21  ;;  %v1564_v0 = vld [vmem:[#allocation2 + $0xe1] sm:$0xff]  ;;  %v5843_v56 = vld [vmem:[#allocation5_spill] sm:$0xff] }
 0x249   : > { %2634 = vmatmul.bf16.gmra.mxu0 %v4955_v52  ;;  %2723 = vmatmul.bf16.gmra.mxu1 %v1983_v5  ;;  %v1335_v58 = vpack.c.b16 %v1159_v1, %v1159_v1  ;;  %v5153_v52 = vpop.f32.mrf.mxu3  ;;  %v1079_v53 = vsel %vm226_vm0, %v791_v6, %v983_v32  ;;  %v1794_v5 = vpack.c.b16 %v5161_v43, %v5161_v43  ;;  %v5842_v32 = vld [vmem:[#allocation15_spill] sm:$0xff] }
 0x24a   : > { %5835 = vst [vmem:[#allocation14_spill] sm:$0xff] %v5138_v27  ;;  %1836 = vrot.lane.b32.xlu1 %v1823_v26, %s4096_s13  ;;  %v1601_v3 = vpack.c.b16 %v1593_v15, %v1593_v15  ;;  %v1634_v26 = vpack.c.b16 %v1626_v57, %v1626_v57  ;;  %v1158_v20 = vunpack.c.l.b16 %v1079_v53  ;;  %v1989_v6 = vpack.c.b16 %v1159_v1, %v5842_v32  ;;  %v1337_v57 = vpop.permute.xlu2 %1336 }
 0x24b   : > { %5840 = vst [vmem:[#allocation11_spill] sm:$0xff] %v5153_v52  ;;  %1350 = vrot.lane.b32.xlu0 %v1335_v58, %s4096_s13  ;;  %v1597_v15 = vpack.c.b16 %v1589_v17, %v1589_v17  ;;  %v1819_v58 = vpack.c.b16 %v5843_v56, %v5843_v56  ;;  %v1426_v17 = vsel %vm226_vm0, %v4615_v10, %v1337_v57 }
 0x24c   : > { %1616 = vrot.lane.b32.xlu2 %v1601_v3, %s4096_s13  ;;  %v1988_v54 = vpack.c.b16 %v1158_v20, %v1153_v62  ;;  %v1315_v42 = vpop.permute.xlu1 %1314  ;;  %v1572_v3 = vpack.c.bf16 %v1564_v0, %v1564_v0  ;;  %v5846_v20 = vld [vmem:[#allocation3_spill] sm:$0xff] }
 0x24d   : > { %v1339_v1 = vpop.permute.xlu0 %1338  ;;  %v1402_v62 = vsel %vm226_vm0, %v5846_v20, %v1313_v63  ;;  %v1491_v63 = vunpack.c.l.b16 %v1426_v17 }
 0x24e   : > { %v5175_v33 = vpop.f32.mrf.mxu2  ;;  %v1429_v61 = vsel %vm226_vm0, %v4629_v31, %v1339_v1 }
 0x250   : > { %2550 = vmatmul.bf16.gmra.mxu3 %v1986_v37  ;;  %v1197_v37 = vld [vmem:[#allocation2 + $0x1a2] sm:$0xff] }
 0x251   : > { %v5173_v16 = vpop.f32.mrf.mxu3 }
 0x252   : > { %1838 = vrot.lane.b32.xlu1 %v1824_v59, %s4096_s13  ;;  %5841 = vst [vmem:[#allocation12_spill] sm:$0xff] %v5173_v16  ;;  %v5845_v59 = vld [vmem:[#allocation6_spill] sm:$0xff]  ;;  %v1319_v17 = vpop.permute.xlu2 %1318 }
 0x253   : > { %1642 = vrot.lane.b32.xlu0 %v1634_v26, %s4096_s13  ;;  %v1405_v53 = vsel %vm226_vm0, %v5845_v59, %v1315_v42  ;;  %v1496_v42 = vunpack.c.l.b16 %v1429_v61 }
 0x254   : > { %1802 = vrot.lane.b32.xlu2 %v1794_v5, %s4096_s13  ;;  %v5195_v5 = vunpack.c.l.b16 %v1572_v3  ;;  %v1317_v0 = vpop.permute.xlu1 %1316  ;;  %v2010_v3 = vpack.c.b16 %v5200_v44, %v5161_v43 }
 0x256   : > { %v5193_v26 = vpop.f32.mrf.mxu2  ;;  %v1820_v31 = vpack.c.b16 %v5195_v5, %v5195_v5 }
 0x258   : > { %3815 = vmatmul.msk.bf16.gmra.mxu2 %vm226_vm0, %v1989_v6  ;;  %v1205_v6 = vpack.c.bf16 %v1197_v37, %v1197_v37  ;;  %v1198_v37 = vld [vmem:[#allocation2 + $0x1b2] sm:$0xff] }
 0x259   : > { %2639 = vmatmul.bf16.gmra.mxu0 %v5018_v41  ;;  %2728 = vmatmul.bf16.gmra.mxu1 %v1988_v54  ;;  %v5185_v29 = vpop.f32.mrf.mxu3  ;;  %v1551_v41 = vld [vmem:[#allocation2 + $0x71] sm:$0xff]  ;;  %v1598_v54 = vpack.c.b16 %v1590_v19, %v1590_v19  ;;  %v1552_v19 = vld [vmem:[#allocation2 + $0x81] sm:$0xff] }
 0x25a   : > { %5844 = vst [vmem:[#allocation7_spill] sm:$0xff] %v5185_v29  ;;  %v5202_v32 = vpack.c.bf16 %v1551_v41, %v1551_v41  ;;  %v5215_v1 = vunpack.c.l.b16 %v1205_v6  ;;  %v5217_v41 = vpack.c.b16 %v1496_v42, %v1491_v63  ;;  %v5225_v61 = vpack.c.bf16 %v1552_v19, %v1552_v19  ;;  %v5849_v63 = vld [vmem:[#allocation8_spill] sm:$0xff] }
 0x25b   : > { %1608 = vrot.lane.b32.xlu0 %v1597_v15, %s4096_s13  ;;  %v1490_v15 = vunpack.c.l.b16 %v1402_v62  ;;  %v1206_v6 = vpack.c.bf16 %v1198_v37, %v1198_v37  ;;  %v5851_v37 = vld [vmem:[#allocation10_spill] sm:$0xff] }
 0x25c   : > { %1828 = vrot.lane.b32.xlu2 %v1819_v58, %s4096_s13  ;;  %v1631_v10 = vunpack.c.l.b16 %v5202_v32  ;;  %5848 = vst [vmem:[#allocation5_spill] sm:$0xff] %v5225_v61  ;;  %v1799_v62 = vpack.c.b16 %v5215_v1, %v5215_v1 }
 0x25d   : > { %v5234_v42 = vunpack.c.l.b16 %v1206_v6 }
 0x25e   : > { %v1639_v43 = vpack.c.b16 %v1631_v10, %v1631_v10 }
 0x260   : > { %2555 = vmatmul.bf16.gmra.mxu3 %v4998_v7  ;;  %v1495_v7 = vunpack.c.l.b16 %v1405_v53 }
 0x261   : > { %v5219_v57 = vpop.f32.mrf.mxu3 }
 0x262   : > { %v2008_v58 = vpack.c.b16 %v1495_v7, %v1490_v15  ;;  %5847 = vst [vmem:[#allocation15_spill] sm:$0xff] %v5219_v57  ;;  %v1341_v15 = vpop.permute.xlu0 %1340 }
 0x263   : > { %1610 = vrot.lane.b32.xlu0 %v1598_v54, %s4096_s13  ;;  %v5221_v53 = vpop.f32.mrf.mxu2  ;;  %v1343_v54 = vpop.permute.xlu1 %1342  ;;  %v1432_v6 = vsel %vm226_vm0, %v4652_v48, %v1341_v15 }
 0x264   : > { %1830 = vrot.lane.b32.xlu2 %v1820_v31, %s4096_s13  ;;  %v1632_v31 = vunpack.c.l.b16 %v5225_v61  ;;  %v1435_v10 = vsel %vm226_vm0, %v4667_v36, %v1343_v54  ;;  %v1502_v36 = vunpack.c.l.b16 %v5028_v51  ;;  %v1501_v54 = vunpack.c.l.b16 %v1432_v6 }
 0x265   : > { %v5210_v23 = vpop.f32.mrf.mxu0  ;;  %v1506_v16 = vunpack.c.l.b16 %v1435_v10  ;;  %v1795_v10 = vpack.c.b16 %v5200_v44, %v5200_v44 }
 0x266   : > { %v2015_v15 = vpack.c.b16 %v5094_v40, %v1502_v36 }
 0x268   : > { %3816 = vmatmul.msk.bf16.gmra.mxu2 %vm226_vm0, %v2010_v3  ;;  %v1569_v3 = vld [vmem:[#allocation2 + $0x131] sm:$0xff] }
 0x269   : > { %2644 = vmatmul.bf16.gmra.mxu0 %v2008_v58  ;;  %2733 = vmatmul.bf16.gmra.mxu1 %v5217_v41  ;;  %v1408_v58 = vsel %vm226_vm0, %v5849_v63, %v1317_v0  ;;  %v5241_v19 = vpop.f32.mrf.mxu3  ;;  %v1800_v0 = vpack.c.b16 %v5234_v42, %v5234_v42 }
 0x26a   : > { %5850 = vst [vmem:[#allocation6_spill] sm:$0xff] %v5241_v19  ;;  %v1500_v57 = vunpack.c.l.b16 %v1408_v58  ;;  %v5259_v19 = vpack.c.b16 %v1506_v16, %v1501_v54  ;;  %v1323_v40 = vpop.permute.xlu0 %1322  ;;  %v5856_v54 = vld [vmem:[#allocation16_spill] sm:$0xff] }
 0x26b   : > { %1652 = vrot.lane.b32.xlu0 %v1639_v43, %s4096_s13  ;;  %v1411_v43 = vsel %vm226_vm0, %v5851_v37, %v1319_v17  ;;  %v5247_v29 = vpop.f32.mrf.mxu2  ;;  %v1321_v17 = vpop.permute.xlu2 %1320 }
 0x26c   : > { %1812 = vrot.lane.b32.xlu2 %v1799_v62, %s4096_s13  ;;  %v1640_v62 = vpack.c.b16 %v1632_v31, %v1632_v31  ;;  %v1505_v52 = vunpack.c.l.b16 %v1411_v43  ;;  %v1345_v16 = vpop.permute.xlu1 %1344 }
 0x26d   : > { %v5231_v7 = vpop.f32.mrf.mxu0  ;;  %v1438_v44 = vsel %vm226_vm0, %v4705_v25, %v1345_v16 }
 0x26e   : > { %v2013_v48 = vpack.c.b16 %v1505_v52, %v1500_v57 }
 0x270   : > { %2560 = vmatmul.bf16.gmra.mxu3 %v5045_v39  ;;  %v1577_v39 = vpack.c.bf16 %v1569_v3, %v1569_v3 }
 0x271   : > { %v5265_v51 = vpop.f32.mrf.mxu3 }
 0x272   : > { %v5257_v58 = vunpack.c.l.b16 %v1577_v39  ;;  %5852 = vst [vmem:[#allocation3_spill] sm:$0xff] %v5265_v51  ;;  %v1565_v39 = vld [vmem:[#allocation2 + $0xf1] sm:$0xff] }
 0x273   : > { %1654 = vrot.lane.b32.xlu0 %v1640_v62, %s4096_s13  ;;  %v1347_v43 = vpop.permute.xlu2 %1346  ;;  %v5854_v62 = vld [vmem:[#allocation13_spill] sm:$0xff]  ;;  %v1573_v28 = vpack.c.bf16 %v1565_v39, %v1565_v39 }
 0x274   : > { %1814 = vrot.lane.b32.xlu2 %v1800_v0, %s4096_s13  ;;  %v1825_v3 = vpack.c.b16 %v5257_v58, %v5257_v58  ;;  %v1417_v6 = vsel %vm226_vm0, %v5854_v62, %v1323_v40  ;;  %v5855_v0 = vld [vmem:[#allocation9_spill] sm:$0xff]  ;;  %v1511_v40 = vunpack.c.l.b16 %v1438_v44 }
 0x275   : > { %v5293_v16 = vunpack.c.l.b16 %v1573_v28  ;;  %v1199_v28 = vld [vmem:[#allocation2 + $0x1c2] sm:$0xff] }
 0x276   : > { %v5254_v31 = vpop.f32.mrf.mxu0 }
 0x278   : > { %3817 = vmatmul.msk.bf16.gmra.mxu2 %vm226_vm0, %v2015_v15  ;;  %v1441_v15 = vsel %vm226_vm0, %v4716_v24, %v1347_v43  ;;  %v1327_v43 = vpop.permute.xlu1 %1326 }
 0x279   : > { %2649 = vmatmul.bf16.gmra.mxu0 %v2013_v48  ;;  %2738 = vmatmul.bf16.gmra.mxu1 %v5259_v19  ;;  %v1414_v48 = vsel %vm226_vm0, %v5856_v54, %v1321_v17  ;;  %v2020_v17 = vpack.c.b16 %v5215_v1, %v5112_v38 }
 0x27a   : > { %v1510_v61 = vunpack.c.l.b16 %v1414_v48  ;;  %v1325_v48 = vpop.permute.xlu0 %1324 }
 0x27b   : > { %v5269_v52 = vpop.f32.mrf.mxu2  ;;  %1804 = vrot.lane.b32.xlu0 %v1795_v10, %s4096_s13  ;;  %v1796_v10 = vpack.c.b16 %v1502_v36, %v1502_v36  ;;  %v1566_v36 = vld [vmem:[#allocation2 + $0x101] sm:$0xff]  ;;  %v5305_v38 = vpop.permute.xlu2 %1348 }
 0x27c   : > { %5853 = vst [vmem:[#allocation8_spill] sm:$0xff] %v5269_v52  ;;  %1840 = vrot.lane.b32.xlu2 %v1825_v3, %s4096_s13  ;;  %v1515_v3 = vunpack.c.l.b16 %v1417_v6  ;;  %v1821_v6 = vpack.c.b16 %v5293_v16, %v5293_v16  ;;  %v1574_v44 = vpack.c.bf16 %v1566_v36, %v1566_v36 }
 0x27e   : > { %v5273_v57 = vpop.f32.mrf.mxu0  ;;  %v2018_v25 = vpack.c.b16 %v1515_v3, %v1510_v61  ;;  %v1207_v3 = vpack.c.bf16 %v1199_v28, %v1199_v28 }
 0x280   : > { %2565 = vmatmul.bf16.gmra.mxu3 %v5855_v0  ;;  %v1516_v0 = vunpack.c.l.b16 %v1441_v15  ;;  %v5310_v15 = vunpack.c.l.b16 %v1574_v44  ;;  %v1603_v44 = vpop.permute.xlu1 %1602 }
 0x282   : > { %v5295_v24 = vpack.c.b16 %v1516_v0, %v1511_v40  ;;  %v5862_v0 = vld [vmem:[#allocation17_spill] sm:$0xff] }
 0x283   : > { %v5284_v51 = vpop.f32.mrf.mxu2  ;;  %v5286_v55 = vpop.f32.mrf.mxu3  ;;  %1806 = vrot.lane.b32.xlu0 %v1796_v10, %s4096_s13  ;;  %v5861_v10 = vld [vmem:[#allocation18_spill] sm:$0xff] }
 0x284   : > { %5857 = vst [vmem:[#allocation10_spill] sm:$0xff] %v5284_v51  ;;  %v1423_v40 = vsel %vm226_vm0, %v5861_v10, %v1327_v43  ;;  %v1605_v28 = vpop.permute.xlu2 %1604 }
 0x285   : > { %5858 = vst [vmem:[#allocation13_spill] sm:$0xff] %v5286_v55  ;;  %v1525_v36 = vunpack.c.l.b16 %v1423_v40  ;;  %v1677_v52 = vsel %vm226_vm0, %v5845_v59, %v1605_v28 }
 0x286   : > { %v5289_v45 = vpop.f32.mrf.mxu0 }
 0x288   : > { %3818 = vmatmul.msk.bf16.gmra.mxu2 %vm226_vm0, %v2020_v17 }
 0x289   : > { %2654 = vmatmul.bf16.gmra.mxu0 %v2018_v25  ;;  %2743 = vmatmul.bf16.gmra.mxu1 %v5295_v24  ;;  %v5863_v25 = vld [vmem:[#allocation19_spill] sm:$0xff] }
 0x28a   : > { %v1420_v17 = vsel %vm226_vm0, %v5863_v25, %v1325_v48 }
 0x28b   : > { %v5301_v39 = vpop.f32.mrf.mxu2  ;;  %v5303_v61 = vpop.f32.mrf.mxu3  ;;  %1832 = vrot.lane.b32.xlu0 %v1821_v6, %s4096_s13  ;;  %v1520_v51 = vunpack.c.l.b16 %v1420_v17 }
 0x28c   : > { %5859 = vst [vmem:[#allocation9_spill] sm:$0xff] %v5301_v39  ;;  %v1527_v39 = vunpack.c.l.b16 %v1207_v3 }
 0x28d   : > { %5860 = vst [vmem:[#allocation16_spill] sm:$0xff] %v5303_v61  ;;  %v1822_v61 = vpack.c.b16 %v5310_v15, %v5310_v15  ;;  %v2023_v48 = vpack.c.b16 %v1525_v36, %v1520_v51 }
 0x28e   : > { %v5308_v1 = vpop.f32.mrf.mxu0  ;;  %v2025_v40 = vpack.c.b16 %v1527_v39, %v5234_v42  ;;  %v5342_v42 = vld [vmem:[%s5773_s4] ss:$0 sm:$0xff] }
 0x28f   : > { %v2448_v59 = vadd.f32 %v5342_v42, %v5210_v23 }
 0x290   : > { %2570 = vmatmul.bf16.gmra.mxu3 %v5862_v0  ;;  %v1675_v0 = vsel %vm226_vm0, %v5846_v20, %v1603_v44 }
 0x291   : > { %v1747_v3 = vunpack.c.l.b16 %v1675_v0  ;;  %v2450_v0 = vadd.f32 %v5342_v42, %v5231_v7 }
 0x293   : > { %v5319_v55 = vpop.f32.mrf.mxu2  ;;  %v5321_v6 = vpop.f32.mrf.mxu3  ;;  %1834 = vrot.lane.b32.xlu0 %v1822_v61, %s4096_s13  ;;  %v1751_v61 = vunpack.c.l.b16 %v1677_v52 }
 0x294   : > { %5864 = vst [vmem:[#allocation18_spill] sm:$0xff] %v5319_v55 }
 0x295   : > { %5865 = vst [vmem:[#allocation17_spill] sm:$0xff] %v5321_v6  ;;  %v1801_v6 = vpack.c.b16 %v1527_v39, %v1527_v39  ;;  %v2043_v20 = vpack.c.b16 %v1751_v61, %v1747_v3 }
 0x296   : > { %v5324_v43 = vpop.f32.mrf.mxu0 }
 0x298   : > { %3819 = vmatmul.msk.bf16.gmra.mxu2 %vm226_vm0, %v2025_v40 }
 0x299   : > { %2659 = vmatmul.bf16.gmra.mxu0 %v2023_v48 }
 0x29b   : > { %v5332_v17 = vpop.f32.mrf.mxu3  ;;  %v5334_v55 = vpop.f32.mrf.mxu2  ;;  %1816 = vrot.lane.b32.xlu0 %v1801_v6, %s4096_s13  ;;  %v5869_v6 = vpack.c.b16 %v5843_v56, %v4544_v2  ;;  %s3863_s13 = sshll.u32 %s5896_s19, 8 }
 0x29c   : > { %5866 = vst [vmem:[#allocation19_spill] sm:$0xff] %v5332_v17  ;;  %s5389_s15 = scalar_lea.vmem %s5774_s5, %s3863_s13 }
 0x29d   : > { %5867 = vst [vmem:[#allocation26_spill] sm:$0xff] %v5334_v55 }
 0x29e   : > { %v5337_v27 = vpop.f32.mrf.mxu0 }
 0x2a0   : > { %2575 = vmatmul.bf16.gmra.mxu3 %v2043_v20 }
 0x2a3   : > { %v2536_v51 = vpop.f32.mrf.mxu3  ;;  %v5346_v39 = vpop.f32.mrf.mxu2 }
 0x2a4   : > { %5868 = vst [vmem:[#allocation27_spill] sm:$0xff] %v5346_v39  ;;  %v2537_v52 = vadd.f32 %v2536_v51, %v2448_v59 }
 0x2a6   : > { %v2625_v36 = vpop.f32.mrf.mxu0  ;;  %v2714_v28 = vpop.f32.mrf.mxu1 }
 0x2a7   : > { %v2626_v44 = vadd.f32 %v2625_v36, %v2537_v52 }
 0x2a8   : > { %3820 = vmatmul.msk.bf16.gmra.mxu2 %vm226_vm0, %v5869_v6 }
 0x2a9   : > { %2664 = vmatmul.bf16.gmra.mxu0 %v5217_v41  ;;  %v2715_v48 = vadd.f32 %v2714_v28, %v2626_v44  ;;  %v2453_v41 = vadd.f32 %v5342_v42, %v5254_v31  ;;  %v2455_v31 = vadd.f32 %v5342_v42, %v5273_v57  ;;  %v5870_v57 = vld [vmem:[#allocation22_spill] sm:$0xff] }
 0x2ab   : > { %v2538_v40 = vpop.f32.mrf.mxu3  ;;  %v2803_v23 = vpop.f32.mrf.mxu2 }
 0x2ac   : > { %v2539_v3 = vadd.f32 %v2538_v40, %v2450_v0  ;;  %v2804_v61 = vadd.f32 %v2803_v23, %v2715_v48  ;;  %v2049_v0 = vpack.c.b16 %v5293_v16, %v5195_v5  ;;  %v1444_v5 = vsel %vm226_vm0, %v4734_v22, %v5305_v38  ;;  %v1530_v38 = vld [vmem:[#allocation2 + $0xd0] sm:$0xff] }
 0x2ad   : > { %v2458_v22 = vadd.f32 %v5342_v42, %v5289_v45 }
 0x2ae   : > { %v2627_v20 = vpop.f32.mrf.mxu0  ;;  %v3828_v59 = vmul.f32 -1.442695, %v2804_v61  ;;  %v2716_v52 = vpop.f32.mrf.mxu1 }
 0x2af   : > { %v2628_v51 = vadd.f32 %v2627_v20, %v2539_v3  ;;  %v1645_v20 = vpop.permute.xlu1 %1644 }
 0x2b0   : > { %3959 = vpow2.f32 %v3828_v59 }
 0x2b1   : > { %v2717_v36 = vadd.f32 %v2716_v52, %v2628_v51 }
 0x2b3   : > { %v2541_v2 = vpop.f32.mrf.mxu3  ;;  %v2805_v56 = vpop.f32.mrf.mxu2 }
 0x2b4   : > { %v2542_v6 = vadd.f32 %v2541_v2, %v2453_v41  ;;  %v2806_v17 = vadd.f32 %v2805_v56, %v2717_v36  ;;  %v1521_v2 = vunpack.c.l.b16 %v1444_v5  ;;  %v1538_v5 = vpack.c.bf16 %v1530_v38, %v1530_v38 }
 0x2b6   : > { %v2630_v39 = vpop.f32.mrf.mxu0  ;;  %v3960_v7 = vpop.eup %3959  ;;  %v3829_v44 = vmul.f32 -1.442695, %v2806_v17 }
 0x2b7   : > { %v2631_v28 = vadd.f32 %v2630_v39, %v2542_v6  ;;  %v2719_v55 = vpop.f32.mrf.mxu1  ;;  %v5359_v48 = vadd.f32 1.0, %v3960_v7 }
 0x2b8   : > { %3961 = vpow2.f32 %v3829_v44  ;;  %3821 = vmatmul.msk.bf16.gmra.mxu2 %vm226_vm0, %v2049_v0 }
 0x2b9   : > { %2669 = vmatmul.bf16.gmra.mxu0 %v5259_v19  ;;  %3963 = vrcp.f32 %v5359_v48  ;;  %v2720_v40 = vadd.f32 %v2719_v55, %v2631_v28  ;;  %vm3016_vm3 = vweird.f32 %v5359_v48 }
 0x2bb   : > { %v2543_v23 = vpop.f32.mrf.mxu3  ;;  %v2808_v17 = vpop.f32.mrf.mxu2 }
 0x2bc   : > { %v2544_v39 = vadd.f32 %v2543_v23, %v2455_v31  ;;  %v2809_v3 = vadd.f32 %v2808_v17, %v2720_v40  ;;  %v3022_v31 = vand.u32 2147483648, %v5359_v48  ;;  %v1607_v17 = vpop.permute.xlu2 %1606 }
 0x2bd   : > { %v1351_v59 = vpop.permute.xlu0 %1350 }
 0x2be   : > { %v2632_v16 = vpop.f32.mrf.mxu0  ;;  %v3962_v61 = vpop.eup %3961  ;;  %v3830_v19 = vmul.f32 -1.442695, %v2809_v3  ;;  %v1447_v55 = vsel %vm226_vm0, %v5870_v57, %v1351_v59  ;;  %v3020_v3 = vand.u32 2147483647, %v5359_v48 }
 0x2bf   : > { %v2633_v51 = vadd.f32 %v2632_v16, %v2544_v39  ;;  %v3964_v52 = vpop.eup %3963  ;;  %v5369_v41 = vadd.f32 1.0, %v3962_v61  ;;  %v2721_v36 = vpop.f32.mrf.mxu1  ;;  %v1526_v6 = vunpack.c.l.b16 %v1447_v55  ;;  %v2053_v55 = vpack.c.b16 %v5126_v4, %v5310_v15 }
 0x2c0   : > { %v3012_v56 = vmul.f32 %v3964_v52, %v5359_v48  ;;  %3965 = vpow2.f32 %v3830_v19  ;;  %vm3017_vm2 = vweird.f32 %v3964_v52  ;;  %vm3021_vm6 = vcmp.eq.f32.partialorder %v3020_v3, 8.507059e+37 }
 0x2c1   : > { %3967 = vrcp.f32 %v5369_v41  ;;  %v2722_v44 = vadd.f32 %v2721_v36, %v2633_v51  ;;  %v5377_v28 = vpack.c.b16 %v1526_v6, %v1521_v2  ;;  %v1529_v51 = vld [vmem:[#allocation2 + $0xc0] sm:$0xff]  ;;  %vm3018_vm4 = vmor %vm3016_vm3, %vm3017_vm2  ;;  %v3023_v2 = vor.u32 1.1754944e-38, %v3022_v31 }
 0x2c2   : > { %v3013_v7 = vsub.f32 1.0, %v3012_v56  ;;  %v2460_v15 = vadd.f32 %v5342_v42, %v5308_v1  ;;  %v3037_v31 = vand.u32 2147483648, %v5369_v41  ;;  %v3035_v1 = vand.u32 2147483647, %v5369_v41 }
 0x2c3   : > { %v2546_v0 = vpop.f32.mrf.mxu3  ;;  %v2810_v40 = vpop.f32.mrf.mxu2  ;;  %2748 = vmatmul.bf16.gmra.mxu1 %v5377_v28  ;;  %vm3031_vm8 = vweird.f32 %v5369_v41 }
 0x2c4   : > { %v2547_v23 = vadd.f32 %v2546_v0, %v2458_v22  ;;  %v3014_v39 = vmul.f32 %v3964_v52, %v3013_v7  ;;  %v2811_v45 = vadd.f32 %v2810_v40, %v2722_v44  ;;  %v5394_v22 = vpop.permute.xlu1 %1646  ;;  %v1537_v44 = vpack.c.bf16 %v1529_v51, %v1529_v51 }
 0x2c5   : > { %v1643_v57 = vpop.permute.xlu0 %1642  ;;  %v1695_v0 = vsel %vm226_vm0, %v1538_v5, %v1645_v20  ;;  %vm3036_vm10 = vcmp.eq.f32.partialorder %v3035_v1, 8.507059e+37 }
 0x2c6   : > { %v2635_v16 = vpop.f32.mrf.mxu0  ;;  %v3966_v61 = vpop.eup %3965  ;;  %v3015_v19 = vadd.f32 %v3964_v52, %v3014_v39  ;;  %v3831_v59 = vmul.f32 -1.442695, %v2811_v45 }
 0x2c7   : > { %v3968_v36 = vpop.eup %3967  ;;  %v5392_v56 = vadd.f32 1.0, %v3966_v61  ;;  %v2636_v48 = vadd.f32 %v2635_v16, %v2547_v23  ;;  %v2724_v6 = vpop.f32.mrf.mxu1  ;;  %v1692_v23 = vsel %vm226_vm0, %v1537_v44, %v1643_v57  ;;  %v1679_v16 = vsel %vm226_vm0, %v5849_v63, %v1607_v17 }
 0x2c8   : > { %v3019_v38 = vsel %vm3018_vm4, %v3964_v52, %v3015_v19  ;;  %v3027_v4 = vmul.f32 %v3968_v36, %v5369_v41  ;;  %3969 = vpow2.f32 %v3831_v59  ;;  %3822 = vmatmul.msk.bf16.gmra.mxu2 %vm226_vm0, %v2053_v55  ;;  %vm3032_vm7 = vweird.f32 %v3968_v36  ;;  %v5410_v59 = vpop.permute.xlu2 %1648 }
 0x2c9   : > { %2674 = vmatmul.bf16.gmra.mxu0 %v5295_v24  ;;  %v3024_v7 = vsel %vm3021_vm6, %v3023_v2, %v3019_v38  ;;  %3971 = vrcp.f32 %v5392_v56  ;;  %v2725_v24 = vadd.f32 %v2724_v6, %v2636_v48  ;;  %v1752_v61 = vunpack.c.l.b16 %v1695_v0  ;;  %vm3033_vm9 = vmor %vm3031_vm8, %vm3032_vm7 }
 0x2ca   : > { %3492 = vst.msk [vmem:[%s5389_s15] sm:$0xff] %vm3491_vm5, %v3024_v7  ;;  %v3028_v52 = vsub.f32 1.0, %v3027_v4  ;;  %v3038_v57 = vor.u32 1.1754944e-38, %v3037_v31  ;;  %v1748_v55 = vunpack.c.l.b16 %v1692_v23  ;;  %v1755_v41 = vunpack.c.l.b16 %v1679_v16 }
 0x2cb   : > { %v2548_v40 = vpop.f32.mrf.mxu3  ;;  %v2813_v39 = vpop.f32.mrf.mxu2  ;;  %v2463_v0 = vadd.f32 %v5342_v42, %v5324_v43  ;;  %v1532_v43 = vld [vmem:[#allocation2 + $0xf0] sm:$0xff]  ;;  %vm3046_vm12 = vweird.f32 %v5392_v56 }
 0x2cc   : > { %v2549_v3 = vadd.f32 %v2548_v40, %v2460_v15  ;;  %v3029_v45 = vmul.f32 %v3968_v36, %v3028_v52  ;;  %v2814_v20 = vadd.f32 %v2813_v39, %v2725_v24  ;;  %v5421_v31 = vpop.permute.xlu1 %1612  ;;  %v3052_v24 = vand.u32 2147483648, %v5392_v56 }
 0x2cd   : > { %v1609_v2 = vpop.permute.xlu0 %1608 }
 0x2ce   : > { %v2637_v5 = vpop.f32.mrf.mxu0  ;;  %v3970_v19 = vpop.eup %3969  ;;  %v3030_v51 = vadd.f32 %v3968_v36, %v3029_v45  ;;  %v3832_v38 = vmul.f32 -1.442695, %v2814_v20  ;;  %v1681_v63 = vsel %vm226_vm0, %v5851_v37, %v1609_v2  ;;  %v2044_v37 = vpack.c.b16 %v1752_v61, %v1748_v55 }
 0x2cf   : > { %v3972_v48 = vpop.eup %3971  ;;  %v5413_v6 = vadd.f32 1.0, %v3970_v19  ;;  %v2638_v17 = vadd.f32 %v2637_v5, %v2549_v3  ;;  %v2726_v4 = vpop.f32.mrf.mxu1  ;;  %v1759_v44 = vunpack.c.l.b16 %v1681_v63  ;;  %v3050_v20 = vand.u32 2147483647, %v5392_v56  ;;  %v5429_v5 = vld [vmem:[#allocation2 + $0x22] sm:$0xff] }
 0x2d0   : > { %v3034_v15 = vsel %vm3033_vm9, %v3968_v36, %v3030_v51  ;;  %v3042_v7 = vmul.f32 %v3972_v48, %v5392_v56  ;;  %v5425_v36 = vld [vmem:[#allocation2 + $0x52] sm:$0xff]  ;;  %vm3047_vm11 = vweird.f32 %v3972_v48  ;;  %v1531_v19 = vld [vmem:[#allocation2 + $0xe0] sm:$0xff]  ;;  %v2057_v63 = vpack.c.b16 %v5257_v58, %v5151_v21 }
 0x2d1   : > { %v3039_v52 = vsel %vm3036_vm10, %v3038_v57, %v3034_v15  ;;  %3973 = vrcp.f32 %v5413_v6  ;;  %v2727_v39 = vadd.f32 %v2726_v4, %v2638_v17  ;;  %v2047_v3 = vpack.c.b16 %v1759_v44, %v1755_v41  ;;  %vm3048_vm13 = vmor %vm3046_vm12, %vm3047_vm11 }
 0x2d2   : > { %3493 = vst.msk [vmem:[%s5389_s15 + $0x8] sm:$0xff] %vm3491_vm5, %v3039_v52  ;;  %v3043_v40 = vsub.f32 1.0, %v3042_v7  ;;  %3975 = vpow2.f32 %v3832_v38  ;;  %v1789_v57 = vpack.c.bf16 %v5425_v36, %v5425_v36  ;;  %v1540_v4 = vpack.c.bf16 %v1532_v43, %v1532_v43  ;;  %v5441_v52 = vpop.permute.xlu2 %1650 }
 0x2d3   : > { %v2551_v23 = vpop.f32.mrf.mxu3  ;;  %v2815_v45 = vpop.f32.mrf.mxu2  ;;  %2753 = vmatmul.bf16.gmra.mxu1 %v2044_v37  ;;  %2580 = vmatmul.bf16.gmra.mxu3 %v2047_v3  ;;  %v3053_v15 = vor.u32 1.1754944e-38, %v3052_v24  ;;  %v1786_v41 = vpack.c.bf16 %v5429_v5, %v5429_v5  ;;  %v1539_v56 = vpack.c.bf16 %v1531_v19, %v1531_v19  ;;  %vm3051_vm14 = vcmp.eq.f32.partialorder %v3050_v20, 8.507059e+37 }
 0x2d4   : > { %v2552_v1 = vadd.f32 %v2551_v23, %v2463_v0  ;;  %v3044_v16 = vmul.f32 %v3972_v48, %v3043_v40  ;;  %v2816_v61 = vadd.f32 %v2815_v45, %v2727_v39  ;;  %v1701_v58 = vsel %vm226_vm0, %v1540_v4, %v5410_v59  ;;  %v1779_v45 = vld [vmem:[#allocation2 + $0x32] sm:$0xff]  ;;  %v5462_v20 = vpop.permute.xlu1 %1614 }
 0x2d5   : > { %v1611_v2 = vpop.permute.xlu0 %1610  ;;  %v1698_v24 = vsel %vm226_vm0, %v1539_v56, %v5394_v22  ;;  %v3065_v43 = vand.u32 2147483647, %v5413_v6  ;;  %v3067_v59 = vand.u32 2147483648, %v5413_v6  ;;  %vm3061_vm1 = vweird.f32 %v5413_v6 }
 0x2d6   : > { %v2640_v51 = vpop.f32.mrf.mxu0  ;;  %v3045_v55 = vadd.f32 %v3972_v48, %v3044_v16  ;;  %v3833_v7 = vmul.f32 -1.442695, %v2816_v61  ;;  %v1683_v16 = vsel %vm226_vm0, %v5856_v54, %v1611_v2  ;;  %v1756_v61 = vunpack.c.l.b16 %v1698_v24 }
 0x2d7   : > { %v2641_v38 = vadd.f32 %v2640_v51, %v2552_v1  ;;  %v5436_v17 = vpop.eup %3973  ;;  %v2729_v44 = vpop.f32.mrf.mxu1  ;;  %v1780_v1 = vld [vmem:[#allocation2 + $0x42] sm:$0xff]  ;;  %v1685_v51 = vsel %vm226_vm0, %v5854_v62, %v5421_v31  ;;  %v1763_v56 = vunpack.c.l.b16 %v1683_v16  ;;  %v1941_v31 = vunpack.c.l.b16 %v1786_v41 }
 0x2d8   : > { %v3976_v0 = vpop.eup %3975  ;;  %v3049_v40 = vsel %vm3048_vm13, %v3972_v48, %v3045_v55  ;;  %v3057_v21 = vmul.f32 %v5436_v17, %v5413_v6  ;;  %3823 = vmatmul.msk.bf16.gmra.mxu2 %vm226_vm0, %v2057_v63  ;;  %3977 = vpow2.f32 %v3833_v7  ;;  %v2465_v48 = vadd.f32 %v5342_v42, %v5337_v27 }
 0x2d9   : > { %2679 = vmatmul.bf16.gmra.mxu0 %v5377_v28  ;;  %v3054_v37 = vsel %vm3051_vm14, %v3053_v15, %v3049_v40  ;;  %v5449_v23 = vadd.f32 1.0, %v3976_v0  ;;  %v2730_v3 = vadd.f32 %v2729_v44, %v2641_v38  ;;  %vm3062_vm15 = vweird.f32 %v5436_v17 }
 0x2da   : > { %3494 = vst.msk [vmem:[%s5389_s15 + $0x10] sm:$0xff] %vm3491_vm5, %v3054_v37  ;;  %v3058_v39 = vsub.f32 1.0, %v3057_v21  ;;  %v1787_v38 = vpack.c.bf16 %v1779_v45, %v1779_v45  ;;  %v1788_v63 = vpack.c.bf16 %v1780_v1, %v1780_v1  ;;  %v1760_v44 = vunpack.c.l.b16 %v1701_v58  ;;  %vm3063_vm2 = vmor %vm3061_vm1, %vm3062_vm15  ;;  %v1617_v40 = vpop.permute.xlu2 %1616 }
 0x2db   : > { %v2553_v28 = vpop.f32.mrf.mxu3  ;;  %3979 = vrcp.f32 %v5449_v23  ;;  %v2818_v22 = vpop.f32.mrf.mxu2  ;;  %v3068_v0 = vor.u32 1.1754944e-38, %v3067_v59  ;;  %vm3066_vm3 = vcmp.eq.f32.partialorder %v3065_v43, 8.507059e+37  ;;  %v2468_v24 = vadd.f32 %v5342_v42, %v5124_v8 }
 0x2dc   : > { %v3059_v27 = vmul.f32 %v5436_v17, %v3058_v39  ;;  %v2819_v5 = vadd.f32 %v2818_v22, %v2730_v3  ;;  %v2554_v19 = vadd.f32 %v2553_v28, %v2465_v48  ;;  %v1767_v58 = vunpack.c.l.b16 %v1685_v51  ;;  %v1533_v3 = vld [vmem:[#allocation2 + $0x100] sm:$0xff]  ;;  %v1534_v22 = vld [vmem:[#allocation2 + $0x110] sm:$0xff] }
 0x2dd   : > { %v5471_v2 = vpop.permute.xlu0 %1652  ;;  %v1945_v39 = vunpack.c.l.b16 %v1787_v38  ;;  %v3080_v51 = vand.u32 2147483647, %v5449_v23  ;;  %v2470_v36 = vadd.f32 %v5342_v42, %v5155_v34  ;;  %vm3076_vm6 = vweird.f32 %v5449_v23 }
 0x2de   : > { %v2642_v55 = vpop.f32.mrf.mxu0  ;;  %v3060_v4 = vadd.f32 %v5436_v17, %v3059_v27  ;;  %v3834_v54 = vmul.f32 -1.442695, %v2819_v5  ;;  %v3978_v7 = vpop.eup %3977  ;;  %v2051_v1 = vpack.c.b16 %v1767_v58, %v1763_v56  ;;  %v5484_v27 = vunpack.c.l.b16 %v1788_v63 }
 0x2df   : > { %v2643_v15 = vadd.f32 %v2642_v55, %v2554_v19  ;;  %v2731_v62 = vpop.f32.mrf.mxu1  ;;  %v5476_v37 = vadd.f32 1.0, %v3978_v7  ;;  %v5489_v5 = vunpack.c.l.b16 %v1789_v57  ;;  %v1541_v19 = vpack.c.bf16 %v1533_v3, %v1533_v3 }
 0x2e0   : > { %v3064_v21 = vsel %vm3063_vm2, %v5436_v17, %v3060_v4  ;;  %3981 = vpow2.f32 %v3834_v54  ;;  %v2048_v17 = vpack.c.b16 %v1760_v44, %v1756_v61  ;;  %v3082_v61 = vand.u32 2147483648, %v5449_v23  ;;  %v5493_v54 = vpop.permute.xlu1 %1656 }
 0x2e1   : > { %v3980_v6 = vpop.eup %3979  ;;  %v3069_v48 = vsel %vm3066_vm3, %v3068_v0, %v3064_v21  ;;  %3983 = vrcp.f32 %v5476_v37  ;;  %v2732_v41 = vadd.f32 %v2731_v62, %v2643_v15  ;;  %v2073_v38 = vpack.c.b16 %v1945_v39, %v1941_v31 }
 0x2e2   : > { %3495 = vst.msk [vmem:[%s5389_s15 + $0x18] sm:$0xff] %vm3491_vm5, %v3069_v48  ;;  %v3072_v28 = vmul.f32 %v3980_v6, %v5449_v23  ;;  %vm3077_vm4 = vweird.f32 %v3980_v6  ;;  %v5501_v57 = vadd.f32 %v5342_v42, %v5175_v33  ;;  %v1542_v56 = vpack.c.bf16 %v1534_v22, %v1534_v22  ;;  %v1803_v48 = vpop.permute.xlu2 %1802 }
 0x2e3   : > { %v2556_v45 = vpop.f32.mrf.mxu3  ;;  %v2820_v43 = vpop.f32.mrf.mxu2  ;;  %2758 = vmatmul.bf16.gmra.mxu1 %v2048_v17  ;;  %2585 = vmatmul.bf16.gmra.mxu3 %v2051_v1  ;;  %v1704_v21 = vsel %vm226_vm0, %v1541_v19, %v5441_v52  ;;  %v1687_v34 = vsel %vm226_vm0, %v5863_v25, %v5462_v20  ;;  %vm3078_vm7 = vmor %vm3076_vm6, %vm3077_vm4  ;;  %v3083_v33 = vor.u32 1.1754944e-38, %v3082_v61  ;;  %v1689_v52 = vsel %vm226_vm0, %v5861_v10, %v1617_v40 }
 0x2e4   : > { %v2557_v59 = vadd.f32 %v2556_v45, %v2468_v24  ;;  %v3073_v16 = vsub.f32 1.0, %v3072_v28  ;;  %v2821_v8 = vadd.f32 %v2820_v43, %v2732_v41  ;;  %vm3081_vm8 = vcmp.eq.f32.partialorder %v3080_v51, 8.507059e+37 }
 0x2e5   : > { %v5495_v7 = vpop.permute.xlu0 %1654  ;;  %v1707_v25 = vsel %vm226_vm0, %v1542_v56, %v5471_v2  ;;  %v1764_v45 = vunpack.c.l.b16 %v1704_v21  ;;  %v1771_v1 = vunpack.c.l.b16 %v1687_v34  ;;  %v3097_v43 = vand.u32 2147483648, %v5476_v37 }
 0x2e6   : > { %v2645_v55 = vpop.f32.mrf.mxu0  ;;  %v3982_v4 = vpop.eup %3981  ;;  %v3074_v15 = vmul.f32 %v3980_v6, %v3073_v16  ;;  %v3835_v63 = vmul.f32 -1.442695, %v2821_v8  ;;  %v1775_v10 = vunpack.c.l.b16 %v1689_v52  ;;  %v1860_v8 = vsel %vm226_vm0, %v4535_v60, %v1803_v48 }
 0x2e7   : > { %v2646_v44 = vadd.f32 %v2645_v55, %v2557_v59  ;;  %v5503_v0 = vadd.f32 1.0, %v3982_v4  ;;  %v2734_v62 = vpop.f32.mrf.mxu1  ;;  %v3984_v31 = vpop.eup %3983  ;;  %v1768_v2 = vunpack.c.l.b16 %v1707_v25  ;;  %vm3091_vm10 = vweird.f32 %v5476_v37  ;;  %v1535_v25 = vld [vmem:[#allocation2 + $0x120] sm:$0xff] }
 0x2e8   : > { %v3075_v24 = vadd.f32 %v3980_v6, %v3074_v15  ;;  %3985 = vpow2.f32 %v3835_v63  ;;  %3824 = vmatmul.msk.bf16.gmra.mxu2 %vm226_vm0, %v2073_v38  ;;  %v3087_v58 = vmul.f32 %v3984_v31, %v5476_v37  ;;  %vm3092_vm9 = vweird.f32 %v3984_v31 }
 0x2e9   : > { %3987 = vrcp.f32 %v5503_v0  ;;  %v2735_v39 = vadd.f32 %v2734_v62, %v2646_v44  ;;  %v5530_v44 = vpop.permute.xlu1 %1826  ;;  %vm3093_vm11 = vmor %vm3091_vm10, %vm3092_vm9  ;;  %v3098_v60 = vor.u32 1.1754944e-38, %v3097_v43  ;;  %v1939_v62 = vunpack.c.l.b16 %v1860_v8 }
 0x2ea   : > { %v3079_v23 = vsel %vm3078_vm7, %v3980_v6, %v3075_v24  ;;  %v3088_v41 = vsub.f32 1.0, %v3087_v58  ;;  %v3095_v6 = vand.u32 2147483647, %v5476_v37  ;;  %v1536_v37 = vld [vmem:[#allocation2 + $0x130] sm:$0xff]  ;;  %v3112_v52 = vand.u32 2147483648, %v5503_v0 }
 0x2eb   : > { %v2558_v3 = vpop.f32.mrf.mxu3  ;;  %v3084_v28 = vsel %vm3081_vm8, %v3083_v33, %v3079_v23  ;;  %v2823_v20 = vpop.f32.mrf.mxu2  ;;  %v2052_v33 = vpack.c.b16 %v1768_v2, %v1764_v45  ;;  %v2055_v48 = vpack.c.b16 %v1775_v10, %v1771_v1  ;;  %v2077_v1 = vpack.c.b16 %v5489_v5, %v5484_v27  ;;  %v1783_v27 = vld [vmem:[#allocation2 + $0x72] sm:$0xff] }
 0x2ec   : > { %v2559_v17 = vadd.f32 %v2558_v3, %v2470_v36  ;;  %3496 = vst.msk [vmem:[%s5389_s15 + $0x20] sm:$0xff] %vm3491_vm5, %v3084_v28  ;;  %v2824_v59 = vadd.f32 %v2823_v20, %v2735_v39  ;;  %v3089_v40 = vmul.f32 %v3984_v31, %v3088_v41  ;;  %vm3096_vm12 = vcmp.eq.f32.partialorder %v3095_v6, 8.507059e+37  ;;  %v5539_v28 = vpop.permute.xlu2 %1828 }
 0x2ed   : > { %v1805_v51 = vpop.permute.xlu0 %1804  ;;  %v3110_v41 = vand.u32 2147483647, %v5503_v0  ;;  %vm3106_vm14 = vweird.f32 %v5503_v0  ;;  %v3113_v6 = vor.u32 1.1754944e-38, %v3112_v52  ;;  %v2475_v5 = vadd.f32 %v5342_v42, %v5193_v26 }
 0x2ee   : > { %v2647_v16 = vpop.f32.mrf.mxu0  ;;  %v3986_v22 = vpop.eup %3985  ;;  %v3836_v19 = vmul.f32 -1.442695, %v2824_v59  ;;  %v3090_v38 = vadd.f32 %v3984_v31, %v3089_v40  ;;  %v1863_v15 = vsel %vm226_vm0, %v4557_v11, %v1805_v51 }
 0x2ef   : > { %v2648_v61 = vadd.f32 %v2647_v16, %v2559_v17  ;;  %v3988_v55 = vpop.eup %3987  ;;  %v5526_v4 = vadd.f32 1.0, %v3986_v22  ;;  %v2736_v63 = vpop.f32.mrf.mxu1  ;;  %v1943_v56 = vunpack.c.l.b16 %v1863_v15  ;;  %v1544_v17 = vpack.c.bf16 %v1536_v37, %v1536_v37 }
 0x2f0   : > { %v3102_v36 = vmul.f32 %v3988_v55, %v5503_v0  ;;  %3989 = vpow2.f32 %v3836_v19  ;;  %v3094_v21 = vsel %vm3093_vm11, %v3984_v31, %v3090_v38  ;;  %vm3107_vm13 = vweird.f32 %v3988_v55 }
 0x2f1   : > { %3991 = vrcp.f32 %v5526_v4  ;;  %v3099_v24 = vsel %vm3096_vm12, %v3098_v60, %v3094_v21  ;;  %v2737_v11 = vadd.f32 %v2736_v63, %v2648_v61  ;;  %v2071_v23 = vpack.c.b16 %v1943_v56, %v1939_v62  ;;  %vm3108_vm15 = vmor %vm3106_vm14, %vm3107_vm13  ;;  %v1809_v38 = vpop.permute.xlu1 %1808 }
 0x2f2   : > { %v3103_v34 = vsub.f32 1.0, %v3102_v36  ;;  %3497 = vst.msk [vmem:[%s5389_s15 + $0x28] sm:$0xff] %vm3491_vm5, %v3099_v24  ;;  %v1543_v16 = vpack.c.bf16 %v1535_v25, %v1535_v25  ;;  %vm3111_vm1 = vcmp.eq.f32.partialorder %v3110_v41, 8.507059e+37  ;;  %v1713_v61 = vsel %vm226_vm0, %v1544_v17, %v5493_v54  ;;  %v1782_v36 = vld [vmem:[#allocation2 + $0x62] sm:$0xff] }
 0x2f3   : > { %v2561_v58 = vpop.f32.mrf.mxu3  ;;  %v2825_v39 = vpop.f32.mrf.mxu2  ;;  %2763 = vmatmul.bf16.gmra.mxu1 %v2052_v33  ;;  %2590 = vmatmul.bf16.gmra.mxu3 %v2055_v48  ;;  %v3125_v56 = vand.u32 2147483647, %v5526_v4  ;;  %v3127_v26 = vand.u32 2147483648, %v5526_v4  ;;  %v1791_v37 = vpack.c.bf16 %v1783_v27, %v1783_v27  ;;  %v1790_v52 = vpack.c.bf16 %v1782_v36, %v1782_v36 }
 0x2f4   : > { %v2562_v3 = vadd.f32 %v2561_v58, %v5501_v57  ;;  %v3104_v31 = vmul.f32 %v3988_v55, %v3103_v34  ;;  %v2826_v20 = vadd.f32 %v2825_v39, %v2737_v11  ;;  %2684 = vmatmul.bf16.gmra.mxu0 %v2071_v23  ;;  %v1710_v15 = vsel %vm226_vm0, %v1543_v16, %v5495_v7  ;;  %v5565_v23 = vpop.permute.xlu2 %1830 }
 0x2f5   : > { %v1807_v51 = vpop.permute.xlu0 %1806  ;;  %v1776_v11 = vunpack.c.l.b16 %v1713_v61  ;;  %v1869_v7 = vsel %vm226_vm0, %v4604_v50, %v1809_v38  ;;  %v1772_v33 = vunpack.c.l.b16 %v1710_v15  ;;  %vm3121_vm3 = vweird.f32 %v5526_v4 }
 0x2f6   : > { %v2650_v45 = vpop.f32.mrf.mxu0  ;;  %v3990_v43 = vpop.eup %3989  ;;  %v3105_v59 = vadd.f32 %v3988_v55, %v3104_v31  ;;  %v3837_v57 = vmul.f32 -1.442695, %v2826_v20  ;;  %v1866_v54 = vsel %vm226_vm0, %v4516_v47, %v1807_v51  ;;  %v3128_v47 = vor.u32 1.1754944e-38, %v3127_v26 }
 0x2f7   : > { %v2651_v10 = vadd.f32 %v2650_v45, %v2562_v3  ;;  %v3992_v40 = vpop.eup %3991  ;;  %v5546_v22 = vadd.f32 1.0, %v3990_v43  ;;  %v2739_v8 = vpop.f32.mrf.mxu1  ;;  %v1947_v20 = vunpack.c.l.b16 %v1866_v54  ;;  %v1961_v17 = vunpack.c.l.b16 %v1791_v37 }
 0x2f8   : > { %v3109_v2 = vsel %vm3108_vm15, %v3988_v55, %v3105_v59  ;;  %v3117_v19 = vmul.f32 %v3992_v40, %v5526_v4  ;;  %3993 = vpow2.f32 %v3837_v57  ;;  %3825 = vmatmul.msk.bf16.gmra.mxu2 %vm226_vm0, %v2077_v1  ;;  %vm3122_vm2 = vweird.f32 %v3992_v40 }
 0x2f9   : > { %v3114_v0 = vsel %vm3111_vm1, %v3113_v6, %v3109_v2  ;;  %3995 = vrcp.f32 %v5546_v22  ;;  %v2740_v63 = vadd.f32 %v2739_v8, %v2651_v10  ;;  %vm3123_vm4 = vmor %vm3121_vm3, %vm3122_vm2  ;;  %vm3126_vm6 = vcmp.eq.f32.partialorder %v3125_v56, 8.507059e+37  ;;  %v1811_v54 = vpop.permute.xlu1 %1810 }
 0x2fa   : > { %3498 = vst.msk [vmem:[%s5389_s15 + $0x30] sm:$0xff] %vm3491_vm5, %v3114_v0  ;;  %v3118_v55 = vsub.f32 1.0, %v3117_v19  ;;  %v2478_v4 = vadd.f32 %v5342_v42, %v5221_v53  ;;  %v1951_v43 = vunpack.c.l.b16 %v1869_v7  ;;  %v2056_v6 = vpack.c.b16 %v1776_v11, %v1772_v33 }
 0x2fb   : > { %v2563_v60 = vpop.f32.mrf.mxu3  ;;  %v2828_v62 = vpop.f32.mrf.mxu2  ;;  %v3142_v8 = vand.u32 2147483648, %v5546_v22  ;;  %v1957_v27 = vunpack.c.l.b16 %v1790_v52  ;;  %v3140_v53 = vand.u32 2147483647, %v5546_v22  ;;  %vm3136_vm8 = vweird.f32 %v5546_v22  ;;  %v1784_v52 = vld [vmem:[#allocation2 + $0x82] sm:$0xff] }
 0x2fc   : > { %v2564_v21 = vadd.f32 %v2563_v60, %v2475_v5  ;;  %v3119_v24 = vmul.f32 %v3992_v40, %v3118_v55  ;;  %v2829_v34 = vadd.f32 %v2828_v62, %v2740_v63 }
 0x2fd   : > { %v5579_v51 = vpop.permute.xlu0 %1832  ;;  %v2081_v38 = vpack.c.b16 %v1961_v17, %v1957_v27  ;;  %v3143_v56 = vor.u32 1.1754944e-38, %v3142_v8  ;;  %vm3141_vm10 = vcmp.eq.f32.partialorder %v3140_v53, 8.507059e+37 }
 0x2fe   : > { %v2652_v58 = vpop.f32.mrf.mxu0  ;;  %v3994_v48 = vpop.eup %3993  ;;  %v3120_v39 = vadd.f32 %v3992_v40, %v3119_v24  ;;  %v3838_v3 = vmul.f32 -1.442695, %v2829_v34  ;;  %v5871_v34 = vld [vmem:[#allocation20_spill] sm:$0xff] }
 0x2ff   : > { %v2653_v31 = vadd.f32 %v2652_v58, %v2564_v21  ;;  %v3996_v41 = vpop.eup %3995  ;;  %v5569_v25 = vadd.f32 1.0, %v3994_v48  ;;  %v2741_v50 = vpop.f32.mrf.mxu1  ;;  %v1887_v11 = vsel %vm226_vm0, %v5871_v34, %v5539_v28  ;;  %v1785_v48 = vld [vmem:[#allocation2 + $0x92] sm:$0xff] }
 0x300   : > { %v3124_v45 = vsel %vm3123_vm4, %v3992_v40, %v3120_v39  ;;  %v3132_v1 = vmul.f32 %v3996_v41, %v5546_v22  ;;  %3997 = vpow2.f32 %v3838_v3  ;;  %v2075_v40 = vpack.c.b16 %v1951_v43, %v1947_v20  ;;  %v1813_v21 = vpop.permute.xlu2 %1812 }
 0x301   : > { %v3129_v59 = vsel %vm3126_vm6, %v3128_v47, %v3124_v45  ;;  %3999 = vrcp.f32 %v5569_v25  ;;  %v2742_v10 = vadd.f32 %v2741_v50, %v2653_v31  ;;  %vm3137_vm7 = vweird.f32 %v3996_v41 }
 0x302   : > { %3499 = vst.msk [vmem:[%s5389_s15 + $0x38] sm:$0xff] %vm3491_vm5, %v3129_v59  ;;  %v3133_v57 = vsub.f32 1.0, %v3132_v1  ;;  %vm3138_vm9 = vmor %vm3136_vm8, %vm3137_vm7  ;;  %v2480_v22 = vadd.f32 %v5342_v42, %v5247_v29  ;;  %v1884_v39 = vsel %vm226_vm0, %v5149_v12, %v5530_v44  ;;  %v1875_v29 = vsel %vm226_vm0, %v5836_v46, %v1813_v21 }
 0x303   : > { %v2566_v16 = vpop.f32.mrf.mxu3  ;;  %v2830_v2 = vpop.f32.mrf.mxu2  ;;  %2768 = vmatmul.bf16.gmra.mxu1 %v2056_v6  ;;  %2595 = vmatmul.bf16.gmra.mxu3 %v5067_v30  ;;  %v3157_v42 = vand.u32 2147483648, %v5569_v25  ;;  %v3155_v28 = vand.u32 2147483647, %v5569_v25  ;;  %v1872_v20 = vsel %vm226_vm0, %v4559_v13, %v1811_v54  ;;  %v1944_v50 = vunpack.c.l.b16 %v1887_v11 }
 0x304   : > { %v2567_v19 = vadd.f32 %v2566_v16, %v2478_v4  ;;  %v3134_v5 = vmul.f32 %v3996_v41, %v3133_v57  ;;  %v2831_v0 = vadd.f32 %v2830_v2, %v2742_v10  ;;  %2689 = vmatmul.bf16.gmra.mxu0 %v2075_v40  ;;  %v1792_v45 = vpack.c.bf16 %v1784_v52, %v1784_v52 }
 0x305   : > { %v1793_v1 = vpack.c.bf16 %v1785_v48, %v1785_v48  ;;  %vm3151_vm12 = vweird.f32 %v5569_v25  ;;  %v1940_v59 = vunpack.c.l.b16 %v1884_v39  ;;  %v1959_v57 = vunpack.c.l.b16 %v1875_v29  ;;  %v5609_v13 = vpop.permute.xlu0 %1834  ;;  %v5873_v29 = vld [vmem:[#allocation21_spill] sm:$0xff] }
 0x306   : > { %v2655_v61 = vpop.f32.mrf.mxu0  ;;  %v3998_v55 = vpop.eup %3997  ;;  %v3135_v15 = vadd.f32 %v3996_v41, %v3134_v5  ;;  %v3839_v63 = vmul.f32 -1.442695, %v2831_v0  ;;  %v3158_v10 = vor.u32 1.1754944e-38, %v3157_v42  ;;  %vm3156_vm14 = vcmp.eq.f32.partialorder %v3155_v28, 8.507059e+37 }
 0x307   : > { %v2656_v60 = vadd.f32 %v2655_v61, %v2567_v19  ;;  %v4000_v36 = vpop.eup %3999  ;;  %v5584_v26 = vadd.f32 1.0, %v3998_v55  ;;  %v2744_v62 = vpop.f32.mrf.mxu1  ;;  %v1955_v40 = vunpack.c.l.b16 %v1872_v20  ;;  %v1969_v19 = vunpack.c.l.b16 %v1793_v1 }
 0x308   : > { %v3139_v37 = vsel %vm3138_vm9, %v3996_v41, %v3135_v15  ;;  %v3147_v30 = vmul.f32 %v4000_v36, %v5569_v25  ;;  %4001 = vpow2.f32 %v3839_v63  ;;  %3826 = vmatmul.msk.bf16.gmra.mxu2 %vm226_vm0, %v2081_v38  ;;  %vm3152_vm11 = vweird.f32 %v4000_v36 }
 0x309   : > { %v3144_v24 = vsel %vm3141_vm10, %v3143_v56, %v3139_v37  ;;  %4003 = vrcp.f32 %v5584_v26  ;;  %v2745_v33 = vadd.f32 %v2744_v62, %v2656_v60  ;;  %vm3153_vm13 = vmor %vm3151_vm12, %vm3152_vm11  ;;  %v2072_v53 = vpack.c.b16 %v1944_v50, %v1940_v59 }
 0x30a   : > { %3500 = vst.msk [vmem:[%s5389_s15 + $0x40] sm:$0xff] %vm3491_vm5, %v3144_v24  ;;  %v3148_v7 = vsub.f32 1.0, %v3147_v30  ;;  %v1965_v0 = vunpack.c.l.b16 %v1792_v45  ;;  %v3172_v61 = vand.u32 2147483648, %v5584_v26  ;;  %v2079_v38 = vpack.c.b16 %v1959_v57, %v1955_v40 }
 0x30b   : > { %v2568_v58 = vpop.f32.mrf.mxu3  ;;  %v2833_v3 = vpop.f32.mrf.mxu2  ;;  %v3170_v63 = vand.u32 2147483647, %v5584_v26  ;;  %vm3166_vm1 = vweird.f32 %v5584_v26  ;;  %v1890_v42 = vsel %vm226_vm0, %v5873_v29, %v5565_v23 }
 0x30c   : > { %v2569_v31 = vadd.f32 %v2568_v58, %v2480_v22  ;;  %v3149_v41 = vmul.f32 %v4000_v36, %v3148_v7  ;;  %v2834_v47 = vadd.f32 %v2833_v3, %v2745_v33  ;;  %v2085_v21 = vpack.c.b16 %v1969_v19, %v1965_v0  ;;  %v5872_v7 = vld [vmem:[#allocation23_spill] sm:$0xff]  ;;  %v1837_v19 = vpop.permute.xlu1 %1836 }
 0x30d   : > { %v3173_v30 = vor.u32 1.1754944e-38, %v3172_v61  ;;  %vm3171_vm3 = vcmp.eq.f32.partialorder %v3170_v63, 8.507059e+37  ;;  %v1817_v34 = vpop.permute.xlu0 %1816  ;;  %v1893_v33 = vsel %vm226_vm0, %v5872_v7, %v5579_v51  ;;  %v5877_v7 = vld [vmem:[#allocation5_spill] sm:$0xff] }
 0x30e   : > { %v2657_v17 = vpop.f32.mrf.mxu0  ;;  %v4002_v12 = vpop.eup %4001  ;;  %v3150_v44 = vadd.f32 %v4000_v36, %v3149_v41  ;;  %v3840_v46 = vmul.f32 -1.442695, %v2834_v47  ;;  %v1881_v39 = vsel %vm226_vm0, %v5134_v49, %v1817_v34  ;;  %v1952_v41 = vunpack.c.l.b16 %v1893_v33 }
 0x30f   : > { %v2658_v4 = vadd.f32 %v2657_v17, %v2569_v31  ;;  %v4004_v43 = vpop.eup %4003  ;;  %v5607_v6 = vadd.f32 1.0, %v4002_v12  ;;  %v2746_v2 = vpop.f32.mrf.mxu1  ;;  %v1967_v20 = vunpack.c.l.b16 %v1881_v39  ;;  %v1948_v49 = vunpack.c.l.b16 %v1890_v42 }
 0x310   : > { %v3154_v16 = vsel %vm3153_vm13, %v4000_v36, %v3150_v44  ;;  %v3162_v8 = vmul.f32 %v4004_v43, %v5584_v26  ;;  %4005 = vpow2.f32 %v3840_v46  ;;  %vm3167_vm15 = vweird.f32 %v4004_v43  ;;  %v1815_v26 = vpop.permute.xlu2 %1814 }
 0x311   : > { %v3159_v25 = vsel %vm3156_vm14, %v3158_v10, %v3154_v16  ;;  %4007 = vrcp.f32 %v5607_v6  ;;  %v2747_v5 = vadd.f32 %v2746_v2, %v2658_v4  ;;  %vm3168_vm2 = vmor %vm3166_vm1, %vm3167_vm15  ;;  %v3187_v58 = vand.u32 2147483648, %v5607_v6 }
 0x312   : > { %3501 = vst.msk [vmem:[%s5389_s15 + $0x48] sm:$0xff] %vm3491_vm5, %v3159_v25  ;;  %v3163_v27 = vsub.f32 1.0, %v3162_v8  ;;  %v3185_v48 = vand.u32 2147483647, %v5607_v6  ;;  %v1878_v31 = vsel %vm226_vm0, %v5834_v9, %v1815_v26  ;;  %vm3181_vm6 = vweird.f32 %v5607_v6 }
 0x313   : > { %v2835_v55 = vpop.f32.mrf.mxu2  ;;  %2773 = vmatmul.bf16.gmra.mxu1 %v2072_v53  ;;  %2600 = vmatmul.bf16.gmra.mxu3 %v5083_v14  ;;  %v3188_v47 = vor.u32 1.1754944e-38, %v3187_v58  ;;  %v1963_v12 = vunpack.c.l.b16 %v1878_v31  ;;  %v2076_v46 = vpack.c.b16 %v1952_v41, %v1948_v49 }
 0x314   : > { %v3164_v15 = vmul.f32 %v4004_v43, %v3163_v27  ;;  %v2836_v60 = vadd.f32 %v2835_v55, %v2747_v5  ;;  %2694 = vmatmul.bf16.gmra.mxu0 %v2079_v38  ;;  %vm3186_vm8 = vcmp.eq.f32.partialorder %v3185_v48, 8.507059e+37  ;;  %v1899_v38 = vsel %vm226_vm0, %v5202_v32, %v1837_v19  ;;  %v5656_v32 = vld [vmem:[%s5773_s4] ss:$0 sm:$0xff] }
 0x316   : > { %v4006_v36 = vpop.eup %4005  ;;  %v3165_v56 = vadd.f32 %v4004_v43, %v3164_v15  ;;  %v3841_v62 = vmul.f32 -1.442695, %v2836_v60  ;;  %v5636_v17 = vpop.f32.mrf.mxu0  ;;  %v1960_v60 = vunpack.c.l.b16 %v1899_v38 }
 0x317   : > { %v4008_v37 = vpop.eup %4007  ;;  %v2991_v22 = vadd.f32 1.0, %v4006_v36 }
 0x318   : > { %v3169_v24 = vsel %vm3168_vm2, %v4004_v43, %v3165_v56  ;;  %v3177_v54 = vmul.f32 %v4008_v37, %v5607_v6  ;;  %4009 = vpow2.f32 %v3841_v62  ;;  %3827 = vmatmul.msk.bf16.gmra.mxu2 %vm226_vm0, %v2085_v21  ;;  %vm3182_vm4 = vweird.f32 %v4008_v37  ;;  %v2571_v62 = vpop.f32.mrf.mxu3 }
 0x319   : > { %v3174_v14 = vsel %vm3171_vm3, %v3173_v30, %v3169_v24  ;;  %4011 = vrcp.f32 %v2991_v22  ;;  %vm3183_vm7 = vmor %vm3181_vm6, %vm3182_vm4  ;;  %v3202_v4 = vand.u32 2147483648, %v2991_v22  ;;  %v2083_v43 = vpack.c.b16 %v1967_v20, %v1963_v12  ;;  %v1841_v30 = vpop.permute.xlu2 %1840 }
 0x31a   : > { %3502 = vst.msk [vmem:[%s5389_s15 + $0x50] sm:$0xff] %vm3491_vm5, %v3174_v14  ;;  %v3178_v11 = vsub.f32 1.0, %v3177_v54  ;;  %v3200_v57 = vand.u32 2147483647, %v2991_v22  ;;  %vm3196_vm10 = vweird.f32 %v2991_v22  ;;  %v1839_v54 = vpop.permute.xlu1 %1838  ;;  %v5876_v14 = vld [vmem:[#allocation24_spill] sm:$0xff] }
 0x31b   : > { %v5638_v1 = vpop.f32.mrf.mxu2  ;;  %v3203_v16 = vor.u32 1.1754944e-38, %v3202_v4  ;;  %v1905_v34 = vsel %vm226_vm0, %v5876_v14, %v1841_v30  ;;  %v1902_v33 = vsel %vm226_vm0, %v5877_v7, %v1839_v54 }
 0x31c   : > { %v3179_v52 = vmul.f32 %v4008_v37, %v3178_v11  ;;  %vm3201_vm12 = vcmp.eq.f32.partialorder %v3200_v57, 8.507059e+37  ;;  %v1964_v39 = vunpack.c.l.b16 %v1902_v33 }
 0x31e   : > { %v4010_v3 = vpop.eup %4009  ;;  %v3180_v28 = vadd.f32 %v4008_v37, %v3179_v52  ;;  %v2662_v2 = vpop.f32.mrf.mxu0  ;;  %v1968_v52 = vunpack.c.l.b16 %v1905_v34 }
 0x31f   : > { %v4012_v51 = vpop.eup %4011  ;;  %v2992_v50 = vadd.f32 1.0, %v4010_v3  ;;  %v5878_v3 = vld [vmem:[#allocation10_spill] sm:$0xff] }
 0x320   : > { %v3184_v45 = vsel %vm3183_vm7, %v4008_v37, %v3180_v28  ;;  %v3192_v23 = vmul.f32 %v4012_v51, %v2991_v22  ;;  %vm3197_vm9 = vweird.f32 %v4012_v51  ;;  %v5874_v37 = vld [vmem:[#allocation14_spill] sm:$0xff]  ;;  %v5875_v22 = vld [vmem:[#allocation8_spill] sm:$0xff]  ;;  %v2573_v26 = vpop.f32.mrf.mxu3  ;;  %v2485_v31 = vadd.f32 %v5656_v32, %v5878_v3 }
 0x321   : > { %v3189_v9 = vsel %vm3186_vm8, %v3188_v47, %v3184_v45  ;;  %4013 = vrcp.f32 %v2992_v50  ;;  %vm3198_vm11 = vmor %vm3196_vm10, %vm3197_vm9  ;;  %v3217_v53 = vand.u32 2147483648, %v2992_v50  ;;  %v3215_v61 = vand.u32 2147483647, %v2992_v50 }
 0x322   : > { %3503 = vst.msk [vmem:[%s5389_s15 + $0x58] sm:$0xff] %vm3491_vm5, %v3189_v9  ;;  %v3193_v44 = vsub.f32 1.0, %v3192_v23  ;;  %vm3211_vm14 = vweird.f32 %v2992_v50  ;;  %v2483_v24 = vadd.f32 %v5656_v32, %v5875_v22  ;;  %v2084_v28 = vpack.c.b16 %v1968_v52, %v1964_v39  ;;  %v5879_v9 = vld [vmem:[#allocation9_spill] sm:$0xff] }
 0x323   : > { %2778 = vmatmul.bf16.gmra.mxu1 %v2076_v46  ;;  %2605 = vmatmul.bf16.gmra.mxu3 %v5098_v35  ;;  %v2840_v5 = vpop.f32.mrf.mxu2  ;;  %v1896_v35 = vsel %vm226_vm0, %v4996_v18, %v5609_v13  ;;  %v3218_v63 = vor.u32 1.1754944e-38, %v3217_v53  ;;  %vm3216_vm1 = vcmp.eq.f32.partialorder %v3215_v61, 8.507059e+37 }
 0x324   : > { %v3194_v59 = vmul.f32 %v4012_v51, %v3193_v44  ;;  %2699 = vmatmul.bf16.gmra.mxu0 %v2083_v43  ;;  %v1956_v55 = vunpack.c.l.b16 %v1896_v35  ;;  %v2572_v11 = vadd.f32 %v2571_v62, %v2483_v24 }
 0x326   : > { %v3195_v10 = vadd.f32 %v4012_v51, %v3194_v59  ;;  %v2080_v18 = vpack.c.b16 %v1960_v60, %v1956_v55  ;;  %v2665_v13 = vpop.f32.mrf.mxu0  ;;  %v2661_v29 = vadd.f32 %v5636_v17, %v2572_v11  ;;  %v2488_v17 = vadd.f32 %v5656_v32, %v5879_v9 }
 0x327   : > { %v4014_v6 = vpop.eup %4013 }
 0x328   : > { %v3199_v8 = vsel %vm3198_vm11, %v4012_v51, %v3195_v10  ;;  %v3207_v40 = vmul.f32 %v4014_v6, %v2992_v50  ;;  %vm3212_vm13 = vweird.f32 %v4014_v6  ;;  %v2574_v51 = vadd.f32 %v2573_v26, %v2485_v31  ;;  %v2576_v20 = vpop.f32.mrf.mxu3 }
 0x329   : > { %v3204_v25 = vsel %vm3201_vm12, %v3203_v16, %v3199_v8  ;;  %vm3213_vm15 = vmor %vm3211_vm14, %vm3212_vm13  ;;  %v2577_v46 = vadd.f32 %v2576_v20, %v2488_v17  ;;  %v5880_v8 = vld [vmem:[#allocation18_spill] sm:$0xff] }
 0x32a   : > { %3504 = vst.msk [vmem:[%s5389_s15 + $0x60] sm:$0xff] %vm3491_vm5, %v3204_v25  ;;  %v3208_v27 = vsub.f32 1.0, %v3207_v40  ;;  %v2663_v45 = vadd.f32 %v2662_v2, %v2574_v51  ;;  %v2490_v40 = vadd.f32 %v5656_v32, %v5880_v8 }
 0x32b   : > { %v2843_v21 = vpop.f32.mrf.mxu2  ;;  %v2666_v10 = vadd.f32 %v2665_v13, %v2577_v46 }
 0x32c   : > { %v3209_v0 = vmul.f32 %v4014_v6, %v3208_v27 }
 0x32e   : > { %v3210_v15 = vadd.f32 %v4014_v6, %v3209_v0  ;;  %v2667_v58 = vpop.f32.mrf.mxu0 }
 0x330   : > { %v3214_v36 = vsel %vm3213_vm15, %v4014_v6, %v3210_v15 }
 0x331   : > { %v3219_v56 = vsel %vm3216_vm1, %v3218_v63, %v3214_v36  ;;  %v5881_v63 = vld [vmem:[#allocation26_spill] sm:$0xff] }
 0x332   : > { %3505 = vst.msk [vmem:[%s5389_s15 + $0x68] sm:$0xff] %vm3491_vm5, %v3219_v56  ;;  %v2493_v60 = vadd.f32 %v5656_v32, %v5881_v63 }
 0x333   : > { %2783 = vmatmul.bf16.gmra.mxu1 %v2080_v18  ;;  %2610 = vmatmul.bf16.gmra.mxu3 %v5874_v37  ;;  %v2845_v48 = vpop.f32.mrf.mxu2 }
 0x336   : > { %v2670_v49 = vpop.f32.mrf.mxu0 }
 0x33b   : > { %v5668_v23 = vpop.f32.mrf.mxu2 }
 0x33e   : > { %v5672_v6 = vpop.f32.mrf.mxu0 }
 0x340   : > { %v2749_v42 = vpop.f32.mrf.mxu1 }
 0x341   : > { %v2750_v41 = vadd.f32 %v2749_v42, %v2661_v29  ;;  %v5882_v42 = vld [vmem:[#allocation27_spill] sm:$0xff] }
 0x343   : > { %v2839_v47 = vadd.f32 %v5638_v1, %v2750_v41  ;;  %2788 = vmatmul.bf16.gmra.mxu1 %v2084_v28  ;;  %v2578_v1 = vpop.f32.mrf.mxu3  ;;  %v5676_v25 = vpop.f32.mrf.mxu2 }
 0x344   : > { %v2579_v19 = vadd.f32 %v2578_v1, %v2490_v40  ;;  %v5883_v1 = vld [vmem:[#allocation4_spill] sm:$0xff] }
 0x345   : > { %v3842_v50 = vmul.f32 -1.442695, %v2839_v47 }
 0x346   : > { %v2668_v61 = vadd.f32 %v2667_v58, %v2579_v19  ;;  %v5680_v13 = vpop.f32.mrf.mxu0 }
 0x347   : > { %4015 = vpow2.f32 %v3842_v50 }
 0x348   : > { %v2751_v12 = vpop.f32.mrf.mxu1 }
 0x349   : > { %v2752_v44 = vadd.f32 %v2751_v12, %v2663_v45 }
 0x34b   : > { %v2841_v4 = vadd.f32 %v2840_v5, %v2752_v44  ;;  %v5682_v37 = vpop.f32.mrf.mxu2 }
 0x34d   : > { %v4016_v43 = vpop.eup %4015  ;;  %v3843_v59 = vmul.f32 -1.442695, %v2841_v4 }
 0x34e   : > { %v2993_v57 = vadd.f32 1.0, %v4016_v43  ;;  %v5689_v50 = vpop.f32.mrf.mxu0 }
 0x34f   : > { %4017 = vpow2.f32 %v3843_v59 }
 0x350   : > { %4019 = vrcp.f32 %v2993_v57  ;;  %v2754_v16 = vpop.f32.mrf.mxu1  ;;  %v3230_v62 = vand.u32 2147483647, %v2993_v57  ;;  %v3232_v18 = vand.u32 2147483648, %v2993_v57  ;;  %vm3226_vm2 = vweird.f32 %v2993_v57 }
 0x351   : > { %v2755_v2 = vadd.f32 %v2754_v16, %v2666_v10  ;;  %v2498_v16 = vadd.f32 %v5656_v32, %v5883_v1 }
 0x352   : > { %vm3231_vm4 = vcmp.eq.f32.partialorder %v3230_v62, 8.507059e+37  ;;  %v3233_v11 = vor.u32 1.1754944e-38, %v3232_v18 }
 0x353   : > { %v2844_v27 = vadd.f32 %v2843_v21, %v2755_v2  ;;  %v5691_v12 = vpop.f32.mrf.mxu2 }
 0x355   : > { %v4018_v35 = vpop.eup %4017  ;;  %v3844_v5 = vmul.f32 -1.442695, %v2844_v27 }
 0x356   : > { %v4020_v53 = vpop.eup %4019  ;;  %v2994_v0 = vadd.f32 1.0, %v4018_v35  ;;  %v2581_v55 = vpop.f32.mrf.mxu3 }
 0x357   : > { %v3222_v38 = vmul.f32 %v4020_v53, %v2993_v57  ;;  %4021 = vpow2.f32 %v3844_v5  ;;  %vm3227_vm0 = vweird.f32 %v4020_v53  ;;  %v2582_v30 = vadd.f32 %v2581_v55, %v2493_v60  ;;  %v5699_v55 = vpop.f32.mrf.mxu0 }
 0x358   : > { %4023 = vrcp.f32 %v2994_v0  ;;  %v2756_v15 = vpop.f32.mrf.mxu1  ;;  %vm3228_vm3 = vmor %vm3226_vm2, %vm3227_vm0  ;;  %v3245_v41 = vand.u32 2147483647, %v2994_v0  ;;  %v3247_v28 = vand.u32 2147483648, %v2994_v0  ;;  %vm3241_vm7 = vweird.f32 %v2994_v0 }
 0x359   : > { %v3223_v36 = vsub.f32 1.0, %v3222_v38  ;;  %v2757_v56 = vadd.f32 %v2756_v15, %v2668_v61  ;;  %v2671_v52 = vadd.f32 %v2670_v49, %v2582_v30 }
 0x35a   : > { %vm3246_vm9 = vcmp.eq.f32.partialorder %v3245_v41, 8.507059e+37  ;;  %v3248_v44 = vor.u32 1.1754944e-38, %v3247_v28  ;;  %v5885_v28 = vld [vmem:[#allocation11_spill] sm:$0xff] }
 0x35b   : > { %v3224_v21 = vmul.f32 %v4020_v53, %v3223_v36  ;;  %v2846_v22 = vadd.f32 %v2845_v48, %v2757_v56  ;;  %v2495_v48 = vadd.f32 %v5656_v32, %v5882_v42  ;;  %v5701_v36 = vpop.f32.mrf.mxu2 }
 0x35d   : > { %v4022_v24 = vpop.eup %4021  ;;  %v3225_v54 = vadd.f32 %v4020_v53, %v3224_v21  ;;  %v3845_v14 = vmul.f32 -1.442695, %v2846_v22  ;;  %v5884_v21 = vld [vmem:[#allocation25_spill] sm:$0xff] }
 0x35e   : > { %v4024_v34 = vpop.eup %4023  ;;  %v2995_v26 = vadd.f32 1.0, %v4022_v24  ;;  %v2583_v58 = vpop.f32.mrf.mxu3  ;;  %v2500_v30 = vadd.f32 %v5656_v32, %v5884_v21 }
 0x35f   : > { %v3229_v7 = vsel %vm3228_vm3, %v4020_v53, %v3225_v54  ;;  %v3237_v33 = vmul.f32 %v4024_v34, %v2994_v0  ;;  %4025 = vpow2.f32 %v3845_v14  ;;  %vm3242_vm6 = vweird.f32 %v4024_v34  ;;  %v2682_v41 = vpop.f32.mrf.mxu0 }
 0x360   : > { %v3234_v39 = vsel %vm3231_vm4, %v3233_v11, %v3229_v7  ;;  %4027 = vrcp.f32 %v2995_v26  ;;  %v2759_v29 = vpop.f32.mrf.mxu1  ;;  %v2584_v47 = vadd.f32 %v2583_v58, %v2495_v48  ;;  %vm3243_vm8 = vmor %vm3241_vm7, %vm3242_vm6  ;;  %v3260_v2 = vand.u32 2147483647, %v2995_v26 }
 0x361   : > { %3506 = vst.msk [vmem:[%s5389_s15 + $0x70] sm:$0xff] %vm3491_vm5, %v3234_v39  ;;  %v3238_v3 = vsub.f32 1.0, %v3237_v33  ;;  %v2760_v31 = vadd.f32 %v2759_v29, %v2671_v52  ;;  %v3262_v19 = vand.u32 2147483648, %v2995_v26  ;;  %vm3256_vm11 = vweird.f32 %v2995_v26 }
 0x362   : > { %vm3261_vm13 = vcmp.eq.f32.partialorder %v3260_v2, 8.507059e+37 }
 0x363   : > { %v3239_v51 = vmul.f32 %v4024_v34, %v3238_v3  ;;  %v2849_v20 = vadd.f32 %v5668_v23, %v2760_v31  ;;  %v2673_v23 = vadd.f32 %v5672_v6, %v2584_v47  ;;  %v3263_v38 = vor.u32 1.1754944e-38, %v3262_v19  ;;  %v5886_v19 = vld [vmem:[#allocation12_spill] sm:$0xff] }
 0x365   : > { %v4026_v49 = vpop.eup %4025  ;;  %v3240_v45 = vadd.f32 %v4024_v34, %v3239_v51  ;;  %v3846_v9 = vmul.f32 -1.442695, %v2849_v20  ;;  %v2503_v51 = vadd.f32 %v5656_v32, %v5885_v28  ;;  %v5714_v20 = vpop.f32.mrf.mxu2 }
 0x366   : > { %v4028_v17 = vpop.eup %4027  ;;  %v2996_v46 = vadd.f32 1.0, %v4026_v49  ;;  %v2586_v59 = vpop.f32.mrf.mxu3 }
 0x367   : > { %v3244_v4 = vsel %vm3243_vm8, %v4024_v34, %v3240_v45  ;;  %v3252_v43 = vmul.f32 %v4028_v17, %v2995_v26  ;;  %4029 = vpow2.f32 %v3846_v9  ;;  %vm3257_vm10 = vweird.f32 %v4028_v17 }
 0x368   : > { %v3249_v57 = vsel %vm3246_vm9, %v3248_v44, %v3244_v4  ;;  %4031 = vrcp.f32 %v2996_v46  ;;  %v2761_v10 = vpop.f32.mrf.mxu1  ;;  %v2587_v35 = vadd.f32 %v2586_v59, %v2498_v16  ;;  %vm3258_vm12 = vmor %vm3256_vm11, %vm3257_vm10  ;;  %v3275_v54 = vand.u32 2147483647, %v2996_v46 }
 0x369   : > { %3507 = vst.msk [vmem:[%s5389_s15 + $0x78] sm:$0xff] %vm3491_vm5, %v3249_v57  ;;  %v3253_v8 = vsub.f32 1.0, %v3252_v43  ;;  %v2762_v40 = vadd.f32 %v2761_v10, %v2673_v23  ;;  %v3277_v14 = vand.u32 2147483648, %v2996_v46  ;;  %vm3271_vm15 = vweird.f32 %v2996_v46 }
 0x36a   : > { %vm3276_vm0 = vcmp.eq.f32.partialorder %v3275_v54, 8.507059e+37 }
 0x36b   : > { %v3254_v27 = vmul.f32 %v4028_v17, %v3253_v8  ;;  %v2851_v5 = vadd.f32 %v5676_v25, %v2762_v40  ;;  %v2676_v25 = vadd.f32 %v5680_v13, %v2587_v35  ;;  %v3278_v52 = vor.u32 1.1754944e-38, %v3277_v14  ;;  %v5887_v14 = vld [vmem:[#allocation7_spill] sm:$0xff] }
 0x36d   : > { %v4030_v53 = vpop.eup %4029  ;;  %v3255_v0 = vadd.f32 %v4028_v17, %v3254_v27  ;;  %v3847_v6 = vmul.f32 -1.442695, %v2851_v5  ;;  %v2505_v27 = vadd.f32 %v5656_v32, %v5886_v19 }
 0x36e   : > { %v4032_v61 = vpop.eup %4031  ;;  %v2997_v15 = vadd.f32 1.0, %v4030_v53  ;;  %v2588_v56 = vpop.f32.mrf.mxu3 }
 0x36f   : > { %v3259_v63 = vsel %vm3258_vm12, %v4028_v17, %v3255_v0  ;;  %v3267_v60 = vmul.f32 %v4032_v61, %v2996_v46  ;;  %4033 = vpow2.f32 %v3847_v6  ;;  %vm3272_vm14 = vweird.f32 %v4032_v61 }
 0x370   : > { %v3264_v62 = vsel %vm3261_vm13, %v3263_v38, %v3259_v63  ;;  %4035 = vrcp.f32 %v2997_v15  ;;  %v2764_v18 = vpop.f32.mrf.mxu1  ;;  %v2589_v11 = vadd.f32 %v2588_v56, %v2500_v30  ;;  %vm3273_vm1 = vmor %vm3271_vm15, %vm3272_vm14  ;;  %v3290_v45 = vand.u32 2147483647, %v2997_v15 }
 0x371   : > { %3508 = vst.msk [vmem:[%s5389_s15 + $0x80] sm:$0xff] %vm3491_vm5, %v3264_v62  ;;  %v3268_v22 = vsub.f32 1.0, %v3267_v60  ;;  %v2765_v24 = vadd.f32 %v2764_v18, %v2676_v25  ;;  %v3292_v9 = vand.u32 2147483648, %v2997_v15  ;;  %vm3286_vm3 = vweird.f32 %v2997_v15  ;;  %v2685_v2 = vpop.f32.mrf.mxu0 }
 0x372   : > { %v2678_v3 = vadd.f32 %v5689_v50, %v2589_v11  ;;  %vm3291_vm6 = vcmp.eq.f32.partialorder %v3290_v45, 8.507059e+37 }
 0x373   : > { %v3269_v34 = vmul.f32 %v4032_v61, %v3268_v22  ;;  %v2854_v26 = vadd.f32 %v5682_v37, %v2765_v24  ;;  %v3293_v23 = vor.u32 1.1754944e-38, %v3292_v9 }
 0x375   : > { %v4034_v7 = vpop.eup %4033  ;;  %v3270_v33 = vadd.f32 %v4032_v61, %v3269_v34  ;;  %v3848_v13 = vmul.f32 -1.442695, %v2854_v26 }
 0x376   : > { %v4036_v58 = vpop.eup %4035  ;;  %v2998_v39 = vadd.f32 1.0, %v4034_v7  ;;  %v2591_v48 = vpop.f32.mrf.mxu3 }
 0x377   : > { %v3274_v29 = vsel %vm3273_vm1, %v4032_v61, %v3270_v33  ;;  %v3282_v42 = vmul.f32 %v4036_v58, %v2997_v15  ;;  %4037 = vpow2.f32 %v3848_v13  ;;  %vm3287_vm2 = vweird.f32 %v4036_v58  ;;  %v2863_v61 = vpop.f32.mrf.mxu2 }
 0x378   : > { %v3279_v31 = vsel %vm3276_vm0, %v3278_v52, %v3274_v29  ;;  %4039 = vrcp.f32 %v2998_v39  ;;  %v2766_v37 = vpop.f32.mrf.mxu1  ;;  %v2592_v44 = vadd.f32 %v2591_v48, %v2503_v51  ;;  %vm3288_vm4 = vmor %vm3286_vm3, %vm3287_vm2  ;;  %v3305_v53 = vand.u32 2147483647, %v2998_v39 }
 0x379   : > { %3509 = vst.msk [vmem:[%s5389_s15 + $0x88] sm:$0xff] %vm3491_vm5, %v3279_v31  ;;  %v3283_v47 = vsub.f32 1.0, %v3282_v42  ;;  %v2767_v49 = vadd.f32 %v2766_v37, %v2678_v3  ;;  %v3307_v0 = vand.u32 2147483648, %v2998_v39  ;;  %vm3301_vm8 = vweird.f32 %v2998_v39  ;;  %v2687_v33 = vpop.f32.mrf.mxu0 }
 0x37a   : > { %v2681_v8 = vadd.f32 %v5699_v55, %v2592_v44  ;;  %vm3306_vm10 = vcmp.eq.f32.partialorder %v3305_v53, 8.507059e+37 }
 0x37b   : > { %v3284_v17 = vmul.f32 %v4036_v58, %v3283_v47  ;;  %v2856_v50 = vadd.f32 %v5691_v12, %v2767_v49  ;;  %v3308_v25 = vor.u32 1.1754944e-38, %v3307_v0  ;;  %v5889_v0 = vld [vmem:[#allocation6_spill] sm:$0xff] }
 0x37d   : > { %v4038_v46 = vpop.eup %4037  ;;  %v3285_v4 = vadd.f32 %v4036_v58, %v3284_v17  ;;  %v3849_v43 = vmul.f32 -1.442695, %v2856_v50 }
 0x37e   : > { %v4040_v59 = vpop.eup %4039  ;;  %v2999_v57 = vadd.f32 1.0, %v4038_v46  ;;  %v2593_v16 = vpop.f32.mrf.mxu3 }
 0x37f   : > { %v3289_v10 = vsel %vm3288_vm4, %v4036_v58, %v3285_v4  ;;  %v3297_v1 = vmul.f32 %v4040_v59, %v2998_v39  ;;  %4041 = vpow2.f32 %v3849_v43  ;;  %vm3302_vm7 = vweird.f32 %v4040_v59  ;;  %v2865_v42 = vpop.f32.mrf.mxu2 }
 0x380   : > { %v3294_v40 = vsel %vm3291_vm6, %v3293_v23, %v3289_v10  ;;  %4043 = vrcp.f32 %v2999_v57  ;;  %v2769_v12 = vpop.f32.mrf.mxu1  ;;  %v2594_v38 = vadd.f32 %v2593_v16, %v2505_v27  ;;  %vm3303_vm9 = vmor %vm3301_vm8, %vm3302_vm7  ;;  %v3320_v26 = vand.u32 2147483647, %v2999_v57 }
 0x381   : > { %3510 = vst.msk [vmem:[%s5389_s15 + $0x90] sm:$0xff] %vm3491_vm5, %v3294_v40  ;;  %v3298_v35 = vsub.f32 1.0, %v3297_v1  ;;  %v2770_v5 = vadd.f32 %v2769_v12, %v2681_v8  ;;  %v3322_v7 = vand.u32 2147483648, %v2999_v57  ;;  %vm3316_vm12 = vweird.f32 %v2999_v57  ;;  %v2690_v23 = vpop.f32.mrf.mxu0 }
 0x382   : > { %v2683_v22 = vadd.f32 %v2682_v41, %v2594_v38  ;;  %vm3321_vm14 = vcmp.eq.f32.partialorder %v3320_v26, 8.507059e+37 }
 0x383   : > { %v3299_v6 = vmul.f32 %v4040_v59, %v3298_v35  ;;  %v2859_v15 = vadd.f32 %v5701_v36, %v2770_v5  ;;  %v2508_v36 = vadd.f32 %v5656_v32, %v5887_v14  ;;  %v3323_v31 = vor.u32 1.1754944e-38, %v3322_v7  ;;  %v5890_v7 = vld [vmem:[#allocation3_spill] sm:$0xff] }
 0x385   : > { %v4042_v55 = vpop.eup %4041  ;;  %v3300_v63 = vadd.f32 %v4040_v59, %v3299_v6  ;;  %v3850_v60 = vmul.f32 -1.442695, %v2859_v15  ;;  %v2513_v6 = vadd.f32 %v5656_v32, %v5889_v0 }
 0x386   : > { %v4044_v56 = vpop.eup %4043  ;;  %v3000_v62 = vadd.f32 1.0, %v4042_v55  ;;  %v2596_v30 = vpop.f32.mrf.mxu3 }
 0x387   : > { %v3304_v18 = vsel %vm3303_vm9, %v4040_v59, %v3300_v63  ;;  %v3312_v21 = vmul.f32 %v4044_v56, %v2999_v57  ;;  %4045 = vpow2.f32 %v3850_v60  ;;  %vm3317_vm11 = vweird.f32 %v4044_v56  ;;  %v2868_v12 = vpop.f32.mrf.mxu2 }
 0x388   : > { %v3309_v24 = vsel %vm3306_vm10, %v3308_v25, %v3304_v18  ;;  %4047 = vrcp.f32 %v3000_v62  ;;  %v2771_v54 = vpop.f32.mrf.mxu1  ;;  %v2597_v58 = vadd.f32 %v2596_v30, %v2508_v36  ;;  %vm3318_vm13 = vmor %vm3316_vm12, %vm3317_vm11  ;;  %v3335_v50 = vand.u32 2147483647, %v3000_v62 }
 0x389   : > { %3511 = vst.msk [vmem:[%s5389_s15 + $0x98] sm:$0xff] %vm3491_vm5, %v3309_v24  ;;  %v3313_v34 = vsub.f32 1.0, %v3312_v21  ;;  %v2772_v11 = vadd.f32 %v2771_v54, %v2683_v22  ;;  %v3337_v46 = vand.u32 2147483648, %v3000_v62  ;;  %vm3331_vm1 = vweird.f32 %v3000_v62  ;;  %v2692_v22 = vpop.f32.mrf.mxu0 }
 0x38a   : > { %v2686_v47 = vadd.f32 %v2685_v2, %v2597_v58  ;;  %vm3336_vm2 = vcmp.eq.f32.partialorder %v3335_v50, 8.507059e+37 }
 0x38b   : > { %v3314_v13 = vmul.f32 %v4044_v56, %v3313_v34  ;;  %v2861_v52 = vadd.f32 %v5714_v20, %v2772_v11  ;;  %v5888_v20 = vld [vmem:[#allocation15_spill] sm:$0xff]  ;;  %v3338_v8 = vor.u32 1.1754944e-38, %v3337_v46  ;;  %v5891_v46 = vld [vmem:[#allocation13_spill] sm:$0xff] }
 0x38c   : > { %v2510_v9 = vadd.f32 %v5656_v32, %v5888_v20 }
 0x38d   : > { %v4046_v39 = vpop.eup %4045  ;;  %v3315_v29 = vadd.f32 %v4044_v56, %v3314_v13  ;;  %v3851_v48 = vmul.f32 -1.442695, %v2861_v52 }
 0x38e   : > { %v4048_v3 = vpop.eup %4047  ;;  %v3001_v41 = vadd.f32 1.0, %v4046_v39  ;;  %v2598_v51 = vpop.f32.mrf.mxu3 }
 0x38f   : > { %v3319_v37 = vsel %vm3318_vm13, %v4044_v56, %v3315_v29  ;;  %v3327_v28 = vmul.f32 %v4048_v3, %v3000_v62  ;;  %4049 = vpow2.f32 %v3851_v48  ;;  %vm3332_vm15 = vweird.f32 %v4048_v3  ;;  %v2870_v13 = vpop.f32.mrf.mxu2 }
 0x390   : > { %v3324_v49 = vsel %vm3321_vm14, %v3323_v31, %v3319_v37  ;;  %4051 = vrcp.f32 %v3001_v41  ;;  %v2774_v45 = vpop.f32.mrf.mxu1  ;;  %v2599_v43 = vadd.f32 %v2598_v51, %v2510_v9  ;;  %vm3333_vm0 = vmor %vm3331_vm1, %vm3332_vm15  ;;  %v3350_v15 = vand.u32 2147483647, %v3001_v41 }
 0x391   : > { %3512 = vst.msk [vmem:[%s5389_s15 + $0xa0] sm:$0xff] %vm3491_vm5, %v3324_v49  ;;  %v3328_v17 = vsub.f32 1.0, %v3327_v28  ;;  %v2775_v44 = vadd.f32 %v2774_v45, %v2686_v47  ;;  %v3352_v55 = vand.u32 2147483648, %v3001_v41  ;;  %vm3346_vm4 = vweird.f32 %v3001_v41 }
 0x392   : > { %v2688_v35 = vadd.f32 %v2687_v33, %v2599_v43  ;;  %vm3351_vm7 = vcmp.eq.f32.partialorder %v3350_v15, 8.507059e+37  ;;  %v2515_v33 = vadd.f32 %v5656_v32, %v5890_v7  ;;  %v5892_v15 = vld [vmem:[#allocation16_spill] sm:$0xff] }
 0x393   : > { %v3329_v4 = vmul.f32 %v4048_v3, %v3328_v17  ;;  %v2864_v59 = vadd.f32 %v2863_v61, %v2775_v44  ;;  %v3353_v30 = vor.u32 1.1754944e-38, %v3352_v55  ;;  %v2695_v44 = vpop.f32.mrf.mxu0  ;;  %v2520_v55 = vadd.f32 %v5656_v32, %v5892_v15 }
 0x395   : > { %v4050_v57 = vpop.eup %4049  ;;  %v3330_v10 = vadd.f32 %v4048_v3, %v3329_v4  ;;  %v3852_v1 = vmul.f32 -1.442695, %v2864_v59  ;;  %v2518_v4 = vadd.f32 %v5656_v32, %v5891_v46 }
 0x396   : > { %v4052_v16 = vpop.eup %4051  ;;  %v3002_v40 = vadd.f32 1.0, %v4050_v57  ;;  %v2601_v27 = vpop.f32.mrf.mxu3 }
 0x397   : > { %v3334_v2 = vsel %vm3333_vm0, %v4048_v3, %v3330_v10  ;;  %v3342_v19 = vmul.f32 %v4052_v16, %v3001_v41  ;;  %4053 = vpow2.f32 %v3852_v1  ;;  %vm3347_vm3 = vweird.f32 %v4052_v16  ;;  %v2873_v10 = vpop.f32.mrf.mxu2 }
 0x398   : > { %v3339_v5 = vsel %vm3336_vm2, %v3338_v8, %v3334_v2  ;;  %4055 = vrcp.f32 %v3002_v40  ;;  %v2776_v53 = vpop.f32.mrf.mxu1  ;;  %v2602_v60 = vadd.f32 %v2601_v27, %v2513_v6  ;;  %vm3348_vm6 = vmor %vm3346_vm4, %vm3347_vm3  ;;  %v3365_v39 = vand.u32 2147483647, %v3002_v40 }
 0x399   : > { %3513 = vst.msk [vmem:[%s5389_s15 + $0xa8] sm:$0xff] %vm3491_vm5, %v3339_v5  ;;  %v3343_v61 = vsub.f32 1.0, %v3342_v19  ;;  %v2777_v38 = vadd.f32 %v2776_v53, %v2688_v35  ;;  %v3367_v29 = vand.u32 2147483648, %v3002_v40  ;;  %vm3361_vm9 = vweird.f32 %v3002_v40 }
 0x39a   : > { %v2691_v34 = vadd.f32 %v2690_v23, %v2602_v60  ;;  %vm3366_vm11 = vcmp.eq.f32.partialorder %v3365_v39, 8.507059e+37  ;;  %v5893_v39 = vld [vmem:[#allocation17_spill] sm:$0xff] }
 0x39b   : > { %v3344_v63 = vmul.f32 %v4052_v16, %v3343_v61  ;;  %v2866_v56 = vadd.f32 %v2865_v42, %v2777_v38  ;;  %v3368_v51 = vor.u32 1.1754944e-38, %v3367_v29  ;;  %v2523_v29 = vadd.f32 %v5656_v32, %v5893_v39 }
 0x39d   : > { %v4054_v25 = vpop.eup %4053  ;;  %v3345_v62 = vadd.f32 %v4052_v16, %v3344_v63  ;;  %v3853_v18 = vmul.f32 -1.442695, %v2866_v56  ;;  %v2697_v56 = vpop.f32.mrf.mxu0 }
 0x39e   : > { %v4056_v21 = vpop.eup %4055  ;;  %v3003_v24 = vadd.f32 1.0, %v4054_v25  ;;  %v2603_v36 = vpop.f32.mrf.mxu3 }
 0x39f   : > { %v3349_v54 = vsel %vm3348_vm6, %v4052_v16, %v3345_v62  ;;  %v3357_v14 = vmul.f32 %v4056_v21, %v3002_v40  ;;  %4057 = vpow2.f32 %v3853_v18  ;;  %vm3362_vm8 = vweird.f32 %v4056_v21 }
 0x3a0   : > { %v3354_v11 = vsel %vm3351_vm7, %v3353_v30, %v3349_v54  ;;  %4059 = vrcp.f32 %v3003_v24  ;;  %v2779_v26 = vpop.f32.mrf.mxu1  ;;  %v2604_v48 = vadd.f32 %v2603_v36, %v2515_v33  ;;  %vm3363_vm10 = vmor %vm3361_vm9, %vm3362_vm8  ;;  %v3380_v23 = vand.u32 2147483647, %v3003_v24 }
 0x3a1   : > { %3514 = vst.msk [vmem:[%s5389_s15 + $0xb0] sm:$0xff] %vm3491_vm5, %v3354_v11  ;;  %v3358_v58 = vsub.f32 1.0, %v3357_v14  ;;  %v2780_v52 = vadd.f32 %v2779_v26, %v2691_v34  ;;  %v3382_v57 = vand.u32 2147483648, %v3003_v24  ;;  %vm3376_vm13 = vweird.f32 %v3003_v24 }
 0x3a2   : > { %v2693_v9 = vadd.f32 %v2692_v22, %v2604_v48  ;;  %vm3381_vm15 = vcmp.eq.f32.partialorder %v3380_v23, 8.507059e+37 }
 0x3a3   : > { %v3359_v42 = vmul.f32 %v4056_v21, %v3358_v58  ;;  %v2869_v3 = vadd.f32 %v2868_v12, %v2780_v52  ;;  %v3383_v27 = vor.u32 1.1754944e-38, %v3382_v57  ;;  %v5894_v57 = vld [vmem:[#allocation19_spill] sm:$0xff] }
 0x3a5   : > { %v4058_v31 = vpop.eup %4057  ;;  %v3360_v41 = vadd.f32 %v4056_v21, %v3359_v42  ;;  %v3854_v37 = vmul.f32 -1.442695, %v2869_v3 }
 0x3a6   : > { %v4060_v28 = vpop.eup %4059  ;;  %v3004_v47 = vadd.f32 1.0, %v4058_v31  ;;  %v2606_v20 = vpop.f32.mrf.mxu3 }
 0x3a7   : > { %v3364_v49 = vsel %vm3363_vm10, %v4056_v21, %v3360_v41  ;;  %v3372_v45 = vmul.f32 %v4060_v28, %v3003_v24  ;;  %4061 = vpow2.f32 %v3854_v37  ;;  %vm3377_vm12 = vweird.f32 %v4060_v28  ;;  %v2875_v24 = vpop.f32.mrf.mxu2 }
 0x3a8   : > { %v3369_v17 = vsel %vm3366_vm11, %v3368_v51, %v3364_v49  ;;  %4063 = vrcp.f32 %v3004_v47  ;;  %v2781_v50 = vpop.f32.mrf.mxu1  ;;  %v2607_v16 = vadd.f32 %v2606_v20, %v2518_v4  ;;  %vm3378_vm14 = vmor %vm3376_vm13, %vm3377_vm12  ;;  %v3395_v25 = vand.u32 2147483647, %v3004_v47  ;;  %v2700_v51 = vpop.f32.mrf.mxu0 }
 0x3a9   : > { %3515 = vst.msk [vmem:[%s5389_s15 + $0xb8] sm:$0xff] %vm3491_vm5, %v3369_v17  ;;  %v3373_v43 = vsub.f32 1.0, %v3372_v45  ;;  %v2782_v59 = vadd.f32 %v2781_v50, %v2693_v9  ;;  %v3397_v62 = vand.u32 2147483648, %v3004_v47  ;;  %vm3391_vm0 = vweird.f32 %v3004_v47 }
 0x3aa   : > { %v2696_v6 = vadd.f32 %v2695_v44, %v2607_v16  ;;  %vm3396_vm3 = vcmp.eq.f32.partialorder %v3395_v25, 8.507059e+37 }
 0x3ab   : > { %v3374_v1 = vmul.f32 %v4060_v28, %v3373_v43  ;;  %v2871_v8 = vadd.f32 %v2870_v13, %v2782_v59  ;;  %v3398_v34 = vor.u32 1.1754944e-38, %v3397_v62 }
 0x3ad   : > { %v4062_v40 = vpop.eup %4061  ;;  %v3375_v2 = vadd.f32 %v4060_v28, %v3374_v1  ;;  %v3855_v12 = vmul.f32 -1.442695, %v2871_v8 }
 0x3ae   : > { %v4064_v19 = vpop.eup %4063  ;;  %v3005_v35 = vadd.f32 1.0, %v4062_v40  ;;  %v2608_v0 = vpop.f32.mrf.mxu3 }
 0x3af   : > { %v3379_v5 = vsel %vm3378_vm14, %v4060_v28, %v3375_v2  ;;  %v3387_v53 = vmul.f32 %v4064_v19, %v3004_v47  ;;  %4065 = vpow2.f32 %v3855_v12  ;;  %vm3392_vm1 = vweird.f32 %v4064_v19  ;;  %v2878_v44 = vpop.f32.mrf.mxu2 }
 0x3b0   : > { %v3384_v61 = vsel %vm3381_vm15, %v3383_v27, %v3379_v5  ;;  %4067 = vrcp.f32 %v3005_v35  ;;  %v2784_v38 = vpop.f32.mrf.mxu1  ;;  %v2609_v21 = vadd.f32 %v2608_v0, %v2520_v55  ;;  %vm3393_vm2 = vmor %vm3391_vm0, %vm3392_vm1  ;;  %v3410_v3 = vand.u32 2147483647, %v3005_v35  ;;  %v2702_v0 = vpop.f32.mrf.mxu0 }
 0x3b1   : > { %3516 = vst.msk [vmem:[%s5389_s15 + $0xc0] sm:$0xff] %vm3491_vm5, %v3384_v61  ;;  %v3388_v63 = vsub.f32 1.0, %v3387_v53  ;;  %v2785_v60 = vadd.f32 %v2784_v38, %v2696_v6  ;;  %v3412_v31 = vand.u32 2147483648, %v3005_v35  ;;  %vm3406_vm6 = vweird.f32 %v3005_v35 }
 0x3b2   : > { %v2698_v13 = vadd.f32 %v2697_v56, %v2609_v21  ;;  %vm3411_vm8 = vcmp.eq.f32.partialorder %v3410_v3, 8.507059e+37 }
 0x3b3   : > { %v3389_v18 = vmul.f32 %v4064_v19, %v3388_v63  ;;  %v2874_v30 = vadd.f32 %v2873_v10, %v2785_v60  ;;  %v3413_v9 = vor.u32 1.1754944e-38, %v3412_v31  ;;  %v2525_v10 = vadd.f32 %v5656_v32, %v5894_v57 }
 0x3b5   : > { %v4066_v22 = vpop.eup %4065  ;;  %v3390_v54 = vadd.f32 %v4064_v19, %v3389_v18  ;;  %v3856_v14 = vmul.f32 -1.442695, %v2874_v30 }
 0x3b6   : > { %v4068_v36 = vpop.eup %4067  ;;  %v3006_v11 = vadd.f32 1.0, %v4066_v22  ;;  %v2611_v33 = vpop.f32.mrf.mxu3 }
 0x3b7   : > { %v3394_v26 = vsel %vm3393_vm2, %v4064_v19, %v3390_v54  ;;  %v3402_v7 = vmul.f32 %v4068_v36, %v3005_v35  ;;  %4069 = vpow2.f32 %v3856_v14  ;;  %vm3407_vm4 = vweird.f32 %v4068_v36  ;;  %v2880_v25 = vpop.f32.mrf.mxu2 }
 0x3b8   : > { %v3399_v58 = vsel %vm3396_vm3, %v3398_v34, %v3394_v26  ;;  %4071 = vrcp.f32 %v3006_v11  ;;  %v2786_v52 = vpop.f32.mrf.mxu1  ;;  %v2612_v37 = vadd.f32 %v2611_v33, %v2523_v29  ;;  %vm3408_vm7 = vmor %vm3406_vm6, %vm3407_vm4  ;;  %v3425_v8 = vand.u32 2147483647, %v3006_v11 }
 0x3b9   : > { %3517 = vst.msk [vmem:[%s5389_s15 + $0xc8] sm:$0xff] %vm3491_vm5, %v3399_v58  ;;  %v3403_v42 = vsub.f32 1.0, %v3402_v7  ;;  %v2787_v48 = vadd.f32 %v2786_v52, %v2698_v13  ;;  %v3427_v40 = vand.u32 2147483648, %v3006_v11  ;;  %vm3421_vm10 = vweird.f32 %v3006_v11 }
 0x3ba   : > { %v2701_v4 = vadd.f32 %v2700_v51, %v2612_v37  ;;  %vm3426_vm12 = vcmp.eq.f32.partialorder %v3425_v8, 8.507059e+37 }
 0x3bb   : > { %v3404_v41 = vmul.f32 %v4068_v36, %v3403_v42  ;;  %v2876_v28 = vadd.f32 %v2875_v24, %v2787_v48  ;;  %v3428_v32 = vor.u32 1.1754944e-38, %v3427_v40 }
 0x3bd   : > { %v4070_v47 = vpop.eup %4069  ;;  %v3405_v49 = vadd.f32 %v4068_v36, %v3404_v41  ;;  %v3857_v45 = vmul.f32 -1.442695, %v2876_v28 }
 0x3be   : > { %v4072_v20 = vpop.eup %4071  ;;  %v3007_v17 = vadd.f32 1.0, %v4070_v47  ;;  %v2613_v59 = vpop.f32.mrf.mxu3 }
 0x3bf   : > { %v3409_v50 = vsel %vm3408_vm7, %v4068_v36, %v3405_v49  ;;  %v3417_v46 = vmul.f32 %v4072_v20, %v3006_v11  ;;  %4073 = vpow2.f32 %v3857_v45  ;;  %vm3422_vm9 = vweird.f32 %v4072_v20 }
 0x3c0   : > { %v3414_v43 = vsel %vm3411_vm8, %v3413_v9, %v3409_v50  ;;  %4075 = vrcp.f32 %v3007_v17  ;;  %v2789_v23 = vpop.f32.mrf.mxu1  ;;  %v2614_v12 = vadd.f32 %v2613_v59, %v2525_v10  ;;  %vm3423_vm11 = vmor %vm3421_vm10, %vm3422_vm9  ;;  %v3442_v62 = vand.u32 2147483648, %v3007_v17 }
 0x3c1   : > { %3518 = vst.msk [vmem:[%s5389_s15 + $0xd0] sm:$0xff] %vm3491_vm5, %v3414_v43  ;;  %v3418_v1 = vsub.f32 1.0, %v3417_v46  ;;  %v2790_v16 = vadd.f32 %v2789_v23, %v2701_v4  ;;  %v3440_v21 = vand.u32 2147483647, %v3007_v17  ;;  %vm3436_vm14 = vweird.f32 %v3007_v17 }
 0x3c2   : > { %v2703_v15 = vadd.f32 %v2702_v0, %v2614_v12  ;;  %v3443_v36 = vor.u32 1.1754944e-38, %v3442_v62 }
 0x3c3   : > { %v3419_v2 = vmul.f32 %v4072_v20, %v3418_v1  ;;  %v2879_v19 = vadd.f32 %v2878_v44, %v2790_v16  ;;  %vm3441_vm1 = vcmp.eq.f32.partialorder %v3440_v21, 8.507059e+37 }
 0x3c5   : > { %v4074_v27 = vpop.eup %4073  ;;  %v3420_v35 = vadd.f32 %v4072_v20, %v3419_v2  ;;  %v3858_v5 = vmul.f32 -1.442695, %v2879_v19 }
 0x3c6   : > { %v4076_v53 = vpop.eup %4075  ;;  %v3008_v6 = vadd.f32 1.0, %v4074_v27 }
 0x3c7   : > { %v3424_v61 = vsel %vm3423_vm11, %v4072_v20, %v3420_v35  ;;  %v3432_v38 = vmul.f32 %v4076_v53, %v3007_v17  ;;  %4077 = vpow2.f32 %v3858_v5  ;;  %vm3437_vm13 = vweird.f32 %v4076_v53 }
 0x3c8   : > { %v3429_v55 = vsel %vm3426_vm12, %v3428_v32, %v3424_v61  ;;  %4079 = vrcp.f32 %v3008_v6  ;;  %v2791_v63 = vpop.f32.mrf.mxu1  ;;  %vm3438_vm15 = vmor %vm3436_vm14, %vm3437_vm13  ;;  %v3457_v13 = vand.u32 2147483648, %v3008_v6  ;;  %v3455_v52 = vand.u32 2147483647, %v3008_v6 }
 0x3c9   : > { %3519 = vst.msk [vmem:[%s5389_s15 + $0xd8] sm:$0xff] %vm3491_vm5, %v3429_v55  ;;  %v3433_v60 = vsub.f32 1.0, %v3432_v38  ;;  %v2792_v56 = vadd.f32 %v2791_v63, %v2703_v15  ;;  %vm3451_vm2 = vweird.f32 %v3008_v6 }
 0x3ca   : > { %v3458_v48 = vor.u32 1.1754944e-38, %v3457_v13  ;;  %vm3456_vm4 = vcmp.eq.f32.partialorder %v3455_v52, 8.507059e+37 }
 0x3cb   : > { %v3434_v18 = vmul.f32 %v4076_v53, %v3433_v60  ;;  %v2881_v30 = vadd.f32 %v2880_v25, %v2792_v56 }
 0x3cd   : > { %v4078_v22 = vpop.eup %4077  ;;  %v3435_v24 = vadd.f32 %v4076_v53, %v3434_v18  ;;  %v3859_v54 = vmul.f32 -1.442695, %v2881_v30 }
 0x3ce   : > { %v4080_v14 = vpop.eup %4079  ;;  %v3009_v34 = vadd.f32 1.0, %v4078_v22 }
 0x3cf   : > { %v3439_v11 = vsel %vm3438_vm15, %v4076_v53, %v3435_v24  ;;  %v3447_v26 = vmul.f32 %v4080_v14, %v3008_v6  ;;  %4081 = vpow2.f32 %v3859_v54  ;;  %vm3452_vm0 = vweird.f32 %v4080_v14 }
 0x3d0   : > { %v3444_v7 = vsel %vm3441_vm1, %v3443_v36, %v3439_v11  ;;  %4083 = vrcp.f32 %v3009_v34  ;;  %vm3453_vm3 = vmor %vm3451_vm2, %vm3452_vm0  ;;  %v3472_v51 = vand.u32 2147483648, %v3009_v34  ;;  %v3470_v49 = vand.u32 2147483647, %v3009_v34 }
 0x3d1   : > { %3520 = vst.msk [vmem:[%s5389_s15 + $0xe0] sm:$0xff] %vm3491_vm5, %v3444_v7  ;;  %v3448_v33 = vsub.f32 1.0, %v3447_v26  ;;  %vm3466_vm7 = vweird.f32 %v3009_v34 }
 0x3d2   : > { %v3473_v9 = vor.u32 1.1754944e-38, %v3472_v51  ;;  %vm3471_vm9 = vcmp.eq.f32.partialorder %v3470_v49, 8.507059e+37 }
 0x3d3   : > { %v3449_v58 = vmul.f32 %v4080_v14, %v3448_v33 }
 0x3d5   : > { %v4082_v39 = vpop.eup %4081  ;;  %v3450_v29 = vadd.f32 %v4080_v14, %v3449_v58 }
 0x3d6   : > { %v4084_v42 = vpop.eup %4083  ;;  %v3010_v3 = vadd.f32 1.0, %v4082_v39 }
 0x3d7   : > { %v3454_v31 = vsel %vm3453_vm3, %v4080_v14, %v3450_v29  ;;  %v3462_v41 = vmul.f32 %v4084_v42, %v3009_v34  ;;  %vm3467_vm6 = vweird.f32 %v4084_v42 }
 0x3d8   : > { %v3459_v37 = vsel %vm3456_vm4, %v3458_v48, %v3454_v31  ;;  %4085 = vrcp.f32 %v3010_v3  ;;  %vm3468_vm8 = vmor %vm3466_vm7, %vm3467_vm6  ;;  %v3487_v4 = vand.u32 2147483648, %v3010_v3  ;;  %v3485_v59 = vand.u32 2147483647, %v3010_v3 }
 0x3d9   : > { %3521 = vst.msk [vmem:[%s5389_s15 + $0xe8] sm:$0xff] %vm3491_vm5, %v3459_v37  ;;  %v3463_v28 = vsub.f32 1.0, %v3462_v41  ;;  %vm3481_vm11 = vweird.f32 %v3010_v3 }
 0x3da   : > { %v3488_v57 = vor.u32 1.1754944e-38, %v3487_v4  ;;  %vm3486_vm13 = vcmp.eq.f32.partialorder %v3485_v59, 8.507059e+37 }
 0x3db   : > { %v3464_v47 = vmul.f32 %v4084_v42, %v3463_v28 }
 0x3dd   : > { %v3465_v45 = vadd.f32 %v4084_v42, %v3464_v47 }
 0x3de   : > { %v4086_v20 = vpop.eup %4085 }
 0x3df   : > { %v3469_v17 = vsel %vm3468_vm8, %v4084_v42, %v3465_v45  ;;  %v3477_v44 = vmul.f32 %v4086_v20, %v3010_v3  ;;  %vm3482_vm10 = vweird.f32 %v4086_v20 }
 0x3e0   : > { %v3474_v50 = vsel %vm3471_vm9, %v3473_v9, %v3469_v17  ;;  %vm3483_vm12 = vmor %vm3481_vm11, %vm3482_vm10 }
 0x3e1   : > { %3522 = vst.msk [vmem:[%s5389_s15 + $0xf0] sm:$0xff] %vm3491_vm5, %v3474_v50  ;;  %v3478_v46 = vsub.f32 1.0, %v3477_v44 }
 0x3e3   : > { %v3479_v43 = vmul.f32 %v4086_v20, %v3478_v46 }
 0x3e5   : > { %v3480_v23 = vadd.f32 %v4086_v20, %v3479_v43 }
 0x3e7   : > { %v3484_v10 = vsel %vm3483_vm12, %v4086_v20, %v3480_v23 }
 0x3e8   : > { %v3489_v1 = vsel %vm3486_vm13, %v3488_v57, %v3484_v10 }
 0x3e9   : > { %3523 = vst.msk [vmem:[%s5389_s15 + $0xf8] sm:$0xff] %vm3491_vm5, %v3489_v1 }
 0x3ea PF: > { %s15_s18 = sadd.s32 1, %s4094_s18  }
 0x3eb   : > { %p12_p4 = scmp.ge.s32.totalorder %s15_s18, 4  }
 0x3ed   :  { %14 = sbr.rel (!%p12_p4) target bundleno = 1 (0x1), region = 78 }

// kernel: video_frame_transformer.2
= control target key start
LH: loop header
LB: loop body
LE: loop exit
PB: predicated region body
PF: predicated region fallthrough
CT: control target
= control target key end

     0   :  { %s6224_s18 = smov 0   ;;  %s8088_s0 = inlined_call_operand.vmem [shape: f32[2,16,16,3], index: 0, kind: input, shape index: {}]   ;;  %s8089_s1 = inlined_call_operand.vmem [shape: f32[9,3,64], index: 1, kind: input, shape index: {}]   ;;  %s8090_s2 = inlined_call_operand.vmem [shape: f32[1,64], index: 2, kind: input, shape index: {}]   ;;  %s8091_s3 = inlined_call_operand.vmem [shape: bf16[576,128], index: 3, kind: input, shape index: {}]   ;;  %s8092_s4 = inlined_call_operand.vmem [shape: f32[1,128], index: 4, kind: input, shape index: {}]   ;;  %s8093_s5 = inlined_call_operand.vmem [shape: bf16[2,8,8,128], index: 5, kind: output, shape index: {}]  }
   0x1 LB: > { %s5631_s19 = sadd.s32 4294967295, %s6190_s18   ;;  %p5635_p0 = scmp.ge.s32.totalorder %s6190_s18, 1  ;;  %s6190_s18 = sphi %s6224_s18, %s15_s18  }
   0x2   : > { %p187_p1 = scmp.lt.s32.totalorder %s6190_s18, 3 }
   0x4   : > { %p188_p2 = pnand %p5635_p0, %p187_p1 }
   0x6   : > { %191 = sbr.rel (%p188_p2) target bundleno = 1358 (0x54e), region = 40 }
   0xb   : > { %v5640_v0 = vld [vmem:[%s8089_s1 + $0x4] sm:$0x7]  ;;  %vm566_vm0 = vcmask 1042432   ;;  %v435_v1 = vld [vmem:[%s8089_s1] sm:$0x7]  ;;  %p215_p3 = scmp.lt.s32.totalorder %s5631_s19, 1 }
   0xc   : > { %6168 = vmatpush.msk.msra.mxu2 %vm566_vm0, %v5640_v0  ;;  %6169 = vmatpush.msk.msra.mxu3 %vm566_vm0, %v435_v1  ;;  %vm226_vm1 = vcmask 23552   ;;  %v8094_v2 = vmov 0.0   ;;  %v5707_v4 = vld [vmem:[%s8089_s1 + $0x8] sm:$0x7]  ;;  %v5741_v5 = vld [vmem:[%s8089_s1 + $0xc] sm:$0x7] }
   0xd   : > { %s8200_s19 = smov (!%p215_p3, %s5631_s19), 1  ;;  %252 = vst.msk [vmem:[#allocation2 + $0xc0] sm:$0xff] %vm226_vm1, %v8094_v2  ;;  %5641 = vmatpush.msk.msra.mxu0 %vm566_vm0, %v5640_v0  ;;  %5674 = vmatpush.msk.msra.mxu1 %vm566_vm0, %v435_v1  ;;  %v5775_v10 = vld [vmem:[%s8089_s1 + $0x10] sm:$0x7]  ;;  %vm229_vm2 = vcmask 17408   ;;  %vm282_vm3 = vcmask 523264  }
   0xe   : > { %253 = vst.msk [vmem:[#allocation2 + $0xc8] sm:$0xff] %vm226_vm1, %v8094_v2  ;;  %s6107_s24 = sshll.u32 %s8200_s19, 8  ;;  %5708 = vmatpush.msk.msrb.mxu2 %vm566_vm0, %v5707_v4  ;;  %5742 = vmatpush.msk.msrb.mxu3 %vm566_vm0, %v5741_v5  ;;  %vm285_vm4 = vcmask 517120   ;;  %s6193_s8 = smov 64  }
   0xf   : > { %227 = vst.msk [vmem:[#allocation2] sm:$0xff] %vm226_vm1, %v8094_v2  ;;  %s6254_s27 = scalar_lea.vmem %s8088_s0, %s6107_s24  ;;  %5776 = vmatpush.msk.msrb.mxu0 %vm566_vm0, %v5775_v10  ;;  %s6108_s30 = sshll.u32 %s8200_s19, 5 }
  0x10   : > { %228 = vst.msk [vmem:[#allocation2 + $0x8] sm:$0xff] %vm226_vm1, %v8094_v2  ;;  %v352_v3 = vld [vmem:[%s6254_s27 + $0x70] sm:$0xff]  ;;  %v353_v12 = vld [vmem:[%s6254_s27 + $0x78] sm:$0xff]  ;;  %v354_v16 = vld [vmem:[%s6254_s27 + $0x80] sm:$0xff]  ;;  %s8013_s9 = scalar_lea.vmem %s8093_s5, %s6108_s30 }
  0x11   : > { %231 = vst.msk [vmem:[#allocation2 + $0x18] sm:$0xff] %vm226_vm1, %v8094_v2  ;;  %v355_v17 = vld [vmem:[%s6254_s27 + $0x88] sm:$0xff]  ;;  %v338_v18 = vld [vmem:[%s6254_s27] sm:$0xff]  ;;  %v356_v19 = vld [vmem:[%s6254_s27 + $0x90] sm:$0xff] }
  0x12   : > { %385 = vst.msk [vmem:[#allocation2 + $0xc1] sm:$0xff] %vm226_vm1, %v352_v3  ;;  %v339_v20 = vld [vmem:[%s6254_s27 + $0x8] sm:$0xff]  ;;  %v357_v21 = vld [vmem:[%s6254_s27 + $0x98] sm:$0xff]  ;;  %v340_v22 = vld [vmem:[%s6254_s27 + $0x10] sm:$0xff] }
  0x13   : > { %232 = vst.msk [vmem:[#allocation2 + $0x20] sm:$0xff] %vm226_vm1, %v8094_v2  ;;  %v358_v23 = vld [vmem:[%s6254_s27 + $0xa0] sm:$0xff]  ;;  %v341_v24 = vld [vmem:[%s6254_s27 + $0x18] sm:$0xff]  ;;  %v359_v27 = vld [vmem:[%s6254_s27 + $0xa8] sm:$0xff] }
  0x14   : > { %234 = vst.msk [vmem:[#allocation2 + $0x30] sm:$0xff] %vm226_vm1, %v8094_v2  ;;  %v342_v30 = vld [vmem:[%s6254_s27 + $0x20] sm:$0xff]  ;;  %v360_v35 = vld [vmem:[%s6254_s27 + $0xb0] sm:$0xff]  ;;  %v343_v36 = vld [vmem:[%s6254_s27 + $0x28] sm:$0xff] }
  0x15   : > { %235 = vst.msk [vmem:[#allocation2 + $0x38] sm:$0xff] %vm226_vm1, %v8094_v2  ;;  %v361_v41 = vld [vmem:[%s6254_s27 + $0xb8] sm:$0xff]  ;;  %v344_v42 = vld [vmem:[%s6254_s27 + $0x30] sm:$0xff]  ;;  %v362_v47 = vld [vmem:[%s6254_s27 + $0xc0] sm:$0xff] }
  0x16   : > { %237 = vst.msk [vmem:[#allocation2 + $0x48] sm:$0xff] %vm226_vm1, %v8094_v2  ;;  %v403_v9 = vld [vmem:[#allocation2] sm:$0xff]  ;;  %v345_v48 = vld [vmem:[%s6254_s27 + $0x38] sm:$0xff]  ;;  %v363_v53 = vld [vmem:[%s6254_s27 + $0xc8] sm:$0xff] }
  0x17   : > { %238 = vst.msk [vmem:[#allocation2 + $0x50] sm:$0xff] %vm226_vm1, %v8094_v2  ;;  %v436_v8 = vld [vmem:[#allocation2 + $0x1] sm:$0xff]  ;;  %5675 = vmatmul.msk.f32.vlgmr.msra.gmra.mxu1 %vm226_vm1, %v403_v9  ;;  %v364_v59 = vld [vmem:[%s6254_s27 + $0xd0] sm:$0xff]  ;;  %v365_v1 = vld [vmem:[%s6254_s27 + $0xd8] sm:$0xff] }
  0x18   : > { %240 = vst.msk [vmem:[#allocation2 + $0x60] sm:$0xff] %vm226_vm1, %v8094_v2  ;;  %5642 = vmatmul.msk.f32.vlgmr.msra.gmra.mxu0 %vm226_vm1, %v436_v8  ;;  %v404_v11 = vld [vmem:[#allocation2 + $0x8] sm:$0xff]  ;;  %v346_v54 = vld [vmem:[%s6254_s27 + $0x40] sm:$0xff]  ;;  %v348_v3 = vld [vmem:[%s6254_s27 + $0x50] sm:$0xff] }
  0x19   : > { %v6282_v6 = vld [vmem:[#allocation2 + $0xc1] sm:$0xff]  ;;  %241 = vst.msk [vmem:[#allocation2 + $0x68] sm:$0xff] %vm226_vm1, %v8094_v2 }
  0x1a   : > { %v6286_v7 = vld [vmem:[#allocation2 + $0xc0] sm:$0xff]  ;;  %5658 = vmatmul.msk.f32.vlgmr.msra.gmra.mxu2 %vm226_vm1, %v6282_v6  ;;  %243 = vst.msk [vmem:[#allocation2 + $0x78] sm:$0xff] %vm226_vm1, %v8094_v2  ;;  %v347_v60 = vld [vmem:[%s6254_s27 + $0x48] sm:$0xff] }
  0x1b   : > { %5691 = vmatmul.msk.f32.vlgmr.msra.gmra.mxu3 %vm226_vm1, %v6286_v7  ;;  %244 = vst.msk [vmem:[#allocation2 + $0x80] sm:$0xff] %vm226_vm1, %v8094_v2  ;;  %v366_v10 = vld [vmem:[%s6254_s27 + $0xe0] sm:$0xff] }
  0x1c   : > { %246 = vst.msk [vmem:[#allocation2 + $0x90] sm:$0xff] %vm226_vm1, %v8094_v2 }
  0x1d   : > { %247 = vst.msk [vmem:[#allocation2 + $0x98] sm:$0xff] %vm226_vm1, %v8094_v2 }
  0x1e   : > { %249 = vst.msk [vmem:[#allocation2 + $0xa8] sm:$0xff] %vm226_vm1, %v8094_v2 }
  0x1f   : > { %250 = vst.msk [vmem:[#allocation2 + $0xb0] sm:$0xff] %vm226_vm1, %v8094_v2  ;;  %5676 = vmatmul.msk.f32.gmra.mxu1 %vm226_vm1, %v404_v11  ;;  %v349_v11 = vld [vmem:[%s6254_s27 + $0x58] sm:$0xff] }
  0x20   : > { %255 = vst.msk [vmem:[#allocation2 + $0xd8] sm:$0xff] %vm226_vm1, %v8094_v2 }
  0x21   : > { %256 = vst.msk [vmem:[#allocation2 + $0xe0] sm:$0xff] %vm226_vm1, %v8094_v2 }
  0x22   : > { %258 = vst.msk [vmem:[#allocation2 + $0xf0] sm:$0xff] %vm226_vm1, %v8094_v2 }
  0x23   : > { %259 = vst.msk [vmem:[#allocation2 + $0xf8] sm:$0xff] %vm226_vm1, %v8094_v2 }
  0x24   : > { %261 = vst.msk [vmem:[#allocation2 + $0x108] sm:$0xff] %vm226_vm1, %v8094_v2 }
  0x25   : > { %262 = vst.msk [vmem:[#allocation2 + $0x110] sm:$0xff] %vm226_vm1, %v8094_v2 }
  0x26   : > { %264 = vst.msk [vmem:[#allocation2 + $0x120] sm:$0xff] %vm226_vm1, %v8094_v2 }
  0x27   : > { %265 = vst.msk [vmem:[#allocation2 + $0x128] sm:$0xff] %vm226_vm1, %v8094_v2 }
  0x28   : > { %267 = vst.msk [vmem:[#allocation2 + $0x138] sm:$0xff] %vm226_vm1, %v8094_v2 }
  0x29   : > { %268 = vst.msk [vmem:[#allocation2 + $0x140] sm:$0xff] %vm226_vm1, %v8094_v2 }
  0x2a   : > { %270 = vst.msk [vmem:[#allocation2 + $0x150] sm:$0xff] %vm226_vm1, %v8094_v2 }
  0x2b   : > { %271 = vst.msk [vmem:[#allocation2 + $0x158] sm:$0xff] %vm226_vm1, %v8094_v2 }
  0x2c   : > { %273 = vst.msk [vmem:[#allocation2 + $0x168] sm:$0xff] %vm226_vm1, %v8094_v2 }
  0x2d   : > { %274 = vst.msk [vmem:[#allocation2 + $0x170] sm:$0xff] %vm226_vm1, %v8094_v2 }
  0x2e   : > { %276 = vst.msk [vmem:[#allocation2 + $0x180] sm:$0xff] %vm226_vm1, %v8094_v2 }
  0x2f   : > { %277 = vst.msk [vmem:[#allocation2 + $0x188] sm:$0xff] %vm226_vm1, %v8094_v2 }
  0x30   : > { %279 = vst.msk [vmem:[#allocation2 + $0x198] sm:$0xff] %vm226_vm1, %v8094_v2 }
  0x31   : > { %280 = vst.msk [vmem:[#allocation2 + $0x1a0] sm:$0xff] %vm226_vm1, %v8094_v2 }
  0x32   : > { %254 = vst.msk [vmem:[#allocation2 + $0xd0] sm:$0x3] %vm229_vm2, %v8094_v2 }
  0x33   : > { %386 = vst.msk [vmem:[#allocation2 + $0xc9] sm:$0xff] %vm226_vm1, %v353_v12 }
  0x34   : > { %230 = vst.msk [vmem:[#allocation2 + $0x10] sm:$0x3] %vm229_vm2, %v8094_v2 }
  0x35   : > { %233 = vst.msk [vmem:[#allocation2 + $0x28] sm:$0x3] %vm229_vm2, %v8094_v2 }
  0x36   : > { %236 = vst.msk [vmem:[#allocation2 + $0x40] sm:$0x3] %vm229_vm2, %v8094_v2 }
  0x37   : > { %239 = vst.msk [vmem:[#allocation2 + $0x58] sm:$0x3] %vm229_vm2, %v8094_v2 }
  0x38   : > { %242 = vst.msk [vmem:[#allocation2 + $0x70] sm:$0x3] %vm229_vm2, %v8094_v2 }
  0x39   : > { %245 = vst.msk [vmem:[#allocation2 + $0x88] sm:$0x3] %vm229_vm2, %v8094_v2 }
  0x3a   : > { %v6363_v13 = vld [vmem:[#allocation2 + $0xc9] sm:$0xff]  ;;  %248 = vst.msk [vmem:[#allocation2 + $0xa0] sm:$0x3] %vm229_vm2, %v8094_v2 }
  0x3b   : > { %v6367_v14 = vld [vmem:[#allocation2 + $0xc8] sm:$0xff]  ;;  %5659 = vmatmul.msk.f32.gmra.mxu2 %vm226_vm1, %v6363_v13  ;;  %251 = vst.msk [vmem:[#allocation2 + $0xb8] sm:$0x3] %vm229_vm2, %v8094_v2 }
  0x3c   : > { %5692 = vmatmul.msk.f32.gmra.mxu3 %vm226_vm1, %v6367_v14  ;;  %v437_v15 = vld [vmem:[#allocation2 + $0x9] sm:$0xff]  ;;  %257 = vst.msk [vmem:[#allocation2 + $0xe8] sm:$0x3] %vm229_vm2, %v8094_v2 }
  0x3d   : > { %5643 = vmatmul.msk.f32.gmra.mxu0 %vm226_vm1, %v437_v15  ;;  %260 = vst.msk [vmem:[#allocation2 + $0x100] sm:$0x3] %vm229_vm2, %v8094_v2 }
  0x3e   : > { %263 = vst.msk [vmem:[#allocation2 + $0x118] sm:$0x3] %vm229_vm2, %v8094_v2 }
  0x3f   : > { %266 = vst.msk [vmem:[#allocation2 + $0x130] sm:$0x3] %vm229_vm2, %v8094_v2 }
  0x40   : > { %269 = vst.msk [vmem:[#allocation2 + $0x148] sm:$0x3] %vm229_vm2, %v8094_v2 }
  0x41   : > { %272 = vst.msk [vmem:[#allocation2 + $0x160] sm:$0x3] %vm229_vm2, %v8094_v2 }
  0x42   : > { %275 = vst.msk [vmem:[#allocation2 + $0x178] sm:$0x3] %vm229_vm2, %v8094_v2 }
  0x43   : > { %278 = vst.msk [vmem:[#allocation2 + $0x190] sm:$0x3] %vm229_vm2, %v8094_v2 }
  0x44   : > { %281 = vst.msk [vmem:[#allocation2 + $0x1a8] sm:$0x3] %vm229_vm2, %v8094_v2 }
  0x45   : > { %387 = vst.msk [vmem:[#allocation2 + $0xd9] sm:$0xff] %vm226_vm1, %v354_v16 }
  0x46   : > { %388 = vst.msk [vmem:[#allocation2 + $0xe1] sm:$0xff] %vm226_vm1, %v355_v17 }
  0x47   : > { %371 = vst.msk [vmem:[#allocation2 + $0x19] sm:$0xff] %vm226_vm1, %v338_v18  ;;  %v367_v18 = vld [vmem:[%s6254_s27 + $0xe8] sm:$0xff] }
  0x48   : > { %389 = vst.msk [vmem:[#allocation2 + $0xf1] sm:$0xff] %vm226_vm1, %v356_v19  ;;  %v350_v19 = vld [vmem:[%s6254_s27 + $0x60] sm:$0xff] }
  0x49   : > { %372 = vst.msk [vmem:[#allocation2 + $0x21] sm:$0xff] %vm226_vm1, %v339_v20 }
  0x4a   : > { %390 = vst.msk [vmem:[#allocation2 + $0xf9] sm:$0xff] %vm226_vm1, %v357_v21 }
  0x4b   : > { %373 = vst.msk [vmem:[#allocation2 + $0x31] sm:$0xff] %vm226_vm1, %v340_v22 }
  0x4c   : > { %v6410_v25 = vld [vmem:[#allocation2 + $0xd9] sm:$0xff]  ;;  %391 = vst.msk [vmem:[#allocation2 + $0x109] sm:$0xff] %vm226_vm1, %v358_v23 }
  0x4d   : > { %v6412_v26 = vld [vmem:[#allocation2 + $0xd8] sm:$0xff]  ;;  %5660 = vmatmul.msk.f32.gmra.mxu2 %vm226_vm1, %v6410_v25  ;;  %374 = vst.msk [vmem:[#allocation2 + $0x39] sm:$0xff] %vm226_vm1, %v341_v24  ;;  %v6432_v31 = vld [vmem:[#allocation2 + $0xe1] sm:$0xff] }
  0x4e   : > { %5693 = vmatmul.msk.f32.gmra.mxu3 %vm226_vm1, %v6412_v26  ;;  %v6421_v28 = vld [vmem:[#allocation2 + $0x19] sm:$0xff]  ;;  %392 = vst.msk [vmem:[#allocation2 + $0x111] sm:$0xff] %vm226_vm1, %v359_v27  ;;  %v351_v24 = vld [vmem:[%s6254_s27 + $0x68] sm:$0xff] }
  0x4f   : > { %v6423_v29 = vld [vmem:[#allocation2 + $0x18] sm:$0xff]  ;;  %5644 = vmatmul.msk.f32.gmra.mxu0 %vm226_vm1, %v6421_v28  ;;  %375 = vst.msk [vmem:[#allocation2 + $0x49] sm:$0xff] %vm226_vm1, %v342_v30  ;;  %v6434_v32 = vld [vmem:[#allocation2 + $0xe0] sm:$0xff]  ;;  %v6454_v38 = vld [vmem:[#allocation2 + $0xf0] sm:$0xff] }
  0x50   : > { %5677 = vmatmul.msk.f32.gmra.mxu1 %vm226_vm1, %v6423_v29  ;;  %v6436_v33 = vld [vmem:[#allocation2 + $0x21] sm:$0xff]  ;;  %393 = vst.msk [vmem:[#allocation2 + $0x121] sm:$0xff] %vm226_vm1, %v360_v35  ;;  %v6452_v37 = vld [vmem:[#allocation2 + $0xf1] sm:$0xff] }
  0x51   : > { %v6438_v34 = vld [vmem:[#allocation2 + $0x20] sm:$0xff]  ;;  %376 = vst.msk [vmem:[#allocation2 + $0x51] sm:$0xff] %vm226_vm1, %v343_v36  ;;  %v6474_v44 = vld [vmem:[#allocation2 + $0xf8] sm:$0xff] }
  0x52   : > { %v6456_v39 = vld [vmem:[#allocation2 + $0x31] sm:$0xff]  ;;  %394 = vst.msk [vmem:[#allocation2 + $0x129] sm:$0xff] %vm226_vm1, %v361_v41  ;;  %v6472_v43 = vld [vmem:[#allocation2 + $0xf9] sm:$0xff] }
  0x53   : > { %v6458_v40 = vld [vmem:[#allocation2 + $0x30] sm:$0xff]  ;;  %377 = vst.msk [vmem:[#allocation2 + $0x61] sm:$0xff] %vm226_vm1, %v344_v42  ;;  %v6494_v50 = vld [vmem:[#allocation2 + $0x108] sm:$0xff]  ;;  %v5843_v41 = vld [vmem:[%s8089_s1 + $0x18] sm:$0x7] }
  0x54   : > { %v6476_v45 = vld [vmem:[#allocation2 + $0x39] sm:$0xff]  ;;  %395 = vst.msk [vmem:[#allocation2 + $0x139] sm:$0xff] %vm226_vm1, %v362_v47  ;;  %v6492_v49 = vld [vmem:[#allocation2 + $0x109] sm:$0xff]  ;;  %5844 = vmatpush.msk.msra.mxu2 %vm566_vm0, %v5843_v41 }
  0x55   : > { %5661 = vmatmul.msk.f32.gmra.mxu2 %vm226_vm1, %v6432_v31  ;;  %v6478_v46 = vld [vmem:[#allocation2 + $0x38] sm:$0xff]  ;;  %378 = vst.msk [vmem:[#allocation2 + $0x69] sm:$0xff] %vm226_vm1, %v345_v48  ;;  %v6514_v56 = vld [vmem:[#allocation2 + $0x110] sm:$0xff] }
  0x56   : > { %5694 = vmatmul.msk.f32.gmra.mxu3 %vm226_vm1, %v6434_v32  ;;  %v6496_v51 = vld [vmem:[#allocation2 + $0x49] sm:$0xff]  ;;  %396 = vst.msk [vmem:[#allocation2 + $0x141] sm:$0xff] %vm226_vm1, %v363_v53  ;;  %v6512_v55 = vld [vmem:[#allocation2 + $0x111] sm:$0xff]  ;;  %v5877_v42 = vld [vmem:[%s8089_s1 + $0x1c] sm:$0x7] }
  0x57   : > { %5645 = vmatmul.msk.f32.gmra.mxu0 %vm226_vm1, %v6436_v33  ;;  %v6498_v52 = vld [vmem:[#allocation2 + $0x48] sm:$0xff]  ;;  %379 = vst.msk [vmem:[#allocation2 + $0x79] sm:$0xff] %vm226_vm1, %v346_v54  ;;  %v6534_v62 = vld [vmem:[#allocation2 + $0x120] sm:$0xff]  ;;  %5878 = vmatpush.msk.msra.mxu3 %vm566_vm0, %v5877_v42 }
  0x58   : > { %5678 = vmatmul.msk.f32.gmra.mxu1 %vm226_vm1, %v6438_v34  ;;  %v6516_v57 = vld [vmem:[#allocation2 + $0x51] sm:$0xff]  ;;  %397 = vst.msk [vmem:[#allocation2 + $0x151] sm:$0xff] %vm226_vm1, %v364_v59  ;;  %v6532_v61 = vld [vmem:[#allocation2 + $0x121] sm:$0xff] }
  0x59   : > { %v6518_v58 = vld [vmem:[#allocation2 + $0x50] sm:$0xff]  ;;  %380 = vst.msk [vmem:[#allocation2 + $0x81] sm:$0xff] %vm226_vm1, %v347_v60  ;;  %v6554_v5 = vld [vmem:[#allocation2 + $0x128] sm:$0xff]  ;;  %v5911_v59 = vld [vmem:[%s8089_s1 + $0x20] sm:$0x7] }
  0x5a   : > { %v6536_v63 = vld [vmem:[#allocation2 + $0x61] sm:$0xff]  ;;  %398 = vst.msk [vmem:[#allocation2 + $0x159] sm:$0xff] %vm226_vm1, %v365_v1  ;;  %v6552_v4 = vld [vmem:[#allocation2 + $0x129] sm:$0xff]  ;;  %v5809_v60 = vld [vmem:[%s8089_s1 + $0x14] sm:$0x7]  ;;  %5912 = vmatpush.msk.msra.mxu0 %vm566_vm0, %v5911_v59 }
  0x5b   : > { %v6538_v0 = vld [vmem:[#allocation2 + $0x60] sm:$0xff]  ;;  %381 = vst.msk [vmem:[#allocation2 + $0x91] sm:$0xff] %vm226_vm1, %v348_v3  ;;  %v6574_v15 = vld [vmem:[#allocation2 + $0x138] sm:$0xff]  ;;  %5810 = vmatpush.msk.msrb.mxu1 %vm566_vm0, %v5809_v60 }
  0x5c   : > { %v6556_v8 = vld [vmem:[#allocation2 + $0x69] sm:$0xff]  ;;  %399 = vst.msk [vmem:[#allocation2 + $0x169] sm:$0xff] %vm226_vm1, %v366_v10  ;;  %v6572_v12 = vld [vmem:[#allocation2 + $0x139] sm:$0xff] }
  0x5d   : > { %5662 = vmatmul.msk.f32.gmra.mxu2 %vm226_vm1, %v6452_v37  ;;  %v6558_v9 = vld [vmem:[#allocation2 + $0x68] sm:$0xff]  ;;  %382 = vst.msk [vmem:[#allocation2 + $0x99] sm:$0xff] %vm226_vm1, %v349_v11  ;;  %v6594_v21 = vld [vmem:[#allocation2 + $0x140] sm:$0xff] }
  0x5e   : > { %5695 = vmatmul.msk.f32.gmra.mxu3 %vm226_vm1, %v6454_v38  ;;  %v6576_v16 = vld [vmem:[#allocation2 + $0x79] sm:$0xff]  ;;  %400 = vst.msk [vmem:[#allocation2 + $0x171] sm:$0xff] %vm226_vm1, %v367_v18  ;;  %v6592_v20 = vld [vmem:[#allocation2 + $0x141] sm:$0xff] }
  0x5f   : > { %5646 = vmatmul.msk.f32.gmra.mxu0 %vm226_vm1, %v6456_v39  ;;  %v6578_v17 = vld [vmem:[#allocation2 + $0x78] sm:$0xff]  ;;  %383 = vst.msk [vmem:[#allocation2 + $0xa9] sm:$0xff] %vm226_vm1, %v350_v19  ;;  %v6612_v30 = vld [vmem:[#allocation2 + $0x150] sm:$0xff]  ;;  %v895_v60 = vld [vmem:[#allocation2 + $0x2] sm:$0xff] }
  0x60   : > { %5679 = vmatmul.msk.f32.gmra.mxu1 %vm226_vm1, %v6458_v40  ;;  %v6596_v22 = vld [vmem:[#allocation2 + $0x81] sm:$0xff]  ;;  %384 = vst.msk [vmem:[#allocation2 + $0xb1] sm:$0xff] %vm226_vm1, %v351_v24  ;;  %v6610_v27 = vld [vmem:[#allocation2 + $0x151] sm:$0xff] }
  0x61   : > { %v6598_v23 = vld [vmem:[#allocation2 + $0x80] sm:$0xff]  ;;  %8116 = vst [vmem:[#allocation5_spill] sm:$0xff] %v6610_v27  ;;  %v6636_v48 = vld [vmem:[#allocation2 + $0x158] sm:$0xff] }
  0x62   : > { %v6614_v35 = vld [vmem:[#allocation2 + $0x91] sm:$0xff]  ;;  %v6634_v47 = vld [vmem:[#allocation2 + $0x159] sm:$0xff]  ;;  %8118 = vst [vmem:[#allocation7_spill] sm:$0xff] %v6636_v48 }
  0x63   : > { %v6616_v36 = vld [vmem:[#allocation2 + $0x90] sm:$0xff]  ;;  %8117 = vst [vmem:[#allocation6_spill] sm:$0xff] %v6634_v47  ;;  %v6660_v3 = vld [vmem:[#allocation2 + $0x168] sm:$0xff] }
  0x64   : > { %v6638_v53 = vld [vmem:[#allocation2 + $0x99] sm:$0xff]  ;;  %v6658_v1 = vld [vmem:[#allocation2 + $0x169] sm:$0xff]  ;;  %8120 = vst [vmem:[#allocation9_spill] sm:$0xff] %v6660_v3 }
  0x65   : > { %5663 = vmatmul.msk.f32.gmra.mxu2 %vm226_vm1, %v6472_v43  ;;  %v6640_v54 = vld [vmem:[#allocation2 + $0x98] sm:$0xff]  ;;  %8119 = vst [vmem:[#allocation8_spill] sm:$0xff] %v6658_v1  ;;  %v6676_v19 = vld [vmem:[#allocation2 + $0x170] sm:$0xff] }
  0x66   : > { %5696 = vmatmul.msk.f32.gmra.mxu3 %vm226_vm1, %v6474_v44  ;;  %v6662_v10 = vld [vmem:[#allocation2 + $0xa9] sm:$0xff]  ;;  %v6674_v18 = vld [vmem:[#allocation2 + $0x171] sm:$0xff]  ;;  %8122 = vst [vmem:[#allocation11_spill] sm:$0xff] %v6676_v19 }
  0x67   : > { %5647 = vmatmul.msk.f32.gmra.mxu0 %vm226_vm1, %v6476_v45  ;;  %v6664_v11 = vld [vmem:[#allocation2 + $0xa8] sm:$0xff]  ;;  %8121 = vst [vmem:[#allocation10_spill] sm:$0xff] %v6674_v18  ;;  %v6678_v24 = vld [vmem:[#allocation2 + $0xb1] sm:$0xff] }
  0x68   : > { %5680 = vmatmul.msk.f32.gmra.mxu1 %vm226_vm1, %v6478_v46  ;;  %v6680_v41 = vld [vmem:[#allocation2 + $0xb0] sm:$0xff] }
  0x6d   : > { %5664 = vmatmul.msk.f32.gmra.mxu2 %vm226_vm1, %v6492_v49 }
  0x6e   : > { %5697 = vmatmul.msk.f32.gmra.mxu3 %vm226_vm1, %v6494_v50 }
  0x6f   : > { %5648 = vmatmul.msk.f32.gmra.mxu0 %vm226_vm1, %v6496_v51 }
  0x70   : > { %5681 = vmatmul.msk.f32.gmra.mxu1 %vm226_vm1, %v6498_v52 }
  0x75   : > { %5665 = vmatmul.msk.f32.gmra.mxu2 %vm226_vm1, %v6512_v55 }
  0x76   : > { %5698 = vmatmul.msk.f32.gmra.mxu3 %vm226_vm1, %v6514_v56 }
  0x77   : > { %5649 = vmatmul.msk.f32.gmra.mxu0 %vm226_vm1, %v6516_v57 }
  0x78   : > { %5682 = vmatmul.msk.f32.gmra.mxu1 %vm226_vm1, %v6518_v58 }
  0x7d   : > { %5666 = vmatmul.msk.f32.gmra.mxu2 %vm226_vm1, %v6532_v61 }
  0x7e   : > { %5699 = vmatmul.msk.f32.gmra.mxu3 %vm226_vm1, %v6534_v62 }
  0x7f   : > { %5650 = vmatmul.msk.f32.gmra.mxu0 %vm226_vm1, %v6536_v63 }
  0x80   : > { %5683 = vmatmul.msk.f32.gmra.mxu1 %vm226_vm1, %v6538_v0 }
  0x85   : > { %5667 = vmatmul.msk.f32.gmra.mxu2 %vm226_vm1, %v6552_v4 }
  0x86   : > { %5700 = vmatmul.msk.f32.gmra.mxu3 %vm226_vm1, %v6554_v5 }
  0x87   : > { %5651 = vmatmul.msk.f32.gmra.mxu0 %vm226_vm1, %v6556_v8 }
  0x88   : > { %5684 = vmatmul.msk.f32.gmra.mxu1 %vm226_vm1, %v6558_v9 }
  0x8d   : > { %5668 = vmatmul.msk.f32.gmra.mxu2 %vm226_vm1, %v6572_v12 }
  0x8e   : > { %5701 = vmatmul.msk.f32.gmra.mxu3 %vm226_vm1, %v6574_v15 }
  0x8f   : > { %5652 = vmatmul.msk.f32.gmra.mxu0 %vm226_vm1, %v6576_v16 }
  0x90   : > { %5685 = vmatmul.msk.f32.gmra.mxu1 %vm226_vm1, %v6578_v17 }
  0x94   : > { %v6692_v59 = vpop.f32.mrf.mxu1 }
  0x95   : > { %5669 = vmatmul.msk.f32.gmra.mxu2 %vm226_vm1, %v6592_v20  ;;  %v6690_v42 = vpop.f32.mrf.mxu0 }
  0x96   : > { %5702 = vmatmul.msk.f32.gmra.mxu3 %vm226_vm1, %v6594_v21 }
  0x97   : > { %5653 = vmatmul.msk.f32.gmra.mxu0 %vm226_vm1, %v6596_v22 }
  0x98   : > { %5686 = vmatmul.msk.f32.gmra.mxu1 %vm226_vm1, %v6598_v23 }
  0x9d   : > { %5670 = vmatmul.msk.f32.gmra.mxu2 %vm226_vm1, %v6610_v27  ;;  %v6694_v2 = vpop.f32.mrf.mxu2  ;;  %v6737_v27 = vld [vmem:[#allocation2 + $0x3a] sm:$0xff] }
  0x9e   : > { %5703 = vmatmul.msk.f32.gmra.mxu3 %vm226_vm1, %v6612_v30  ;;  %8123 = vst [vmem:[#allocation12_spill] sm:$0xff] %v6694_v2  ;;  %v6722_v2 = vld [vmem:[#allocation2 + $0x32] sm:$0xff] }
  0x9f   : > { %5654 = vmatmul.msk.f32.gmra.mxu0 %vm226_vm1, %v6614_v35  ;;  %8127 = vst [vmem:[#allocation16_spill] sm:$0xff] %v6722_v2 }
  0xa0   : > { %5687 = vmatmul.msk.f32.gmra.mxu1 %vm226_vm1, %v6616_v36  ;;  %8129 = vst [vmem:[#allocation18_spill] sm:$0xff] %v6737_v27 }
  0xa5   : > { %5671 = vmatmul.msk.f32.gmra.mxu2 %vm226_vm1, %v6634_v47  ;;  %v6706_v47 = vpop.f32.mrf.mxu1 }
  0xa6   : > { %5704 = vmatmul.msk.f32.gmra.mxu3 %vm226_vm1, %v6636_v48  ;;  %v1730_v48 = vld [vmem:[#allocation2 + $0x22] sm:$0xff] }
  0xa7   : > { %5655 = vmatmul.msk.f32.gmra.mxu0 %vm226_vm1, %v6638_v53 }
  0xa8   : > { %5688 = vmatmul.msk.f32.gmra.mxu1 %vm226_vm1, %v6640_v54 }
  0xad   : > { %5672 = vmatmul.msk.f32.gmra.mxu2 %vm226_vm1, %v6658_v1  ;;  %v6696_v1 = vpop.f32.mrf.mxu3 }
  0xae   : > { %5705 = vmatmul.msk.f32.gmra.mxu3 %vm226_vm1, %v6660_v3  ;;  %8124 = vst [vmem:[#allocation13_spill] sm:$0xff] %v6696_v1  ;;  %v1729_v3 = vld [vmem:[#allocation2 + $0x1a] sm:$0xff] }
  0xaf   : > { %5656 = vmatmul.msk.f32.gmra.mxu0 %vm226_vm1, %v6662_v10 }
  0xb0   : > { %5689 = vmatmul.msk.f32.gmra.mxu1 %vm226_vm1, %v6664_v11 }
  0xb5   : > { %5673 = vmatmul.msk.f32.gmra.mxu2 %vm226_vm1, %v6674_v18  ;;  %v896_v18 = vld [vmem:[#allocation2 + $0xa] sm:$0xff] }
  0xb6   : > { %5706 = vmatmul.msk.f32.gmra.mxu3 %vm226_vm1, %v6676_v19 }
  0xb7   : > { %5657 = vmatmul.msk.f32.gmra.mxu0 %vm226_vm1, %v6678_v24 }
  0xb8   : > { %5690 = vmatmul.msk.f32.gmra.mxu1 %vm226_vm1, %v6680_v41 }
  0xba   : > { %v6704_v19 = vpop.f32.mrf.mxu0 }
  0xbd   : > { %5709 = vmatmul.msk.f32.vlgmr.msrb.gmra.mxu2 %vm226_vm1, %v895_v60 }
  0xbe   : > { %5743 = vmatmul.msk.f32.vlgmr.msrb.gmra.mxu3 %vm226_vm1, %v6423_v29  ;;  %v6711_v60 = vpop.f32.mrf.mxu2 }
  0xbf   : > { %5777 = vmatmul.msk.f32.vlgmr.msrb.gmra.mxu0 %vm226_vm1, %v6421_v28  ;;  %8125 = vst [vmem:[#allocation14_spill] sm:$0xff] %v6711_v60  ;;  %v6713_v1 = vpop.f32.mrf.mxu3 }
  0xc0   : > { %5811 = vmatmul.msk.f32.vlgmr.msrb.gmra.mxu1 %vm226_vm1, %v1729_v3  ;;  %8126 = vst [vmem:[#allocation15_spill] sm:$0xff] %v6713_v1 }
  0xc5   : > { %5710 = vmatmul.msk.f32.gmra.mxu2 %vm226_vm1, %v896_v18 }
  0xc6   : > { %5744 = vmatmul.msk.f32.gmra.mxu3 %vm226_vm1, %v6438_v34 }
  0xc7   : > { %5778 = vmatmul.msk.f32.gmra.mxu0 %vm226_vm1, %v6436_v33 }
  0xc8   : > { %5812 = vmatmul.msk.f32.gmra.mxu1 %vm226_vm1, %v1730_v48 }
  0xcc   : > { %v6718_v28 = vpop.f32.mrf.mxu0 }
  0xcd   : > { %v6720_v29 = vpop.f32.mrf.mxu1  ;;  %5711 = vmatmul.msk.f32.gmra.mxu2 %vm226_vm1, %v1729_v3 }
  0xce   : > { %5745 = vmatmul.msk.f32.gmra.mxu3 %vm226_vm1, %v6458_v40 }
  0xcf   : > { %5779 = vmatmul.msk.f32.gmra.mxu0 %vm226_vm1, %v6456_v39 }
  0xd0   : > { %5813 = vmatmul.msk.f32.gmra.mxu1 %vm226_vm1, %v6722_v2  ;;  %v641_v33 = vpop.f32.mrf.mxu2 }
  0xd1   : > { %v853_v34 = vpop.f32.mrf.mxu3 }
  0xd2   : > { %v6731_v18 = vadd.f32 %v853_v34, %v641_v33 }
  0xd4   : > { %8128 = vst [vmem:[#allocation17_spill] sm:$0xff] %v6731_v18  ;;  %v6733_v1 = vpop.f32.mrf.mxu0  ;;  %v6752_v18 = vld [vmem:[#allocation2 + $0x4a] sm:$0xff] }
  0xd5   : > { %v6735_v60 = vpop.f32.mrf.mxu1  ;;  %5712 = vmatmul.msk.f32.gmra.mxu2 %vm226_vm1, %v1730_v48  ;;  %8131 = vst [vmem:[#allocation20_spill] sm:$0xff] %v6752_v18 }
  0xd6   : > { %5746 = vmatmul.msk.f32.gmra.mxu3 %vm226_vm1, %v6478_v46 }
  0xd7   : > { %5780 = vmatmul.msk.f32.gmra.mxu0 %vm226_vm1, %v6476_v45 }
  0xd8   : > { %5814 = vmatmul.msk.f32.gmra.mxu1 %vm226_vm1, %v6737_v27  ;;  %v644_v39 = vpop.f32.mrf.mxu2 }
  0xd9   : > { %v856_v40 = vpop.f32.mrf.mxu3 }
  0xda   : > { %v6746_v3 = vadd.f32 %v856_v40, %v644_v39 }
  0xdc   : > { %8130 = vst [vmem:[#allocation19_spill] sm:$0xff] %v6746_v3  ;;  %v6748_v33 = vpop.f32.mrf.mxu0  ;;  %v6768_v3 = vld [vmem:[#allocation2 + $0x52] sm:$0xff] }
  0xdd   : > { %v6750_v34 = vpop.f32.mrf.mxu1  ;;  %5713 = vmatmul.msk.f32.gmra.mxu2 %vm226_vm1, %v6722_v2  ;;  %8133 = vst [vmem:[#allocation22_spill] sm:$0xff] %v6768_v3  ;;  %v6784_v2 = vld [vmem:[#allocation2 + $0x62] sm:$0xff] }
  0xde   : > { %5747 = vmatmul.msk.f32.gmra.mxu3 %vm226_vm1, %v6498_v52  ;;  %8135 = vst [vmem:[#allocation24_spill] sm:$0xff] %v6784_v2 }
  0xdf   : > { %5781 = vmatmul.msk.f32.gmra.mxu0 %vm226_vm1, %v6496_v51 }
  0xe0   : > { %5815 = vmatmul.msk.f32.gmra.mxu1 %vm226_vm1, %v6752_v18  ;;  %v647_v45 = vpop.f32.mrf.mxu2 }
  0xe1   : > { %v859_v46 = vpop.f32.mrf.mxu3 }
  0xe2   : > { %v6762_v48 = vadd.f32 %v859_v46, %v647_v45 }
  0xe4   : > { %8132 = vst [vmem:[#allocation21_spill] sm:$0xff] %v6762_v48  ;;  %v6764_v39 = vpop.f32.mrf.mxu0 }
  0xe5   : > { %v6766_v40 = vpop.f32.mrf.mxu1  ;;  %5714 = vmatmul.msk.f32.gmra.mxu2 %vm226_vm1, %v6737_v27  ;;  %v6800_v27 = vld [vmem:[#allocation2 + $0x6a] sm:$0xff] }
  0xe6   : > { %5748 = vmatmul.msk.f32.gmra.mxu3 %vm226_vm1, %v6518_v58  ;;  %8137 = vst [vmem:[#allocation26_spill] sm:$0xff] %v6800_v27 }
  0xe7   : > { %5782 = vmatmul.msk.f32.gmra.mxu0 %vm226_vm1, %v6516_v57 }
  0xe8   : > { %5816 = vmatmul.msk.f32.gmra.mxu1 %vm226_vm1, %v6768_v3  ;;  %v650_v51 = vpop.f32.mrf.mxu2 }
  0xe9   : > { %v862_v52 = vpop.f32.mrf.mxu3 }
  0xea   : > { %v6778_v45 = vadd.f32 %v862_v52, %v650_v51 }
  0xec   : > { %8134 = vst [vmem:[#allocation23_spill] sm:$0xff] %v6778_v45  ;;  %v6780_v46 = vpop.f32.mrf.mxu0 }
  0xed   : > { %v6782_v48 = vpop.f32.mrf.mxu1  ;;  %5715 = vmatmul.msk.f32.gmra.mxu2 %vm226_vm1, %v6752_v18  ;;  %v6816_v18 = vld [vmem:[#allocation2 + $0x7a] sm:$0xff] }
  0xee   : > { %5749 = vmatmul.msk.f32.gmra.mxu3 %vm226_vm1, %v6538_v0  ;;  %8139 = vst [vmem:[#allocation28_spill] sm:$0xff] %v6816_v18 }
  0xef   : > { %5783 = vmatmul.msk.f32.gmra.mxu0 %vm226_vm1, %v6536_v63 }
  0xf0   : > { %5817 = vmatmul.msk.f32.gmra.mxu1 %vm226_vm1, %v6784_v2  ;;  %v653_v57 = vpop.f32.mrf.mxu2 }
  0xf1   : > { %v865_v58 = vpop.f32.mrf.mxu3 }
  0xf2   : > { %v6794_v51 = vadd.f32 %v865_v58, %v653_v57 }
  0xf4   : > { %8136 = vst [vmem:[#allocation25_spill] sm:$0xff] %v6794_v51  ;;  %v6796_v52 = vpop.f32.mrf.mxu0 }
  0xf5   : > { %v6798_v45 = vpop.f32.mrf.mxu1  ;;  %5716 = vmatmul.msk.f32.gmra.mxu2 %vm226_vm1, %v6768_v3  ;;  %v6832_v3 = vld [vmem:[#allocation2 + $0x82] sm:$0xff] }
  0xf6   : > { %5750 = vmatmul.msk.f32.gmra.mxu3 %vm226_vm1, %v6558_v9  ;;  %8141 = vst [vmem:[#allocation30_spill] sm:$0xff] %v6832_v3 }
  0xf7   : > { %5784 = vmatmul.msk.f32.gmra.mxu0 %vm226_vm1, %v6556_v8 }
  0xf8   : > { %5818 = vmatmul.msk.f32.gmra.mxu1 %vm226_vm1, %v6800_v27  ;;  %v656_v63 = vpop.f32.mrf.mxu2 }
  0xf9   : > { %v868_v0 = vpop.f32.mrf.mxu3 }
  0xfa   : > { %v6810_v57 = vadd.f32 %v868_v0, %v656_v63 }
  0xfc   : > { %8138 = vst [vmem:[#allocation27_spill] sm:$0xff] %v6810_v57  ;;  %v6812_v58 = vpop.f32.mrf.mxu0 }
  0xfd   : > { %v6814_v51 = vpop.f32.mrf.mxu1  ;;  %5717 = vmatmul.msk.f32.gmra.mxu2 %vm226_vm1, %v6784_v2  ;;  %v6848_v2 = vld [vmem:[#allocation2 + $0x92] sm:$0xff] }
  0xfe   : > { %5751 = vmatmul.msk.f32.gmra.mxu3 %vm226_vm1, %v6578_v17  ;;  %8143 = vst [vmem:[#allocation32_spill] sm:$0xff] %v6848_v2 }
  0xff   : > { %5785 = vmatmul.msk.f32.gmra.mxu0 %vm226_vm1, %v6576_v16 }
 0x100   : > { %5819 = vmatmul.msk.f32.gmra.mxu1 %vm226_vm1, %v6816_v18  ;;  %v659_v8 = vpop.f32.mrf.mxu2 }
 0x101   : > { %v871_v9 = vpop.f32.mrf.mxu3 }
 0x102   : > { %v6826_v63 = vadd.f32 %v871_v9, %v659_v8 }
 0x104   : > { %8140 = vst [vmem:[#allocation29_spill] sm:$0xff] %v6826_v63  ;;  %v6828_v0 = vpop.f32.mrf.mxu0 }
 0x105   : > { %v6830_v57 = vpop.f32.mrf.mxu1  ;;  %5718 = vmatmul.msk.f32.gmra.mxu2 %vm226_vm1, %v6800_v27  ;;  %v6864_v27 = vld [vmem:[#allocation2 + $0x9a] sm:$0xff] }
 0x106   : > { %5752 = vmatmul.msk.f32.gmra.mxu3 %vm226_vm1, %v6598_v23  ;;  %8145 = vst [vmem:[#allocation34_spill] sm:$0xff] %v6864_v27 }
 0x107   : > { %5786 = vmatmul.msk.f32.gmra.mxu0 %vm226_vm1, %v6596_v22 }
 0x108   : > { %5820 = vmatmul.msk.f32.gmra.mxu1 %vm226_vm1, %v6832_v3  ;;  %v662_v16 = vpop.f32.mrf.mxu2 }
 0x109   : > { %v874_v17 = vpop.f32.mrf.mxu3 }
 0x10a   : > { %v6842_v8 = vadd.f32 %v874_v17, %v662_v16 }
 0x10c   : > { %8142 = vst [vmem:[#allocation31_spill] sm:$0xff] %v6842_v8  ;;  %v6844_v9 = vpop.f32.mrf.mxu0 }
 0x10d   : > { %v6846_v63 = vpop.f32.mrf.mxu1  ;;  %5719 = vmatmul.msk.f32.gmra.mxu2 %vm226_vm1, %v6816_v18  ;;  %v6880_v18 = vld [vmem:[#allocation2 + $0xaa] sm:$0xff] }
 0x10e   : > { %5753 = vmatmul.msk.f32.gmra.mxu3 %vm226_vm1, %v6616_v36  ;;  %8147 = vst [vmem:[#allocation36_spill] sm:$0xff] %v6880_v18 }
 0x10f   : > { %5787 = vmatmul.msk.f32.gmra.mxu0 %vm226_vm1, %v6614_v35 }
 0x110   : > { %5821 = vmatmul.msk.f32.gmra.mxu1 %vm226_vm1, %v6848_v2  ;;  %v665_v22 = vpop.f32.mrf.mxu2 }
 0x111   : > { %v877_v23 = vpop.f32.mrf.mxu3 }
 0x112   : > { %v6858_v16 = vadd.f32 %v877_v23, %v665_v22 }
 0x114   : > { %8144 = vst [vmem:[#allocation33_spill] sm:$0xff] %v6858_v16  ;;  %v6860_v17 = vpop.f32.mrf.mxu0 }
 0x115   : > { %v6862_v8 = vpop.f32.mrf.mxu1  ;;  %5720 = vmatmul.msk.f32.gmra.mxu2 %vm226_vm1, %v6832_v3  ;;  %v6896_v3 = vld [vmem:[#allocation2 + $0xb2] sm:$0xff] }
 0x116   : > { %5754 = vmatmul.msk.f32.gmra.mxu3 %vm226_vm1, %v6640_v54  ;;  %8149 = vst [vmem:[#allocation38_spill] sm:$0xff] %v6896_v3 }
 0x117   : > { %5788 = vmatmul.msk.f32.gmra.mxu0 %vm226_vm1, %v6638_v53 }
 0x118   : > { %5822 = vmatmul.msk.f32.gmra.mxu1 %vm226_vm1, %v6864_v27  ;;  %v668_v35 = vpop.f32.mrf.mxu2 }
 0x119   : > { %v880_v36 = vpop.f32.mrf.mxu3 }
 0x11a   : > { %v6874_v22 = vadd.f32 %v880_v36, %v668_v35 }
 0x11c   : > { %8146 = vst [vmem:[#allocation35_spill] sm:$0xff] %v6874_v22  ;;  %v6876_v23 = vpop.f32.mrf.mxu0 }
 0x11d   : > { %v6878_v16 = vpop.f32.mrf.mxu1  ;;  %5721 = vmatmul.msk.f32.gmra.mxu2 %vm226_vm1, %v6848_v2  ;;  %v6912_v2 = vld [vmem:[#allocation2 + $0xc2] sm:$0xff] }
 0x11e   : > { %5755 = vmatmul.msk.f32.gmra.mxu3 %vm226_vm1, %v6664_v11  ;;  %8151 = vst [vmem:[#allocation40_spill] sm:$0xff] %v6912_v2 }
 0x11f   : > { %5789 = vmatmul.msk.f32.gmra.mxu0 %vm226_vm1, %v6662_v10 }
 0x120   : > { %5823 = vmatmul.msk.f32.gmra.mxu1 %vm226_vm1, %v6880_v18  ;;  %v671_v53 = vpop.f32.mrf.mxu2 }
 0x121   : > { %v883_v54 = vpop.f32.mrf.mxu3 }
 0x122   : > { %v6890_v35 = vadd.f32 %v883_v54, %v671_v53 }
 0x124   : > { %8148 = vst [vmem:[#allocation37_spill] sm:$0xff] %v6890_v35  ;;  %v6892_v36 = vpop.f32.mrf.mxu0 }
 0x125   : > { %v6894_v22 = vpop.f32.mrf.mxu1  ;;  %5722 = vmatmul.msk.f32.gmra.mxu2 %vm226_vm1, %v6864_v27  ;;  %v6928_v27 = vld [vmem:[#allocation2 + $0xca] sm:$0xff] }
 0x126   : > { %5756 = vmatmul.msk.f32.gmra.mxu3 %vm226_vm1, %v6680_v41 }
 0x127   : > { %5790 = vmatmul.msk.f32.gmra.mxu0 %vm226_vm1, %v6678_v24 }
 0x128   : > { %5824 = vmatmul.msk.f32.gmra.mxu1 %vm226_vm1, %v6896_v3  ;;  %v674_v10 = vpop.f32.mrf.mxu2 }
 0x129   : > { %v886_v11 = vpop.f32.mrf.mxu3 }
 0x12a   : > { %v6906_v53 = vadd.f32 %v886_v11, %v674_v10 }
 0x12c   : > { %8150 = vst [vmem:[#allocation39_spill] sm:$0xff] %v6906_v53  ;;  %v6908_v54 = vpop.f32.mrf.mxu0 }
 0x12d   : > { %v6910_v35 = vpop.f32.mrf.mxu1  ;;  %5723 = vmatmul.msk.f32.gmra.mxu2 %vm226_vm1, %v6880_v18  ;;  %v6940_v18 = vld [vmem:[#allocation2 + $0xda] sm:$0xff] }
 0x12e   : > { %5757 = vmatmul.msk.f32.gmra.mxu3 %vm226_vm1, %v6286_v7 }
 0x12f   : > { %5791 = vmatmul.msk.f32.gmra.mxu0 %vm226_vm1, %v6282_v6 }
 0x130   : > { %5825 = vmatmul.msk.f32.gmra.mxu1 %vm226_vm1, %v6912_v2  ;;  %v677_v24 = vpop.f32.mrf.mxu2 }
 0x131   : > { %v889_v41 = vpop.f32.mrf.mxu3 }
 0x132   : > { %v6922_v10 = vadd.f32 %v889_v41, %v677_v24 }
 0x134   : > { %8152 = vst [vmem:[#allocation41_spill] sm:$0xff] %v6922_v10  ;;  %v6924_v11 = vpop.f32.mrf.mxu0 }
 0x135   : > { %8153 = vst [vmem:[#allocation42_spill] sm:$0xff] %v6924_v11  ;;  %v6926_v53 = vpop.f32.mrf.mxu1  ;;  %5724 = vmatmul.msk.f32.gmra.mxu2 %vm226_vm1, %v6896_v3  ;;  %v6952_v11 = vld [vmem:[#allocation2 + $0xe2] sm:$0xff] }
 0x136   : > { %8154 = vst [vmem:[#allocation43_spill] sm:$0xff] %v6926_v53  ;;  %5758 = vmatmul.msk.f32.gmra.mxu3 %vm226_vm1, %v6367_v14 }
 0x137   : > { %5792 = vmatmul.msk.f32.gmra.mxu0 %vm226_vm1, %v6363_v13  ;;  %v800_v13 = vadd.f32 %v6692_v59, %v6690_v42 }
 0x138   : > { %5826 = vmatmul.msk.f32.gmra.mxu1 %vm226_vm1, %v6928_v27  ;;  %v680_v6 = vpop.f32.mrf.mxu2 }
 0x139   : > { %v892_v7 = vpop.f32.mrf.mxu3 }
 0x13a   : > { %v6938_v24 = vadd.f32 %v892_v7, %v680_v6 }
 0x13c   : > { %8155 = vst [vmem:[#allocation44_spill] sm:$0xff] %v6938_v24  ;;  %v1601_v41 = vpop.f32.mrf.mxu0 }
 0x13d   : > { %v1879_v10 = vpop.f32.mrf.mxu1  ;;  %5725 = vmatmul.msk.f32.gmra.mxu2 %vm226_vm1, %v6912_v2 }
 0x13e   : > { %5759 = vmatmul.msk.f32.gmra.mxu3 %vm226_vm1, %v6412_v26 }
 0x13f   : > { %5793 = vmatmul.msk.f32.gmra.mxu0 %vm226_vm1, %v6410_v25  ;;  %v803_v25 = vadd.f32 %v6706_v47, %v6704_v19 }
 0x140   : > { %5827 = vmatmul.msk.f32.gmra.mxu1 %vm226_vm1, %v6940_v18  ;;  %v1045_v14 = vpop.f32.mrf.mxu2 }
 0x141   : > { %v1323_v6 = vpop.f32.mrf.mxu3  ;;  %v1141_v7 = vadd.f32 %v1045_v14, %v800_v13 }
 0x143   : > { %v1419_v24 = vadd.f32 %v1323_v6, %v1141_v7  ;;  %v6966_v6 = vld [vmem:[#allocation2 + $0xf2] sm:$0xff] }
 0x144   : > { %v1604_v3 = vpop.f32.mrf.mxu0 }
 0x145   : > { %v1882_v53 = vpop.f32.mrf.mxu1  ;;  %v1697_v2 = vadd.f32 %v1601_v41, %v1419_v24  ;;  %5726 = vmatmul.msk.f32.gmra.mxu2 %vm226_vm1, %v6928_v27 }
 0x146   : > { %5760 = vmatmul.msk.f32.gmra.mxu3 %vm226_vm1, %v6434_v32 }
 0x147   : > { %v6960_v26 = vadd.f32 %v1879_v10, %v1697_v2  ;;  %5794 = vmatmul.msk.f32.gmra.mxu0 %vm226_vm1, %v6432_v31  ;;  %v806_v2 = vadd.f32 %v6720_v29, %v6718_v28 }
 0x148   : > { %5828 = vmatmul.msk.f32.gmra.mxu1 %vm226_vm1, %v6952_v11  ;;  %v1048_v42 = vpop.f32.mrf.mxu2 }
 0x149   : > { %v1326_v59 = vpop.f32.mrf.mxu3  ;;  %v1142_v24 = vadd.f32 %v1048_v42, %v803_v25  ;;  %v1748_v42 = vld [vmem:[#allocation2 + $0xfa] sm:$0xff] }
 0x14b   : > { %v1420_v41 = vadd.f32 %v1326_v59, %v1142_v24 }
 0x14c   : > { %v1607_v13 = vpop.f32.mrf.mxu0 }
 0x14d   : > { %v1885_v14 = vpop.f32.mrf.mxu1  ;;  %v1698_v32 = vadd.f32 %v1604_v3, %v1420_v41  ;;  %5727 = vmatmul.msk.f32.gmra.mxu2 %vm226_vm1, %v6940_v18 }
 0x14e   : > { %5761 = vmatmul.msk.f32.gmra.mxu3 %vm226_vm1, %v6454_v38 }
 0x14f   : > { %v6974_v31 = vadd.f32 %v1882_v53, %v1698_v32  ;;  %5795 = vmatmul.msk.f32.gmra.mxu0 %vm226_vm1, %v6452_v37  ;;  %v809_v37 = vadd.f32 %v6735_v60, %v6733_v1  ;;  %v812_v1 = vadd.f32 %v6750_v34, %v6748_v33 }
 0x150   : > { %5829 = vmatmul.msk.f32.gmra.mxu1 %vm226_vm1, %v6966_v6  ;;  %v1051_v47 = vpop.f32.mrf.mxu2 }
 0x151   : > { %v1329_v19 = vpop.f32.mrf.mxu3  ;;  %v1143_v3 = vadd.f32 %v1051_v47, %v806_v2 }
 0x153   : > { %v1421_v10 = vadd.f32 %v1329_v19, %v1143_v3  ;;  %v1750_v3 = vld [vmem:[#allocation2 + $0x112] sm:$0xff] }
 0x154   : > { %v1610_v7 = vpop.f32.mrf.mxu0 }
 0x155   : > { %v1888_v25 = vpop.f32.mrf.mxu1  ;;  %v1699_v59 = vadd.f32 %v1607_v13, %v1421_v10  ;;  %5728 = vmatmul.msk.f32.gmra.mxu2 %vm226_vm1, %v6952_v11  ;;  %v1749_v13 = vld [vmem:[#allocation2 + $0x10a] sm:$0xff] }
 0x156   : > { %5762 = vmatmul.msk.f32.gmra.mxu3 %vm226_vm1, %v6474_v44 }
 0x157   : > { %v6986_v38 = vadd.f32 %v1885_v14, %v1699_v59  ;;  %5796 = vmatmul.msk.f32.gmra.mxu0 %vm226_vm1, %v6472_v43 }
 0x158   : > { %5830 = vmatmul.msk.f32.gmra.mxu1 %vm226_vm1, %v1748_v42  ;;  %v1054_v28 = vpop.f32.mrf.mxu2 }
 0x159   : > { %v1332_v29 = vpop.f32.mrf.mxu3  ;;  %v1144_v53 = vadd.f32 %v1054_v28, %v809_v37 }
 0x15b   : > { %v1422_v24 = vadd.f32 %v1332_v29, %v1144_v53 }
 0x15c   : > { %v1613_v41 = vpop.f32.mrf.mxu0 }
 0x15d   : > { %v1700_v32 = vadd.f32 %v1610_v7, %v1422_v24  ;;  %5729 = vmatmul.msk.f32.gmra.mxu2 %vm226_vm1, %v6966_v6  ;;  %v1891_v44 = vpop.f32.mrf.mxu1 }
 0x15e   : > { %5763 = vmatmul.msk.f32.gmra.mxu3 %vm226_vm1, %v6494_v50  ;;  %v815_v50 = vadd.f32 %v6766_v40, %v6764_v39 }
 0x15f   : > { %v6997_v43 = vadd.f32 %v1888_v25, %v1700_v32  ;;  %5797 = vmatmul.msk.f32.gmra.mxu0 %vm226_vm1, %v6492_v49 }
 0x160   : > { %5831 = vmatmul.msk.f32.gmra.mxu1 %vm226_vm1, %v1749_v13  ;;  %v1057_v60 = vpop.f32.mrf.mxu2 }
 0x161   : > { %v1335_v14 = vpop.f32.mrf.mxu3  ;;  %v1145_v2 = vadd.f32 %v1057_v60, %v812_v1 }
 0x163   : > { %v1423_v47 = vadd.f32 %v1335_v14, %v1145_v2  ;;  %v1753_v2 = vld [vmem:[#allocation2 + $0x13a] sm:$0xff] }
 0x164   : > { %v1616_v19 = vpop.f32.mrf.mxu0 }
 0x165   : > { %v1701_v10 = vadd.f32 %v1613_v41, %v1423_v47  ;;  %5730 = vmatmul.msk.f32.gmra.mxu2 %vm226_vm1, %v1748_v42  ;;  %v1894_v49 = vpop.f32.mrf.mxu1  ;;  %v1751_v42 = vld [vmem:[#allocation2 + $0x122] sm:$0xff] }
 0x166   : > { %5764 = vmatmul.msk.f32.gmra.mxu3 %vm226_vm1, %v6514_v56  ;;  %v818_v56 = vadd.f32 %v6782_v48, %v6780_v46 }
 0x167   : > { %v7007_v33 = vadd.f32 %v1891_v44, %v1701_v10  ;;  %5798 = vmatmul.msk.f32.gmra.mxu0 %vm226_vm1, %v6512_v55 }
 0x168   : > { %5832 = vmatmul.msk.f32.gmra.mxu1 %vm226_vm1, %v1750_v3  ;;  %v1060_v34 = vpop.f32.mrf.mxu2 }
 0x169   : > { %v1338_v7 = vpop.f32.mrf.mxu3  ;;  %v1146_v25 = vadd.f32 %v1060_v34, %v815_v50  ;;  %v1754_v50 = vld [vmem:[#allocation2 + $0x142] sm:$0xff] }
 0x16b   : > { %v1424_v59 = vadd.f32 %v1338_v7, %v1146_v25 }
 0x16c   : > { %v1619_v37 = vpop.f32.mrf.mxu0 }
 0x16d   : > { %v1702_v28 = vadd.f32 %v1616_v19, %v1424_v59  ;;  %5731 = vmatmul.msk.f32.gmra.mxu2 %vm226_vm1, %v1749_v13  ;;  %v1897_v53 = vpop.f32.mrf.mxu1  ;;  %v1752_v13 = vld [vmem:[#allocation2 + $0x12a] sm:$0xff]  ;;  %v1755_v59 = vld [vmem:[#allocation2 + $0x152] sm:$0xff] }
 0x16e   : > { %5765 = vmatmul.msk.f32.gmra.mxu3 %vm226_vm1, %v6534_v62  ;;  %v821_v62 = vadd.f32 %v6798_v45, %v6796_v52 }
 0x16f   : > { %v7017_v39 = vadd.f32 %v1894_v49, %v1702_v28  ;;  %5799 = vmatmul.msk.f32.gmra.mxu0 %vm226_vm1, %v6532_v61 }
 0x170   : > { %5833 = vmatmul.msk.f32.gmra.mxu1 %vm226_vm1, %v1751_v42  ;;  %v1063_v55 = vpop.f32.mrf.mxu2 }
 0x171   : > { %v1341_v40 = vpop.f32.mrf.mxu3  ;;  %v1147_v29 = vadd.f32 %v1063_v55, %v818_v56 }
 0x173   : > { %v1425_v24 = vadd.f32 %v1341_v40, %v1147_v29  ;;  %v1756_v40 = vld [vmem:[#allocation2 + $0x15a] sm:$0xff] }
 0x174   : > { %v1622_v41 = vpop.f32.mrf.mxu0 }
 0x175   : > { %v1703_v32 = vadd.f32 %v1619_v37, %v1425_v24  ;;  %5732 = vmatmul.msk.f32.gmra.mxu2 %vm226_vm1, %v1750_v3  ;;  %v1900_v60 = vpop.f32.mrf.mxu1 }
 0x176   : > { %5766 = vmatmul.msk.f32.gmra.mxu3 %vm226_vm1, %v6554_v5  ;;  %v824_v5 = vadd.f32 %v6814_v51, %v6812_v58 }
 0x177   : > { %v7027_v48 = vadd.f32 %v1897_v53, %v1703_v32  ;;  %5800 = vmatmul.msk.f32.gmra.mxu0 %vm226_vm1, %v6552_v4 }
 0x178   : > { %5834 = vmatmul.msk.f32.gmra.mxu1 %vm226_vm1, %v1752_v13  ;;  %v1066_v61 = vpop.f32.mrf.mxu2 }
 0x179   : > { %v1344_v46 = vpop.f32.mrf.mxu3  ;;  %v1148_v44 = vadd.f32 %v1066_v61, %v821_v62  ;;  %v1757_v62 = vld [vmem:[#allocation2 + $0x16a] sm:$0xff] }
 0x17b   : > { %v1426_v1 = vadd.f32 %v1344_v46, %v1148_v44  ;;  %v8159_v46 = vld [vmem:[#allocation9_spill] sm:$0xff] }
 0x17c   : > { %v1625_v14 = vpop.f32.mrf.mxu0 }
 0x17d   : > { %v1704_v47 = vadd.f32 %v1622_v41, %v1426_v1  ;;  %5733 = vmatmul.msk.f32.gmra.mxu2 %vm226_vm1, %v1751_v42 }
 0x17e   : > { %5767 = vmatmul.msk.f32.gmra.mxu3 %vm226_vm1, %v6574_v15  ;;  %v368_v15 = vld [vmem:[%s6254_s27 + $0xf0] sm:$0xff] }
 0x17f   : > { %v7037_v4 = vadd.f32 %v1900_v60, %v1704_v47  ;;  %5801 = vmatmul.msk.f32.gmra.mxu0 %vm226_vm1, %v6572_v12  ;;  %v827_v12 = vadd.f32 %v6830_v57, %v6828_v0  ;;  %401 = vst.msk [vmem:[#allocation2 + $0x181] sm:$0xff] %vm226_vm1, %v368_v15  ;;  %v8156_v57 = vld [vmem:[#allocation5_spill] sm:$0xff]  ;;  %v1758_v47 = vld [vmem:[#allocation2 + $0x172] sm:$0xff] }
 0x180   : > { %5835 = vmatmul.msk.f32.gmra.mxu1 %vm226_vm1, %v1753_v2  ;;  %v1069_v45 = vpop.f32.mrf.mxu2 }
 0x181   : > { %v1347_v52 = vpop.f32.mrf.mxu3  ;;  %v1149_v19 = vadd.f32 %v1069_v45, %v824_v5  ;;  %v8161_v45 = vld [vmem:[#allocation11_spill] sm:$0xff] }
 0x183   : > { %v1427_v3 = vadd.f32 %v1347_v52, %v1149_v19  ;;  %v8162_v52 = vld [vmem:[#allocation10_spill] sm:$0xff] }
 0x184   : > { %v1628_v10 = vpop.f32.mrf.mxu0 }
 0x185   : > { %v7042_v49 = vadd.f32 %v1625_v14, %v1427_v3  ;;  %5734 = vmatmul.msk.f32.gmra.mxu2 %vm226_vm1, %v1752_v13 }
 0x186   : > { %5768 = vmatmul.msk.f32.gmra.mxu3 %vm226_vm1, %v6594_v21  ;;  %v369_v21 = vld [vmem:[%s6254_s27 + $0xf8] sm:$0xff] }
 0x187   : > { %5802 = vmatmul.msk.f32.gmra.mxu0 %vm226_vm1, %v6592_v20  ;;  %v830_v20 = vadd.f32 %v6846_v63, %v6844_v9  ;;  %402 = vst.msk [vmem:[#allocation2 + $0x189] sm:$0xff] %vm226_vm1, %v369_v21  ;;  %v833_v63 = vadd.f32 %v6862_v8, %v6860_v17  ;;  %v8158_v9 = vld [vmem:[#allocation6_spill] sm:$0xff]  ;;  %v836_v8 = vadd.f32 %v6878_v16, %v6876_v23  ;;  %v8160_v17 = vld [vmem:[#allocation8_spill] sm:$0xff] }
 0x188   : > { %5836 = vmatmul.msk.f32.gmra.mxu1 %vm226_vm1, %v1754_v50  ;;  %v1072_v51 = vpop.f32.mrf.mxu2  ;;  %v6116_v16 = vld [vmem:[%s8091_s3 + $0x38] sm:$0xff]  ;;  %v839_v23 = vadd.f32 %v6894_v22, %v6892_v36  ;;  %v842_v22 = vadd.f32 %v6910_v35, %v6908_v54  ;;  %v8164_v35 = vld [vmem:[#allocation43_spill] sm:$0xff] }
 0x189   : > { %v1350_v58 = vpop.f32.mrf.mxu3  ;;  %v1150_v34 = vadd.f32 %v1072_v51, %v827_v12  ;;  %4964 = vmatpush.bf16.msra.mxu1 %v6116_v16  ;;  %v1481_v51 = vld [vmem:[#allocation2 + $0x181] sm:$0xff]  ;;  %v8169_v16 = vld [vmem:[#allocation15_spill] sm:$0xff] }
 0x18b   : > { %v1428_v7 = vadd.f32 %v1350_v58, %v1150_v34 }
 0x18c   : > { %v1631_v25 = vpop.f32.mrf.mxu0 }
 0x18d   : > { %v7054_v37 = vadd.f32 %v1628_v10, %v1428_v7  ;;  %5735 = vmatmul.msk.f32.gmra.mxu2 %vm226_vm1, %v1753_v2 }
 0x18e   : > { %5769 = vmatmul.msk.f32.gmra.mxu3 %vm226_vm1, %v6612_v30  ;;  %v8157_v30 = vld [vmem:[#allocation7_spill] sm:$0xff]  ;;  %v1759_v58 = vld [vmem:[#allocation2 + $0x182] sm:$0xff] }
 0x18f   : > { %5803 = vmatmul.msk.f32.gmra.mxu0 %vm226_vm1, %v8156_v57  ;;  %v1482_v57 = vld [vmem:[#allocation2 + $0x189] sm:$0xff] }
 0x190   : > { %5837 = vmatmul.msk.f32.gmra.mxu1 %vm226_vm1, %v1755_v59  ;;  %v1075_v0 = vpop.f32.mrf.mxu2 }
 0x191   : > { %v1353_v42 = vpop.f32.mrf.mxu3  ;;  %v1151_v28 = vadd.f32 %v1075_v0, %v830_v20  ;;  %v1760_v0 = vld [vmem:[#allocation2 + $0x18a] sm:$0xff] }
 0x193   : > { %v1429_v56 = vadd.f32 %v1353_v42, %v1151_v28  ;;  %v8163_v28 = vld [vmem:[#allocation42_spill] sm:$0xff] }
 0x194   : > { %v1634_v55 = vpop.f32.mrf.mxu0  ;;  %v845_v54 = vadd.f32 %v8164_v35, %v8163_v28  ;;  %v8173_v35 = vld [vmem:[#allocation22_spill] sm:$0xff] }
 0x195   : > { %v7066_v29 = vadd.f32 %v1631_v25, %v1429_v56  ;;  %5736 = vmatmul.msk.f32.gmra.mxu2 %vm226_vm1, %v1754_v50  ;;  %v1203_v50 = vld [vmem:[#allocation2 + $0x180] sm:$0xff] }
 0x196   : > { %5770 = vmatmul.msk.f32.gmra.mxu3 %vm226_vm1, %v8157_v30  ;;  %v2008_v30 = vld [vmem:[#allocation2 + $0x30] sm:$0xff] }
 0x197   : > { %5804 = vmatmul.msk.f32.gmra.mxu0 %vm226_vm1, %v8158_v9 }
 0x198   : > { %5838 = vmatmul.msk.f32.gmra.mxu1 %vm226_vm1, %v1756_v40  ;;  %v1078_v53 = vpop.f32.mrf.mxu2 }
 0x199   : > { %v1356_v24 = vpop.f32.mrf.mxu3  ;;  %v1152_v41 = vadd.f32 %v1078_v53, %v833_v63  ;;  %v2286_v63 = vld [vmem:[#allocation2 + $0x31] sm:$0xff] }
 0x19b   : > { %v1430_v13 = vadd.f32 %v1356_v24, %v1152_v41  ;;  %v8165_v41 = vld [vmem:[#allocation12_spill] sm:$0xff] }
 0x19c   : > { %v1637_v32 = vpop.f32.mrf.mxu0 }
 0x19d   : > { %v7076_v61 = vadd.f32 %v1634_v55, %v1430_v13  ;;  %5737 = vmatmul.msk.f32.gmra.mxu2 %vm226_vm1, %v1755_v59  ;;  %v1204_v59 = vld [vmem:[#allocation2 + $0x188] sm:$0xff]  ;;  %v8166_v13 = vld [vmem:[#allocation13_spill] sm:$0xff] }
 0x19e   : > { %5771 = vmatmul.msk.f32.gmra.mxu3 %vm226_vm1, %v8159_v46 }
 0x19f   : > { %5805 = vmatmul.msk.f32.gmra.mxu0 %vm226_vm1, %v8160_v17 }
 0x1a0   : > { %5839 = vmatmul.msk.f32.gmra.mxu1 %vm226_vm1, %v1757_v62  ;;  %v1081_v44 = vpop.f32.mrf.mxu2 }
 0x1a1   : > { %v1359_v1 = vpop.f32.mrf.mxu3  ;;  %v1153_v60 = vadd.f32 %v1081_v44, %v836_v8  ;;  %v2009_v44 = vld [vmem:[#allocation2 + $0x38] sm:$0xff] }
 0x1a3   : > { %v1431_v14 = vadd.f32 %v1359_v1, %v1153_v60  ;;  %v2287_v1 = vld [vmem:[#allocation2 + $0x39] sm:$0xff] }
 0x1a4   : > { %v1640_v2 = vpop.f32.mrf.mxu0 }
 0x1a5   : > { %v7086_v5 = vadd.f32 %v1637_v32, %v1431_v14  ;;  %5738 = vmatmul.msk.f32.gmra.mxu2 %vm226_vm1, %v1756_v40  ;;  %v848_v32 = vadd.f32 %v8166_v13, %v8165_v41  ;;  %v8175_v13 = vld [vmem:[#allocation24_spill] sm:$0xff] }
 0x1a6   : > { %5772 = vmatmul.msk.f32.gmra.mxu3 %vm226_vm1, %v8161_v45  ;;  %v8168_v45 = vld [vmem:[#allocation14_spill] sm:$0xff] }
 0x1a7   : > { %5806 = vmatmul.msk.f32.gmra.mxu0 %vm226_vm1, %v8162_v52  ;;  %v8170_v52 = vld [vmem:[#allocation18_spill] sm:$0xff] }
 0x1a8   : > { %5840 = vmatmul.msk.f32.gmra.mxu1 %vm226_vm1, %v1758_v47  ;;  %v1084_v19 = vpop.f32.mrf.mxu2 }
 0x1a9   : > { %v1362_v3 = vpop.f32.mrf.mxu3  ;;  %v1154_v10 = vadd.f32 %v1084_v19, %v839_v23  ;;  %v851_v23 = vadd.f32 %v8169_v16, %v8168_v45  ;;  %v8177_v45 = vld [vmem:[#allocation26_spill] sm:$0xff] }
 0x1ab   : > { %v1432_v15 = vadd.f32 %v1362_v3, %v1154_v10 }
 0x1ac   : > { %v1643_v12 = vpop.f32.mrf.mxu0 }
 0x1ad   : > { %v7099_v34 = vadd.f32 %v1640_v2, %v1432_v15  ;;  %5739 = vmatmul.msk.f32.gmra.mxu2 %vm226_vm1, %v1757_v62  ;;  %v8167_v62 = vld [vmem:[#allocation16_spill] sm:$0xff]  ;;  %v2288_v15 = vld [vmem:[#allocation2 + $0x49] sm:$0xff] }
 0x1ae   : > { %5773 = vmatmul.msk.f32.gmra.mxu3 %vm226_vm1, %v1203_v50  ;;  %v2010_v50 = vld [vmem:[#allocation2 + $0x48] sm:$0xff] }
 0x1af   : > { %5807 = vmatmul.msk.f32.gmra.mxu0 %vm226_vm1, %v1481_v51 }
 0x1b0   : > { %5841 = vmatmul.msk.f32.gmra.mxu1 %vm226_vm1, %v1759_v58  ;;  %v1087_v36 = vpop.f32.mrf.mxu2 }
 0x1b1   : > { %v1365_v7 = vpop.f32.mrf.mxu3  ;;  %v1155_v25 = vadd.f32 %v1087_v36, %v842_v22  ;;  %v8171_v22 = vld [vmem:[#allocation20_spill] sm:$0xff] }
 0x1b3   : > { %v1433_v21 = vadd.f32 %v1365_v7, %v1155_v25  ;;  %v8172_v25 = vld [vmem:[#allocation17_spill] sm:$0xff] }
 0x1b4   : > { %v1646_v20 = vpop.f32.mrf.mxu0 }
 0x1b5   : > { %v7107_v42 = vadd.f32 %v1643_v12, %v1433_v21  ;;  %5740 = vmatmul.msk.f32.gmra.mxu2 %vm226_vm1, %v1758_v47  ;;  %v6115_v47 = vld [vmem:[%s8091_s3 + $0x30] sm:$0xff] }
 0x1b6   : > { %5774 = vmatmul.msk.f32.gmra.mxu3 %vm226_vm1, %v1204_v59  ;;  %4965 = vmatpush.bf16.msra.mxu1 %v6115_v47  ;;  %v2011_v21 = vld [vmem:[#allocation2 + $0x50] sm:$0xff]  ;;  %v6114_v47 = vld [vmem:[%s8091_s3 + $0x28] sm:$0xff] }
 0x1b7   : > { %5808 = vmatmul.msk.f32.gmra.mxu0 %vm226_vm1, %v1482_v57 }
 0x1b8   : > { %5842 = vmatmul.msk.f32.gmra.mxu1 %vm226_vm1, %v1760_v0  ;;  %v1090_v56 = vpop.f32.mrf.mxu2 }
 0x1b9   : > { %v1368_v55 = vpop.f32.mrf.mxu3  ;;  %v1156_v40 = vadd.f32 %v1090_v56, %v845_v54 }
 0x1ba   : > { %4966 = vmatpush.bf16.msra.mxu1 %v6114_v47 }
 0x1bb   : > { %v1434_v9 = vadd.f32 %v1368_v55, %v1156_v40  ;;  %v8174_v55 = vld [vmem:[#allocation19_spill] sm:$0xff] }
 0x1bc   : > { %v1649_v53 = vpop.f32.mrf.mxu0 }
 0x1bd   : > { %v7115_v24 = vadd.f32 %v1646_v20, %v1434_v9  ;;  %5845 = vmatmul.msk.f32.vlgmr.msra.gmra.mxu2 %vm226_vm1, %v2008_v30  ;;  %v2289_v20 = vld [vmem:[#allocation2 + $0x51] sm:$0xff]  ;;  %v2012_v30 = vld [vmem:[#allocation2 + $0x60] sm:$0xff] }
 0x1be   : > { %5879 = vmatmul.msk.f32.vlgmr.msra.gmra.mxu3 %vm226_vm1, %v2286_v63  ;;  %v2290_v63 = vld [vmem:[#allocation2 + $0x61] sm:$0xff] }
 0x1bf   : > { %5913 = vmatmul.msk.f32.vlgmr.msra.gmra.mxu0 %vm226_vm1, %v8167_v62 }
 0x1c0   : > { %v1093_v46 = vpop.f32.mrf.mxu2 }
 0x1c1   : > { %v1371_v8 = vpop.f32.mrf.mxu3  ;;  %v1157_v17 = vadd.f32 %v1093_v46, %v848_v32  ;;  %v8176_v46 = vld [vmem:[#allocation21_spill] sm:$0xff] }
 0x1c3   : > { %v1435_v60 = vadd.f32 %v1371_v8, %v1157_v17  ;;  %v2013_v17 = vld [vmem:[#allocation2 + $0x68] sm:$0xff] }
 0x1c4   : > { %v1652_v14 = vpop.f32.mrf.mxu0 }
 0x1c5   : > { %v7123_v2 = vadd.f32 %v1649_v53, %v1435_v60  ;;  %5846 = vmatmul.msk.f32.gmra.mxu2 %vm226_vm1, %v2009_v44  ;;  %v2291_v44 = vld [vmem:[#allocation2 + $0x69] sm:$0xff] }
 0x1c6   : > { %5880 = vmatmul.msk.f32.gmra.mxu3 %vm226_vm1, %v2287_v1 }
 0x1c7   : > { %5914 = vmatmul.msk.f32.gmra.mxu0 %vm226_vm1, %v8170_v52  ;;  %v8178_v52 = vld [vmem:[#allocation23_spill] sm:$0xff] }
 0x1c8   : > { %v1096_v19 = vpop.f32.mrf.mxu2 }
 0x1c9   : > { %v1374_v3 = vpop.f32.mrf.mxu3  ;;  %v1158_v10 = vadd.f32 %v1096_v19, %v851_v23 }
 0x1cb   : > { %v1436_v12 = vadd.f32 %v1374_v3, %v1158_v10  ;;  %v2014_v3 = vld [vmem:[#allocation2 + $0x78] sm:$0xff] }
 0x1cc   : > { %v1655_v51 = vpop.f32.mrf.mxu0  ;;  %v2292_v10 = vld [vmem:[#allocation2 + $0x79] sm:$0xff] }
 0x1cd   : > { %v7134_v58 = vadd.f32 %v1652_v14, %v1436_v12  ;;  %5847 = vmatmul.msk.f32.gmra.mxu2 %vm226_vm1, %v2010_v50 }
 0x1ce   : > { %5881 = vmatmul.msk.f32.gmra.mxu3 %vm226_vm1, %v2288_v15 }
 0x1cf   : > { %5915 = vmatmul.msk.f32.gmra.mxu0 %vm226_vm1, %v8171_v22 }
 0x1d0   : > { %v1099_v36 = vpop.f32.mrf.mxu2 }
 0x1d1   : > { %v1377_v7 = vpop.f32.mrf.mxu3  ;;  %v1159_v59 = vadd.f32 %v1099_v36, %v8172_v25 }
 0x1d3   : > { %v1437_v57 = vadd.f32 %v1377_v7, %v1159_v59  ;;  %v8180_v7 = vld [vmem:[#allocation25_spill] sm:$0xff] }
 0x1d4   : > { %v1658_v0 = vpop.f32.mrf.mxu0  ;;  %v2015_v59 = vld [vmem:[#allocation2 + $0x80] sm:$0xff] }
 0x1d5   : > { %v7141_v28 = vadd.f32 %v1655_v51, %v1437_v57  ;;  %5848 = vmatmul.msk.f32.gmra.mxu2 %vm226_vm1, %v2011_v21  ;;  %v8179_v51 = vld [vmem:[#allocation28_spill] sm:$0xff]  ;;  %v2293_v21 = vld [vmem:[#allocation2 + $0x81] sm:$0xff] }
 0x1d6   : > { %5882 = vmatmul.msk.f32.gmra.mxu3 %vm226_vm1, %v2289_v20 }
 0x1d7   : > { %5916 = vmatmul.msk.f32.gmra.mxu0 %vm226_vm1, %v8173_v35  ;;  %v8181_v35 = vld [vmem:[#allocation30_spill] sm:$0xff] }
 0x1d8   : > { %v1102_v54 = vpop.f32.mrf.mxu2 }
 0x1d9   : > { %v1380_v56 = vpop.f32.mrf.mxu3  ;;  %v1160_v40 = vadd.f32 %v1102_v54, %v8174_v55  ;;  %v8182_v55 = vld [vmem:[#allocation27_spill] sm:$0xff] }
 0x1db   : > { %v1438_v9 = vadd.f32 %v1380_v56, %v1160_v40 }
 0x1dc   : > { %v1661_v53 = vpop.f32.mrf.mxu0 }
 0x1dd   : > { %v7148_v41 = vadd.f32 %v1658_v0, %v1438_v9  ;;  %5849 = vmatmul.msk.f32.gmra.mxu2 %vm226_vm1, %v2012_v30  ;;  %v2016_v30 = vld [vmem:[#allocation2 + $0x90] sm:$0xff] }
 0x1de   : > { %5883 = vmatmul.msk.f32.gmra.mxu3 %vm226_vm1, %v2290_v63  ;;  %v2294_v63 = vld [vmem:[#allocation2 + $0x91] sm:$0xff] }
 0x1df   : > { %5917 = vmatmul.msk.f32.gmra.mxu0 %vm226_vm1, %v8175_v13 }
 0x1e0   : > { %v1105_v32 = vpop.f32.mrf.mxu2 }
 0x1e1   : > { %v1383_v62 = vpop.f32.mrf.mxu3  ;;  %v1161_v8 = vadd.f32 %v1105_v32, %v8176_v46  ;;  %v8183_v32 = vld [vmem:[#allocation32_spill] sm:$0xff] }
 0x1e3   : > { %v1439_v1 = vadd.f32 %v1383_v62, %v1161_v8  ;;  %v8184_v8 = vld [vmem:[#allocation29_spill] sm:$0xff] }
 0x1e4   : > { %v1664_v60 = vpop.f32.mrf.mxu0 }
 0x1e5   : > { %v7155_v14 = vadd.f32 %v1661_v53, %v1439_v1  ;;  %5850 = vmatmul.msk.f32.gmra.mxu2 %vm226_vm1, %v2013_v17  ;;  %v2295_v1 = vld [vmem:[#allocation2 + $0x99] sm:$0xff] }
 0x1e6   : > { %5884 = vmatmul.msk.f32.gmra.mxu3 %vm226_vm1, %v2291_v44  ;;  %v2017_v44 = vld [vmem:[#allocation2 + $0x98] sm:$0xff] }
 0x1e7   : > { %5918 = vmatmul.msk.f32.gmra.mxu0 %vm226_vm1, %v8177_v45 }
 0x1e8   : > { %v1108_v16 = vpop.f32.mrf.mxu2 }
 0x1e9   : > { %v1386_v23 = vpop.f32.mrf.mxu3  ;;  %v1162_v19 = vadd.f32 %v1108_v16, %v8178_v52  ;;  %v6113_v16 = vld [vmem:[%s8091_s3 + $0x20] sm:$0xff] }
 0x1ea   : > { %4967 = vmatpush.bf16.msra.mxu1 %v6113_v16  ;;  %v8193_v16 = vld [vmem:[#allocation37_spill] sm:$0xff] }
 0x1eb   : > { %v1440_v50 = vadd.f32 %v1386_v23, %v1162_v19  ;;  %v8185_v23 = vld [vmem:[#allocation34_spill] sm:$0xff] }
 0x1ec   : > { %v1667_v15 = vpop.f32.mrf.mxu0 }
 0x1ed   : > { %v7165_v12 = vadd.f32 %v1664_v60, %v1440_v50  ;;  %5851 = vmatmul.msk.f32.gmra.mxu2 %vm226_vm1, %v2014_v3  ;;  %v8186_v3 = vld [vmem:[#allocation31_spill] sm:$0xff]  ;;  %v2018_v50 = vld [vmem:[#allocation2 + $0xa8] sm:$0xff] }
 0x1ee   : > { %5885 = vmatmul.msk.f32.gmra.mxu3 %vm226_vm1, %v2292_v10 }
 0x1ef   : > { %5919 = vmatmul.msk.f32.gmra.mxu0 %vm226_vm1, %v8179_v51 }
 0x1f0   : > { %v1111_v22 = vpop.f32.mrf.mxu2 }
 0x1f1   : > { %v1389_v36 = vpop.f32.mrf.mxu3  ;;  %v1163_v25 = vadd.f32 %v1111_v22, %v8180_v7  ;;  %v8187_v7 = vld [vmem:[#allocation36_spill] sm:$0xff] }
 0x1f3   : > { %v1441_v20 = vadd.f32 %v1389_v36, %v1163_v25 }
 0x1f4   : > { %v1670_v57 = vpop.f32.mrf.mxu0 }
 0x1f5   : > { %v7172_v0 = vadd.f32 %v1667_v15, %v1441_v20  ;;  %5852 = vmatmul.msk.f32.gmra.mxu2 %vm226_vm1, %v2015_v59  ;;  %v2296_v15 = vld [vmem:[#allocation2 + $0xa9] sm:$0xff] }
 0x1f6   : > { %5886 = vmatmul.msk.f32.gmra.mxu3 %vm226_vm1, %v2293_v21  ;;  %v8188_v21 = vld [vmem:[#allocation33_spill] sm:$0xff] }
 0x1f7   : > { %5920 = vmatmul.msk.f32.gmra.mxu0 %vm226_vm1, %v8181_v35  ;;  %v2297_v35 = vld [vmem:[#allocation2 + $0xb1] sm:$0xff] }
 0x1f8   : > { %v1114_v54 = vpop.f32.mrf.mxu2 }
 0x1f9   : > { %v1392_v56 = vpop.f32.mrf.mxu3  ;;  %v1164_v40 = vadd.f32 %v1114_v54, %v8182_v55 }
 0x1fb   : > { %v1442_v9 = vadd.f32 %v1392_v56, %v1164_v40  ;;  %v8189_v40 = vld [vmem:[#allocation38_spill] sm:$0xff] }
 0x1fc   : > { %v1673_v53 = vpop.f32.mrf.mxu0 }
 0x1fd   : > { %v7179_v13 = vadd.f32 %v1670_v57, %v1442_v9  ;;  %5853 = vmatmul.msk.f32.gmra.mxu2 %vm226_vm1, %v2016_v30  ;;  %v2019_v57 = vld [vmem:[#allocation2 + $0xb0] sm:$0xff] }
 0x1fe   : > { %5887 = vmatmul.msk.f32.gmra.mxu3 %vm226_vm1, %v2294_v63  ;;  %v8190_v9 = vld [vmem:[#allocation35_spill] sm:$0xff] }
 0x1ff   : > { %5921 = vmatmul.msk.f32.gmra.mxu0 %vm226_vm1, %v8183_v32  ;;  %v2020_v32 = vld [vmem:[#allocation2 + $0xc0] sm:$0xff] }
 0x200   : > { %v1117_v62 = vpop.f32.mrf.mxu2 }
 0x201   : > { %v1395_v46 = vpop.f32.mrf.mxu3  ;;  %v1165_v17 = vadd.f32 %v1117_v62, %v8184_v8  ;;  %v2298_v62 = vld [vmem:[#allocation2 + $0xc1] sm:$0xff]  ;;  %v8191_v8 = vmov 0.0  }
 0x202   : > { %287 = vst.msk [vmem:[#allocation3 + $0x18] sm:$0xff] %vm282_vm3, %v8191_v8 }
 0x203   : > { %v1443_v60 = vadd.f32 %v1395_v46, %v1165_v17  ;;  %288 = vst.msk [vmem:[#allocation3 + $0x20] sm:$0xff] %vm282_vm3, %v8191_v8 }
 0x204   : > { %v1676_v47 = vpop.f32.mrf.mxu0  ;;  %283 = vst.msk [vmem:[#allocation3] sm:$0xff] %vm282_vm3, %v8191_v8 }
 0x205   : > { %v7186_v45 = vadd.f32 %v1673_v53, %v1443_v60  ;;  %5854 = vmatmul.msk.f32.gmra.mxu2 %vm226_vm1, %v2017_v44  ;;  %284 = vst.msk [vmem:[#allocation3 + $0x8] sm:$0xff] %vm282_vm3, %v8191_v8 }
 0x206   : > { %5888 = vmatmul.msk.f32.gmra.mxu3 %vm226_vm1, %v2295_v1  ;;  %v8192_v1 = vld [vmem:[#allocation40_spill] sm:$0xff]  ;;  %290 = vst.msk [vmem:[#allocation3 + $0x30] sm:$0xff] %vm282_vm3, %v8191_v8 }
 0x207   : > { %5922 = vmatmul.msk.f32.gmra.mxu0 %vm226_vm1, %v8185_v23  ;;  %291 = vst.msk [vmem:[#allocation3 + $0x38] sm:$0xff] %vm282_vm3, %v8191_v8 }
 0x208   : > { %v1120_v52 = vpop.f32.mrf.mxu2  ;;  %293 = vst.msk [vmem:[#allocation3 + $0x48] sm:$0xff] %vm282_vm3, %v8191_v8 }
 0x209   : > { %v1398_v19 = vpop.f32.mrf.mxu3  ;;  %v1166_v10 = vadd.f32 %v1120_v52, %v8186_v3  ;;  %v2021_v52 = vld [vmem:[#allocation2 + $0xc8] sm:$0xff]  ;;  %294 = vst.msk [vmem:[#allocation3 + $0x50] sm:$0xff] %vm282_vm3, %v8191_v8 }
 0x20a   : > { %296 = vst.msk [vmem:[#allocation3 + $0x60] sm:$0xff] %vm282_vm3, %v8191_v8 }
 0x20b   : > { %v1444_v51 = vadd.f32 %v1398_v19, %v1166_v10  ;;  %v2299_v19 = vld [vmem:[#allocation2 + $0xc9] sm:$0xff]  ;;  %297 = vst.msk [vmem:[#allocation3 + $0x68] sm:$0xff] %vm282_vm3, %v8191_v8 }
 0x20c   : > { %v1679_v22 = vpop.f32.mrf.mxu0  ;;  %299 = vst.msk [vmem:[#allocation3 + $0x78] sm:$0xff] %vm282_vm3, %v8191_v8 }
 0x20d   : > { %v7196_v36 = vadd.f32 %v1676_v47, %v1444_v51  ;;  %5855 = vmatmul.msk.f32.gmra.mxu2 %vm226_vm1, %v2018_v50  ;;  %300 = vst.msk [vmem:[#allocation3 + $0x80] sm:$0xff] %vm282_vm3, %v8191_v8 }
 0x20e   : > { %5889 = vmatmul.msk.f32.gmra.mxu3 %vm226_vm1, %v2296_v15  ;;  %302 = vst.msk [vmem:[#allocation3 + $0x90] sm:$0xff] %vm282_vm3, %v8191_v8 }
 0x20f   : > { %5923 = vmatmul.msk.f32.gmra.mxu0 %vm226_vm1, %v8187_v7  ;;  %303 = vst.msk [vmem:[#allocation3 + $0x98] sm:$0xff] %vm282_vm3, %v8191_v8 }
 0x210   : > { %v1123_v25 = vpop.f32.mrf.mxu2  ;;  %305 = vst.msk [vmem:[#allocation3 + $0xa8] sm:$0xff] %vm282_vm3, %v8191_v8 }
 0x211   : > { %v1401_v59 = vpop.f32.mrf.mxu3  ;;  %v1167_v20 = vadd.f32 %v1123_v25, %v8188_v21  ;;  %v2022_v25 = vld [vmem:[#allocation2 + $0xd8] sm:$0xff]  ;;  %306 = vst.msk [vmem:[#allocation3 + $0xb0] sm:$0xff] %vm282_vm3, %v8191_v8 }
 0x212   : > { %308 = vst.msk [vmem:[#allocation3 + $0xc0] sm:$0xff] %vm282_vm3, %v8191_v8 }
 0x213   : > { %v1445_v54 = vadd.f32 %v1401_v59, %v1167_v20  ;;  %v2300_v59 = vld [vmem:[#allocation2 + $0xd9] sm:$0xff]  ;;  %309 = vst.msk [vmem:[#allocation3 + $0xc8] sm:$0xff] %vm282_vm3, %v8191_v8 }
 0x214   : > { %v1682_v56 = vpop.f32.mrf.mxu0  ;;  %311 = vst.msk [vmem:[#allocation3 + $0xd8] sm:$0xff] %vm282_vm3, %v8191_v8 }
 0x215   : > { %v7203_v55 = vadd.f32 %v1679_v22, %v1445_v54  ;;  %5856 = vmatmul.msk.f32.gmra.mxu2 %vm226_vm1, %v2019_v57  ;;  %v8194_v22 = vld [vmem:[#allocation39_spill] sm:$0xff]  ;;  %312 = vst.msk [vmem:[#allocation3 + $0xe0] sm:$0xff] %vm282_vm3, %v8191_v8 }
 0x216   : > { %5890 = vmatmul.msk.f32.gmra.mxu3 %vm226_vm1, %v2297_v35  ;;  %314 = vst.msk [vmem:[#allocation3 + $0xf0] sm:$0xff] %vm282_vm3, %v8191_v8 }
 0x217   : > { %5924 = vmatmul.msk.f32.gmra.mxu0 %vm226_vm1, %v8189_v40  ;;  %315 = vst.msk [vmem:[#allocation3 + $0xf8] sm:$0xff] %vm282_vm3, %v8191_v8 }
 0x218   : > { %v1126_v30 = vpop.f32.mrf.mxu2  ;;  %317 = vst.msk [vmem:[#allocation3 + $0x108] sm:$0xff] %vm282_vm3, %v8191_v8 }
 0x219   : > { %v1404_v63 = vpop.f32.mrf.mxu3  ;;  %v1168_v53 = vadd.f32 %v1126_v30, %v8190_v9  ;;  %v2023_v30 = vld [vmem:[#allocation2 + $0xe0] sm:$0xff]  ;;  %318 = vst.msk [vmem:[#allocation3 + $0x110] sm:$0xff] %vm282_vm3, %v8191_v8 }
 0x21a   : > { %320 = vst.msk [vmem:[#allocation3 + $0x120] sm:$0xff] %vm282_vm3, %v8191_v8 }
 0x21b   : > { %v1446_v46 = vadd.f32 %v1404_v63, %v1168_v53  ;;  %v2301_v63 = vld [vmem:[#allocation2 + $0xe1] sm:$0xff]  ;;  %321 = vst.msk [vmem:[#allocation3 + $0x128] sm:$0xff] %vm282_vm3, %v8191_v8 }
 0x21c   : > { %v1685_v17 = vpop.f32.mrf.mxu0  ;;  %323 = vst.msk [vmem:[#allocation3 + $0x138] sm:$0xff] %vm282_vm3, %v8191_v8 }
 0x21d   : > { %v7214_v44 = vadd.f32 %v1682_v56, %v1446_v46  ;;  %5857 = vmatmul.msk.f32.gmra.mxu2 %vm226_vm1, %v2020_v32  ;;  %v8195_v56 = vld [vmem:[#allocation41_spill] sm:$0xff]  ;;  %324 = vst.msk [vmem:[#allocation3 + $0x140] sm:$0xff] %vm282_vm3, %v8191_v8  ;;  %v8196_v46 = vld [vmem:[#allocation44_spill] sm:$0xff] }
 0x21e   : > { %5891 = vmatmul.msk.f32.gmra.mxu3 %vm226_vm1, %v2298_v62  ;;  %326 = vst.msk [vmem:[#allocation3 + $0x150] sm:$0xff] %vm282_vm3, %v8191_v8 }
 0x21f   : > { %5925 = vmatmul.msk.f32.gmra.mxu0 %vm226_vm1, %v8192_v1  ;;  %327 = vst.msk [vmem:[#allocation3 + $0x158] sm:$0xff] %vm282_vm3, %v8191_v8  ;;  %v2024_v1 = vld [vmem:[#allocation2 + $0xf0] sm:$0xff] }
 0x220   : > { %v1129_v60 = vpop.f32.mrf.mxu2  ;;  %329 = vst.msk [vmem:[#allocation3 + $0x168] sm:$0xff] %vm282_vm3, %v8191_v8 }
 0x221   : > { %v1407_v47 = vpop.f32.mrf.mxu3  ;;  %v1169_v23 = vadd.f32 %v1129_v60, %v8193_v16  ;;  %v2302_v60 = vld [vmem:[#allocation2 + $0xf1] sm:$0xff]  ;;  %330 = vst.msk [vmem:[#allocation3 + $0x170] sm:$0xff] %vm282_vm3, %v8191_v8 }
 0x222   : > { %332 = vst.msk [vmem:[#allocation3 + $0x180] sm:$0xff] %vm282_vm3, %v8191_v8 }
 0x223   : > { %v1447_v3 = vadd.f32 %v1407_v47, %v1169_v23  ;;  %333 = vst.msk [vmem:[#allocation3 + $0x188] sm:$0xff] %vm282_vm3, %v8191_v8 }
 0x224   : > { %v1688_v10 = vpop.f32.mrf.mxu0  ;;  %335 = vst.msk [vmem:[#allocation3 + $0x198] sm:$0xff] %vm282_vm3, %v8191_v8 }
 0x225   : > { %v7237_v50 = vadd.f32 %v1685_v17, %v1447_v3  ;;  %5858 = vmatmul.msk.f32.gmra.mxu2 %vm226_vm1, %v2021_v52  ;;  %336 = vst.msk [vmem:[#allocation3 + $0x1a0] sm:$0xff] %vm282_vm3, %v8191_v8 }
 0x226   : > { %5892 = vmatmul.msk.f32.gmra.mxu3 %vm226_vm1, %v2299_v19  ;;  %286 = vst.msk [vmem:[#allocation3 + $0x10] sm:$0x3] %vm285_vm4, %v8191_v8  ;;  %v3007_v19 = vld [vmem:[#allocation3 + $0x1] sm:$0xff] }
 0x227   : > { %5926 = vmatmul.msk.f32.gmra.mxu0 %vm226_vm1, %v6928_v27  ;;  %v6112_v27 = vld [vmem:[%s8091_s3 + $0x18] sm:$0xff]  ;;  %289 = vst.msk [vmem:[#allocation3 + $0x28] sm:$0x3] %vm285_vm4, %v8191_v8 }
 0x228   : > { %v1132_v15 = vpop.f32.mrf.mxu2  ;;  %4968 = vmatpush.bf16.msra.mxu1 %v6112_v27  ;;  %292 = vst.msk [vmem:[#allocation3 + $0x40] sm:$0x3] %vm285_vm4, %v8191_v8 }
 0x229   : > { %v1410_v51 = vpop.f32.mrf.mxu3  ;;  %v1170_v7 = vadd.f32 %v1132_v15, %v8194_v22  ;;  %v2303_v15 = vld [vmem:[#allocation2 + $0xf9] sm:$0xff]  ;;  %295 = vst.msk [vmem:[#allocation3 + $0x58] sm:$0x3] %vm285_vm4, %v8191_v8  ;;  %v3039_v22 = vpack.c.bf16 %v3007_v19, %v3007_v19  ;;  %v2027_v19 = vld [vmem:[#allocation2 + $0x110] sm:$0xff] }
 0x22a   : > { %298 = vst.msk [vmem:[#allocation3 + $0x70] sm:$0x3] %vm285_vm4, %v8191_v8 }
 0x22b   : > { %v1448_v21 = vadd.f32 %v1410_v51, %v1170_v7  ;;  %v7331_v51 = vld [vmem:[%s8090_s2] ss:$0 sm:$0xff]  ;;  %301 = vst.msk [vmem:[#allocation3 + $0x88] sm:$0x3] %vm285_vm4, %v8191_v8 }
 0x22c   : > { %v1691_v20 = vpop.f32.mrf.mxu0  ;;  %v2581_v7 = vld [vmem:[#allocation2 + $0xfa] sm:$0xff]  ;;  %304 = vst.msk [vmem:[#allocation3 + $0xa0] sm:$0x3] %vm285_vm4, %v8191_v8 }
 0x22d   : > { %v7263_v57 = vadd.f32 %v1688_v10, %v1448_v21  ;;  %5859 = vmatmul.msk.f32.gmra.mxu2 %vm226_vm1, %v2022_v25  ;;  %v2025_v10 = vld [vmem:[#allocation2 + $0xf8] sm:$0xff]  ;;  %307 = vst.msk [vmem:[#allocation3 + $0xb8] sm:$0x3] %vm285_vm4, %v8191_v8 }
 0x22e   : > { %5893 = vmatmul.msk.f32.gmra.mxu3 %vm226_vm1, %v2300_v59  ;;  %v3008_v59 = vld [vmem:[#allocation3 + $0x9] sm:$0xff]  ;;  %310 = vst.msk [vmem:[#allocation3 + $0xd0] sm:$0x3] %vm285_vm4, %v8191_v8 }
 0x22f   : > { %5927 = vmatmul.msk.f32.gmra.mxu0 %vm226_vm1, %v6940_v18  ;;  %v3040_v27 = vpack.c.bf16 %v3008_v59, %v3008_v59  ;;  %313 = vst.msk [vmem:[#allocation3 + $0xe8] sm:$0x3] %vm285_vm4, %v8191_v8 }
 0x230   : > { %v1135_v35 = vpop.f32.mrf.mxu2  ;;  %316 = vst.msk [vmem:[#allocation3 + $0x100] sm:$0x3] %vm285_vm4, %v8191_v8 }
 0x231   : > { %v1413_v54 = vpop.f32.mrf.mxu3  ;;  %v1171_v40 = vadd.f32 %v1135_v35, %v8195_v56  ;;  %319 = vst.msk [vmem:[#allocation3 + $0x118] sm:$0x3] %vm285_vm4, %v8191_v8 }
 0x232   : > { %322 = vst.msk [vmem:[#allocation3 + $0x130] sm:$0x3] %vm285_vm4, %v8191_v8 }
 0x233   : > { %v1449_v9 = vadd.f32 %v1413_v54, %v1171_v40  ;;  %325 = vst.msk [vmem:[#allocation3 + $0x148] sm:$0x3] %vm285_vm4, %v8191_v8 }
 0x234   : > { %v1694_v18 = vpop.f32.mrf.mxu0  ;;  %328 = vst.msk [vmem:[#allocation3 + $0x160] sm:$0x3] %vm285_vm4, %v8191_v8 }
 0x235   : > { %v7286_v53 = vadd.f32 %v1691_v20, %v1449_v9  ;;  %5860 = vmatmul.msk.f32.gmra.mxu2 %vm226_vm1, %v2023_v30  ;;  %v3632_v20 = vunpack.c.l.b16 %v3039_v22  ;;  %v3633_v30 = vunpack.c.l.b16 %v3040_v27  ;;  %331 = vst.msk [vmem:[#allocation3 + $0x178] sm:$0x3] %vm285_vm4, %v8191_v8 }
 0x236   : > { %5894 = vmatmul.msk.f32.gmra.mxu3 %vm226_vm1, %v2301_v63  ;;  %v2026_v63 = vld [vmem:[#allocation2 + $0x108] sm:$0xff]  ;;  %334 = vst.msk [vmem:[#allocation3 + $0x190] sm:$0x3] %vm285_vm4, %v8191_v8 }
 0x237   : > { %5928 = vmatmul.msk.f32.gmra.mxu0 %vm226_vm1, %v6952_v11  ;;  %v3664_v9 = vpack.c.b16 %v3633_v30, %v3632_v20  ;;  %337 = vst.msk [vmem:[#allocation3 + $0x1a8] sm:$0x3] %vm285_vm4, %v8191_v8  ;;  %v2028_v20 = vld [vmem:[#allocation2 + $0x120] sm:$0xff] }
 0x238   : > { %v1138_v32 = vpop.f32.mrf.mxu2 }
 0x239   : > { %v1416_v62 = vpop.f32.mrf.mxu3  ;;  %v1172_v17 = vadd.f32 %v1138_v32, %v8196_v46  ;;  %v2304_v32 = vld [vmem:[#allocation2 + $0x109] sm:$0xff]  ;;  %3680 = vrot.lane.b32.xlu0 %v3664_v9, %s6193_s8 }
 0x23a   : > { %v2582_v46 = vld [vmem:[#allocation2 + $0x10a] sm:$0xff] }
 0x23b   : > { %v1450_v47 = vadd.f32 %v1416_v62, %v1172_v17  ;;  %v6111_v62 = vld [vmem:[%s8091_s3 + $0x10] sm:$0xff]  ;;  %v7360_v17 = vpop.f32.mrf.mxu1 }
 0x23c   : > { %v2714_v11 = vpop.f32.mrf.mxu0  ;;  %4969 = vmatpush.bf16.msra.mxu1 %v6111_v62 }
 0x23d   : > { %v7309_v16 = vadd.f32 %v1694_v18, %v1450_v47  ;;  %5861 = vmatmul.msk.f32.gmra.mxu2 %vm226_vm1, %v2024_v1 }
 0x23e   : > { %5895 = vmatmul.msk.f32.gmra.mxu3 %vm226_vm1, %v2302_v60 }
 0x23f   : > { %5929 = vmatmul.msk.f32.gmra.mxu0 %vm226_vm1, %v6966_v6 }
 0x240   : > { %v2158_v23 = vpop.f32.mrf.mxu2 }
 0x241   : > { %v2436_v52 = vpop.f32.mrf.mxu3  ;;  %v2254_v3 = vadd.f32 %v2158_v23, %v6960_v26 }
 0x243   : > { %v2532_v6 = vadd.f32 %v2436_v52, %v2254_v3 }
 0x244   : > { %v2717_v26 = vpop.f32.mrf.mxu0 }
 0x245   : > { %v2810_v25 = vadd.f32 %v2714_v11, %v2532_v6  ;;  %5862 = vmatmul.msk.f32.gmra.mxu2 %vm226_vm1, %v2025_v10  ;;  %v2305_v10 = vld [vmem:[#allocation2 + $0x111] sm:$0xff] }
 0x246   : > { %5896 = vmatmul.msk.f32.gmra.mxu3 %vm226_vm1, %v2303_v15  ;;  %v2583_v6 = vld [vmem:[#allocation2 + $0x112] sm:$0xff] }
 0x247   : > { %v2846_v21 = vadd.f32 %v7331_v51, %v2810_v25  ;;  %5930 = vmatmul.msk.f32.gmra.mxu0 %vm226_vm1, %v2581_v7  ;;  %v7381_v7 = vpop.f32.mrf.mxu1 }
 0x248   : > { %v2161_v35 = vpop.f32.mrf.mxu2 }
 0x249   : > { %v2439_v54 = vpop.f32.mrf.mxu3  ;;  %v2878_v56 = vmax.f32 %v2846_v21, 0.0  ;;  %v2255_v40 = vadd.f32 %v2161_v35, %v6974_v31 }
 0x24b   : > { %2911 = vst.msk [vmem:[#allocation3 + $0x19] sm:$0xff] %vm282_vm3, %v2878_v56  ;;  %v2533_v18 = vadd.f32 %v2439_v54, %v2255_v40  ;;  %v2306_v56 = vld [vmem:[#allocation2 + $0x121] sm:$0xff] }
 0x24c   : > { %v2720_v31 = vpop.f32.mrf.mxu0 }
 0x24d   : > { %v2811_v1 = vadd.f32 %v2717_v26, %v2533_v18  ;;  %5863 = vmatmul.msk.f32.gmra.mxu2 %vm226_vm1, %v2026_v63  ;;  %v2584_v63 = vld [vmem:[#allocation2 + $0x122] sm:$0xff] }
 0x24e   : > { %5897 = vmatmul.msk.f32.gmra.mxu3 %vm226_vm1, %v2304_v32 }
 0x24f   : > { %v2847_v60 = vadd.f32 %v7331_v51, %v2811_v1  ;;  %5931 = vmatmul.msk.f32.gmra.mxu0 %vm226_vm1, %v2582_v46  ;;  %v7391_v1 = vpop.f32.mrf.mxu1 }
 0x250   : > { %v2164_v47 = vpop.f32.mrf.mxu2 }
 0x251   : > { %v2442_v11 = vpop.f32.mrf.mxu3  ;;  %v2879_v23 = vmax.f32 %v2847_v60, 0.0  ;;  %v2256_v52 = vadd.f32 %v2164_v47, %v6986_v38 }
 0x252   : > { %v3009_v26 = vld [vmem:[#allocation3 + $0x19] sm:$0xff] }
 0x253   : > { %2912 = vst.msk [vmem:[#allocation3 + $0x21] sm:$0xff] %vm282_vm3, %v2879_v23  ;;  %v2534_v3 = vadd.f32 %v2442_v11, %v2256_v52  ;;  %v3041_v27 = vpack.c.bf16 %v3009_v26, %v3009_v26  ;;  %v2029_v11 = vld [vmem:[#allocation2 + $0x128] sm:$0xff] }
 0x254   : > { %v2723_v15 = vpop.f32.mrf.mxu0  ;;  %v2307_v52 = vld [vmem:[#allocation2 + $0x129] sm:$0xff] }
 0x255   : > { %v2812_v22 = vadd.f32 %v2720_v31, %v2534_v3  ;;  %5864 = vmatmul.msk.f32.gmra.mxu2 %vm226_vm1, %v2027_v19  ;;  %v3634_v18 = vunpack.c.l.b16 %v3041_v27  ;;  %v2585_v3 = vld [vmem:[#allocation2 + $0x12a] sm:$0xff] }
 0x256   : > { %5898 = vmatmul.msk.f32.gmra.mxu3 %vm226_vm1, %v2305_v10 }
 0x257   : > { %v2848_v8 = vadd.f32 %v7331_v51, %v2812_v22  ;;  %5932 = vmatmul.msk.f32.gmra.mxu0 %vm226_vm1, %v2583_v6 }
 0x258   : > { %v2167_v38 = vpop.f32.mrf.mxu2 }
 0x259   : > { %v2445_v25 = vpop.f32.mrf.mxu3  ;;  %v2880_v59 = vmax.f32 %v2848_v8, 0.0  ;;  %v2257_v21 = vadd.f32 %v2167_v38, %v6997_v43 }
 0x25a   : > { %v3010_v35 = vld [vmem:[#allocation3 + $0x21] sm:$0xff] }
 0x25b   : > { %2913 = vst.msk [vmem:[#allocation3 + $0x31] sm:$0xff] %vm282_vm3, %v2880_v59  ;;  %v2535_v54 = vadd.f32 %v2445_v25, %v2257_v21  ;;  %v3042_v40 = vpack.c.bf16 %v3010_v35, %v3010_v35  ;;  %v2030_v25 = vld [vmem:[#allocation2 + $0x138] sm:$0xff]  ;;  %v7401_v21 = vpop.f32.mrf.mxu1 }
 0x25c   : > { %v2726_v30 = vpop.f32.mrf.mxu0 }
 0x25d   : > { %v2813_v9 = vadd.f32 %v2723_v15, %v2535_v54  ;;  %5865 = vmatmul.msk.f32.gmra.mxu2 %vm226_vm1, %v2028_v20  ;;  %v3635_v32 = vunpack.c.l.b16 %v3042_v40  ;;  %v2308_v20 = vld [vmem:[#allocation2 + $0x139] sm:$0xff]  ;;  %v6110_v54 = vld [vmem:[%s8091_s3 + $0x8] sm:$0xff] }
 0x25e   : > { %5899 = vmatmul.msk.f32.gmra.mxu3 %vm226_vm1, %v2306_v56  ;;  %v2586_v40 = vld [vmem:[#allocation2 + $0x13a] sm:$0xff]  ;;  %4970 = vmatpush.bf16.msra.mxu1 %v6110_v54 }
 0x25f   : > { %v2849_v62 = vadd.f32 %v7331_v51, %v2813_v9  ;;  %v3665_v43 = vpack.c.b16 %v3635_v32, %v3634_v18  ;;  %5933 = vmatmul.msk.f32.gmra.mxu0 %vm226_vm1, %v2584_v63 }
 0x260   : > { %v2170_v31 = vpop.f32.mrf.mxu2 }
 0x261   : > { %v2448_v46 = vpop.f32.mrf.mxu3  ;;  %v2881_v60 = vmax.f32 %v2849_v62, 0.0  ;;  %v2258_v47 = vadd.f32 %v2170_v31, %v7007_v33  ;;  %3682 = vrot.lane.b32.xlu0 %v3665_v43, %s6193_s8 }
 0x262   : > { %v3011_v15 = vld [vmem:[#allocation3 + $0x31] sm:$0xff] }
 0x263   : > { %2914 = vst.msk [vmem:[#allocation3 + $0x39] sm:$0xff] %vm282_vm3, %v2881_v60  ;;  %v2536_v23 = vadd.f32 %v2448_v46, %v2258_v47  ;;  %v3043_v38 = vpack.c.bf16 %v3011_v15, %v3011_v15  ;;  %v2031_v46 = vld [vmem:[#allocation2 + $0x140] sm:$0xff] }
 0x264   : > { %v2729_v19 = vpop.f32.mrf.mxu0  ;;  %v2309_v47 = vld [vmem:[#allocation2 + $0x141] sm:$0xff] }
 0x265   : > { %v2814_v10 = vadd.f32 %v2726_v30, %v2536_v23  ;;  %5866 = vmatmul.msk.f32.gmra.mxu2 %vm226_vm1, %v2029_v11  ;;  %v2587_v23 = vld [vmem:[#allocation2 + $0x142] sm:$0xff] }
 0x266   : > { %5900 = vmatmul.msk.f32.gmra.mxu3 %vm226_vm1, %v2307_v52  ;;  %v7414_v52 = vpop.f32.mrf.mxu1 }
 0x267   : > { %v2850_v6 = vadd.f32 %v7331_v51, %v2814_v10  ;;  %5934 = vmatmul.msk.f32.gmra.mxu0 %vm226_vm1, %v2585_v3 }
 0x268   : > { %v2173_v33 = vpop.f32.mrf.mxu2 }
 0x269   : > { %v2451_v22 = vpop.f32.mrf.mxu3  ;;  %v2882_v26 = vmax.f32 %v2850_v6, 0.0  ;;  %v2259_v8 = vadd.f32 %v2173_v33, %v7017_v39  ;;  %v3636_v39 = vunpack.c.l.b16 %v3043_v38 }
 0x26a   : > { %v3012_v59 = vld [vmem:[#allocation3 + $0x39] sm:$0xff] }
 0x26b   : > { %2915 = vst.msk [vmem:[#allocation3 + $0x49] sm:$0xff] %vm282_vm3, %v2882_v26  ;;  %v2537_v27 = vadd.f32 %v2451_v22, %v2259_v8  ;;  %v3044_v35 = vpack.c.bf16 %v3012_v59, %v3012_v59  ;;  %v2032_v26 = vld [vmem:[#allocation2 + $0x150] sm:$0xff] }
 0x26c   : > { %v2732_v56 = vpop.f32.mrf.mxu0 }
 0x26d   : > { %v2815_v30 = vadd.f32 %v2729_v19, %v2537_v27  ;;  %5867 = vmatmul.msk.f32.gmra.mxu2 %vm226_vm1, %v2030_v25  ;;  %v3637_v63 = vunpack.c.l.b16 %v3044_v35  ;;  %v2310_v25 = vld [vmem:[#allocation2 + $0x151] sm:$0xff] }
 0x26e   : > { %5901 = vmatmul.msk.f32.gmra.mxu3 %vm226_vm1, %v2308_v20  ;;  %v2588_v20 = vld [vmem:[#allocation2 + $0x152] sm:$0xff] }
 0x26f   : > { %v2851_v9 = vadd.f32 %v7331_v51, %v2815_v30  ;;  %v3666_v18 = vpack.c.b16 %v3637_v63, %v3636_v39  ;;  %5935 = vmatmul.msk.f32.gmra.mxu0 %vm226_vm1, %v2586_v40  ;;  %v7426_v40 = vpop.f32.mrf.mxu1 }
 0x270   : > { %v2176_v32 = vpop.f32.mrf.mxu2 }
 0x271   : > { %v2454_v62 = vpop.f32.mrf.mxu3  ;;  %v2883_v43 = vmax.f32 %v2851_v9, 0.0  ;;  %v2260_v31 = vadd.f32 %v2176_v32, %v7027_v48  ;;  %3684 = vrot.lane.b32.xlu1 %v3666_v18, %s6193_s8 }
 0x272   : > { %v3013_v3 = vld [vmem:[#allocation3 + $0x49] sm:$0xff] }
 0x273   : > { %2916 = vst.msk [vmem:[#allocation3 + $0x51] sm:$0xff] %vm282_vm3, %v2883_v43  ;;  %v2538_v60 = vadd.f32 %v2454_v62, %v2260_v31  ;;  %v3045_v22 = vpack.c.bf16 %v3013_v3, %v3013_v3  ;;  %v2033_v62 = vld [vmem:[#allocation2 + $0x158] sm:$0xff] }
 0x274   : > { %v2735_v11 = vpop.f32.mrf.mxu0  ;;  %v2311_v31 = vld [vmem:[#allocation2 + $0x159] sm:$0xff] }
 0x275   : > { %v2816_v19 = vadd.f32 %v2732_v56, %v2538_v60  ;;  %5868 = vmatmul.msk.f32.gmra.mxu2 %vm226_vm1, %v2031_v46  ;;  %v3638_v54 = vunpack.c.l.b16 %v3045_v22 }
 0x276   : > { %5902 = vmatmul.msk.f32.gmra.mxu3 %vm226_vm1, %v2309_v47  ;;  %v1984_v47 = vadd.f32 %v7381_v7, %v7054_v37  ;;  %v6109_v37 = vld [vmem:[%s8091_s3] sm:$0xff] }
 0x277   : > { %v2852_v10 = vadd.f32 %v7331_v51, %v2816_v19  ;;  %5936 = vmatmul.msk.f32.gmra.mxu0 %vm226_vm1, %v2587_v23  ;;  %v7438_v3 = vpop.f32.mrf.mxu1  ;;  %4971 = vmatpush.bf16.msra.mxu1 %v6109_v37  ;;  %v1987_v37 = vadd.f32 %v7414_v52, %v7086_v5  ;;  %v2315_v52 = vld [vmem:[#allocation2 + $0x189] sm:$0xff] }
 0x278   : > { %v2179_v48 = vpop.f32.mrf.mxu2 }
 0x279   : > { %v2457_v15 = vpop.f32.mrf.mxu3  ;;  %v2884_v6 = vmax.f32 %v2852_v10, 0.0  ;;  %v2261_v33 = vadd.f32 %v2179_v48, %v7037_v4  ;;  %v1983_v4 = vadd.f32 %v7360_v17, %v7042_v49  ;;  %v2589_v49 = vld [vmem:[#allocation2 + $0x15a] sm:$0xff] }
 0x27a   : > { %v3014_v8 = vld [vmem:[#allocation3 + $0x51] sm:$0xff] }
 0x27b   : > { %2917 = vst.msk [vmem:[#allocation3 + $0x61] sm:$0xff] %vm282_vm3, %v2884_v6  ;;  %v2539_v38 = vadd.f32 %v2457_v15, %v2261_v33  ;;  %v3046_v59 = vpack.c.bf16 %v3014_v8, %v3014_v8  ;;  %v2034_v6 = vld [vmem:[#allocation2 + $0x168] sm:$0xff] }
 0x27c   : > { %v2738_v27 = vpop.f32.mrf.mxu0 }
 0x27d   : > { %v2817_v35 = vadd.f32 %v2735_v11, %v2539_v38  ;;  %5869 = vmatmul.msk.f32.gmra.mxu2 %vm226_vm1, %v2032_v26  ;;  %v3639_v56 = vunpack.c.l.b16 %v3046_v59  ;;  %v2312_v26 = vld [vmem:[#allocation2 + $0x169] sm:$0xff] }
 0x27e   : > { %5903 = vmatmul.msk.f32.gmra.mxu3 %vm226_vm1, %v2310_v25  ;;  %v2590_v38 = vld [vmem:[#allocation2 + $0x16a] sm:$0xff] }
 0x27f   : > { %v2853_v30 = vadd.f32 %v7331_v51, %v2817_v35  ;;  %v3667_v39 = vpack.c.b16 %v3639_v56, %v3638_v54  ;;  %5937 = vmatmul.msk.f32.gmra.mxu0 %vm226_vm1, %v2588_v20  ;;  %v1985_v20 = vadd.f32 %v7391_v1, %v7066_v29  ;;  %v2591_v29 = vld [vmem:[#allocation2 + $0x172] sm:$0xff] }
 0x280   : > { %v2182_v63 = vpop.f32.mrf.mxu2 }
 0x281   : > { %v2460_v9 = vpop.f32.mrf.mxu3  ;;  %v2885_v18 = vmax.f32 %v2853_v30, 0.0  ;;  %v2262_v32 = vadd.f32 %v2182_v63, %v1983_v4  ;;  %3686 = vrot.lane.b32.xlu1 %v3667_v39, %s6193_s8  ;;  %v2035_v63 = vld [vmem:[#allocation2 + $0x170] sm:$0xff] }
 0x282   : > { %v3015_v60 = vld [vmem:[#allocation3 + $0x61] sm:$0xff] }
 0x283   : > { %2918 = vst.msk [vmem:[#allocation3 + $0x69] sm:$0xff] %vm282_vm3, %v2885_v18  ;;  %v2540_v43 = vadd.f32 %v2460_v9, %v2262_v32  ;;  %v3047_v15 = vpack.c.bf16 %v3015_v60, %v3015_v60  ;;  %v7451_v9 = vpop.f32.mrf.mxu1  ;;  %v2313_v32 = vld [vmem:[#allocation2 + $0x171] sm:$0xff] }
 0x284   : > { %v2741_v46 = vpop.f32.mrf.mxu0 }
 0x285   : > { %v2818_v17 = vadd.f32 %v2738_v27, %v2540_v43  ;;  %5870 = vmatmul.msk.f32.gmra.mxu2 %vm226_vm1, %v2033_v62  ;;  %v3640_v59 = vunpack.c.l.b16 %v3047_v15 }
 0x286   : > { %5904 = vmatmul.msk.f32.gmra.mxu3 %vm226_vm1, %v2311_v31  ;;  %v1986_v31 = vadd.f32 %v7401_v21, %v7076_v61  ;;  %v6124_v61 = vld [vmem:[%s8091_s3 + $0x78] sm:$0xff] }
 0x287   : > { %v2854_v11 = vadd.f32 %v7331_v51, %v2818_v17  ;;  %5938 = vmatmul.msk.f32.gmra.mxu0 %vm226_vm1, %v2589_v49  ;;  %5053 = vmatpush.bf16.msrb.mxu2 %v6124_v61 }
 0x288   : > { %v2185_v23 = vpop.f32.mrf.mxu2 }
 0x289   : > { %v2463_v19 = vpop.f32.mrf.mxu3  ;;  %v2886_v10 = vmax.f32 %v2854_v11, 0.0  ;;  %v2263_v48 = vadd.f32 %v2185_v23, %v1984_v47  ;;  %v2036_v23 = vld [vmem:[#allocation2 + $0x180] sm:$0xff] }
 0x28a   : > { %v3016_v33 = vld [vmem:[#allocation3 + $0x69] sm:$0xff] }
 0x28b   : > { %2919 = vst.msk [vmem:[#allocation3 + $0x79] sm:$0xff] %vm282_vm3, %v2886_v10  ;;  %v2541_v22 = vadd.f32 %v2463_v19, %v2263_v48  ;;  %v3048_v8 = vpack.c.bf16 %v3016_v33, %v3016_v33  ;;  %v2314_v48 = vld [vmem:[#allocation2 + $0x181] sm:$0xff]  ;;  %v7464_v33 = vpop.f32.mrf.mxu1 }
 0x28c   : > { %v2744_v7 = vpop.f32.mrf.mxu0 }
 0x28d   : > { %v2819_v25 = vadd.f32 %v2741_v46, %v2541_v22  ;;  %5871 = vmatmul.msk.f32.gmra.mxu2 %vm226_vm1, %v2034_v6  ;;  %v3641_v27 = vunpack.c.l.b16 %v3048_v8  ;;  %v2592_v6 = vld [vmem:[#allocation2 + $0x182] sm:$0xff] }
 0x28e   : > { %5905 = vmatmul.msk.f32.gmra.mxu3 %vm226_vm1, %v2312_v26 }
 0x28f   : > { %v2855_v35 = vadd.f32 %v7331_v51, %v2819_v25  ;;  %v3668_v54 = vpack.c.b16 %v3641_v27, %v3640_v59  ;;  %5939 = vmatmul.msk.f32.gmra.mxu0 %vm226_vm1, %v2590_v38  ;;  %v6132_v27 = vld [vmem:[%s8091_s3 + $0xb8] sm:$0xff] }
 0x290   : > { %v2188_v56 = vpop.f32.mrf.mxu2  ;;  %5142 = vmatpush.bf16.msrb.mxu3 %v6132_v27 }
 0x291   : > { %v2466_v4 = vpop.f32.mrf.mxu3  ;;  %v2887_v30 = vmax.f32 %v2855_v35, 0.0  ;;  %v2264_v39 = vadd.f32 %v2188_v56, %v1985_v20  ;;  %3688 = vrot.lane.b32.xlu2 %v3668_v54, %s6193_s8  ;;  %v2037_v54 = vld [vmem:[#allocation2 + $0x188] sm:$0xff]  ;;  %v6140_v56 = vld [vmem:[%s8091_s3 + $0xf8] sm:$0xff] }
 0x292   : > { %v3017_v43 = vld [vmem:[#allocation3 + $0x79] sm:$0xff]  ;;  %5231 = vmatpush.bf16.msrb.mxu0 %v6140_v56 }
 0x293   : > { %2920 = vst.msk [vmem:[#allocation3 + $0x81] sm:$0xff] %vm282_vm3, %v2887_v30  ;;  %v2542_v18 = vadd.f32 %v2466_v4, %v2264_v39  ;;  %v3049_v11 = vpack.c.bf16 %v3017_v43, %v3017_v43  ;;  %v2593_v30 = vld [vmem:[#allocation2 + $0x18a] sm:$0xff] }
 0x294   : > { %v2747_v62 = vpop.f32.mrf.mxu0 }
 0x295   : > { %v2820_v1 = vadd.f32 %v2744_v7, %v2542_v18  ;;  %5872 = vmatmul.msk.f32.gmra.mxu2 %vm226_vm1, %v2035_v63  ;;  %v3642_v26 = vunpack.c.l.b16 %v3049_v11  ;;  %v1988_v18 = vadd.f32 %v7426_v40, %v7099_v34  ;;  %v6144_v34 = vld [vmem:[%s8091_s3 + $0x118] sm:$0xff] }
 0x296   : > { %5906 = vmatmul.msk.f32.gmra.mxu3 %vm226_vm1, %v2313_v32  ;;  %v7484_v32 = vpop.f32.mrf.mxu1  ;;  %5324 = vmatpush.bf16.msrb.mxu1 %v6144_v34  ;;  %v1991_v34 = vadd.f32 %v7464_v33, %v7123_v2  ;;  %v6139_v2 = vld [vmem:[%s8091_s3 + $0xf0] sm:$0xff] }
 0x297   : > { %v2856_v46 = vadd.f32 %v7331_v51, %v2820_v1  ;;  %5940 = vmatmul.msk.f32.gmra.mxu0 %vm226_vm1, %v2591_v29 }
 0x298   : > { %v2191_v49 = vpop.f32.mrf.mxu2  ;;  %5232 = vmatpush.bf16.msrb.mxu0 %v6139_v2 }
 0x299   : > { %v2469_v17 = vpop.f32.mrf.mxu3  ;;  %v2888_v60 = vmax.f32 %v2856_v46, 0.0  ;;  %v2265_v47 = vadd.f32 %v2191_v49, %v1986_v31  ;;  %v2038_v49 = vld [vmem:[#allocation2 + $0x198] sm:$0xff] }
 0x29a   : > { %v3018_v19 = vld [vmem:[#allocation3 + $0x81] sm:$0xff] }
 0x29b   : > { %2921 = vst.msk [vmem:[#allocation3 + $0x91] sm:$0xff] %vm282_vm3, %v2888_v60  ;;  %v2543_v10 = vadd.f32 %v2469_v17, %v2265_v47  ;;  %v3050_v15 = vpack.c.bf16 %v3018_v19, %v3018_v19  ;;  %v2316_v47 = vld [vmem:[#allocation2 + $0x199] sm:$0xff] }
 0x29c   : > { %v2750_v21 = vpop.f32.mrf.mxu0 }
 0x29d   : > { %v2821_v22 = vadd.f32 %v2747_v62, %v2543_v10  ;;  %5873 = vmatmul.msk.f32.gmra.mxu2 %vm226_vm1, %v2036_v23  ;;  %v3643_v8 = vunpack.c.l.b16 %v3050_v15  ;;  %v2594_v23 = vld [vmem:[#allocation2 + $0x19a] sm:$0xff]  ;;  %v1989_v15 = vadd.f32 %v7438_v3, %v7107_v42 }
 0x29e   : > { %5907 = vmatmul.msk.f32.gmra.mxu3 %vm226_vm1, %v2314_v48  ;;  %v2317_v42 = vld [vmem:[#allocation2 + $0x1a1] sm:$0xff] }
 0x29f   : > { %v2857_v7 = vadd.f32 %v7331_v51, %v2821_v22  ;;  %v3669_v38 = vpack.c.b16 %v3643_v8, %v3642_v26  ;;  %5941 = vmatmul.msk.f32.gmra.mxu0 %vm226_vm1, %v2592_v6 }
 0x2a0   : > { %v2194_v25 = vpop.f32.mrf.mxu2 }
 0x2a1   : > { %v2472_v59 = vpop.f32.mrf.mxu3  ;;  %v2889_v20 = vmax.f32 %v2857_v7, 0.0  ;;  %v2266_v35 = vadd.f32 %v2194_v25, %v1987_v37  ;;  %3690 = vrot.lane.b32.xlu2 %v3669_v38, %s6193_s8  ;;  %v2944_v37 = vld [vmem:[#allocation3 + $0x8] sm:$0xff]  ;;  %v2943_v7 = vld [vmem:[#allocation3] sm:$0xff]  ;;  %v7499_v38 = vpop.f32.mrf.mxu1  ;;  %v2039_v25 = vld [vmem:[#allocation2 + $0x1a0] sm:$0xff] }
 0x2a2   : > { %v3019_v63 = vld [vmem:[#allocation3 + $0x91] sm:$0xff]  ;;  %v2976_v3 = vpack.c.bf16 %v2944_v37, %v2944_v37  ;;  %v2975_v27 = vpack.c.bf16 %v2943_v7, %v2943_v7  ;;  %v1992_v37 = vadd.f32 %v7484_v32, %v7134_v58 }
 0x2a3   : > { %2922 = vst.msk [vmem:[#allocation3 + $0x99] sm:$0xff] %vm282_vm3, %v2889_v20  ;;  %v2544_v5 = vadd.f32 %v2472_v59, %v2266_v35  ;;  %v3051_v46 = vpack.c.bf16 %v3019_v63, %v3019_v63  ;;  %v2595_v35 = vld [vmem:[#allocation2 + $0x1a2] sm:$0xff] }
 0x2a4   : > { %v2753_v4 = vpop.f32.mrf.mxu0  ;;  %v3552_v63 = vunpack.c.l.b16 %v2975_v27 }
 0x2a5   : > { %v2822_v39 = vadd.f32 %v2750_v21, %v2544_v5  ;;  %5874 = vmatmul.msk.f32.gmra.mxu2 %vm226_vm1, %v2037_v54  ;;  %v3644_v10 = vunpack.c.l.b16 %v3051_v46 }
 0x2a6   : > { %5908 = vmatmul.msk.f32.gmra.mxu3 %vm226_vm1, %v2315_v52  ;;  %v1990_v52 = vadd.f32 %v7451_v9, %v7115_v24  ;;  %v6123_v24 = vld [vmem:[%s8091_s3 + $0x70] sm:$0xff] }
 0x2a7   : > { %v2858_v62 = vadd.f32 %v7331_v51, %v2822_v39  ;;  %5942 = vmatmul.msk.f32.gmra.mxu0 %vm226_vm1, %v2593_v30  ;;  %v3553_v39 = vunpack.c.l.b16 %v2976_v3  ;;  %v6131_v9 = vld [vmem:[%s8091_s3 + $0xb0] sm:$0xff]  ;;  %5054 = vmatpush.bf16.msrb.mxu2 %v6123_v24 }
 0x2a8   : > { %v2197_v29 = vpop.f32.mrf.mxu2  ;;  %5143 = vmatpush.bf16.msrb.mxu3 %v6131_v9 }
 0x2a9   : > { %v2475_v1 = vpop.f32.mrf.mxu3  ;;  %v2890_v43 = vmax.f32 %v2858_v62, 0.0  ;;  %v2267_v31 = vadd.f32 %v2197_v29, %v1988_v18  ;;  %v7515_v46 = vpop.f32.mrf.mxu1 }
 0x2aa   : > { %v3020_v17 = vld [vmem:[#allocation3 + $0x99] sm:$0xff] }
 0x2ab   : > { %2923 = vst.msk [vmem:[#allocation3 + $0xa9] sm:$0xff] %vm282_vm3, %v2890_v43  ;;  %v2545_v60 = vadd.f32 %v2475_v1, %v2267_v31  ;;  %v3052_v11 = vpack.c.bf16 %v3020_v17, %v3020_v17 }
 0x2ac   : > { %v2756_v40 = vpop.f32.mrf.mxu0 }
 0x2ad   : > { %v2823_v19 = vadd.f32 %v2753_v4, %v2545_v60  ;;  %5875 = vmatmul.msk.f32.gmra.mxu2 %vm226_vm1, %v2038_v49  ;;  %v3645_v48 = vunpack.c.l.b16 %v3052_v11  ;;  %v3584_v49 = vpack.c.b16 %v3553_v39, %v3552_v63 }
 0x2ae   : > { %5909 = vmatmul.msk.f32.gmra.mxu3 %vm226_vm1, %v2316_v47 }
 0x2af   : > { %v2859_v61 = vadd.f32 %v7331_v51, %v2823_v19  ;;  %v3670_v21 = vpack.c.b16 %v3645_v48, %v3644_v10  ;;  %5943 = vmatmul.msk.f32.gmra.mxu0 %vm226_vm1, %v2594_v23 }
 0x2b0   : > { %v2200_v6 = vpop.f32.mrf.mxu2 }
 0x2b1   : > { %v2478_v22 = vpop.f32.mrf.mxu3  ;;  %v2891_v26 = vmax.f32 %v2859_v61, 0.0  ;;  %v2268_v8 = vadd.f32 %v2200_v6, %v1989_v15  ;;  %3692 = vrot.lane.b32.xlu0 %v3670_v21, %s6193_s8 }
 0x2b2   : > { %v3021_v5 = vld [vmem:[#allocation3 + $0xa9] sm:$0xff] }
 0x2b3   : > { %2924 = vst.msk [vmem:[#allocation3 + $0xb1] sm:$0xff] %vm282_vm3, %v2891_v26  ;;  %v2546_v59 = vadd.f32 %v2478_v22, %v2268_v8  ;;  %v3053_v29 = vpack.c.bf16 %v3021_v5, %v3021_v5  ;;  %v7526_v26 = vpop.f32.mrf.mxu1 }
 0x2b4   : > { %v2759_v20 = vpop.f32.mrf.mxu0 }
 0x2b5   : > { %v2824_v54 = vadd.f32 %v2756_v40, %v2546_v59  ;;  %5876 = vmatmul.msk.f32.gmra.mxu2 %vm226_vm1, %v2039_v25  ;;  %v3646_v47 = vunpack.c.l.b16 %v3053_v29  ;;  %v3681_v40 = vpop.permute.xlu0 %3680  ;;  %v2946_v25 = vld [vmem:[#allocation3 + $0x20] sm:$0xff] }
 0x2b6   : > { %5910 = vmatmul.msk.f32.gmra.mxu3 %vm226_vm1, %v2317_v42  ;;  %v4370_v10 = vsel %vm282_vm3, %v3584_v49, %v3681_v40  ;;  %v2978_v5 = vpack.c.bf16 %v2946_v25, %v2946_v25  ;;  %v1994_v40 = vadd.f32 %v7515_v46, %v7148_v41  ;;  %v6122_v41 = vld [vmem:[%s8091_s3 + $0x68] sm:$0xff] }
 0x2b7   : > { %v2860_v56 = vadd.f32 %v7331_v51, %v2824_v54  ;;  %5944 = vmatmul.msk.f32.gmra.mxu0 %vm226_vm1, %v2595_v35  ;;  %4972 = vmatmul.bf16.vlgmr.msra.gmra.mxu1 %v4370_v10  ;;  %v2945_v35 = vld [vmem:[#allocation3 + $0x18] sm:$0xff] }
 0x2b8   : > { %v2203_v4 = vpop.f32.mrf.mxu2  ;;  %v3555_v32 = vunpack.c.l.b16 %v2978_v5  ;;  %v6130_v46 = vld [vmem:[%s8091_s3 + $0xa8] sm:$0xff]  ;;  %5055 = vmatpush.bf16.msrb.mxu2 %v6122_v41 }
 0x2b9   : > { %v2481_v30 = vpop.f32.mrf.mxu3  ;;  %v2892_v18 = vmax.f32 %v2860_v56, 0.0  ;;  %v2269_v62 = vadd.f32 %v2203_v4, %v1990_v52  ;;  %5144 = vmatpush.bf16.msrb.mxu3 %v6130_v46 }
 0x2ba   : > { %v3022_v1 = vld [vmem:[#allocation3 + $0xb1] sm:$0xff] }
 0x2bb   : > { %2925 = vst.msk [vmem:[#allocation3 + $0xc1] sm:$0xff] %vm282_vm3, %v2892_v18  ;;  %v2547_v43 = vadd.f32 %v2481_v30, %v2269_v62  ;;  %v3054_v31 = vpack.c.bf16 %v3022_v1, %v3022_v1  ;;  %v2977_v30 = vpack.c.bf16 %v2945_v35, %v2945_v35  ;;  %v1993_v18 = vadd.f32 %v7499_v38, %v7141_v28  ;;  %v1942_v1 = vpop.f32.mrf.mxu1 }
 0x2bc   : > { %v2762_v17 = vpop.f32.mrf.mxu0 }
 0x2bd   : > { %v2825_v60 = vadd.f32 %v2759_v20, %v2547_v43  ;;  %v3647_v11 = vunpack.c.l.b16 %v3054_v31  ;;  %v3554_v31 = vunpack.c.l.b16 %v2977_v30 }
 0x2bf   : > { %v2861_v23 = vadd.f32 %v7331_v51, %v2825_v60  ;;  %v3671_v19 = vpack.c.b16 %v3647_v11, %v3646_v47 }
 0x2c0   : > { %v2206_v48 = vpop.f32.mrf.mxu2 }
 0x2c1   : > { %v2484_v15 = vpop.f32.mrf.mxu3  ;;  %v2893_v61 = vmax.f32 %v2861_v23, 0.0  ;;  %v2270_v21 = vadd.f32 %v2206_v48, %v1991_v34  ;;  %3694 = vrot.lane.b32.xlu1 %v3671_v19, %s6193_s8  ;;  %v2948_v19 = vld [vmem:[#allocation3 + $0x38] sm:$0xff] }
 0x2c2   : > { %v3023_v8 = vld [vmem:[#allocation3 + $0xc1] sm:$0xff] }
 0x2c3   : > { %2926 = vst.msk [vmem:[#allocation3 + $0xc9] sm:$0xff] %vm282_vm3, %v2893_v61  ;;  %v2548_v6 = vadd.f32 %v2484_v15, %v2270_v21  ;;  %v3055_v20 = vpack.c.bf16 %v3023_v8, %v3023_v8  ;;  %v1945_v2 = vpop.f32.mrf.mxu1 }
 0x2c4   : > { %v2765_v33 = vpop.f32.mrf.mxu0 }
 0x2c5   : > { %v2826_v22 = vadd.f32 %v2762_v17, %v2548_v6  ;;  %v3648_v63 = vunpack.c.l.b16 %v3055_v20  ;;  %v7536_v17 = vpack.c.b16 %v3555_v32, %v3554_v31  ;;  %v2947_v6 = vld [vmem:[#allocation3 + $0x30] sm:$0xff]  ;;  %v1995_v20 = vadd.f32 %v7526_v26, %v7155_v14  ;;  %v6138_v14 = vld [vmem:[%s8091_s3 + $0xe8] sm:$0xff] }
 0x2c6   : > { %v2979_v25 = vpack.c.bf16 %v2947_v6, %v2947_v6  ;;  %5233 = vmatpush.bf16.msrb.mxu0 %v6138_v14  ;;  %v1997_v6 = vadd.f32 %v1945_v2, %v7172_v0 }
 0x2c7   : > { %v2862_v7 = vadd.f32 %v7331_v51, %v2826_v22  ;;  %v2980_v22 = vpack.c.bf16 %v2948_v19, %v2948_v19  ;;  %v6143_v19 = vld [vmem:[%s8091_s3 + $0x110] sm:$0xff] }
 0x2c8   : > { %v2209_v59 = vpop.f32.mrf.mxu2  ;;  %5325 = vmatpush.bf16.msrb.mxu1 %v6143_v19 }
 0x2c9   : > { %v2487_v42 = vpop.f32.mrf.mxu3  ;;  %v2894_v3 = vmax.f32 %v2862_v7, 0.0  ;;  %v2271_v27 = vadd.f32 %v2209_v59, %v1992_v37 }
 0x2ca   : > { %v3024_v54 = vld [vmem:[#allocation3 + $0xc9] sm:$0xff] }
 0x2cb   : > { %2927 = vst.msk [vmem:[#allocation3 + $0xd9] sm:$0xff] %vm282_vm3, %v2894_v3  ;;  %v2549_v52 = vadd.f32 %v2487_v42, %v2271_v27  ;;  %v3056_v56 = vpack.c.bf16 %v3024_v54, %v3024_v54  ;;  %v3557_v27 = vunpack.c.l.b16 %v2980_v22  ;;  %v1948_v26 = vpop.f32.mrf.mxu1 }
 0x2cc   : > { %v2768_v4 = vpop.f32.mrf.mxu0 }
 0x2cd   : > { %v2827_v39 = vadd.f32 %v2765_v33, %v2549_v52  ;;  %v3649_v58 = vunpack.c.l.b16 %v3056_v56  ;;  %v3556_v52 = vunpack.c.l.b16 %v2979_v25 }
 0x2cf   : > { %v2863_v62 = vadd.f32 %v7331_v51, %v2827_v39  ;;  %v3672_v29 = vpack.c.b16 %v3649_v58, %v3648_v63  ;;  %v7555_v39 = vpack.c.b16 %v3557_v27, %v3556_v52 }
 0x2d0   : > { %v2212_v43 = vpop.f32.mrf.mxu2 }
 0x2d1   : > { %v2895_v24 = vmax.f32 %v2863_v62, 0.0  ;;  %v2272_v9 = vadd.f32 %v2212_v43, %v1993_v18  ;;  %3696 = vrot.lane.b32.xlu2 %v3672_v29, %s6193_s8  ;;  %v2490_v49 = vpop.f32.mrf.mxu3  ;;  %v1996_v43 = vadd.f32 %v1942_v1, %v7165_v12 }
 0x2d2   : > { %v3025_v34 = vld [vmem:[#allocation3 + $0xd9] sm:$0xff] }
 0x2d3   : > { %2928 = vst.msk [vmem:[#allocation3 + $0xe1] sm:$0xff] %vm282_vm3, %v2895_v24  ;;  %v2550_v60 = vadd.f32 %v2490_v49, %v2272_v9  ;;  %v3683_v47 = vpop.permute.xlu0 %3682  ;;  %v3057_v21 = vpack.c.bf16 %v3025_v34, %v3025_v34  ;;  %v2950_v24 = vld [vmem:[#allocation3 + $0x50] sm:$0xff] }
 0x2d4   : > { %v4374_v28 = vsel %vm282_vm3, %v7536_v17, %v3683_v47  ;;  %v2771_v38 = vpop.f32.mrf.mxu0  ;;  %v2982_v34 = vpack.c.bf16 %v2950_v24, %v2950_v24 }
 0x2d5   : > { %v2828_v11 = vadd.f32 %v2768_v4, %v2550_v60  ;;  %4977 = vmatmul.bf16.gmra.mxu1 %v4374_v28  ;;  %v3650_v42 = vunpack.c.l.b16 %v3057_v21 }
 0x2d6   : > { %v3559_v21 = vunpack.c.l.b16 %v2982_v34 }
 0x2d7   : > { %v2864_v23 = vadd.f32 %v7331_v51, %v2828_v11 }
 0x2d8   : > { %v2215_v10 = vpop.f32.mrf.mxu2 }
 0x2d9   : > { %v2896_v48 = vmax.f32 %v2864_v23, 0.0  ;;  %v2273_v15 = vadd.f32 %v2215_v10, %v1994_v40  ;;  %v2493_v61 = vpop.f32.mrf.mxu3 }
 0x2da   : > { %v3026_v33 = vld [vmem:[#allocation3 + $0xe1] sm:$0xff] }
 0x2db   : > { %2929 = vst.msk [vmem:[#allocation3 + $0xf1] sm:$0xff] %vm282_vm3, %v2896_v48  ;;  %v2551_v8 = vadd.f32 %v2493_v61, %v2273_v15  ;;  %v3058_v37 = vpack.c.bf16 %v3026_v33, %v3026_v33  ;;  %v1951_v61 = vpop.f32.mrf.mxu1 }
 0x2dc   : > { %v2774_v7 = vpop.f32.mrf.mxu0 }
 0x2dd   : > { %v2829_v59 = vadd.f32 %v2771_v38, %v2551_v8  ;;  %v3651_v3 = vunpack.c.l.b16 %v3058_v37  ;;  %v2949_v38 = vld [vmem:[#allocation3 + $0x48] sm:$0xff] }
 0x2de   : > { %v2981_v1 = vpack.c.bf16 %v2949_v38, %v2949_v38 }
 0x2df   : > { %v2865_v35 = vadd.f32 %v7331_v51, %v2829_v59  ;;  %v3673_v54 = vpack.c.b16 %v3651_v3, %v3650_v42 }
 0x2e0   : > { %v2218_v5 = vpop.f32.mrf.mxu2  ;;  %v3558_v37 = vunpack.c.l.b16 %v2981_v1 }
 0x2e1   : > { %v2897_v56 = vmax.f32 %v2865_v35, 0.0  ;;  %v2274_v4 = vadd.f32 %v2218_v5, %v1995_v20  ;;  %3698 = vrot.lane.b32.xlu0 %v3673_v54, %s6193_s8  ;;  %v2496_v30 = vpop.f32.mrf.mxu3  ;;  %v1998_v20 = vadd.f32 %v1948_v26, %v7179_v13  ;;  %v2952_v54 = vld [vmem:[#allocation3 + $0x68] sm:$0xff]  ;;  %v6121_v13 = vld [vmem:[%s8091_s3 + $0x60] sm:$0xff] }
 0x2e2   : > { %v3027_v29 = vld [vmem:[#allocation3 + $0xf1] sm:$0xff]  ;;  %v7572_v25 = vpack.c.b16 %v3559_v21, %v3558_v37  ;;  %5056 = vmatpush.bf16.msrb.mxu2 %v6121_v13 }
 0x2e3   : > { %2930 = vst.msk [vmem:[#allocation3 + $0xf9] sm:$0xff] %vm282_vm3, %v2897_v56  ;;  %v2552_v63 = vadd.f32 %v2496_v30, %v2274_v4  ;;  %v3685_v58 = vpop.permute.xlu1 %3684  ;;  %v3059_v28 = vpack.c.bf16 %v3027_v29, %v3027_v29  ;;  %v1954_v5 = vpop.f32.mrf.mxu1 }
 0x2e4   : > { %v4378_v32 = vsel %vm282_vm3, %v7555_v39, %v3685_v58  ;;  %v2777_v18 = vpop.f32.mrf.mxu0  ;;  %v2951_v58 = vld [vmem:[#allocation3 + $0x60] sm:$0xff] }
 0x2e5   : > { %v2830_v62 = vadd.f32 %v2774_v7, %v2552_v63  ;;  %4982 = vmatmul.bf16.gmra.mxu1 %v4378_v32  ;;  %v3652_v48 = vunpack.c.l.b16 %v3059_v28  ;;  %v2984_v32 = vpack.c.bf16 %v2952_v54, %v2952_v54  ;;  %v2983_v29 = vpack.c.bf16 %v2951_v58, %v2951_v58 }
 0x2e7   : > { %v2866_v31 = vadd.f32 %v7331_v51, %v2830_v62 }
 0x2e8   : > { %v2221_v9 = vpop.f32.mrf.mxu2 }
 0x2e9   : > { %v2898_v49 = vmax.f32 %v2866_v31, 0.0  ;;  %v2275_v60 = vadd.f32 %v2221_v9, %v1996_v43  ;;  %v2499_v47 = vpop.f32.mrf.mxu3  ;;  %v3561_v9 = vunpack.c.l.b16 %v2984_v32 }
 0x2ea   : > { %v3028_v11 = vld [vmem:[#allocation3 + $0xf9] sm:$0xff] }
 0x2eb   : > { %2931 = vst.msk [vmem:[#allocation3 + $0x109] sm:$0xff] %vm282_vm3, %v2898_v49  ;;  %v2553_v40 = vadd.f32 %v2499_v47, %v2275_v60  ;;  %v3060_v23 = vpack.c.bf16 %v3028_v11, %v3028_v11  ;;  %v1999_v49 = vadd.f32 %v1951_v61, %v7186_v45  ;;  %v7590_v60 = vld [vmem:[%s8090_s2] ss:$0 sm:$0xff]  ;;  %v3560_v11 = vunpack.c.l.b16 %v2983_v29  ;;  %v3689_v34 = vpop.permute.xlu2 %3688 }
 0x2ec   : > { %v2780_v12 = vpop.f32.mrf.mxu0 }
 0x2ed   : > { %v2831_v10 = vadd.f32 %v2777_v18, %v2553_v40  ;;  %v3653_v15 = vunpack.c.l.b16 %v3060_v23  ;;  %v7594_v1 = vpack.c.b16 %v3561_v9, %v3560_v11 }
 0x2ef   : > { %v2867_v33 = vadd.f32 %v7331_v51, %v2831_v10  ;;  %v3674_v22 = vpack.c.b16 %v3653_v15, %v3652_v48  ;;  %v6137_v10 = vld [vmem:[%s8091_s3 + $0xe0] sm:$0xff]  ;;  %v4386_v48 = vsel %vm282_vm3, %v7594_v1, %v3689_v34 }
 0x2f0   : > { %v2224_v8 = vpop.f32.mrf.mxu2  ;;  %5234 = vmatpush.bf16.msrb.mxu0 %v6137_v10  ;;  %v6120_v10 = vld [vmem:[%s8091_s3 + $0x58] sm:$0xff] }
 0x2f1   : > { %v2899_v41 = vmax.f32 %v2867_v33, 0.0  ;;  %v2276_v46 = vadd.f32 %v2224_v8, %v1997_v6  ;;  %3700 = vrot.lane.b32.xlu1 %v3674_v22, %s6193_s8  ;;  %v2502_v7 = vpop.f32.mrf.mxu3  ;;  %v2000_v6 = vadd.f32 %v1954_v5, %v7196_v36  ;;  %v2954_v22 = vld [vmem:[#allocation3 + $0x80] sm:$0xff]  ;;  %5057 = vmatpush.bf16.msrb.mxu2 %v6120_v10 }
 0x2f2   : > { %v3029_v27 = vld [vmem:[#allocation3 + $0x109] sm:$0xff] }
 0x2f3   : > { %2932 = vst.msk [vmem:[#allocation3 + $0x111] sm:$0xff] %vm282_vm3, %v2899_v41  ;;  %v2554_v59 = vadd.f32 %v2502_v7, %v2276_v46  ;;  %v3687_v42 = vpop.permute.xlu1 %3686  ;;  %v3061_v63 = vpack.c.bf16 %v3029_v27, %v3029_v27 }
 0x2f4   : > { %v4382_v3 = vsel %vm282_vm3, %v7572_v25, %v3687_v42  ;;  %v2783_v0 = vpop.f32.mrf.mxu0 }
 0x2f5   : > { %v2832_v2 = vadd.f32 %v2780_v12, %v2554_v59  ;;  %4987 = vmatmul.bf16.gmra.mxu1 %v4382_v3  ;;  %v3654_v31 = vunpack.c.l.b16 %v3061_v63  ;;  %v1957_v12 = vpop.f32.mrf.mxu1  ;;  %v2953_v59 = vld [vmem:[#allocation3 + $0x78] sm:$0xff]  ;;  %v2986_v3 = vpack.c.bf16 %v2954_v22, %v2954_v22 }
 0x2f7   : > { %v2868_v35 = vadd.f32 %v7331_v51, %v2832_v2  ;;  %v6129_v51 = vld [vmem:[%s8091_s3 + $0xa0] sm:$0xff] }
 0x2f8   : > { %v2227_v52 = vpop.f32.mrf.mxu2  ;;  %5145 = vmatpush.bf16.msrb.mxu3 %v6129_v51 }
 0x2f9   : > { %v2900_v56 = vmax.f32 %v2868_v35, 0.0  ;;  %v2277_v4 = vadd.f32 %v2227_v52, %v1998_v20  ;;  %v2505_v30 = vpop.f32.mrf.mxu3  ;;  %v2985_v35 = vpack.c.bf16 %v2953_v59, %v2953_v59  ;;  %v3563_v52 = vunpack.c.l.b16 %v2986_v3 }
 0x2fa   : > { %v3030_v14 = vld [vmem:[#allocation3 + $0x111] sm:$0xff] }
 0x2fb   : > { %2933 = vst.msk [vmem:[#allocation3 + $0x121] sm:$0xff] %vm282_vm3, %v2900_v56  ;;  %v2555_v18 = vadd.f32 %v2505_v30, %v2277_v4  ;;  %v3062_v62 = vpack.c.bf16 %v3030_v14, %v3030_v14  ;;  %v2001_v56 = vadd.f32 %v1957_v12, %v7203_v55  ;;  %v3562_v58 = vunpack.c.l.b16 %v2985_v35  ;;  %v3691_v14 = vpop.permute.xlu2 %3690 }
 0x2fc   : > { %v2786_v26 = vpop.f32.mrf.mxu0 }
 0x2fd   : > { %v2833_v43 = vadd.f32 %v2783_v0, %v2555_v18  ;;  %v3655_v24 = vunpack.c.l.b16 %v3062_v62  ;;  %v1960_v27 = vpop.f32.mrf.mxu1  ;;  %v7608_v13 = vpack.c.b16 %v3563_v52, %v3562_v58  ;;  %v2958_v52 = vld [vmem:[#allocation3 + $0xb0] sm:$0xff] }
 0x2ff   : > { %v2869_v47 = vadd.f32 %v7590_v60, %v2833_v43  ;;  %v3675_v28 = vpack.c.b16 %v3655_v24, %v3654_v31  ;;  %v2002_v24 = vadd.f32 %v1960_v27, %v7214_v44 }
 0x300   : > { %v2230_v38 = vpop.f32.mrf.mxu2 }
 0x301   : > { %v2901_v40 = vmax.f32 %v2869_v47, 0.0  ;;  %v2278_v23 = vadd.f32 %v2230_v38, %v1999_v49  ;;  %3702 = vrot.lane.b32.xlu2 %v3675_v28, %s6193_s8  ;;  %v2508_v19 = vpop.f32.mrf.mxu3  ;;  %v2956_v49 = vld [vmem:[#allocation3 + $0x98] sm:$0xff] }
 0x302   : > { %v3031_v21 = vld [vmem:[#allocation3 + $0x121] sm:$0xff] }
 0x303   : > { %2934 = vst.msk [vmem:[#allocation3 + $0x129] sm:$0xff] %vm282_vm3, %v2901_v40  ;;  %v2556_v45 = vadd.f32 %v2508_v19, %v2278_v23  ;;  %v3063_v7 = vpack.c.bf16 %v3031_v21, %v3031_v21  ;;  %v2955_v40 = vld [vmem:[#allocation3 + $0x90] sm:$0xff]  ;;  %v2988_v19 = vpack.c.bf16 %v2956_v49, %v2956_v49 }
 0x304   : > { %v2789_v15 = vpop.f32.mrf.mxu0 }
 0x305   : > { %v2834_v61 = vadd.f32 %v2786_v26, %v2556_v45  ;;  %4992 = vmatmul.bf16.gmra.mxu1 %v4386_v48  ;;  %v3656_v36 = vunpack.c.l.b16 %v3063_v7  ;;  %v4390_v26 = vsel %vm282_vm3, %v7608_v13, %v3691_v14  ;;  %v1963_v43 = vpop.f32.mrf.mxu1  ;;  %v2987_v48 = vpack.c.bf16 %v2955_v40, %v2955_v40 }
 0x307   : > { %v2870_v33 = vadd.f32 %v7590_v60, %v2834_v61  ;;  %v3564_v7 = vunpack.c.l.b16 %v2987_v48 }
 0x308   : > { %v2233_v8 = vpop.f32.mrf.mxu2 }
 0x309   : > { %v2902_v37 = vmax.f32 %v2870_v33, 0.0  ;;  %v2279_v41 = vadd.f32 %v2233_v8, %v2000_v6  ;;  %v2511_v46 = vpop.f32.mrf.mxu3  ;;  %v3565_v6 = vunpack.c.l.b16 %v2988_v19  ;;  %v2003_v33 = vadd.f32 %v1963_v43, %v7237_v50  ;;  %v3263_v43 = vld [vmem:[#allocation3 + $0x1a] sm:$0xff] }
 0x30a   : > { %v3032_v42 = vld [vmem:[#allocation3 + $0x129] sm:$0xff] }
 0x30b   : > { %2935 = vst.msk [vmem:[#allocation3 + $0x139] sm:$0xff] %vm282_vm3, %v2902_v37  ;;  %v2557_v0 = vadd.f32 %v2511_v46, %v2279_v41  ;;  %v3064_v2 = vpack.c.bf16 %v3032_v42, %v3032_v42  ;;  %v6128_v37 = vld [vmem:[%s8091_s3 + $0x98] sm:$0xff] }
 0x30c   : > { %v2792_v20 = vpop.f32.mrf.mxu0  ;;  %5146 = vmatpush.bf16.msrb.mxu3 %v6128_v37 }
 0x30d   : > { %v2835_v54 = vadd.f32 %v2789_v15, %v2557_v0  ;;  %v3657_v5 = vunpack.c.l.b16 %v3064_v2  ;;  %v1966_v41 = vpop.f32.mrf.mxu1  ;;  %v7625_v0 = vpack.c.b16 %v3565_v6, %v3564_v7  ;;  %v3266_v6 = vld [vmem:[#allocation3 + $0x3a] sm:$0xff] }
 0x30f   : > { %v2871_v4 = vadd.f32 %v7590_v60, %v2835_v54  ;;  %v3676_v30 = vpack.c.b16 %v3657_v5, %v3656_v36  ;;  %v2004_v36 = vadd.f32 %v1966_v41, %v7263_v57  ;;  %v2957_v57 = vld [vmem:[#allocation3 + $0xa8] sm:$0xff] }
 0x310   : > { %v2236_v63 = vpop.f32.mrf.mxu2 }
 0x311   : > { %v2903_v32 = vmax.f32 %v2871_v4, 0.0  ;;  %v2280_v18 = vadd.f32 %v2236_v63, %v2001_v56  ;;  %3704 = vrot.lane.b32.xlu0 %v3676_v30, %s6193_s8  ;;  %v2514_v62 = vpop.f32.mrf.mxu3  ;;  %v6136_v56 = vld [vmem:[%s8091_s3 + $0xd8] sm:$0xff]  ;;  %v6142_v4 = vld [vmem:[%s8091_s3 + $0x108] sm:$0xff] }
 0x312   : > { %v3033_v31 = vld [vmem:[#allocation3 + $0x139] sm:$0xff]  ;;  %5235 = vmatpush.bf16.msrb.mxu0 %v6136_v56  ;;  %5326 = vmatpush.bf16.msrb.mxu1 %v6142_v4 }
 0x313   : > { %2936 = vst.msk [vmem:[#allocation3 + $0x141] sm:$0xff] %vm282_vm3, %v2903_v32  ;;  %v2558_v51 = vadd.f32 %v2514_v62, %v2280_v18  ;;  %v3065_v34 = vpack.c.bf16 %v3033_v31, %v3033_v31  ;;  %v3264_v31 = vld [vmem:[#allocation3 + $0x22] sm:$0xff] }
 0x314   : > { %v2795_v55 = vpop.f32.mrf.mxu0 }
 0x315   : > { %v2836_v29 = vadd.f32 %v2792_v20, %v2558_v51  ;;  %4997 = vmatmul.bf16.gmra.mxu1 %v4390_v26  ;;  %v3658_v61 = vunpack.c.l.b16 %v3065_v34  ;;  %v1969_v18 = vpop.f32.mrf.mxu1  ;;  %v2990_v51 = vpack.c.bf16 %v2958_v52, %v2958_v52  ;;  %v3296_v34 = vpack.c.bf16 %v3264_v31, %v3264_v31 }
 0x317   : > { %v2872_v9 = vadd.f32 %v7590_v60, %v2836_v29  ;;  %v2989_v29 = vpack.c.bf16 %v2957_v57, %v2957_v57 }
 0x318   : > { %v2239_v47 = vpop.f32.mrf.mxu2 }
 0x319   : > { %v2904_v28 = vmax.f32 %v2872_v9, 0.0  ;;  %v2281_v38 = vadd.f32 %v2239_v47, %v2002_v24  ;;  %v2517_v11 = vpop.f32.mrf.mxu3  ;;  %v3567_v47 = vunpack.c.l.b16 %v2990_v51  ;;  %v3566_v19 = vunpack.c.l.b16 %v2989_v29 }
 0x31a   : > { %v3034_v23 = vld [vmem:[#allocation3 + $0x141] sm:$0xff] }
 0x31b   : > { %2937 = vst.msk [vmem:[#allocation3 + $0x151] sm:$0xff] %vm282_vm3, %v2904_v28  ;;  %v2559_v12 = vadd.f32 %v2517_v11, %v2281_v38  ;;  %v3066_v45 = vpack.c.bf16 %v3034_v23, %v3034_v23  ;;  %v3295_v11 = vpack.c.bf16 %v3263_v43, %v3263_v43 }
 0x31c   : > { %v2798_v44 = vpop.f32.mrf.mxu0 }
 0x31d   : > { %v2837_v15 = vadd.f32 %v2795_v55, %v2559_v12  ;;  %v3659_v21 = vunpack.c.l.b16 %v3066_v45 }
 0x31f   : > { %v2873_v22 = vadd.f32 %v7590_v60, %v2837_v15  ;;  %v3677_v8 = vpack.c.b16 %v3659_v21, %v3658_v61  ;;  %v4016_v15 = vunpack.c.l.b16 %v3295_v11  ;;  %v4017_v61 = vunpack.c.l.b16 %v3296_v34  ;;  %v3265_v21 = vld [vmem:[#allocation3 + $0x32] sm:$0xff] }
 0x320   : > { %v2242_v46 = vpop.f32.mrf.mxu2  ;;  %v3297_v41 = vpack.c.bf16 %v3265_v21, %v3265_v21 }
 0x321   : > { %v2905_v59 = vmax.f32 %v2873_v22, 0.0  ;;  %v2282_v42 = vadd.f32 %v2242_v46, %v2003_v33  ;;  %3706 = vrot.lane.b32.xlu1 %v3677_v8, %s6193_s8  ;;  %v2520_v3 = vpop.f32.mrf.mxu3  ;;  %v1972_v33 = vpop.f32.mrf.mxu1  ;;  %v3298_v46 = vpack.c.bf16 %v3266_v6, %v3266_v6 }
 0x322   : > { %v3035_v54 = vld [vmem:[#allocation3 + $0x151] sm:$0xff]  ;;  %v2006_v7 = vadd.f32 %v1972_v33, %v7309_v16  ;;  %v4018_v52 = vunpack.c.l.b16 %v3297_v41  ;;  %v2962_v33 = vld [vmem:[#allocation3 + $0xe0] sm:$0xff] }
 0x323   : > { %2938 = vst.msk [vmem:[#allocation3 + $0x159] sm:$0xff] %vm282_vm3, %v2905_v59  ;;  %v2560_v50 = vadd.f32 %v2520_v3, %v2282_v42  ;;  %v3693_v2 = vpop.permute.xlu0 %3692  ;;  %v3067_v32 = vpack.c.bf16 %v3035_v54, %v3035_v54  ;;  %v4048_v42 = vpack.c.b16 %v4017_v61, %v4016_v15  ;;  %v2960_v3 = vld [vmem:[#allocation3 + $0xc8] sm:$0xff]  ;;  %v2959_v54 = vld [vmem:[#allocation3 + $0xc0] sm:$0xff]  ;;  %v4019_v16 = vunpack.c.l.b16 %v3298_v46 }
 0x324   : > { %v4394_v27 = vsel %vm282_vm3, %v7625_v0, %v3693_v2  ;;  %v2801_v35 = vpop.f32.mrf.mxu0  ;;  %v2992_v56 = vpack.c.bf16 %v2960_v3, %v2960_v3  ;;  %v2994_v41 = vpack.c.bf16 %v2962_v33, %v2962_v33  ;;  %v3397_v3 = vld [vmem:[#allocation3 + $0x69] sm:$0xff] }
 0x325   : > { %v2838_v20 = vadd.f32 %v2798_v44, %v2560_v50  ;;  %5002 = vmatmul.bf16.gmra.mxu1 %v4394_v27  ;;  %v3660_v9 = vunpack.c.l.b16 %v3067_v32  ;;  %v7646_v44 = vpack.c.b16 %v3567_v47, %v3566_v19  ;;  %v3267_v32 = vld [vmem:[#allocation3 + $0x4a] sm:$0xff]  ;;  %v4049_v51 = vpack.c.b16 %v4019_v16, %v4018_v52  ;;  %v6135_v19 = vld [vmem:[%s8091_s3 + $0xd0] sm:$0xff] }
 0x326   : > { %5236 = vmatpush.bf16.msrb.mxu0 %v6135_v19 }
 0x327   : > { %v2874_v5 = vadd.f32 %v7590_v60, %v2838_v20 }
 0x328   : > { %v2245_v30 = vpop.f32.mrf.mxu2 }
 0x329   : > { %v2906_v63 = vmax.f32 %v2874_v5, 0.0  ;;  %v2283_v58 = vadd.f32 %v2245_v30, %v2004_v36  ;;  %3872 = vrot.lane.b32.xlu1 %v7536_v17, %s6193_s8  ;;  %v2523_v14 = vpop.f32.mrf.mxu3  ;;  %v2005_v17 = vadd.f32 %v1969_v18, %v7286_v53 }
 0x32a   : > { %v3036_v62 = vld [vmem:[#allocation3 + $0x159] sm:$0xff] }
 0x32b   : > { %2939 = vst.msk [vmem:[#allocation3 + $0x169] sm:$0xff] %vm282_vm3, %v2906_v63  ;;  %v2561_v26 = vadd.f32 %v2523_v14, %v2283_v58  ;;  %v3068_v55 = vpack.c.bf16 %v3036_v62, %v3036_v62  ;;  %v3393_v63 = vld [vmem:[#allocation3 + $0x39] sm:$0xff]  ;;  %v2991_v14 = vpack.c.bf16 %v2959_v54, %v2959_v54  ;;  %v3697_v47 = vpop.permute.xlu2 %3696 }
 0x32c   : > { %v2804_v23 = vpop.f32.mrf.mxu0  ;;  %v6127_v58 = vld [vmem:[%s8091_s3 + $0x90] sm:$0xff]  ;;  %v3425_v29 = vpack.c.bf16 %v3393_v63, %v3393_v63 }
 0x32d   : > { %v2839_v24 = vadd.f32 %v2801_v35, %v2561_v26  ;;  %v3661_v49 = vunpack.c.l.b16 %v3068_v55  ;;  %5147 = vmatpush.bf16.msrb.mxu3 %v6127_v58  ;;  %v3569_v26 = vunpack.c.l.b16 %v2992_v56  ;;  %v3392_v55 = vld [vmem:[#allocation3 + $0x31] sm:$0xff] }
 0x32f   : > { %v2875_v28 = vadd.f32 %v7590_v60, %v2839_v24  ;;  %v3678_v38 = vpack.c.b16 %v3661_v49, %v3660_v9  ;;  %v3299_v24 = vpack.c.bf16 %v3267_v32, %v3267_v32  ;;  %v3399_v32 = vld [vmem:[#allocation3 + $0x81] sm:$0xff] }
 0x330   : > { %v2248_v40 = vpop.f32.mrf.mxu2 }
 0x331   : > { %v2907_v12 = vmax.f32 %v2875_v28, 0.0  ;;  %v2284_v45 = vadd.f32 %v2248_v40, %v2005_v17  ;;  %3708 = vrot.lane.b32.xlu2 %v3678_v38, %s6193_s8  ;;  %3874 = vrot.lane.b32.xlu1 %v7555_v39, %s6193_s8  ;;  %v2526_v10 = vpop.f32.mrf.mxu3  ;;  %v6119_v39 = vld [vmem:[%s8091_s3 + $0x50] sm:$0xff]  ;;  %v3568_v17 = vunpack.c.l.b16 %v2991_v14  ;;  %v3424_v38 = vpack.c.bf16 %v3392_v55, %v3392_v55 }
 0x332   : > { %v3037_v37 = vld [vmem:[#allocation3 + $0x169] sm:$0xff]  ;;  %5058 = vmatpush.bf16.msrb.mxu2 %v6119_v39  ;;  %v4020_v34 = vunpack.c.l.b16 %v3299_v24  ;;  %v2964_v24 = vld [vmem:[#allocation3 + $0xf8] sm:$0xff] }
 0x333   : > { %2940 = vst.msk [vmem:[#allocation3 + $0x171] sm:$0xff] %vm282_vm3, %v2907_v12  ;;  %v2562_v53 = vadd.f32 %v2526_v10, %v2284_v45  ;;  %v3695_v48 = vpop.permute.xlu1 %3694  ;;  %v3069_v35 = vpack.c.bf16 %v3037_v37, %v3037_v37  ;;  %v7670_v11 = vpack.c.b16 %v3569_v26, %v3568_v17  ;;  %v3269_v45 = vld [vmem:[#allocation3 + $0x62] sm:$0xff]  ;;  %v3270_v10 = vld [vmem:[#allocation3 + $0x6a] sm:$0xff]  ;;  %v3431_v26 = vpack.c.bf16 %v3399_v32, %v3399_v32 }
 0x334   : > { %v4398_v22 = vsel %vm282_vm3, %v7646_v44, %v3695_v48  ;;  %v2807_v36 = vpop.f32.mrf.mxu0  ;;  %v7664_v49 = vpop.f32.mrf.mxu1  ;;  %v3301_v21 = vpack.c.bf16 %v3269_v45, %v3269_v45  ;;  %v3302_v6 = vpack.c.bf16 %v3270_v10, %v3270_v10  ;;  %v2963_v17 = vld [vmem:[#allocation3 + $0xf0] sm:$0xff] }
 0x335   : > { %v2840_v8 = vadd.f32 %v2804_v23, %v2562_v53  ;;  %5007 = vmatmul.bf16.gmra.mxu1 %v4398_v22  ;;  %v3662_v18 = vunpack.c.l.b16 %v3069_v35  ;;  %v3395_v23 = vld [vmem:[#allocation3 + $0x51] sm:$0xff]  ;;  %v4402_v12 = vsel %vm282_vm3, %v7670_v11, %v3697_v47  ;;  %v4208_v53 = vunpack.c.l.b16 %v3424_v38  ;;  %v3396_v35 = vld [vmem:[#allocation3 + $0x61] sm:$0xff] }
 0x336   : > { %v3427_v48 = vpack.c.bf16 %v3395_v23, %v3395_v23  ;;  %v4022_v46 = vunpack.c.l.b16 %v3301_v21  ;;  %v2996_v38 = vpack.c.bf16 %v2964_v24, %v2964_v24  ;;  %v2995_v19 = vpack.c.bf16 %v2963_v17, %v2963_v17  ;;  %v3275_v45 = vld [vmem:[#allocation3 + $0xaa] sm:$0xff]  ;;  %v3276_v10 = vld [vmem:[#allocation3 + $0xb2] sm:$0xff]  ;;  %v3404_v24 = vld [vmem:[#allocation3 + $0xc1] sm:$0xff] }
 0x337   : > { %v2876_v59 = vadd.f32 %v7590_v60, %v2840_v8  ;;  %v2961_v8 = vld [vmem:[#allocation3 + $0xd8] sm:$0xff]  ;;  %v3307_v21 = vpack.c.bf16 %v3275_v45, %v3275_v45 }
 0x338   : > { %v2251_v50 = vpop.f32.mrf.mxu2  ;;  %v4211_v37 = vunpack.c.l.b16 %v3427_v48  ;;  %v3572_v33 = vunpack.c.l.b16 %v2995_v19 }
 0x339   : > { %v2908_v2 = vmax.f32 %v2876_v59, 0.0  ;;  %v2285_v27 = vadd.f32 %v2251_v50, %v2006_v7  ;;  %4064 = vrot.lane.b32.xlu2 %v4048_v42, %s6193_s8  ;;  %3876 = vrot.lane.b32.xlu1 %v7572_v25, %s6193_s8  ;;  %v2529_v20 = vpop.f32.mrf.mxu3  ;;  %v3268_v25 = vld [vmem:[#allocation3 + $0x52] sm:$0xff]  ;;  %v4023_v7 = vunpack.c.l.b16 %v3302_v6  ;;  %v2993_v42 = vpack.c.bf16 %v2961_v8, %v2961_v8  ;;  %v3271_v50 = vld [vmem:[#allocation3 + $0x7a] sm:$0xff] }
 0x33a   : > { %v3038_v5 = vld [vmem:[#allocation3 + $0x171] sm:$0xff]  ;;  %v3300_v9 = vpack.c.bf16 %v3268_v25, %v3268_v25  ;;  %v3308_v6 = vpack.c.bf16 %v3276_v10, %v3276_v10  ;;  %v3407_v10 = vld [vmem:[#allocation3 + $0xe1] sm:$0xff] }
 0x33b   : > { %2941 = vst.msk [vmem:[#allocation3 + $0x181] sm:$0xff] %vm282_vm3, %v2908_v2  ;;  %v2563_v4 = vadd.f32 %v2529_v20, %v2285_v27  ;;  %v3070_v30 = vpack.c.bf16 %v3038_v5, %v3038_v5  ;;  %v3272_v2 = vld [vmem:[#allocation3 + $0x82] sm:$0xff]  ;;  %v3571_v20 = vunpack.c.l.b16 %v2994_v41  ;;  %v4051_v54 = vpack.c.b16 %v4023_v7, %v4022_v46 }
 0x33c   : > { %v4021_v40 = vunpack.c.l.b16 %v3300_v9  ;;  %v7683_v39 = vpop.f32.mrf.mxu1  ;;  %v3303_v5 = vpack.c.bf16 %v3271_v50, %v3271_v50  ;;  %v3304_v52 = vpack.c.bf16 %v3272_v2, %v3272_v2  ;;  %v3570_v16 = vunpack.c.l.b16 %v2993_v42  ;;  %v3403_v42 = vld [vmem:[#allocation3 + $0xb1] sm:$0xff]  ;;  %v3277_v2 = vld [vmem:[#allocation3 + $0xc2] sm:$0xff] }
 0x33d   : > { %v2841_v57 = vadd.f32 %v2807_v36, %v2563_v4  ;;  %v3663_v62 = vunpack.c.l.b16 %v3070_v30  ;;  %v3429_v36 = vpack.c.bf16 %v3397_v3, %v3397_v3  ;;  %v4028_v7 = vunpack.c.l.b16 %v3307_v21  ;;  %v6134_v3 = vld [vmem:[%s8091_s3 + $0xc8] sm:$0xff] }
 0x33e   : > { %v4050_v61 = vpack.c.b16 %v4021_v40, %v4020_v34  ;;  %v7696_v4 = vpack.c.b16 %v3571_v20, %v3570_v16  ;;  %v4024_v58 = vunpack.c.l.b16 %v3303_v5  ;;  %v4025_v14 = vunpack.c.l.b16 %v3304_v52  ;;  %v6126_v40 = vld [vmem:[%s8091_s3 + $0x88] sm:$0xff]  ;;  %v3278_v20 = vld [vmem:[#allocation3 + $0xca] sm:$0xff]  ;;  %5237 = vmatpush.bf16.msrb.mxu0 %v6134_v3 }
 0x33f   : > { %v2877_v43 = vadd.f32 %v7590_v60, %v2841_v57  ;;  %v3679_v31 = vpack.c.b16 %v3663_v62, %v3662_v18  ;;  %v4209_v60 = vunpack.c.l.b16 %v3425_v29  ;;  %v4213_v63 = vunpack.c.l.b16 %v3429_v36  ;;  %v3273_v57 = vld [vmem:[#allocation3 + $0x92] sm:$0xff]  ;;  %v3274_v18 = vld [vmem:[#allocation3 + $0x9a] sm:$0xff]  ;;  %5148 = vmatpush.bf16.msrb.mxu3 %v6126_v40 }
 0x340   : > { %v4052_v29 = vpack.c.b16 %v4025_v14, %v4024_v58  ;;  %v3435_v36 = vpack.c.bf16 %v3403_v42, %v3403_v42  ;;  %v3309_v16 = vpack.c.bf16 %v3277_v2, %v3277_v2  ;;  %v2965_v58 = vld [vmem:[#allocation3 + $0x108] sm:$0xff]  ;;  %v3157_v42 = vld [vmem:[#allocation3 + $0x120] sm:$0xff] }
 0x341   : > { %v2909_v28 = vmax.f32 %v2877_v43, 0.0  ;;  %3710 = vrot.lane.b32.xlu0 %v3679_v31, %s6193_s8  ;;  %4066 = vrot.lane.b32.xlu2 %v4049_v51, %s6193_s8  ;;  %v7678_v15 = vpack.c.b16 %v4209_v60, %v4208_v53  ;;  %v3398_v51 = vld [vmem:[#allocation3 + $0x79] sm:$0xff]  ;;  %v3305_v43 = vpack.c.bf16 %v3273_v57, %v3273_v57  ;;  %v3306_v31 = vpack.c.bf16 %v3274_v18, %v3274_v18 }
 0x342   : > { %3878 = vrot.lane.b32.xlu1 %v7594_v1, %s6193_s8  ;;  %v3394_v1 = vld [vmem:[#allocation3 + $0x49] sm:$0xff]  ;;  %v3430_v9 = vpack.c.bf16 %v3398_v51, %v3398_v51  ;;  %v4219_v32 = vunpack.c.l.b16 %v3435_v36  ;;  %v4030_v57 = vunpack.c.l.b16 %v3309_v16  ;;  %v2997_v51 = vpack.c.bf16 %v2965_v58, %v2965_v58  ;;  %v3409_v16 = vld [vmem:[#allocation3 + $0xf9] sm:$0xff] }
 0x343   : > { %2942 = vst.msk [vmem:[#allocation3 + $0x189] sm:$0xff] %vm282_vm3, %v2909_v28  ;;  %v3426_v22 = vpack.c.bf16 %v3394_v1, %v3394_v1  ;;  %v4215_v28 = vunpack.c.l.b16 %v3431_v26  ;;  %v4026_v60 = vunpack.c.l.b16 %v3305_v43  ;;  %v4027_v34 = vunpack.c.l.b16 %v3306_v31  ;;  %v3279_v26 = vld [vmem:[#allocation3 + $0xda] sm:$0xff] }
 0x344   : > { %v4214_v23 = vunpack.c.l.b16 %v3430_v9  ;;  %v3573_v1 = vunpack.c.l.b16 %v2996_v38 }
 0x345   : > { %5012 = vmatmul.bf16.gmra.mxu1 %v4402_v12  ;;  %v4210_v59 = vunpack.c.l.b16 %v3426_v22  ;;  %v3401_v12 = vld [vmem:[#allocation3 + $0x99] sm:$0xff]  ;;  %v4053_v48 = vpack.c.b16 %v4027_v34, %v4026_v60  ;;  %v3574_v60 = vunpack.c.l.b16 %v2997_v51  ;;  %v3436_v34 = vpack.c.bf16 %v3404_v24, %v3404_v24 }
 0x346   : > { %v7715_v53 = vpack.c.b16 %v4215_v28, %v4214_v23  ;;  %v3311_v28 = vpack.c.bf16 %v3279_v26, %v3279_v26 }
 0x347   : > { %v7687_v27 = vpack.c.b16 %v4211_v37, %v4210_v59  ;;  %v3594_v37 = vpack.c.b16 %v3573_v1, %v3572_v33  ;;  %v4029_v59 = vunpack.c.l.b16 %v3308_v6  ;;  %v6125_v1 = vld [vmem:[%s8091_s3 + $0x80] sm:$0xff]  ;;  %v4220_v21 = vunpack.c.l.b16 %v3436_v34  ;;  %v3406_v6 = vld [vmem:[#allocation3 + $0xd9] sm:$0xff]  ;;  %v3158_v33 = vld [vmem:[#allocation3 + $0x128] sm:$0xff] }
 0x348   : > { %5149 = vmatpush.bf16.msrb.mxu3 %v6125_v1  ;;  %v3438_v3 = vpack.c.bf16 %v3406_v6, %v3406_v6  ;;  %v3162_v1 = vld [vmem:[#allocation3 + $0x158] sm:$0xff] }
 0x349   : > { %4256 = vrot.lane.b32.xlu0 %v7678_v15, %s6193_s8  ;;  %4068 = vrot.lane.b32.xlu2 %v4050_v61, %s6193_s8  ;;  %v3433_v61 = vpack.c.bf16 %v3401_v12, %v3401_v12  ;;  %v4054_v52 = vpack.c.b16 %v4029_v59, %v4028_v7  ;;  %v4032_v12 = vunpack.c.l.b16 %v3311_v28 }
 0x34a   : > { %3880 = vrot.lane.b32.xlu1 %v7608_v13, %s6193_s8  ;;  %v3428_v13 = vpack.c.bf16 %v3396_v35, %v3396_v35  ;;  %v4222_v36 = vunpack.c.l.b16 %v3438_v3 }
 0x34b   : > { %v4217_v46 = vunpack.c.l.b16 %v3433_v61  ;;  %v3282_v61 = vld [vmem:[#allocation3 + $0xfa] sm:$0xff] }
 0x34c   : > { %v4212_v62 = vunpack.c.l.b16 %v3428_v13  ;;  %v3310_v13 = vpack.c.bf16 %v3278_v20, %v3278_v20  ;;  %v3314_v59 = vpack.c.bf16 %v3282_v61, %v3282_v61  ;;  %v3200_v61 = vld [vmem:[#allocation3 + $0x21] sm:$0xff] }
 0x34e   : > { %v7703_v55 = vpack.c.b16 %v4213_v63, %v4212_v62  ;;  %v4031_v18 = vunpack.c.l.b16 %v3310_v13  ;;  %v3283_v13 = vld [vmem:[#allocation3 + $0x10a] sm:$0xff] }
 0x350   : > { %v4055_v9 = vpack.c.b16 %v4031_v18, %v4030_v57  ;;  %v3441_v18 = vpack.c.bf16 %v3409_v16, %v3409_v16 }
 0x351   : > { %4258 = vrot.lane.b32.xlu0 %v7687_v27, %s6193_s8  ;;  %4070 = vrot.lane.b32.xlu2 %v4051_v54, %s6193_s8  ;;  %v3402_v54 = vld [vmem:[#allocation3 + $0xa9] sm:$0xff] }
 0x352   : > { %3882 = vrot.lane.b32.xlu1 %v7625_v0, %s6193_s8  ;;  %v7694_v56 = vpop.f32.mrf.mxu1  ;;  %v6118_v0 = vld [vmem:[%s8091_s3 + $0x48] sm:$0xff]  ;;  %v3434_v63 = vpack.c.bf16 %v3402_v54, %v3402_v54 }
 0x353   : > { %v3699_v30 = vpop.permute.xlu0 %3698  ;;  %5059 = vmatpush.bf16.msrb.mxu2 %v6118_v0  ;;  %v3405_v0 = vld [vmem:[#allocation3 + $0xc9] sm:$0xff] }
 0x354   : > { %v4406_v25 = vsel %vm282_vm3, %v7696_v4, %v3699_v30  ;;  %v2966_v30 = vld [vmem:[#allocation3 + $0x110] sm:$0xff]  ;;  %v4218_v62 = vunpack.c.l.b16 %v3434_v63  ;;  %v3437_v17 = vpack.c.bf16 %v3405_v0, %v3405_v0  ;;  %v3160_v63 = vld [vmem:[#allocation3 + $0x140] sm:$0xff]  ;;  %v3159_v0 = vld [vmem:[#allocation3 + $0x138] sm:$0xff] }
 0x355   : > { %5017 = vmatmul.bf16.gmra.mxu1 %v4406_v25  ;;  %v2998_v25 = vpack.c.bf16 %v2966_v30, %v2966_v30  ;;  %v3284_v30 = vld [vmem:[#allocation3 + $0x112] sm:$0xff]  ;;  %v3191_v24 = vpack.c.bf16 %v3159_v0, %v3159_v0 }
 0x356   : > { %v4245_v43 = vpack.c.b16 %v4219_v32, %v4218_v62  ;;  %v4221_v19 = vunpack.c.l.b16 %v3437_v17  ;;  %v3315_v62 = vpack.c.bf16 %v3283_v13, %v3283_v13  ;;  %v3316_v51 = vpack.c.bf16 %v3284_v30, %v3284_v30 }
 0x357   : > { %v3575_v31 = vunpack.c.l.b16 %v2998_v25  ;;  %v3408_v25 = vld [vmem:[#allocation3 + $0xf1] sm:$0xff]  ;;  %v4225_v17 = vunpack.c.l.b16 %v3441_v18 }
 0x358   : > { %v4036_v28 = vunpack.c.l.b16 %v3315_v62  ;;  %v3072_v18 = vld [vmem:[#allocation3 + $0xa] sm:$0xff] }
 0x359   : > { %4260 = vrot.lane.b32.xlu0 %v7703_v55, %s6193_s8  ;;  %4072 = vrot.lane.b32.xlu2 %v4052_v29, %s6193_s8  ;;  %v3280_v29 = vld [vmem:[#allocation3 + $0xe2] sm:$0xff]  ;;  %v3595_v23 = vpack.c.b16 %v3575_v31, %v3574_v60  ;;  %v3411_v60 = vld [vmem:[#allocation3 + $0x111] sm:$0xff] }
 0x35a   : > { %3884 = vrot.lane.b32.xlu1 %v7646_v44, %s6193_s8  ;;  %v7710_v47 = vpop.f32.mrf.mxu1  ;;  %v3400_v44 = vld [vmem:[#allocation3 + $0x91] sm:$0xff]  ;;  %v3312_v38 = vpack.c.bf16 %v3280_v29, %v3280_v29  ;;  %v3192_v29 = vpack.c.bf16 %v3160_v63, %v3160_v63  ;;  %v3287_v63 = vld [vmem:[#allocation3 + $0x13a] sm:$0xff] }
 0x35b   : > { %v3432_v22 = vpack.c.bf16 %v3400_v44, %v3400_v44 }
 0x35c   : > { %v4033_v45 = vunpack.c.l.b16 %v3312_v38  ;;  %v4037_v38 = vunpack.c.l.b16 %v3316_v51 }
 0x35d   : > { %v4216_v35 = vunpack.c.l.b16 %v3432_v22  ;;  %v6117_v22 = vld [vmem:[%s8091_s3 + $0x40] sm:$0xff] }
 0x35e   : > { %5060 = vmatpush.bf16.msrb.mxu2 %v6117_v22  ;;  %v4058_v6 = vpack.c.b16 %v4037_v38, %v4036_v28 }
 0x35f   : > { %v7731_v5 = vpack.c.b16 %v4217_v46, %v4216_v35  ;;  %v4056_v46 = vpack.c.b16 %v4033_v45, %v4032_v12  ;;  %v3189_v35 = vpack.c.bf16 %v3157_v42, %v3157_v42  ;;  %v3286_v12 = vld [vmem:[#allocation3 + $0x12a] sm:$0xff]  ;;  %v3232_v42 = vpack.c.bf16 %v3200_v61, %v3200_v61 }
 0x360   : > { %v3318_v22 = vpack.c.bf16 %v3286_v12, %v3286_v12 }
 0x361   : > { %4262 = vrot.lane.b32.xlu0 %v7715_v53, %s6193_s8  ;;  %4074 = vrot.lane.b32.xlu2 %v4053_v48, %s6193_s8  ;;  %v3281_v48 = vld [vmem:[#allocation3 + $0xf2] sm:$0xff]  ;;  %v3846_v32 = vunpack.c.l.b16 %v3189_v35 }
 0x362   : > { %3886 = vrot.lane.b32.xlu1 %v7670_v11, %s6193_s8  ;;  %v7722_v8 = vpop.f32.mrf.mxu1  ;;  %v6141_v11 = vld [vmem:[%s8091_s3 + $0x100] sm:$0xff]  ;;  %v3313_v7 = vpack.c.bf16 %v3281_v48, %v3281_v48  ;;  %v3443_v48 = vpack.c.bf16 %v3411_v60, %v3411_v60 }
 0x363   : > { %v3701_v41 = vpop.permute.xlu1 %3700  ;;  %5327 = vmatpush.bf16.msrb.mxu1 %v6141_v11  ;;  %v4035_v11 = vunpack.c.l.b16 %v3314_v59  ;;  %v3199_v59 = vld [vmem:[#allocation3 + $0x19] sm:$0xff] }
 0x364   : > { %v4410_v50 = vsel %vm282_vm3, %v3594_v37, %v3701_v41  ;;  %v4246_v41 = vpack.c.b16 %v4221_v19, %v4220_v21  ;;  %v4034_v54 = vunpack.c.l.b16 %v3313_v7  ;;  %v3285_v19 = vld [vmem:[#allocation3 + $0x122] sm:$0xff]  ;;  %v3194_v7 = vpack.c.bf16 %v3162_v1, %v3162_v1 }
 0x365   : > { %5022 = vmatmul.bf16.gmra.mxu1 %v4410_v50  ;;  %v3190_v50 = vpack.c.bf16 %v3158_v33, %v3158_v33  ;;  %v3317_v33 = vpack.c.bf16 %v3285_v19, %v3285_v19  ;;  %v3231_v30 = vpack.c.bf16 %v3199_v59, %v3199_v59  ;;  %v3166_v59 = vld [vmem:[#allocation3 + $0x188] sm:$0xff] }
 0x366   : > { %v4057_v57 = vpack.c.b16 %v4035_v11, %v4034_v54  ;;  %v4039_v11 = vunpack.c.l.b16 %v3318_v22  ;;  %v3851_v13 = vunpack.c.l.b16 %v3194_v7  ;;  %v3290_v7 = vld [vmem:[#allocation3 + $0x15a] sm:$0xff] }
 0x367   : > { %v4038_v54 = vunpack.c.l.b16 %v3317_v33  ;;  %v3936_v38 = vunpack.c.l.b16 %v3231_v30 }
 0x369   : > { %4264 = vrot.lane.b32.xlu0 %v7731_v5, %s6193_s8  ;;  %4076 = vrot.lane.b32.xlu2 %v4054_v52, %s6193_s8  ;;  %v3847_v52 = vunpack.c.l.b16 %v3190_v50  ;;  %v4227_v50 = vunpack.c.l.b16 %v3443_v48 }
 0x36a   : > { %3888 = vrot.lane.b32.xlu1 %v7696_v4, %s6193_s8  ;;  %v7738_v14 = vpop.f32.mrf.mxu1  ;;  %v3703_v4 = vpop.permute.xlu2 %3702 }
 0x36b   : > { %v4414_v44 = vsel %vm282_vm3, %v3595_v23, %v3703_v4  ;;  %v3867_v26 = vpack.c.b16 %v3847_v52, %v3846_v32  ;;  %v6133_v4 = vld [vmem:[%s8091_s3 + $0xc0] sm:$0xff] }
 0x36c   : > { %5238 = vmatpush.bf16.msrb.mxu0 %v6133_v4  ;;  %v3413_v52 = vld [vmem:[#allocation3 + $0x129] sm:$0xff]  ;;  %v3104_v4 = vpack.c.bf16 %v3072_v18, %v3072_v18 }
 0x36d   : > { %v3164_v32 = vld [vmem:[#allocation3 + $0x170] sm:$0xff] }
 0x36e   : > { %v3745_v22 = vunpack.c.l.b16 %v3104_v4 }
 0x371   : > { %4266 = vrot.lane.b32.xlu0 %v4245_v43, %s6193_s8  ;;  %4078 = vrot.lane.b32.xlu2 %v4055_v9, %s6193_s8  ;;  %v3440_v43 = vpack.c.bf16 %v3408_v25, %v3408_v25  ;;  %v3937_v25 = vunpack.c.l.b16 %v3232_v42 }
 0x372   : > { %3890 = vrot.lane.b32.xlu1 %v3594_v37, %s6193_s8  ;;  %v7743_v40 = vpop.f32.mrf.mxu1  ;;  %v3439_v37 = vpack.c.bf16 %v3407_v10, %v3407_v10  ;;  %v3410_v10 = vld [vmem:[#allocation3 + $0x109] sm:$0xff] }
 0x373   : > { %v4224_v45 = vunpack.c.l.b16 %v3440_v43  ;;  %v3319_v43 = vpack.c.bf16 %v3287_v63, %v3287_v63 }
 0x374   : > { %v4223_v20 = vunpack.c.l.b16 %v3439_v37  ;;  %v3161_v37 = vld [vmem:[#allocation3 + $0x150] sm:$0xff] }
 0x375   : > { %5027 = vmatmul.bf16.gmra.mxu1 %v4414_v44  ;;  %v3848_v44 = vunpack.c.l.b16 %v3191_v24  ;;  %v4248_v21 = vpack.c.b16 %v4225_v17, %v4224_v45  ;;  %v3196_v17 = vpack.c.bf16 %v3164_v32, %v3164_v32 }
 0x376   : > { %v4247_v58 = vpack.c.b16 %v4223_v20, %v4222_v36  ;;  %v3193_v20 = vpack.c.bf16 %v3161_v37, %v3161_v37  ;;  %v3412_v36 = vld [vmem:[#allocation3 + $0x121] sm:$0xff] }
 0x377   : > { %v3444_v0 = vpack.c.bf16 %v3412_v36, %v3412_v36  ;;  %v3853_v61 = vunpack.c.l.b16 %v3196_v17  ;;  %v3415_v37 = vld [vmem:[#allocation3 + $0x141] sm:$0xff] }
 0x378   : > { %v3850_v51 = vunpack.c.l.b16 %v3193_v20  ;;  %v3414_v20 = vld [vmem:[#allocation3 + $0x139] sm:$0xff] }
 0x379   : > { %4268 = vrot.lane.b32.xlu0 %v4246_v41, %s6193_s8  ;;  %4080 = vrot.lane.b32.xlu2 %v4056_v46, %s6193_s8  ;;  %v3442_v46 = vpack.c.bf16 %v3410_v10, %v3410_v10  ;;  %v4228_v1 = vunpack.c.l.b16 %v3444_v0  ;;  %v3446_v63 = vpack.c.bf16 %v3414_v20, %v3414_v20 }
 0x37a   : > { %3892 = vrot.lane.b32.xlu1 %v3595_v23, %s6193_s8  ;;  %v7755_v2 = vpop.f32.mrf.mxu1  ;;  %v3849_v23 = vunpack.c.l.b16 %v3192_v29  ;;  %v4059_v29 = vpack.c.b16 %v4039_v11, %v4038_v54  ;;  %v7773_v28 = vpack.c.b16 %v3851_v13, %v3850_v51  ;;  %v3447_v11 = vpack.c.bf16 %v3415_v37, %v3415_v37  ;;  %v3417_v51 = vld [vmem:[#allocation3 + $0x159] sm:$0xff] }
 0x37b   : > { %v4226_v16 = vunpack.c.l.b16 %v3442_v46  ;;  %v3289_v46 = vld [vmem:[#allocation3 + $0x152] sm:$0xff] }
 0x37c   : > { %v3868_v41 = vpack.c.b16 %v3849_v23, %v3848_v44  ;;  %v3968_v23 = vpack.c.b16 %v3937_v25, %v3936_v38  ;;  %v4040_v44 = vunpack.c.l.b16 %v3319_v43  ;;  %v3321_v36 = vpack.c.bf16 %v3289_v46, %v3289_v46  ;;  %v3292_v43 = vld [vmem:[#allocation3 + $0x172] sm:$0xff] }
 0x37d   : > { %v4249_v62 = vpack.c.b16 %v4227_v50, %v4226_v16  ;;  %v3165_v16 = vld [vmem:[#allocation3 + $0x180] sm:$0xff]  ;;  %v3449_v38 = vpack.c.bf16 %v3417_v51, %v3417_v51 }
 0x37e   : > { %v3197_v32 = vpack.c.bf16 %v3165_v16, %v3165_v16  ;;  %v4042_v18 = vunpack.c.l.b16 %v3321_v36  ;;  %v3418_v36 = vld [vmem:[#allocation3 + $0x169] sm:$0xff] }
 0x380   : > { %v3854_v17 = vunpack.c.l.b16 %v3197_v32 }
 0x381   : > { %4270 = vrot.lane.b32.xlu0 %v4247_v58, %s6193_s8  ;;  %4082 = vrot.lane.b32.xlu2 %v4057_v57, %s6193_s8  ;;  %v3288_v58 = vld [vmem:[#allocation3 + $0x142] sm:$0xff] }
 0x382   : > { %3894 = vrot.lane.b32.xlu1 %v3867_v26, %s6193_s8  ;;  %v7760_v31 = vpop.f32.mrf.mxu1  ;;  %v3071_v57 = vld [vmem:[#allocation3 + $0x2] sm:$0xff]  ;;  %v3320_v24 = vpack.c.bf16 %v3288_v58, %v3288_v58 }
 0x383   : > { %v3705_v9 = vpop.permute.xlu0 %3704  ;;  %v3103_v60 = vpack.c.bf16 %v3071_v57, %v3071_v57  ;;  %v4231_v57 = vunpack.c.l.b16 %v3447_v11 }
 0x384   : > { %v4418_v34 = vsel %vm282_vm3, %v3867_v26, %v3705_v9  ;;  %v3445_v26 = vpack.c.bf16 %v3413_v52, %v3413_v52  ;;  %v3163_v9 = vld [vmem:[#allocation3 + $0x168] sm:$0xff]  ;;  %v4041_v48 = vunpack.c.l.b16 %v3320_v24  ;;  %v3322_v52 = vpack.c.bf16 %v3290_v7, %v3290_v7 }
 0x385   : > { %5032 = vmatmul.bf16.gmra.mxu1 %v4418_v34  ;;  %v3195_v12 = vpack.c.bf16 %v3163_v9, %v3163_v9  ;;  %v3744_v33 = vunpack.c.l.b16 %v3103_v60  ;;  %v4230_v24 = vunpack.c.l.b16 %v3446_v63  ;;  %v3416_v9 = vld [vmem:[#allocation3 + $0x151] sm:$0xff] }
 0x386   : > { %v4229_v19 = vunpack.c.l.b16 %v3445_v26  ;;  %v4060_v54 = vpack.c.b16 %v4041_v48, %v4040_v44 }
 0x387   : > { %v3852_v50 = vunpack.c.l.b16 %v3195_v12  ;;  %v3776_v30 = vpack.c.b16 %v3745_v22, %v3744_v33  ;;  %v4251_v60 = vpack.c.b16 %v4231_v57, %v4230_v24  ;;  %v3073_v12 = vld [vmem:[#allocation3 + $0x1a] sm:$0xff] }
 0x388   : > { %v4250_v42 = vpack.c.b16 %v4229_v19, %v4228_v1  ;;  %v3324_v19 = vpack.c.bf16 %v3292_v43, %v3292_v43  ;;  %v3448_v1 = vpack.c.bf16 %v3416_v9, %v3416_v9  ;;  %v3329_v24 = vld [vmem:[#allocation3 + $0x38] sm:$0xff] }
 0x389   : > { %4272 = vrot.lane.b32.xlu0 %v4248_v21, %s6193_s8  ;;  %4084 = vrot.lane.b32.xlu2 %v4058_v6, %s6193_s8  ;;  %v7783_v13 = vpack.c.b16 %v3853_v61, %v3852_v50  ;;  %v4233_v61 = vunpack.c.l.b16 %v3449_v38  ;;  %v3294_v50 = vld [vmem:[#allocation3 + $0x18a] sm:$0xff]  ;;  %v3075_v9 = vld [vmem:[#allocation3 + $0x32] sm:$0xff] }
 0x38a   : > { %3896 = vrot.lane.b32.xlu1 %v3868_v41, %s6193_s8  ;;  %v7769_v3 = vpop.f32.mrf.mxu1  ;;  %v4045_v22 = vunpack.c.l.b16 %v3324_v19  ;;  %v4232_v7 = vunpack.c.l.b16 %v3448_v1  ;;  %v3361_v19 = vpack.c.bf16 %v3329_v24, %v3329_v24 }
 0x38b   : > { %v7771_v35 = vpop.permute.xlu2 %3708 }
 0x38c   : > { %v4426_v37 = vsel %vm282_vm3, %v7773_v28, %v7771_v35  ;;  %v4252_v20 = vpack.c.b16 %v4233_v61, %v4232_v7 }
 0x391   : > { %4274 = vrot.lane.b32.xlu0 %v4249_v62, %s6193_s8  ;;  %4086 = vrot.lane.b32.xlu2 %v4059_v29, %s6193_s8  ;;  %v4043_v62 = vunpack.c.l.b16 %v3322_v52  ;;  %v3291_v29 = vld [vmem:[#allocation3 + $0x16a] sm:$0xff] }
 0x392   : > { %3898 = vrot.lane.b32.xlu1 %v7773_v28, %s6193_s8  ;;  %v7779_v34 = vpop.f32.mrf.mxu1 }
 0x393   : > { %v4065_v45 = vpop.permute.xlu2 %4064  ;;  %v3707_v10 = vpop.permute.xlu1 %3706  ;;  %v4061_v4 = vpack.c.b16 %v4043_v62, %v4042_v18  ;;  %v3421_v62 = vld [vmem:[#allocation3 + $0x189] sm:$0xff] }
 0x394   : > { %v4498_v21 = vsel %vm282_vm3, %v3968_v23, %v4065_v45  ;;  %v4422_v6 = vsel %vm282_vm3, %v3868_v41, %v3707_v10  ;;  %v3198_v41 = vpack.c.bf16 %v3166_v59, %v3166_v59  ;;  %v3323_v23 = vpack.c.bf16 %v3291_v29, %v3291_v29  ;;  %v3074_v45 = vld [vmem:[#allocation3 + $0x22] sm:$0xff]  ;;  %v3419_v59 = vld [vmem:[#allocation3 + $0x171] sm:$0xff] }
 0x395   : > { %5037 = vmatmul.bf16.gmra.mxu1 %v4422_v6  ;;  %5150 = vmatmul.bf16.vlgmr.msrb.gmra.mxu3 %v4498_v21  ;;  %v3105_v21 = vpack.c.bf16 %v3073_v12, %v3073_v12  ;;  %v3106_v6 = vpack.c.bf16 %v3074_v45, %v3074_v45  ;;  %v3451_v16 = vpack.c.bf16 %v3419_v59, %v3419_v59 }
 0x396   : > { %v3855_v26 = vunpack.c.l.b16 %v3198_v41  ;;  %v4044_v33 = vunpack.c.l.b16 %v3323_v23  ;;  %v3326_v41 = vpack.c.bf16 %v3294_v50, %v3294_v50  ;;  %v3453_v43 = vpack.c.bf16 %v3421_v62, %v3421_v62 }
 0x397   : > { %v3747_v11 = vunpack.c.l.b16 %v3106_v6  ;;  %v4235_v32 = vunpack.c.l.b16 %v3451_v16  ;;  %v3107_v12 = vpack.c.bf16 %v3075_v9, %v3075_v9 }
 0x398   : > { %v3871_v10 = vpack.c.b16 %v3855_v26, %v3854_v17  ;;  %v4062_v52 = vpack.c.b16 %v4045_v22, %v4044_v33  ;;  %v4047_v57 = vunpack.c.l.b16 %v3326_v41  ;;  %v3076_v17 = vld [vmem:[#allocation3 + $0x3a] sm:$0xff]  ;;  %v4237_v1 = vunpack.c.l.b16 %v3453_v43 }
 0x399   : > { %4276 = vrot.lane.b32.xlu0 %v4250_v42, %s6193_s8  ;;  %4088 = vrot.lane.b32.xlu2 %v4060_v54, %s6193_s8  ;;  %v3293_v42 = vld [vmem:[#allocation3 + $0x182] sm:$0xff]  ;;  %v3746_v54 = vunpack.c.l.b16 %v3105_v21  ;;  %v3108_v45 = vpack.c.bf16 %v3076_v17, %v3076_v17  ;;  %v4129_v33 = vunpack.c.l.b16 %v3361_v19  ;;  %v3748_v22 = vunpack.c.l.b16 %v3107_v12 }
 0x39a   : > { %3900 = vrot.lane.b32.xlu1 %v7783_v13, %s6193_s8  ;;  %v7789_v58 = vpop.f32.mrf.mxu1  ;;  %v3332_v19 = vld [vmem:[#allocation3 + $0x60] sm:$0xff] }
 0x39b   : > { %v3873_v25 = vpop.permute.xlu1 %3872  ;;  %v4067_v44 = vpop.permute.xlu2 %4066  ;;  %v3777_v28 = vpack.c.b16 %v3747_v11, %v3746_v54  ;;  %v3077_v11 = vld [vmem:[#allocation3 + $0x4a] sm:$0xff] }
 0x39c   : > { %v4434_v0 = vsel %vm282_vm3, %v3776_v30, %v3873_v25  ;;  %v4502_v46 = vsel %vm282_vm3, %v7678_v15, %v4067_v44  ;;  %v3325_v30 = vpack.c.bf16 %v3293_v42, %v3293_v42  ;;  %v3450_v15 = vpack.c.bf16 %v3418_v36, %v3418_v36  ;;  %v3078_v36 = vld [vmem:[#allocation3 + $0x52] sm:$0xff] }
 0x39d   : > { %5061 = vmatmul.bf16.vlgmr.msrb.gmra.mxu2 %v4434_v0  ;;  %v3420_v0 = vld [vmem:[#allocation3 + $0x181] sm:$0xff] }
 0x39e   : > { %v4046_v25 = vunpack.c.l.b16 %v3325_v30  ;;  %v4234_v51 = vunpack.c.l.b16 %v3450_v15  ;;  %v3330_v30 = vld [vmem:[#allocation3 + $0x48] sm:$0xff]  ;;  %v3110_v15 = vpack.c.bf16 %v3078_v36, %v3078_v36  ;;  %v3334_v36 = vld [vmem:[#allocation3 + $0x78] sm:$0xff] }
 0x3a0   : > { %v4253_v26 = vpack.c.b16 %v4235_v32, %v4234_v51  ;;  %v4063_v29 = vpack.c.b16 %v4047_v57, %v4046_v25  ;;  %v3362_v25 = vpack.c.bf16 %v3330_v30, %v3330_v30 }
 0x3a1   : > { %4278 = vrot.lane.b32.xlu0 %v4251_v60, %s6193_s8  ;;  %4090 = vrot.lane.b32.xlu2 %v4061_v4, %s6193_s8  ;;  %v3452_v60 = vpack.c.bf16 %v3420_v0, %v3420_v0  ;;  %v3328_v4 = vld [vmem:[#allocation3 + $0x30] sm:$0xff] }
 0x3a2   : > { %3902 = vrot.lane.b32.xlu1 %v3871_v10, %s6193_s8  ;;  %v7795_v48 = vpop.f32.mrf.mxu1  ;;  %v3360_v21 = vpack.c.bf16 %v3328_v4, %v3328_v4  ;;  %v4130_v51 = vunpack.c.l.b16 %v3362_v25 }
 0x3a3   : > { %v3875_v63 = vpop.permute.xlu1 %3874  ;;  %v4069_v38 = vpop.permute.xlu2 %4068  ;;  %v4236_v6 = vunpack.c.l.b16 %v3452_v60  ;;  %v3333_v60 = vld [vmem:[#allocation3 + $0x68] sm:$0xff] }
 0x3a4   : > { %v4438_v18 = vsel %vm282_vm3, %v3777_v28, %v3875_v63  ;;  %v4506_v61 = vsel %vm282_vm3, %v7687_v27, %v4069_v38  ;;  %v4128_v7 = vunpack.c.l.b16 %v3360_v21  ;;  %v3109_v63 = vpack.c.bf16 %v3077_v11, %v3077_v11  ;;  %v3080_v38 = vld [vmem:[#allocation3 + $0x6a] sm:$0xff] }
 0x3a5   : > { %5042 = vmatmul.bf16.gmra.mxu1 %v4426_v37  ;;  %5155 = vmatmul.bf16.gmra.mxu3 %v4502_v46  ;;  %v3749_v37 = vunpack.c.l.b16 %v3108_v45  ;;  %v4254_v46 = vpack.c.b16 %v4237_v1, %v4236_v6  ;;  %v3365_v1 = vpack.c.bf16 %v3333_v60, %v3333_v60 }
 0x3a6   : > { %v4160_v50 = vpack.c.b16 %v4129_v33, %v4128_v7  ;;  %v3750_v57 = vunpack.c.l.b16 %v3109_v63 }
 0x3a7   : > { %v4133_v33 = vunpack.c.l.b16 %v3365_v1 }
 0x3a9   : > { %4280 = vrot.lane.b32.xlu0 %v4252_v20, %s6193_s8  ;;  %4092 = vrot.lane.b32.xlu2 %v4062_v52, %s6193_s8  ;;  %v3778_v20 = vpack.c.b16 %v3749_v37, %v3748_v22  ;;  %v3331_v52 = vld [vmem:[#allocation3 + $0x50] sm:$0xff] }
 0x3aa   : > { %v7804_v35 = vpop.f32.mrf.mxu1  ;;  %v3363_v28 = vpack.c.bf16 %v3331_v52, %v3331_v52 }
 0x3ab   : > { %v3877_v59 = vpop.permute.xlu1 %3876  ;;  %v4071_v16 = vpop.permute.xlu2 %4070 }
 0x3ac   : > { %v4442_v27 = vsel %vm282_vm3, %v3778_v20, %v3877_v59  ;;  %v4510_v32 = vsel %vm282_vm3, %v7703_v55, %v4071_v16  ;;  %v4131_v62 = vunpack.c.l.b16 %v3363_v28  ;;  %v3079_v55 = vld [vmem:[#allocation3 + $0x62] sm:$0xff]  ;;  %v3366_v28 = vpack.c.bf16 %v3334_v36, %v3334_v36 }
 0x3ad   : > { %5066 = vmatmul.bf16.gmra.mxu2 %v4438_v18  ;;  %v3751_v18 = vunpack.c.l.b16 %v3110_v15  ;;  %v3111_v45 = vpack.c.bf16 %v3079_v55, %v3079_v55 }
 0x3ae   : > { %v4161_v24 = vpack.c.b16 %v4131_v62, %v4130_v51  ;;  %v4134_v62 = vunpack.c.l.b16 %v3366_v28 }
 0x3af   : > { %v3779_v43 = vpack.c.b16 %v3751_v18, %v3750_v57  ;;  %v3752_v21 = vunpack.c.l.b16 %v3111_v45  ;;  %v3212_v18 = vld [vmem:[#allocation3 + $0xb1] sm:$0xff] }
 0x3b0   : > { %v3337_v45 = vld [vmem:[#allocation3 + $0x98] sm:$0xff] }
 0x3b1   : > { %4282 = vrot.lane.b32.xlu0 %v4253_v26, %s6193_s8  ;;  %4094 = vrot.lane.b32.xlu2 %v4063_v29, %s6193_s8 }
 0x3b2   : > { %v7809_v23 = vpop.f32.mrf.mxu1 }
 0x3b3   : > { %v3711_v10 = vpop.permute.xlu0 %3710  ;;  %v4073_v4 = vpop.permute.xlu2 %4072 }
 0x3b4   : > { %v4430_v44 = vsel %vm282_vm3, %v7783_v13, %v3711_v10  ;;  %v3879_v0 = vpop.permute.xlu1 %3878  ;;  %v3112_v10 = vpack.c.bf16 %v3080_v38, %v3080_v38 }
 0x3b5   : > { %5047 = vmatmul.bf16.gmra.mxu1 %v4430_v44  ;;  %5160 = vmatmul.bf16.gmra.mxu3 %v4506_v61  ;;  %v4446_v9 = vsel %vm282_vm3, %v3779_v43, %v3879_v0  ;;  %v4514_v44 = vsel %vm282_vm3, %v7715_v53, %v4073_v4  ;;  %v3364_v61 = vpack.c.bf16 %v3332_v19, %v3332_v19  ;;  %v3081_v53 = vld [vmem:[#allocation3 + $0x7a] sm:$0xff]  ;;  %v3083_v4 = vld [vmem:[#allocation3 + $0x92] sm:$0xff] }
 0x3b6   : > { %v3753_v6 = vunpack.c.l.b16 %v3112_v10  ;;  %v3113_v16 = vpack.c.bf16 %v3081_v53, %v3081_v53  ;;  %v3084_v19 = vld [vmem:[#allocation3 + $0x9a] sm:$0xff] }
 0x3b7   : > { %v4132_v22 = vunpack.c.l.b16 %v3364_v61 }
 0x3b8   : > { %v3780_v59 = vpack.c.b16 %v3753_v6, %v3752_v21  ;;  %v3115_v6 = vpack.c.bf16 %v3083_v4, %v3083_v4 }
 0x3b9   : > { %4284 = vrot.lane.b32.xlu0 %v4254_v46, %s6193_s8 }
 0x3ba   : > { %v7816_v42 = vpop.f32.mrf.mxu1 }
 0x3bb   : > { %v4257_v13 = vpop.permute.xlu0 %4256  ;;  %v4075_v11 = vpop.permute.xlu2 %4074 }
 0x3bc   : > { %v4562_v54 = vsel %vm282_vm3, %v4160_v50, %v4257_v13  ;;  %v3881_v37 = vpop.permute.xlu1 %3880  ;;  %v4162_v50 = vpack.c.b16 %v4133_v33, %v4132_v22  ;;  %v4518_v15 = vsel %vm282_vm3, %v7731_v5, %v4075_v11  ;;  %v3116_v33 = vpack.c.bf16 %v3084_v19, %v3084_v19  ;;  %v3213_v11 = vld [vmem:[#allocation3 + $0xc1] sm:$0xff] }
 0x3bd   : > { %5071 = vmatmul.bf16.gmra.mxu2 %v4442_v27  ;;  %5239 = vmatmul.bf16.vlgmr.msrb.gmra.mxu0 %v4562_v54  ;;  %v3082_v54 = vld [vmem:[#allocation3 + $0x82] sm:$0xff]  ;;  %v3369_v22 = vpack.c.bf16 %v3337_v45, %v3337_v45 }
 0x3be   : > { %v3335_v27 = vld [vmem:[#allocation3 + $0x80] sm:$0xff]  ;;  %v3114_v30 = vpack.c.bf16 %v3082_v54, %v3082_v54 }
 0x3bf   : > { %v3367_v63 = vpack.c.bf16 %v3335_v27, %v3335_v27 }
 0x3c0   : > { %v3755_v25 = vunpack.c.l.b16 %v3114_v30 }
 0x3c1   : > { %v4135_v57 = vunpack.c.l.b16 %v3367_v63 }
 0x3c2   : > { %v7820_v41 = vpop.f32.mrf.mxu1 }
 0x3c3   : > { %v4259_v26 = vpop.permute.xlu0 %4258  ;;  %v4077_v1 = vpop.permute.xlu2 %4076 }
 0x3c4   : > { %v4566_v17 = vsel %vm282_vm3, %v4161_v24, %v4259_v26  ;;  %v3883_v51 = vpop.permute.xlu1 %3882  ;;  %v3211_v26 = vld [vmem:[#allocation3 + $0xa9] sm:$0xff] }
 0x3c5   : > { %5165 = vmatmul.bf16.gmra.mxu3 %v4510_v32  ;;  %6089 = vmatmul.msk.bf16.vlgmr.msrb.gmra.mxu1 %vm282_vm3, %v3778_v20  ;;  %v4450_v20 = vsel %vm282_vm3, %v3780_v59, %v3881_v37  ;;  %v3754_v32 = vunpack.c.l.b16 %v3113_v16  ;;  %v3243_v38 = vpack.c.bf16 %v3211_v26, %v3211_v26  ;;  %v3338_v26 = vld [vmem:[#allocation3 + $0xa8] sm:$0xff] }
 0x3c7   : > { %v3781_v24 = vpack.c.b16 %v3755_v25, %v3754_v32  ;;  %v3948_v10 = vunpack.c.l.b16 %v3243_v38  ;;  %v3245_v32 = vpack.c.bf16 %v3213_v11, %v3213_v11 }
 0x3c9   : > { %v4454_v55 = vsel %vm282_vm3, %v3781_v24, %v3883_v51  ;;  %v3950_v51 = vunpack.c.l.b16 %v3245_v32 }
 0x3ca   : > { %v7825_v29 = vpop.f32.mrf.mxu1 }
 0x3cb   : > { %v4261_v46 = vpop.permute.xlu0 %4260 }
 0x3cc   : > { %v4570_v13 = vsel %vm282_vm3, %v4162_v50, %v4261_v46  ;;  %v3757_v50 = vunpack.c.l.b16 %v3116_v33  ;;  %v3885_v54 = vpop.permute.xlu1 %3884 }
 0x3cd   : > { %5076 = vmatmul.bf16.gmra.mxu2 %v4446_v9  ;;  %5244 = vmatmul.bf16.gmra.mxu0 %v4566_v17  ;;  %v4163_v9 = vpack.c.b16 %v4135_v57, %v4134_v62  ;;  %v3244_v17 = vpack.c.bf16 %v3212_v18, %v3212_v18  ;;  %v3085_v57 = vld [vmem:[#allocation3 + $0xaa] sm:$0xff]  ;;  %v3086_v18 = vld [vmem:[#allocation3 + $0xb2] sm:$0xff] }
 0x3ce   : > { %v3339_v62 = vld [vmem:[#allocation3 + $0xb0] sm:$0xff] }
 0x3cf   : > { %v3949_v60 = vunpack.c.l.b16 %v3244_v17  ;;  %v3117_v17 = vpack.c.bf16 %v3085_v57, %v3085_v57 }
 0x3d1   : > { %v3974_v21 = vpack.c.b16 %v3949_v60, %v3948_v10  ;;  %v3370_v60 = vpack.c.bf16 %v3338_v26, %v3338_v26  ;;  %v3758_v4 = vunpack.c.l.b16 %v3117_v17  ;;  %v3216_v10 = vld [vmem:[#allocation3 + $0xe1] sm:$0xff]  ;;  %v3218_v26 = vld [vmem:[#allocation3 + $0xf9] sm:$0xff] }
 0x3d2   : > { %v7829_v12 = vpop.f32.mrf.mxu1 }
 0x3d3   : > { %v4263_v0 = vpop.permute.xlu0 %4262  ;;  %v4522_v37 = vsel %vm282_vm3, %v3974_v21, %v4077_v1  ;;  %v4138_v1 = vunpack.c.l.b16 %v3370_v60 }
 0x3d4   : > { %v4574_v5 = vsel %vm282_vm3, %v4163_v9, %v4263_v0  ;;  %v4079_v0 = vpop.permute.xlu2 %4078 }
 0x3d5   : > { %5170 = vmatmul.bf16.gmra.mxu3 %v4514_v44  ;;  %6090 = vmatmul.msk.bf16.gmra.mxu1 %vm282_vm3, %v3779_v43  ;;  %v3336_v44 = vld [vmem:[#allocation3 + $0x90] sm:$0xff] }
 0x3d6   : > { %v3368_v46 = vpack.c.bf16 %v3336_v44, %v3336_v44  ;;  %v3887_v44 = vpop.permute.xlu1 %3886 }
 0x3d8   : > { %v4136_v53 = vunpack.c.l.b16 %v3368_v46  ;;  %v3248_v46 = vpack.c.bf16 %v3216_v10, %v3216_v10 }
 0x3da   : > { %v7834_v7 = vpop.f32.mrf.mxu1 }
 0x3db   : > { %v4265_v27 = vpop.permute.xlu0 %4264 }
 0x3dd   : > { %5081 = vmatmul.bf16.gmra.mxu2 %v4450_v20  ;;  %5249 = vmatmul.bf16.gmra.mxu0 %v4570_v13  ;;  %v4137_v20 = vunpack.c.l.b16 %v3369_v22  ;;  %v3214_v13 = vld [vmem:[#allocation3 + $0xc9] sm:$0xff] }
 0x3de   : > { %v3246_v63 = vpack.c.bf16 %v3214_v13, %v3214_v13  ;;  %v3953_v13 = vunpack.c.l.b16 %v3248_v46 }
 0x3df   : > { %v4164_v30 = vpack.c.b16 %v4137_v20, %v4136_v53  ;;  %v3087_v53 = vld [vmem:[#allocation3 + $0xc2] sm:$0xff] }
 0x3e0   : > { %v3951_v25 = vunpack.c.l.b16 %v3246_v63 }
 0x3e1   : > { %v4578_v28 = vsel %vm282_vm3, %v4164_v30, %v4265_v27  ;;  %v3341_v27 = vld [vmem:[#allocation3 + $0xc8] sm:$0xff]  ;;  %v3119_v30 = vpack.c.bf16 %v3087_v53, %v3087_v53 }
 0x3e2   : > { %v7838_v52 = vpop.f32.mrf.mxu1  ;;  %v3975_v9 = vpack.c.b16 %v3951_v25, %v3950_v51  ;;  %v3373_v25 = vpack.c.bf16 %v3341_v27, %v3341_v27  ;;  %v3090_v53 = vld [vmem:[#allocation3 + $0xe2] sm:$0xff] }
 0x3e3   : > { %v4267_v21 = vpop.permute.xlu0 %4266 }
 0x3e4   : > { %v4526_v38 = vsel %vm282_vm3, %v3975_v9, %v4079_v0  ;;  %v4141_v0 = vunpack.c.l.b16 %v3373_v25 }
 0x3e5   : > { %5175 = vmatmul.bf16.gmra.mxu3 %v4518_v15  ;;  %6091 = vmatmul.msk.bf16.gmra.mxu1 %vm282_vm3, %v3780_v59  ;;  %v3756_v59 = vunpack.c.l.b16 %v3115_v6  ;;  %v3215_v6 = vld [vmem:[#allocation3 + $0xd9] sm:$0xff] }
 0x3e6   : > { %v3247_v20 = vpack.c.bf16 %v3215_v6, %v3215_v6 }
 0x3e7   : > { %v3782_v16 = vpack.c.b16 %v3757_v50, %v3756_v59 }
 0x3e8   : > { %v3952_v11 = vunpack.c.l.b16 %v3247_v20 }
 0x3e9   : > { %v4458_v15 = vsel %vm282_vm3, %v3782_v16, %v3885_v54  ;;  %v3088_v54 = vld [vmem:[#allocation3 + $0xca] sm:$0xff] }
 0x3ea   : > { %v7843_v43 = vpop.f32.mrf.mxu1  ;;  %v3120_v63 = vpack.c.bf16 %v3088_v54, %v3088_v54  ;;  %v3976_v32 = vpack.c.b16 %v3953_v13, %v3952_v11  ;;  %v3089_v13 = vld [vmem:[#allocation3 + $0xda] sm:$0xff] }
 0x3eb   : > { %v3343_v54 = vld [vmem:[#allocation3 + $0xe0] sm:$0xff]  ;;  %v3121_v25 = vpack.c.bf16 %v3089_v13, %v3089_v13  ;;  %v3345_v13 = vld [vmem:[#allocation3 + $0xf8] sm:$0xff] }
 0x3ec   : > { %v3761_v51 = vunpack.c.l.b16 %v3120_v63  ;;  %v3342_v63 = vld [vmem:[#allocation3 + $0xd8] sm:$0xff] }
 0x3ed   : > { %5086 = vmatmul.bf16.gmra.mxu2 %v4454_v55  ;;  %5254 = vmatmul.bf16.gmra.mxu0 %v4574_v5  ;;  %v3118_v55 = vpack.c.bf16 %v3086_v18, %v3086_v18  ;;  %v3371_v5 = vpack.c.bf16 %v3339_v62, %v3339_v62  ;;  %v3760_v62 = vunpack.c.l.b16 %v3119_v30 }
 0x3ef   : > { %v3759_v19 = vunpack.c.l.b16 %v3118_v55  ;;  %v4139_v45 = vunpack.c.l.b16 %v3371_v5  ;;  %v3217_v55 = vld [vmem:[#allocation3 + $0xf1] sm:$0xff]  ;;  %v3889_v5 = vpop.permute.xlu1 %3888  ;;  %v3784_v60 = vpack.c.b16 %v3761_v51, %v3760_v62  ;;  %v3374_v51 = vpack.c.bf16 %v3342_v63, %v3342_v63 }
 0x3f0   : > { %v3249_v6 = vpack.c.bf16 %v3217_v55, %v3217_v55  ;;  %v3220_v55 = vld [vmem:[#allocation3 + $0x111] sm:$0xff] }
 0x3f1   : > { %v3783_v22 = vpack.c.b16 %v3759_v19, %v3758_v4  ;;  %v3422_v4 = vld [vmem:[#allocation3 + $0x199] sm:$0xff]  ;;  %v3423_v19 = vld [vmem:[#allocation3 + $0x1a1] sm:$0xff]  ;;  %v3344_v63 = vld [vmem:[#allocation3 + $0xf0] sm:$0xff] }
 0x3f2   : > { %v7847_v61 = vpop.f32.mrf.mxu1 }
 0x3f3   : > { %v4462_v59 = vsel %vm282_vm3, %v3783_v22, %v3887_v44  ;;  %v3454_v44 = vpack.c.bf16 %v3422_v4, %v3422_v4  ;;  %v4142_v4 = vunpack.c.l.b16 %v3374_v51 }
 0x3f5   : > { %5180 = vmatmul.bf16.gmra.mxu3 %v4522_v37  ;;  %6092 = vmatmul.msk.bf16.gmra.mxu1 %vm282_vm3, %v3781_v24  ;;  %v4165_v37 = vpack.c.b16 %v4139_v45, %v4138_v1  ;;  %v3250_v1 = vpack.c.bf16 %v3218_v26, %v3218_v26  ;;  %v4238_v46 = vunpack.c.l.b16 %v3454_v44 }
 0x3f7   : > { %v4582_v50 = vsel %vm282_vm3, %v4165_v37, %v4267_v21  ;;  %v3455_v21 = vpack.c.bf16 %v3423_v19, %v3423_v19  ;;  %v3891_v19 = vpop.permute.xlu1 %3890 }
 0x3fa   : > { %v7851_v36 = vpop.f32.mrf.mxu1 }
 0x3fd   : > { %5091 = vmatmul.bf16.gmra.mxu2 %v4458_v15  ;;  %5259 = vmatmul.bf16.gmra.mxu0 %v4578_v28  ;;  %v3340_v15 = vld [vmem:[#allocation3 + $0xc0] sm:$0xff] }
 0x3fe   : > { %v3372_v18 = vpack.c.bf16 %v3340_v15, %v3340_v15 }
 0x400   : > { %v4140_v17 = vunpack.c.l.b16 %v3372_v18  ;;  %v3375_v18 = vpack.c.bf16 %v3343_v54, %v3343_v54 }
 0x402   : > { %v7855_v24 = vpop.f32.mrf.mxu1  ;;  %v4166_v10 = vpack.c.b16 %v4141_v0, %v4140_v17  ;;  %v3762_v0 = vunpack.c.l.b16 %v3121_v25  ;;  %v4143_v17 = vunpack.c.l.b16 %v3375_v18 }
 0x405   : > { %5185 = vmatmul.bf16.gmra.mxu3 %v4526_v38  ;;  %6093 = vmatmul.msk.bf16.gmra.mxu1 %vm282_vm3, %v3782_v16  ;;  %v4081_v16 = vpop.permute.xlu2 %4080  ;;  %v4269_v38 = vpop.permute.xlu0 %4268 }
 0x406   : > { %v4530_v57 = vsel %vm282_vm3, %v3976_v32, %v4081_v16  ;;  %v4586_v37 = vsel %vm282_vm3, %v4166_v10, %v4269_v38  ;;  %v3954_v16 = vunpack.c.l.b16 %v3249_v6  ;;  %v4167_v6 = vpack.c.b16 %v4143_v17, %v4142_v4 }
 0x40a   : > { %v7859_v33 = vpop.f32.mrf.mxu1 }
 0x40d   : > { %5096 = vmatmul.bf16.gmra.mxu2 %v4462_v59  ;;  %5264 = vmatmul.bf16.gmra.mxu0 %v4582_v50  ;;  %v4239_v59 = vunpack.c.l.b16 %v3455_v21  ;;  %v3955_v50 = vunpack.c.l.b16 %v3250_v1  ;;  %v4083_v30 = vpop.permute.xlu2 %4082  ;;  %v4271_v10 = vpop.permute.xlu0 %4270  ;;  %v3219_v1 = vld [vmem:[#allocation3 + $0x109] sm:$0xff] }
 0x40f   : > { %v4255_v20 = vpack.c.b16 %v4239_v59, %v4238_v46  ;;  %v3977_v32 = vpack.c.b16 %v3955_v50, %v3954_v16  ;;  %v3251_v46 = vpack.c.bf16 %v3219_v1, %v3219_v1  ;;  %v3091_v50 = vld [vmem:[#allocation3 + $0xf2] sm:$0xff] }
 0x411   : > { %4286 = vrot.lane.b32.xlu0 %v4255_v20, %s6193_s8  ;;  %v4534_v62 = vsel %vm282_vm3, %v3977_v32, %v4083_v30  ;;  %v3092_v20 = vld [vmem:[#allocation3 + $0xfa] sm:$0xff]  ;;  %v3956_v16 = vunpack.c.l.b16 %v3251_v46 }
 0x412   : > { %v7863_v28 = vpop.f32.mrf.mxu1  ;;  %v3124_v18 = vpack.c.bf16 %v3092_v20, %v3092_v20  ;;  %v3221_v46 = vld [vmem:[#allocation3 + $0x121] sm:$0xff] }
 0x415   : > { %5190 = vmatmul.bf16.gmra.mxu3 %v4530_v57  ;;  %6094 = vmatmul.msk.bf16.gmra.mxu1 %vm282_vm3, %v3783_v22  ;;  %v4466_v22 = vsel %vm282_vm3, %v3784_v60, %v3889_v5  ;;  %v3122_v57 = vpack.c.bf16 %v3090_v53, %v3090_v53  ;;  %v4085_v30 = vpop.permute.xlu2 %4084 }
 0x417   : > { %v3763_v26 = vunpack.c.l.b16 %v3122_v57  ;;  %v3123_v57 = vpack.c.bf16 %v3091_v50, %v3091_v50 }
 0x418   : > { %v7867_v9 = vpop.f32.mrf.mxu3 }
 0x419   : > { %v3785_v21 = vpack.c.b16 %v3763_v26, %v3762_v0  ;;  %v3376_v0 = vpack.c.bf16 %v3344_v63, %v3344_v63  ;;  %v7900_v26 = vld [vmem:[%s8092_s4] ss:$0 sm:$0xff]  ;;  %v3764_v17 = vunpack.c.l.b16 %v3123_v57 }
 0x41a   : > { %v7869_v45 = vpop.f32.mrf.mxu1 }
 0x41d   : > { %5101 = vmatmul.bf16.gmra.mxu2 %v4466_v22  ;;  %5269 = vmatmul.bf16.gmra.mxu0 %v4586_v37  ;;  %v3252_v22 = vpack.c.bf16 %v3220_v55, %v3220_v55  ;;  %v4470_v37 = vsel %vm282_vm3, %v3785_v21, %v3891_v19  ;;  %v3765_v55 = vunpack.c.l.b16 %v3124_v18  ;;  %v3222_v19 = vld [vmem:[#allocation3 + $0x129] sm:$0xff] }
 0x41e   : > { %v3093_v18 = vld [vmem:[#allocation3 + $0x10a] sm:$0xff] }
 0x41f   : > { %v3957_v59 = vunpack.c.l.b16 %v3252_v22  ;;  %v4974_v22 = vadd.f32 %v7900_v26, %v7664_v49  ;;  %v3786_v20 = vpack.c.b16 %v3765_v55, %v3764_v17 }
 0x420   : > { %v7873_v27 = vpop.f32.mrf.mxu2  ;;  %v7875_v11 = vpop.f32.mrf.mxu3 }
 0x421   : > { %v3978_v25 = vpack.c.b16 %v3957_v59, %v3956_v16  ;;  %v5063_v16 = vadd.f32 %v7873_v27, %v4974_v22  ;;  %v4976_v27 = vadd.f32 %v7900_v26, %v7683_v39 }
 0x422   : > { %v7878_v15 = vpop.f32.mrf.mxu1 }
 0x423   : > { %v4538_v51 = vsel %vm282_vm3, %v3978_v25, %v4085_v30  ;;  %v3253_v25 = vpack.c.bf16 %v3221_v46, %v3221_v46  ;;  %v5152_v49 = vadd.f32 %v7867_v9, %v5063_v16  ;;  %v3125_v46 = vpack.c.bf16 %v3093_v18, %v3093_v18 }
 0x425   : > { %5195 = vmatmul.bf16.gmra.mxu3 %v4534_v62  ;;  %6095 = vmatmul.msk.bf16.gmra.mxu1 %vm282_vm3, %v3784_v60  ;;  %v4590_v60 = vsel %vm282_vm3, %v4167_v6, %v4271_v10  ;;  %v3377_v62 = vpack.c.bf16 %v3345_v13, %v3345_v13  ;;  %v4144_v6 = vunpack.c.l.b16 %v3376_v0  ;;  %v3254_v13 = vpack.c.bf16 %v3222_v19, %v3222_v19 }
 0x426   : > { %v3958_v55 = vunpack.c.l.b16 %v3253_v25  ;;  %v3766_v39 = vunpack.c.l.b16 %v3125_v46 }
 0x427   : > { %v4145_v4 = vunpack.c.l.b16 %v3377_v62  ;;  %v3959_v57 = vunpack.c.l.b16 %v3254_v13  ;;  %v3094_v62 = vld [vmem:[#allocation3 + $0x112] sm:$0xff] }
 0x428   : > { %v7882_v5 = vpop.f32.mrf.mxu2  ;;  %v7884_v38 = vpop.f32.mrf.mxu3 }
 0x429   : > { %v5065_v13 = vadd.f32 %v7882_v5, %v4976_v27 }
 0x42a   : > { %v7886_v44 = vpop.f32.mrf.mxu1 }
 0x42d   : > { %5106 = vmatmul.bf16.gmra.mxu2 %v4470_v37  ;;  %5274 = vmatmul.bf16.gmra.mxu0 %v4590_v60  ;;  %v3893_v37 = vpop.permute.xlu1 %3892  ;;  %v4273_v60 = vpop.permute.xlu0 %4272 }
 0x42e   : > { %v4474_v30 = vsel %vm282_vm3, %v3786_v20, %v3893_v37 }
 0x430   : > { %v7890_v53 = vpop.f32.mrf.mxu2  ;;  %v7892_v54 = vpop.f32.mrf.mxu3 }
 0x432   : > { %v7894_v32 = vpop.f32.mrf.mxu1 }
 0x435   : > { %5200 = vmatmul.bf16.gmra.mxu3 %v4538_v51  ;;  %6096 = vmatmul.msk.bf16.gmra.mxu1 %vm282_vm3, %v3785_v21  ;;  %v4168_v21 = vpack.c.b16 %v4145_v4, %v4144_v6  ;;  %v3347_v51 = vld [vmem:[#allocation3 + $0x110] sm:$0xff]  ;;  %v4087_v4 = vpop.permute.xlu2 %4086  ;;  %v3346_v6 = vld [vmem:[#allocation3 + $0x108] sm:$0xff]  ;;  %v4275_v27 = vpop.permute.xlu0 %4274 }
 0x436   : > { %v3379_v9 = vpack.c.bf16 %v3347_v51, %v3347_v51  ;;  %v4979_v51 = vadd.f32 %v7900_v26, %v7694_v56 }
 0x437   : > { %v4594_v63 = vsel %vm282_vm3, %v4168_v21, %v4273_v60  ;;  %v3979_v60 = vpack.c.b16 %v3959_v57, %v3958_v55  ;;  %v3126_v21 = vpack.c.bf16 %v3094_v62, %v3094_v62  ;;  %v3224_v57 = vld [vmem:[#allocation3 + $0x141] sm:$0xff]  ;;  %v3895_v55 = vpop.permute.xlu1 %3894 }
 0x438   : > { %v7903_v10 = vpop.f32.mrf.mxu2  ;;  %v7905_v1 = vpop.f32.mrf.mxu3  ;;  %v3256_v46 = vpack.c.bf16 %v3224_v57, %v3224_v57 }
 0x439   : > { %v3767_v25 = vunpack.c.l.b16 %v3126_v21 }
 0x43a   : > { %v7909_v59 = vpop.f32.mrf.mxu1  ;;  %v5240_v50 = vpop.f32.mrf.mxu0  ;;  %v3961_v56 = vunpack.c.l.b16 %v3256_v46 }
 0x43b   : > { %8197 = vst [vmem:[#allocation5_spill] sm:$0xff] %v7909_v59  ;;  %v5241_v19 = vadd.f32 %v5240_v50, %v5152_v49  ;;  %v4147_v50 = vunpack.c.l.b16 %v3379_v9  ;;  %v5154_v49 = vadd.f32 %v7875_v11, %v5065_v13  ;;  %v5068_v11 = vadd.f32 %v7890_v53, %v4979_v51  ;;  %v3348_v51 = vld [vmem:[#allocation3 + $0x120] sm:$0xff] }
 0x43d   : > { %5111 = vmatmul.bf16.gmra.mxu2 %v4474_v30  ;;  %5279 = vmatmul.bf16.gmra.mxu0 %v4594_v63  ;;  %v4542_v30 = vsel %vm282_vm3, %v3979_v60, %v4087_v4  ;;  %v3378_v63 = vpack.c.bf16 %v3346_v6, %v3346_v6  ;;  %v4089_v57 = vpop.permute.xlu2 %4088 }
 0x43f   : > { %v4146_v5 = vunpack.c.l.b16 %v3378_v63  ;;  %v3096_v63 = vld [vmem:[#allocation3 + $0x12a] sm:$0xff] }
 0x440   : > { %v7915_v0 = vpop.f32.mrf.mxu2  ;;  %v7917_v17 = vpop.f32.mrf.mxu3 }
 0x441   : > { %v4169_v60 = vpack.c.b16 %v4147_v50, %v4146_v5 }
 0x442   : > { %v5242_v22 = vpop.f32.mrf.mxu0  ;;  %v5329_v37 = vpop.f32.mrf.mxu1 }
 0x443   : > { %v5330_v16 = vadd.f32 %v5329_v37, %v5241_v19  ;;  %v5243_v4 = vadd.f32 %v5242_v22, %v5154_v49  ;;  %v3223_v19 = vld [vmem:[#allocation3 + $0x139] sm:$0xff]  ;;  %v3787_v37 = vpack.c.b16 %v3767_v25, %v3766_v39  ;;  %v4598_v9 = vsel %vm282_vm3, %v4169_v60, %v4275_v27  ;;  %v3349_v39 = vld [vmem:[#allocation3 + $0x128] sm:$0xff] }
 0x444   : > { %v3255_v13 = vpack.c.bf16 %v3223_v19, %v3223_v19  ;;  %v5157_v22 = vadd.f32 %v7884_v38, %v5068_v11  ;;  %v4981_v49 = vadd.f32 %v7900_v26, %v7710_v47  ;;  %v3128_v38 = vpack.c.bf16 %v3096_v63, %v3096_v63  ;;  %v3897_v63 = vpop.permute.xlu1 %3896 }
 0x445   : > { %v5409_v59 = vmax.f32 %v5330_v16, 0.0  ;;  %5205 = vmatmul.bf16.gmra.mxu3 %v4542_v30  ;;  %6097 = vmatmul.msk.bf16.gmra.mxu1 %vm282_vm3, %v3786_v20  ;;  %v4478_v21 = vsel %vm282_vm3, %v3787_v37, %v3895_v55  ;;  %v3095_v30 = vld [vmem:[#allocation3 + $0x122] sm:$0xff] }
 0x446   : > { %v3960_v53 = vunpack.c.l.b16 %v3255_v13  ;;  %v3127_v19 = vpack.c.bf16 %v3095_v30, %v3095_v30  ;;  %v5070_v60 = vadd.f32 %v7903_v10, %v4981_v49  ;;  %v4984_v30 = vadd.f32 %v7900_v26, %v7722_v8  ;;  %v3225_v49 = vld [vmem:[#allocation3 + $0x151] sm:$0xff] }
 0x447   : > { %5441 = vst [vmem:[#allocation4] sm:$0xff] %v5409_v59 }
 0x448   : > { %v7925_v18 = vpop.f32.mrf.mxu2  ;;  %v7927_v62 = vpop.f32.mrf.mxu3  ;;  %v3768_v47 = vunpack.c.l.b16 %v3127_v19  ;;  %v5159_v13 = vadd.f32 %v7892_v54, %v5070_v60  ;;  %v5073_v54 = vadd.f32 %v7915_v0, %v4984_v30 }
 0x44a   : > { %v5245_v20 = vpop.f32.mrf.mxu0  ;;  %v5331_v6 = vpop.f32.mrf.mxu1 }
 0x44b   : > { %v5332_v59 = vadd.f32 %v5331_v6, %v5243_v4  ;;  %v5246_v5 = vadd.f32 %v5245_v20, %v5157_v22  ;;  %v3980_v4 = vpack.c.b16 %v3961_v56, %v3960_v53  ;;  %v3381_v6 = vpack.c.bf16 %v3349_v39, %v3349_v39  ;;  %v4277_v39 = vpop.permute.xlu0 %4276 }
 0x44d   : > { %v5410_v16 = vmax.f32 %v5332_v59, 0.0  ;;  %5116 = vmatmul.bf16.gmra.mxu2 %v4478_v21  ;;  %5284 = vmatmul.bf16.gmra.mxu0 %v4598_v9  ;;  %v4546_v11 = vsel %vm282_vm3, %v3980_v4, %v4089_v57  ;;  %v3380_v59 = vpack.c.bf16 %v3348_v51, %v3348_v51  ;;  %v3769_v9 = vunpack.c.l.b16 %v3128_v38 }
 0x44e   : > { %v4149_v20 = vunpack.c.l.b16 %v3381_v6  ;;  %v3257_v6 = vpack.c.bf16 %v3225_v49, %v3225_v49 }
 0x44f   : > { %5442 = vst [vmem:[#allocation4 + $0x8] sm:$0xff] %v5410_v16  ;;  %v3226_v16 = vld [vmem:[#allocation3 + $0x159] sm:$0xff]  ;;  %v4148_v10 = vunpack.c.l.b16 %v3380_v59 }
 0x450   : > { %v7935_v25 = vpop.f32.mrf.mxu2  ;;  %v7937_v50 = vpop.f32.mrf.mxu3  ;;  %v3351_v59 = vld [vmem:[#allocation3 + $0x140] sm:$0xff]  ;;  %v3962_v0 = vunpack.c.l.b16 %v3257_v6 }
 0x451   : > { %v4170_v51 = vpack.c.b16 %v4149_v20, %v4148_v10  ;;  %v4091_v20 = vpop.permute.xlu2 %4090 }
 0x452   : > { %v5247_v55 = vpop.f32.mrf.mxu0  ;;  %v5334_v27 = vpop.f32.mrf.mxu1 }
 0x453   : > { %v5335_v46 = vadd.f32 %v5334_v27, %v5246_v5  ;;  %v5248_v53 = vadd.f32 %v5247_v55, %v5159_v13  ;;  %v3788_v5 = vpack.c.b16 %v3769_v9, %v3768_v47  ;;  %v3258_v27 = vpack.c.bf16 %v3226_v16, %v3226_v16  ;;  %v3350_v16 = vld [vmem:[#allocation3 + $0x138] sm:$0xff] }
 0x454   : > { %v4602_v38 = vsel %vm282_vm3, %v4170_v51, %v4277_v39  ;;  %v5162_v55 = vadd.f32 %v7905_v1, %v5073_v54  ;;  %v4986_v9 = vadd.f32 %v7900_v26, %v7738_v14 }
 0x455   : > { %v5411_v21 = vmax.f32 %v5335_v46, 0.0  ;;  %5210 = vmatmul.bf16.gmra.mxu3 %v4546_v11  ;;  %6098 = vmatmul.msk.bf16.gmra.mxu1 %vm282_vm3, %v3787_v37  ;;  %v4482_v19 = vsel %vm282_vm3, %v3788_v5, %v3897_v63  ;;  %v3963_v8 = vunpack.c.l.b16 %v3258_v27  ;;  %v3097_v46 = vld [vmem:[#allocation3 + $0x13a] sm:$0xff]  ;;  %v3098_v11 = vld [vmem:[#allocation3 + $0x142] sm:$0xff]  ;;  %v3382_v27 = vpack.c.bf16 %v3350_v16, %v3350_v16 }
 0x456   : > { %v3129_v39 = vpack.c.bf16 %v3097_v46, %v3097_v46  ;;  %v3130_v1 = vpack.c.bf16 %v3098_v11, %v3098_v11  ;;  %v5075_v49 = vadd.f32 %v7925_v18, %v4986_v9  ;;  %v4279_v46 = vpop.permute.xlu0 %4278 }
 0x457   : > { %5443 = vst [vmem:[#allocation4 + $0x10] sm:$0xff] %v5411_v21  ;;  %v3981_v63 = vpack.c.b16 %v3963_v8, %v3962_v0  ;;  %v4150_v18 = vunpack.c.l.b16 %v3382_v27  ;;  %v4989_v8 = vadd.f32 %v7900_v26, %v7743_v40 }
 0x458   : > { %v7945_v56 = vpop.f32.mrf.mxu2  ;;  %v7947_v22 = vpop.f32.mrf.mxu3  ;;  %v3770_v14 = vunpack.c.l.b16 %v3129_v39 }
 0x459   : > { %v4550_v51 = vsel %vm282_vm3, %v3981_v63, %v4091_v20 }
 0x45a   : > { %v5250_v37 = vpop.f32.mrf.mxu0  ;;  %v5336_v57 = vpop.f32.mrf.mxu1 }
 0x45b   : > { %v5337_v4 = vadd.f32 %v5336_v57, %v5248_v53  ;;  %v5251_v13 = vadd.f32 %v5250_v37, %v5162_v55  ;;  %v3383_v53 = vpack.c.bf16 %v3351_v59, %v3351_v59  ;;  %v3899_v55 = vpop.permute.xlu1 %3898  ;;  %v3227_v59 = vld [vmem:[#allocation3 + $0x169] sm:$0xff] }
 0x45c   : > { %v3259_v39 = vpack.c.bf16 %v3227_v59, %v3227_v59 }
 0x45d   : > { %v5412_v60 = vmax.f32 %v5337_v4, 0.0  ;;  %5121 = vmatmul.bf16.gmra.mxu2 %v4482_v19  ;;  %5289 = vmatmul.bf16.gmra.mxu0 %v4602_v38  ;;  %v3771_v4 = vunpack.c.l.b16 %v3130_v1  ;;  %v4151_v37 = vunpack.c.l.b16 %v3383_v53  ;;  %v5164_v19 = vadd.f32 %v7917_v17, %v5075_v49  ;;  %v3228_v38 = vld [vmem:[#allocation3 + $0x171] sm:$0xff]  ;;  %v3100_v49 = vld [vmem:[#allocation3 + $0x15a] sm:$0xff] }
 0x45e   : > { %v5078_v17 = vadd.f32 %v7935_v25, %v4989_v8  ;;  %v3099_v53 = vld [vmem:[#allocation3 + $0x152] sm:$0xff]  ;;  %v3964_v25 = vunpack.c.l.b16 %v3259_v39  ;;  %v4994_v39 = vadd.f32 %v7900_v26, %v7760_v31 }
 0x45f   : > { %5444 = vst [vmem:[#allocation4 + $0x18] sm:$0xff] %v5412_v60  ;;  %v3789_v9 = vpack.c.b16 %v3771_v4, %v3770_v14  ;;  %v4171_v20 = vpack.c.b16 %v4151_v37, %v4150_v18  ;;  %v4093_v14 = vpop.permute.xlu2 %4092  ;;  %v3352_v37 = vld [vmem:[#allocation3 + $0x150] sm:$0xff]  ;;  %v3131_v8 = vpack.c.bf16 %v3099_v53, %v3099_v53  ;;  %v3229_v53 = vld [vmem:[#allocation3 + $0x181] sm:$0xff] }
 0x460   : > { %v7955_v21 = vpop.f32.mrf.mxu2  ;;  %v7957_v47 = vpop.f32.mrf.mxu3 }
 0x461   : > { %v4606_v63 = vsel %vm282_vm3, %v4171_v20, %v4279_v46 }
 0x462   : > { %v5252_v10 = vpop.f32.mrf.mxu0  ;;  %v5339_v30 = vpop.f32.mrf.mxu1 }
 0x463   : > { %v5340_v57 = vadd.f32 %v5339_v30, %v5251_v13  ;;  %v5253_v11 = vadd.f32 %v5252_v10, %v5164_v19  ;;  %v3260_v13 = vpack.c.bf16 %v3228_v38, %v3228_v38  ;;  %v4486_v30 = vsel %vm282_vm3, %v3789_v9, %v3899_v55 }
 0x464   : > { %v5167_v10 = vadd.f32 %v7927_v62, %v5078_v17  ;;  %v3132_v62 = vpack.c.bf16 %v3100_v49, %v3100_v49 }
 0x465   : > { %v5413_v54 = vmax.f32 %v5340_v57, 0.0  ;;  %5215 = vmatmul.bf16.gmra.mxu3 %v4550_v51  ;;  %6099 = vmatmul.msk.bf16.gmra.mxu1 %vm282_vm3, %v3788_v5  ;;  %v3965_v40 = vunpack.c.l.b16 %v3260_v13  ;;  %v3353_v57 = vld [vmem:[#allocation3 + $0x158] sm:$0xff] }
 0x466   : > { %v3385_v55 = vpack.c.bf16 %v3353_v57, %v3353_v57  ;;  %v3773_v13 = vunpack.c.l.b16 %v3132_v62  ;;  %v3102_v62 = vld [vmem:[#allocation3 + $0x172] sm:$0xff] }
 0x467   : > { %5445 = vst [vmem:[#allocation4 + $0x20] sm:$0xff] %v5413_v54  ;;  %v4991_v54 = vadd.f32 %v7900_v26, %v7755_v2  ;;  %v3982_v18 = vpack.c.b16 %v3965_v40, %v3964_v25  ;;  %v3772_v2 = vunpack.c.l.b16 %v3131_v8  ;;  %v4281_v40 = vpop.permute.xlu0 %4280  ;;  %v3101_v8 = vld [vmem:[#allocation3 + $0x16a] sm:$0xff] }
 0x468   : > { %v7965_v6 = vpop.f32.mrf.mxu2  ;;  %v7967_v60 = vpop.f32.mrf.mxu3 }
 0x469   : > { %v5080_v46 = vadd.f32 %v7945_v56, %v4991_v54  ;;  %v4554_v59 = vsel %vm282_vm3, %v3982_v18, %v4093_v14  ;;  %v3790_v57 = vpack.c.b16 %v3773_v13, %v3772_v2  ;;  %v3354_v2 = vld [vmem:[#allocation3 + $0x168] sm:$0xff] }
 0x46a   : > { %v5255_v5 = vpop.f32.mrf.mxu0  ;;  %v5341_v0 = vpop.f32.mrf.mxu1  ;;  %v5475_v13 = vld [vmem:[#allocation4 + $0x10] ss:$2 sm:$0xff] }
 0x46b   : > { %v5342_v16 = vadd.f32 %v5341_v0, %v5253_v11  ;;  %v5256_v4 = vadd.f32 %v5255_v5, %v5167_v10  ;;  %v3384_v0 = vpack.c.bf16 %v3352_v37, %v3352_v37  ;;  %v4153_v5 = vunpack.c.l.b16 %v3385_v55  ;;  %v3355_v55 = vld [vmem:[#allocation3 + $0x170] sm:$0xff] }
 0x46c   : > { %v5169_v17 = vadd.f32 %v7937_v50, %v5080_v46  ;;  %v5083_v50 = vadd.f32 %v7955_v21, %v4994_v39  ;;  %v4996_v21 = vadd.f32 %v7900_v26, %v7769_v3  ;;  %v3134_v39 = vpack.c.bf16 %v3102_v62, %v3102_v62 }
 0x46d   : > { %v5414_v1 = vmax.f32 %v5342_v16, 0.0  ;;  %5126 = vmatmul.bf16.gmra.mxu2 %v4486_v30  ;;  %5294 = vmatmul.bf16.gmra.mxu0 %v4606_v63  ;;  %v3230_v16 = vld [vmem:[#allocation3 + $0x189] sm:$0xff]  ;;  %v4152_v56 = vunpack.c.l.b16 %v3384_v0 }
 0x46e   : > { %v3262_v54 = vpack.c.bf16 %v3230_v16, %v3230_v16 }
 0x46f   : > { %5446 = vst [vmem:[#allocation4 + $0x28] sm:$0xff] %v5414_v1  ;;  %v3901_v1 = vpop.permute.xlu1 %3900  ;;  %v4172_v25 = vpack.c.b16 %v4153_v5, %v4152_v56  ;;  %v5507_v5 = vld [vmem:[#allocation4 + $0x11] ss:$2 sm:$0xff]  ;;  %v3133_v56 = vpack.c.bf16 %v3101_v8, %v3101_v8 }
 0x470   : > { %v7975_v51 = vpop.f32.mrf.mxu2  ;;  %v7977_v27 = vpop.f32.mrf.mxu3  ;;  %v3967_v31 = vunpack.c.l.b16 %v3262_v54  ;;  %v3386_v54 = vpack.c.bf16 %v3354_v2, %v3354_v2 }
 0x471   : > { %v4610_v37 = vsel %vm282_vm3, %v4172_v25, %v4281_v40  ;;  %v5473_v40 = vld [vmem:[#allocation4] ss:$2 sm:$0xff] }
 0x472   : > { %v5257_v19 = vpop.f32.mrf.mxu0  ;;  %v5344_v38 = vpop.f32.mrf.mxu1 }
 0x473   : > { %v5345_v11 = vadd.f32 %v5344_v38, %v5256_v4  ;;  %v5258_v10 = vadd.f32 %v5257_v19, %v5169_v17  ;;  %v4490_v4 = vsel %vm282_vm3, %v3790_v57, %v3901_v1  ;;  %v3261_v38 = vpack.c.bf16 %v3229_v53, %v3229_v53 }
 0x474   : > { %v5172_v19 = vadd.f32 %v7947_v22, %v5083_v50  ;;  %v3387_v1 = vpack.c.bf16 %v3355_v55, %v3355_v55  ;;  %v5537_v50 = vmax.f32 %v5475_v13, %v5507_v5 }
 0x475   : > { %v5415_v20 = vmax.f32 %v5345_v11, 0.0  ;;  %5220 = vmatmul.bf16.gmra.mxu3 %v4554_v59  ;;  %6100 = vmatmul.msk.bf16.gmra.mxu1 %vm282_vm3, %v3789_v9  ;;  %v3966_v11 = vunpack.c.l.b16 %v3261_v38  ;;  %v4095_v59 = vpop.permute.xlu2 %4094  ;;  %v3774_v38 = vunpack.c.l.b16 %v3133_v56 }
 0x476   : > { %v5477_v3 = vld [vmem:[#allocation4 + $0x20] ss:$2 sm:$0xff]  ;;  %v5509_v25 = vld [vmem:[#allocation4 + $0x21] ss:$2 sm:$0xff] }
 0x477   : > { %5447 = vst [vmem:[#allocation4 + $0x30] sm:$0xff] %v5415_v20  ;;  %v3983_v22 = vpack.c.b16 %v3967_v31, %v3966_v11  ;;  %v4155_v31 = vunpack.c.l.b16 %v3387_v1  ;;  %v4154_v11 = vunpack.c.l.b16 %v3386_v54 }
 0x478   : > { %v7985_v30 = vpop.f32.mrf.mxu2  ;;  %v7987_v63 = vpop.f32.mrf.mxu3 }
 0x47a   : > { %v5260_v9 = vpop.f32.mrf.mxu0  ;;  %v5346_v49 = vpop.f32.mrf.mxu1 }
 0x47b   : > { %v5347_v14 = vadd.f32 %v5346_v49, %v5258_v10  ;;  %v5261_v0 = vadd.f32 %v5260_v9, %v5172_v19  ;;  %v5085_v10 = vadd.f32 %v7965_v6, %v4996_v21  ;;  %v5505_v49 = vld [vmem:[#allocation4 + $0x1] ss:$2 sm:$0xff]  ;;  %v4558_v9 = vsel %vm282_vm3, %v3983_v22, %v4095_v59  ;;  %v3903_v59 = vpop.permute.xlu1 %3902 }
 0x47c   : > { %v5536_v19 = vmax.f32 %v5473_v40, %v5505_v49  ;;  %v5538_v6 = vmax.f32 %v5477_v3, %v5509_v25  ;;  %v4999_v21 = vadd.f32 %v7900_v26, %v7779_v34  ;;  %v4173_v22 = vpack.c.b16 %v4155_v31, %v4154_v11  ;;  %v3357_v49 = vld [vmem:[#allocation3 + $0x188] sm:$0xff] }
 0x47d   : > { %v5416_v18 = vmax.f32 %v5347_v14, 0.0  ;;  %5131 = vmatmul.bf16.gmra.mxu2 %v4490_v4  ;;  %5299 = vmatmul.bf16.gmra.mxu0 %v4610_v37  ;;  %v5174_v62 = vadd.f32 %v7957_v47, %v5085_v10  ;;  %v5004_v11 = vadd.f32 %v7900_v26, %v7795_v48 }
 0x47e   : > { %v5088_v56 = vadd.f32 %v7975_v51, %v4999_v21  ;;  %v5001_v51 = vadd.f32 %v7900_v26, %v7789_v58 }
 0x47f   : > { %5448 = vst [vmem:[#allocation4 + $0x38] sm:$0xff] %v5416_v18  ;;  %v3775_v18 = vunpack.c.l.b16 %v3134_v39 }
 0x480   : > { %v7995_v46 = vpop.f32.mrf.mxu2  ;;  %v7999_v20 = vpop.f32.mrf.mxu3 }
 0x482   : > { %v5262_v17 = vpop.f32.mrf.mxu0  ;;  %v5349_v16 = vpop.f32.mrf.mxu1 }
 0x483   : > { %v5350_v53 = vadd.f32 %v5349_v16, %v5261_v0  ;;  %v5552_v0 = vmax.f32 %v5536_v19, %v5537_v50  ;;  %v5263_v13 = vadd.f32 %v5262_v17, %v5174_v62  ;;  %v3791_v16 = vpack.c.b16 %v3775_v18, %v3774_v38  ;;  %v3485_v62 = vld [vmem:[#allocation3 + $0x18a] sm:$0xff] }
 0x485   : > { %v5417_v14 = vmax.f32 %v5350_v53, 0.0  ;;  %5225 = vmatmul.bf16.gmra.mxu3 %v4558_v9  ;;  %6101 = vmatmul.msk.bf16.gmra.mxu1 %vm282_vm3, %v3790_v57  ;;  %v4283_v57 = vpop.permute.xlu0 %4282  ;;  %v4494_v40 = vsel %vm282_vm3, %v3791_v16, %v3903_v59  ;;  %v5177_v53 = vadd.f32 %v7967_v60, %v5088_v56  ;;  %v3356_v9 = vld [vmem:[#allocation3 + $0x180] sm:$0xff] }
 0x486   : > { %v5479_v4 = vld [vmem:[#allocation4 + $0x30] ss:$2 sm:$0xff]  ;;  %v5511_v37 = vld [vmem:[#allocation4 + $0x31] ss:$2 sm:$0xff]  ;;  %v4614_v17 = vsel %vm282_vm3, %v4173_v22, %v4283_v57  ;;  %v3388_v38 = vpack.c.bf16 %v3356_v9, %v3356_v9 }
 0x487   : > { %v5539_v8 = vmax.f32 %v5479_v4, %v5511_v37  ;;  %5449 = vst [vmem:[#allocation4 + $0x40] sm:$0xff] %v5417_v14  ;;  %v3389_v14 = vpack.c.bf16 %v3357_v49, %v3357_v49  ;;  %v5090_v4 = vadd.f32 %v7985_v30, %v5001_v51 }
 0x488   : > { %v8006_v55 = vpop.f32.mrf.mxu2  ;;  %v8016_v1 = vpop.f32.mrf.mxu3  ;;  %v4156_v58 = vunpack.c.l.b16 %v3388_v38  ;;  %v3486_v38 = vld [vmem:[#allocation3 + $0x19a] sm:$0xff] }
 0x489   : > { %v5553_v2 = vmax.f32 %v5538_v6, %v5539_v8  ;;  %v4157_v60 = vunpack.c.l.b16 %v3389_v14  ;;  %v5179_v19 = vadd.f32 %v7977_v27, %v5090_v4  ;;  %v3484_v8 = vld [vmem:[#allocation3 + $0x182] sm:$0xff]  ;;  %v3358_v27 = vld [vmem:[#allocation3 + $0x198] sm:$0xff] }
 0x48a   : > { %v5265_v5 = vpop.f32.mrf.mxu0  ;;  %v5351_v47 = vpop.f32.mrf.mxu1 }
 0x48b   : > { %v6148_v39 = vpack.c.bf16 %v5553_v2, %v5552_v0  ;;  %v5352_v34 = vadd.f32 %v5351_v47, %v5263_v13  ;;  %v5266_v25 = vadd.f32 %v5265_v5, %v5177_v53  ;;  %v4174_v0 = vpack.c.b16 %v4157_v60, %v4156_v58 }
 0x48c   : > { %v5093_v2 = vadd.f32 %v7995_v46, %v5004_v11  ;;  %v3516_v5 = vpack.c.bf16 %v3484_v8, %v3484_v8  ;;  %v3517_v47 = vpack.c.bf16 %v3485_v62, %v3485_v62  ;;  %v5006_v46 = vadd.f32 %v7900_v26, %v7804_v35 }
 0x48d   : > { %6149 = vst [vmem:[%s8013_s9] sm:$0xff] %v6148_v39   ;;  %v5418_v10 = vmax.f32 %v5352_v34, 0.0  ;;  %5136 = vmatmul.bf16.gmra.mxu2 %v4494_v40  ;;  %5304 = vmatmul.bf16.gmra.mxu0 %v4614_v17  ;;  %v4285_v30 = vpop.permute.xlu0 %4284  ;;  %v3390_v39 = vpack.c.bf16 %v3358_v27, %v3358_v27  ;;  %v5009_v58 = vadd.f32 %v7900_v26, %v7809_v23 }
 0x48e   : > { %v4618_v22 = vsel %vm282_vm3, %v4174_v0, %v4285_v30  ;;  %v5182_v48 = vadd.f32 %v7987_v63, %v5093_v2  ;;  %v4348_v17 = vunpack.c.l.b16 %v3516_v5  ;;  %v3518_v11 = vpack.c.bf16 %v3486_v38, %v3486_v38 }
 0x48f   : > { %5450 = vst [vmem:[#allocation4 + $0x48] sm:$0xff] %v5418_v10  ;;  %v4349_v10 = vunpack.c.l.b16 %v3517_v47  ;;  %v4158_v9 = vunpack.c.l.b16 %v3390_v39  ;;  %v5011_v23 = vadd.f32 %v7900_v26, %v7816_v42 }
 0x490   : > { %v8022_v3 = vpop.f32.mrf.mxu2  ;;  %v8027_v18 = vpop.f32.mrf.mxu3 }
 0x491   : > { %v4366_v4 = vpack.c.b16 %v4349_v10, %v4348_v17  ;;  %v5014_v10 = vadd.f32 %v7900_v26, %v7820_v41 }
 0x492   : > { %v5267_v54 = vpop.f32.mrf.mxu0  ;;  %v5354_v50 = vpop.f32.mrf.mxu1 }
 0x493   : > { %v5355_v37 = vadd.f32 %v5354_v50, %v5266_v25  ;;  %v5268_v21 = vadd.f32 %v5267_v54, %v5179_v19  ;;  %v5095_v50 = vadd.f32 %v8006_v55, %v5006_v46 }
 0x495   : > { %v5419_v31 = vmax.f32 %v5355_v37, 0.0  ;;  %6102 = vmatmul.msk.bf16.gmra.mxu1 %vm282_vm3, %v3791_v16  ;;  %v3359_v16 = vld [vmem:[#allocation3 + $0x1a0] sm:$0xff]  ;;  %v5184_v60 = vadd.f32 %v7999_v20, %v5095_v50  ;;  %v4287_v19 = vpop.permute.xlu0 %4286  ;;  %v4350_v20 = vunpack.c.l.b16 %v3518_v11  ;;  %v5016_v50 = vadd.f32 %v7900_v26, %v7825_v29 }
 0x496   : > { %v3391_v34 = vpack.c.bf16 %v3359_v16, %v3359_v16 }
 0x497   : > { %5451 = vst [vmem:[#allocation4 + $0x50] sm:$0xff] %v5419_v31  ;;  %v3487_v31 = vld [vmem:[#allocation3 + $0x1a2] sm:$0xff] }
 0x498   : > { %v8031_v6 = vpop.f32.mrf.mxu2  ;;  %v5191_v40 = vpop.f32.mrf.mxu3  ;;  %v4159_v54 = vunpack.c.l.b16 %v3391_v34  ;;  %v3519_v55 = vpack.c.bf16 %v3487_v31, %v3487_v31  ;;  %v5481_v31 = vld [vmem:[#allocation4 + $0x40] ss:$2 sm:$0xff] }
 0x499   : > { %v5100_v39 = vadd.f32 %v8031_v6, %v5011_v23 }
 0x49a   : > { %v5270_v59 = vpop.f32.mrf.mxu0  ;;  %v5356_v57 = vpop.f32.mrf.mxu1  ;;  %v4175_v63 = vpack.c.b16 %v4159_v54, %v4158_v9 }
 0x49b   : > { %v5357_v13 = vadd.f32 %v5356_v57, %v5268_v21  ;;  %v5271_v49 = vadd.f32 %v5270_v59, %v5182_v48  ;;  %v5098_v57 = vadd.f32 %v8022_v3, %v5009_v58  ;;  %v5189_v17 = vadd.f32 %v8027_v18, %v5100_v39 }
 0x49c   : > { %v4622_v59 = vsel %vm282_vm3, %v4175_v63, %v4287_v19  ;;  %v5513_v19 = vld [vmem:[#allocation4 + $0x41] ss:$2 sm:$0xff] }
 0x49d   : > { %v5420_v56 = vmax.f32 %v5357_v13, 0.0  ;;  %5309 = vmatmul.bf16.gmra.mxu0 %v4618_v22  ;;  %v4351_v13 = vunpack.c.l.b16 %v3519_v55  ;;  %v5187_v5 = vadd.f32 %v8016_v1, %v5098_v57 }
 0x49f   : > { %5452 = vst [vmem:[#allocation4 + $0x58] sm:$0xff] %v5420_v56  ;;  %v4367_v16 = vpack.c.b16 %v4351_v13, %v4350_v20 }
 0x4a0   : > { %v5102_v53 = vpop.f32.mrf.mxu2  ;;  %v5193_v8 = vpop.f32.mrf.mxu3 }
 0x4a2   : > { %v5272_v51 = vpop.f32.mrf.mxu0  ;;  %v5359_v25 = vpop.f32.mrf.mxu1 }
 0x4a3   : > { %v5360_v14 = vadd.f32 %v5359_v25, %v5271_v49  ;;  %v5273_v62 = vadd.f32 %v5272_v51, %v5184_v60  ;;  %v5103_v51 = vadd.f32 %v5102_v53, %v5014_v10 }
 0x4a5   : > { %v5421_v37 = vmax.f32 %v5360_v14, 0.0  ;;  %6103 = vmatmul.msk.bf16.gmra.mxu1 %vm282_vm3, %v4366_v4  ;;  %v5192_v6 = vadd.f32 %v5191_v40, %v5103_v51 }
 0x4a6   : > { %v5483_v18 = vld [vmem:[#allocation4 + $0x50] ss:$2 sm:$0xff] }
 0x4a7   : > { %5453 = vst [vmem:[#allocation4 + $0x60] sm:$0xff] %v5421_v37  ;;  %v5515_v37 = vld [vmem:[#allocation4 + $0x51] ss:$2 sm:$0xff] }
 0x4a8   : > { %v5104_v35 = vpop.f32.mrf.mxu2  ;;  %v5196_v34 = vpop.f32.mrf.mxu3 }
 0x4a9   : > { %v5105_v41 = vadd.f32 %v5104_v35, %v5016_v50 }
 0x4aa   : > { %v5275_v30 = vpop.f32.mrf.mxu0  ;;  %v5361_v21 = vpop.f32.mrf.mxu1 }
 0x4ab   : > { %v5362_v0 = vadd.f32 %v5361_v21, %v5273_v62  ;;  %v5276_v27 = vadd.f32 %v5275_v30, %v5187_v5  ;;  %v5541_v62 = vmax.f32 %v5483_v18, %v5515_v37  ;;  %v5540_v30 = vmax.f32 %v5481_v31, %v5513_v19 }
 0x4ac   : > { %v5194_v57 = vadd.f32 %v5193_v8, %v5105_v41  ;;  %v5021_v8 = vadd.f32 %v7900_v26, %v7834_v7 }
 0x4ad   : > { %v5422_v2 = vmax.f32 %v5362_v0, 0.0  ;;  %5314 = vmatmul.bf16.gmra.mxu0 %v4622_v59  ;;  %v5019_v0 = vadd.f32 %v7900_v26, %v7829_v12 }
 0x4af   : > { %5454 = vst [vmem:[#allocation4 + $0x68] sm:$0xff] %v5422_v2  ;;  %v5554_v2 = vmax.f32 %v5540_v30, %v5541_v62 }
 0x4b0   : > { %v5107_v47 = vpop.f32.mrf.mxu2  ;;  %v5198_v9 = vpop.f32.mrf.mxu3 }
 0x4b1   : > { %v5108_v23 = vadd.f32 %v5107_v47, %v5019_v0  ;;  %v5024_v47 = vadd.f32 %v7900_v26, %v7838_v52 }
 0x4b2   : > { %v5277_v22 = vpop.f32.mrf.mxu0  ;;  %v5364_v56 = vpop.f32.mrf.mxu1 }
 0x4b3   : > { %v5365_v3 = vadd.f32 %v5364_v56, %v5276_v27  ;;  %v5278_v46 = vadd.f32 %v5277_v22, %v5189_v17  ;;  %v5197_v39 = vadd.f32 %v5196_v34, %v5108_v23 }
 0x4b5   : > { %v5423_v48 = vmax.f32 %v5365_v3, 0.0  ;;  %6104 = vmatmul.msk.bf16.gmra.mxu1 %vm282_vm3, %v4367_v16 }
 0x4b6   : > { %v5485_v58 = vld [vmem:[#allocation4 + $0x60] ss:$2 sm:$0xff]  ;;  %v5517_v53 = vld [vmem:[#allocation4 + $0x61] ss:$2 sm:$0xff] }
 0x4b7   : > { %5455 = vst [vmem:[#allocation4 + $0x70] sm:$0xff] %v5423_v48  ;;  %v5542_v21 = vmax.f32 %v5485_v58, %v5517_v53 }
 0x4b8   : > { %v5109_v1 = vpop.f32.mrf.mxu2  ;;  %v5201_v29 = vpop.f32.mrf.mxu3 }
 0x4b9   : > { %v5110_v10 = vadd.f32 %v5109_v1, %v5021_v8  ;;  %v5026_v1 = vadd.f32 %v7900_v26, %v7843_v43 }
 0x4ba   : > { %v5280_v42 = vpop.f32.mrf.mxu0  ;;  %v5366_v49 = vpop.f32.mrf.mxu1 }
 0x4bb   : > { %v5367_v25 = vadd.f32 %v5366_v49, %v5278_v46  ;;  %v5281_v14 = vadd.f32 %v5280_v42, %v5192_v6  ;;  %v5199_v51 = vadd.f32 %v5198_v9, %v5110_v10 }
 0x4bd   : > { %v5424_v54 = vmax.f32 %v5367_v25, 0.0 }
 0x4bf   : > { %5456 = vst [vmem:[#allocation4 + $0x78] sm:$0xff] %v5424_v54 }
 0x4c0   : > { %v5112_v4 = vpop.f32.mrf.mxu2  ;;  %v5203_v3 = vpop.f32.mrf.mxu3 }
 0x4c1   : > { %v5113_v6 = vadd.f32 %v5112_v4, %v5024_v47  ;;  %v5029_v4 = vadd.f32 %v7900_v26, %v7847_v61 }
 0x4c2   : > { %v5282_v63 = vpop.f32.mrf.mxu0  ;;  %v5369_v38 = vpop.f32.mrf.mxu1 }
 0x4c3   : > { %v5370_v60 = vadd.f32 %v5369_v38, %v5281_v14  ;;  %v5283_v20 = vadd.f32 %v5282_v63, %v5194_v57  ;;  %v5202_v37 = vadd.f32 %v5201_v29, %v5113_v6  ;;  %v5031_v29 = vadd.f32 %v7900_v26, %v7851_v36 }
 0x4c5   : > { %v5425_v11 = vmax.f32 %v5370_v60, 0.0 }
 0x4c6   : > { %v5487_v55 = vld [vmem:[#allocation4 + $0x70] ss:$2 sm:$0xff]  ;;  %v5519_v40 = vld [vmem:[#allocation4 + $0x71] ss:$2 sm:$0xff] }
 0x4c7   : > { %v5543_v59 = vmax.f32 %v5487_v55, %v5519_v40  ;;  %5457 = vst [vmem:[#allocation4 + $0x80] sm:$0xff] %v5425_v11 }
 0x4c8   : > { %v5114_v16 = vpop.f32.mrf.mxu2  ;;  %v5206_v50 = vpop.f32.mrf.mxu3 }
 0x4c9   : > { %v5555_v35 = vmax.f32 %v5542_v21, %v5543_v59  ;;  %v5115_v31 = vadd.f32 %v5114_v16, %v5026_v1 }
 0x4ca   : > { %v5285_v13 = vpop.f32.mrf.mxu0  ;;  %v5371_v5 = vpop.f32.mrf.mxu1 }
 0x4cb   : > { %v6153_v27 = vpack.c.bf16 %v5555_v35, %v5554_v2  ;;  %v5372_v22 = vadd.f32 %v5371_v5, %v5283_v20  ;;  %v5286_v48 = vadd.f32 %v5285_v13, %v5197_v39  ;;  %v5204_v19 = vadd.f32 %v5203_v3, %v5115_v31 }
 0x4cc   : > { %v5034_v5 = vadd.f32 %v7900_v26, %v7855_v24 }
 0x4cd   : > { %6165 = vst [vmem:[%s8013_s9 + $0x8] sm:$0xff] %v6153_v27   ;;  %v5426_v56 = vmax.f32 %v5372_v22, 0.0 }
 0x4cf   : > { %5458 = vst [vmem:[#allocation4 + $0x88] sm:$0xff] %v5426_v56 }
 0x4d0   : > { %v5117_v42 = vpop.f32.mrf.mxu2  ;;  %v5208_v60 = vpop.f32.mrf.mxu3 }
 0x4d1   : > { %v5118_v55 = vadd.f32 %v5117_v42, %v5029_v4 }
 0x4d2   : > { %v5287_v17 = vpop.f32.mrf.mxu0  ;;  %v5374_v12 = vpop.f32.mrf.mxu1 }
 0x4d3   : > { %v5375_v46 = vadd.f32 %v5374_v12, %v5286_v48  ;;  %v5288_v25 = vadd.f32 %v5287_v17, %v5199_v51  ;;  %v5207_v21 = vadd.f32 %v5206_v50, %v5118_v55  ;;  %v5036_v48 = vadd.f32 %v7900_v26, %v7859_v33 }
 0x4d5   : > { %v5427_v49 = vmax.f32 %v5375_v46, 0.0 }
 0x4d7   : > { %5459 = vst [vmem:[#allocation4 + $0x90] sm:$0xff] %v5427_v49  ;;  %v5489_v49 = vld [vmem:[#allocation4 + $0x80] ss:$2 sm:$0xff] }
 0x4d8   : > { %v5119_v18 = vpop.f32.mrf.mxu2  ;;  %v5211_v43 = vpop.f32.mrf.mxu3 }
 0x4d9   : > { %v5120_v2 = vadd.f32 %v5119_v18, %v5031_v29 }
 0x4da   : > { %v5290_v54 = vpop.f32.mrf.mxu0  ;;  %v5376_v34 = vpop.f32.mrf.mxu1 }
 0x4db   : > { %v5377_v14 = vadd.f32 %v5376_v34, %v5288_v25  ;;  %v5291_v63 = vadd.f32 %v5290_v54, %v5202_v37  ;;  %v5209_v13 = vadd.f32 %v5208_v60, %v5120_v2  ;;  %v5521_v25 = vld [vmem:[#allocation4 + $0x81] ss:$2 sm:$0xff] }
 0x4dc   : > { %v5544_v18 = vmax.f32 %v5489_v49, %v5521_v25 }
 0x4dd   : > { %v5428_v7 = vmax.f32 %v5377_v14, 0.0 }
 0x4df   : > { %5460 = vst [vmem:[#allocation4 + $0x98] sm:$0xff] %v5428_v7 }
 0x4e0   : > { %v5122_v58 = vpop.f32.mrf.mxu2  ;;  %v5213_v23 = vpop.f32.mrf.mxu3 }
 0x4e1   : > { %v5123_v56 = vadd.f32 %v5122_v58, %v5034_v5 }
 0x4e2   : > { %v5292_v38 = vpop.f32.mrf.mxu0  ;;  %v5379_v9 = vpop.f32.mrf.mxu1 }
 0x4e3   : > { %v5380_v41 = vadd.f32 %v5379_v9, %v5291_v63  ;;  %v5293_v53 = vadd.f32 %v5292_v38, %v5204_v19  ;;  %v5212_v3 = vadd.f32 %v5211_v43, %v5123_v56  ;;  %v6183_v63 = vld [vmem:[%s8092_s4] ss:$0 sm:$0xff] }
 0x4e4   : > { %v5039_v38 = vadd.f32 %v6183_v63, %v7863_v28  ;;  %v5041_v55 = vadd.f32 %v6183_v63, %v7869_v45  ;;  %v5044_v2 = vadd.f32 %v6183_v63, %v7878_v15 }
 0x4e5   : > { %v5429_v52 = vmax.f32 %v5380_v41, 0.0 }
 0x4e6   : > { %v5491_v12 = vld [vmem:[#allocation4 + $0x90] ss:$2 sm:$0xff]  ;;  %v5523_v10 = vld [vmem:[#allocation4 + $0x91] ss:$2 sm:$0xff] }
 0x4e7   : > { %5461 = vst [vmem:[#allocation4 + $0xa0] sm:$0xff] %v5429_v52  ;;  %v5545_v6 = vmax.f32 %v5491_v12, %v5523_v10  ;;  %v5049_v12 = vadd.f32 %v6183_v63, %v7894_v32 }
 0x4e8   : > { %v5124_v35 = vpop.f32.mrf.mxu2  ;;  %v5216_v51 = vpop.f32.mrf.mxu3 }
 0x4e9   : > { %v5125_v24 = vadd.f32 %v5124_v35, %v5036_v48  ;;  %v5556_v9 = vmax.f32 %v5544_v18, %v5545_v6 }
 0x4ea   : > { %v5295_v62 = vpop.f32.mrf.mxu0  ;;  %v5381_v11 = vpop.f32.mrf.mxu1 }
 0x4eb   : > { %v5382_v40 = vadd.f32 %v5381_v11, %v5293_v53  ;;  %v5296_v59 = vadd.f32 %v5295_v62, %v5207_v21  ;;  %v5214_v1 = vadd.f32 %v5213_v23, %v5125_v24 }
 0x4ed   : > { %v5430_v30 = vmax.f32 %v5382_v40, 0.0 }
 0x4ef   : > { %5462 = vst [vmem:[#allocation4 + $0xa8] sm:$0xff] %v5430_v30 }
 0x4f0   : > { %v5127_v8 = vpop.f32.mrf.mxu2  ;;  %v5218_v53 = vpop.f32.mrf.mxu3 }
 0x4f1   : > { %v5128_v19 = vadd.f32 %v5127_v8, %v5039_v38 }
 0x4f2   : > { %v5297_v57 = vpop.f32.mrf.mxu0  ;;  %v5384_v0 = vpop.f32.mrf.mxu1 }
 0x4f3   : > { %v5385_v20 = vadd.f32 %v5384_v0, %v5296_v59  ;;  %v5298_v27 = vadd.f32 %v5297_v57, %v5209_v13  ;;  %v5217_v11 = vadd.f32 %v5216_v51, %v5128_v19 }
 0x4f5   : > { %v5431_v61 = vmax.f32 %v5385_v20, 0.0 }
 0x4f6   : > { %v5493_v54 = vld [vmem:[#allocation4 + $0xa0] ss:$2 sm:$0xff]  ;;  %v5525_v34 = vld [vmem:[#allocation4 + $0xa1] ss:$2 sm:$0xff] }
 0x4f7   : > { %5463 = vst [vmem:[#allocation4 + $0xb0] sm:$0xff] %v5431_v61  ;;  %v5546_v37 = vmax.f32 %v5493_v54, %v5525_v34  ;;  %v8198_v54 = vld [vmem:[#allocation5_spill] sm:$0xff] }
 0x4f8   : > { %v5129_v33 = vpop.f32.mrf.mxu2  ;;  %v5221_v57 = vpop.f32.mrf.mxu3  ;;  %v5051_v34 = vadd.f32 %v6183_v63, %v8198_v54 }
 0x4f9   : > { %v5130_v28 = vadd.f32 %v5129_v33, %v5041_v55 }
 0x4fa   : > { %v5300_v16 = vpop.f32.mrf.mxu0  ;;  %v5386_v22 = vpop.f32.mrf.mxu1 }
 0x4fb   : > { %v5387_v39 = vadd.f32 %v5386_v22, %v5298_v27  ;;  %v5301_v17 = vadd.f32 %v5300_v16, %v5212_v3  ;;  %v5219_v0 = vadd.f32 %v5218_v53, %v5130_v28  ;;  %v5046_v16 = vadd.f32 %v6183_v63, %v7886_v44 }
 0x4fd   : > { %v5432_v36 = vmax.f32 %v5387_v39, 0.0 }
 0x4ff   : > { %5464 = vst [vmem:[#allocation4 + $0xb8] sm:$0xff] %v5432_v36 }
 0x500   : > { %v5132_v40 = vpop.f32.mrf.mxu2  ;;  %v5223_v22 = vpop.f32.mrf.mxu3 }
 0x501   : > { %v5133_v13 = vadd.f32 %v5132_v40, %v5044_v2 }
 0x502   : > { %v5302_v46 = vpop.f32.mrf.mxu0  ;;  %v5389_v42 = vpop.f32.mrf.mxu1 }
 0x503   : > { %v5390_v47 = vadd.f32 %v5389_v42, %v5301_v17  ;;  %v5303_v41 = vadd.f32 %v5302_v46, %v5214_v1  ;;  %v5222_v45 = vadd.f32 %v5221_v57, %v5133_v13 }
 0x505   : > { %v5433_v50 = vmax.f32 %v5390_v47, 0.0 }
 0x506   : > { %v5495_v14 = vld [vmem:[#allocation4 + $0xb0] ss:$2 sm:$0xff]  ;;  %v5527_v7 = vld [vmem:[#allocation4 + $0xb1] ss:$2 sm:$0xff] }
 0x507   : > { %v5547_v26 = vmax.f32 %v5495_v14, %v5527_v7  ;;  %5465 = vst [vmem:[#allocation4 + $0xc0] sm:$0xff] %v5433_v50 }
 0x508   : > { %v5134_v23 = vpop.f32.mrf.mxu2  ;;  %v5226_v24 = vpop.f32.mrf.mxu3 }
 0x509   : > { %v5557_v31 = vmax.f32 %v5546_v37, %v5547_v26  ;;  %v5135_v36 = vadd.f32 %v5134_v23, %v5046_v16 }
 0x50a   : > { %v5305_v60 = vpop.f32.mrf.mxu0  ;;  %v5391_v52 = vpop.f32.mrf.mxu1 }
 0x50b   : > { %v6158_v4 = vpack.c.bf16 %v5557_v31, %v5556_v9  ;;  %v5392_v58 = vadd.f32 %v5391_v52, %v5303_v41  ;;  %v5306_v30 = vadd.f32 %v5305_v60, %v5217_v11  ;;  %v5224_v15 = vadd.f32 %v5223_v22, %v5135_v36 }
 0x50d   : > { %6166 = vst [vmem:[%s8013_s9 + $0x10] sm:$0xff] %v6158_v4   ;;  %v5434_v62 = vmax.f32 %v5392_v58, 0.0 }
 0x50f   : > { %5466 = vst [vmem:[#allocation4 + $0xc8] sm:$0xff] %v5434_v62 }
 0x510   : > { %v5137_v17 = vpop.f32.mrf.mxu2  ;;  %v5228_v37 = vpop.f32.mrf.mxu3 }
 0x511   : > { %v5138_v42 = vadd.f32 %v5137_v17, %v5049_v12 }
 0x512   : > { %v5307_v43 = vpop.f32.mrf.mxu0  ;;  %v5394_v21 = vpop.f32.mrf.mxu1 }
 0x513   : > { %v5395_v29 = vadd.f32 %v5394_v21, %v5306_v30  ;;  %v5308_v35 = vadd.f32 %v5307_v43, %v5219_v0  ;;  %v5227_v44 = vadd.f32 %v5226_v24, %v5138_v42 }
 0x515   : > { %v5435_v59 = vmax.f32 %v5395_v29, 0.0 }
 0x516   : > { %v5497_v60 = vld [vmem:[#allocation4 + $0xc0] ss:$2 sm:$0xff]  ;;  %v5529_v52 = vld [vmem:[#allocation4 + $0xc1] ss:$2 sm:$0xff] }
 0x517   : > { %5467 = vst [vmem:[#allocation4 + $0xd0] sm:$0xff] %v5435_v59  ;;  %v5548_v62 = vmax.f32 %v5497_v60, %v5529_v52 }
 0x518   : > { %v5139_v25 = vpop.f32.mrf.mxu2 }
 0x519   : > { %v5140_v14 = vadd.f32 %v5139_v25, %v5051_v34 }
 0x51a   : > { %v5310_v20 = vpop.f32.mrf.mxu0  ;;  %v5396_v61 = vpop.f32.mrf.mxu1 }
 0x51b   : > { %v5397_v5 = vadd.f32 %v5396_v61, %v5308_v35  ;;  %v5311_v56 = vadd.f32 %v5310_v20, %v5222_v45  ;;  %v5229_v32 = vadd.f32 %v5228_v37, %v5140_v14 }
 0x51d   : > { %v5436_v27 = vmax.f32 %v5397_v5, 0.0 }
 0x51f   : > { %5468 = vst [vmem:[#allocation4 + $0xd8] sm:$0xff] %v5436_v27 }
 0x522   : > { %v5312_v39 = vpop.f32.mrf.mxu0  ;;  %v5399_v8 = vpop.f32.mrf.mxu1 }
 0x523   : > { %v5400_v3 = vadd.f32 %v5399_v8, %v5311_v56  ;;  %v5313_v10 = vadd.f32 %v5312_v39, %v5224_v15 }
 0x525   : > { %v5437_v48 = vmax.f32 %v5400_v3, 0.0 }
 0x526   : > { %v5499_v31 = vld [vmem:[#allocation4 + $0xd0] ss:$2 sm:$0xff]  ;;  %v5531_v41 = vld [vmem:[#allocation4 + $0xd1] ss:$2 sm:$0xff] }
 0x527   : > { %5469 = vst [vmem:[#allocation4 + $0xe0] sm:$0xff] %v5437_v48  ;;  %v5549_v4 = vmax.f32 %v5499_v31, %v5531_v41 }
 0x529   : > { %v5558_v40 = vmax.f32 %v5548_v62, %v5549_v4 }
 0x52a   : > { %v5401_v46 = vpop.f32.mrf.mxu1  ;;  %v5315_v51 = vpop.f32.mrf.mxu0 }
 0x52b   : > { %v5402_v49 = vadd.f32 %v5401_v46, %v5313_v10  ;;  %v5316_v6 = vadd.f32 %v5315_v51, %v5227_v44 }
 0x52d   : > { %v5438_v47 = vmax.f32 %v5402_v49, 0.0 }
 0x52f   : > { %5470 = vst [vmem:[#allocation4 + $0xe8] sm:$0xff] %v5438_v47 }
 0x532   : > { %v5404_v50 = vpop.f32.mrf.mxu1  ;;  %v5317_v33 = vpop.f32.mrf.mxu0 }
 0x533   : > { %v5405_v7 = vadd.f32 %v5404_v50, %v5316_v6  ;;  %v5318_v26 = vadd.f32 %v5317_v33, %v5229_v32 }
 0x535   : > { %v5439_v18 = vmax.f32 %v5405_v7, 0.0 }
 0x536   : > { %v5501_v63 = vld [vmem:[#allocation4 + $0xe0] ss:$2 sm:$0xff]  ;;  %v5533_v19 = vld [vmem:[#allocation4 + $0xe1] ss:$2 sm:$0xff] }
 0x537   : > { %5471 = vst [vmem:[#allocation4 + $0xf0] sm:$0xff] %v5439_v18  ;;  %v5550_v11 = vmax.f32 %v5501_v63, %v5533_v19 }
 0x53a   : > { %v5406_v1 = vpop.f32.mrf.mxu1 }
 0x53b   : > { %v5407_v38 = vadd.f32 %v5406_v1, %v5318_v26 }
 0x53d   : > { %v5440_v9 = vmax.f32 %v5407_v38, 0.0 }
 0x53f   : > { %5472 = vst [vmem:[#allocation4 + $0xf8] sm:$0xff] %v5440_v9 }
 0x546   : > { %v5503_v58 = vld [vmem:[#allocation4 + $0xf0] ss:$2 sm:$0xff]  ;;  %v5535_v53 = vld [vmem:[#allocation4 + $0xf1] ss:$2 sm:$0xff] }
 0x547   : > { %v5551_v55 = vmax.f32 %v5503_v58, %v5535_v53 }
 0x549   : > { %v5559_v30 = vmax.f32 %v5550_v11, %v5551_v55 }
 0x54b   : > { %v6163_v43 = vpack.c.bf16 %v5559_v30, %v5558_v40 }
 0x54d   : > { %6167 = vst [vmem:[%s8013_s9 + $0x18] sm:$0xff] %v6163_v43  }
 0x54e PF: > { %s15_s18 = sadd.s32 1, %s6190_s18  }
 0x54f   : > { %p12_p4 = scmp.ge.s32.totalorder %s15_s18, 4  }
 0x551   :  { %14 = sbr.rel (!%p12_p4) target bundleno = 1 (0x1), region = 113 }

</bundles_post_ra>
